<compile_context>
chip_gen: v6e
topology: v6e:2x2x1
jax: 0.10.0
libtpu: 0.0.40
codegen_flags: <defaults>
</compile_context>

<pallas_src>
import jax
import jax.numpy as jnp
from jax.experimental import pallas as pl
from jax.experimental.pallas import tpu as pltpu


VMEM_LIMIT = 32 * 1024 * 1024     # safe on v5e/v6e (128 MiB) and v7x (64 MiB physical)

# conv1: 148x148x3 -> 144x144x6 -> pool -> 72x72x6   (S1 = 5184, padded to 5376 = 2*2688)
# conv2:  72x72x6  ->  68x68x16 -> pool -> 34x34x16  (S2 = 1156, padded to 1280 = 2*640)
S1, S1_PAD, S1_TILES = 72 * 72, 5376, 2
S2, S2_PAD, S2_TILES = 34 * 34, 1280, 2
FC1_IN = 16 * S2            # 18496  (torch flatten order: c*1156 + h*34 + w)
FC1_IN_PAD = 16 * S2_PAD    # 20480  (our flatten order:   c*1280 + s, zero weight rows on pad)
FC1_K_TILES = 2             # tk = 10240 (multiple of 128)


# ----------------------------- Pallas kernels ------------------------------ #

def conv_relu_pool_kernel(p_ref, w_ref, b_ref, o_ref):
    """Fused conv (W @ patches^T) + bias + ReLU + 2x2 max-pool, lane-dense output.

    p_ref : [4, 1, K, ts]  bf16 transposed patch blocks, one per pool-window offset
    w_ref : [Cout, K]      bf16 conv weight (torch layout reshaped; k = ci*25+kh*5+kw)
    b_ref : [Cout, 1]      f32 bias
    o_ref : [1, Cout, ts]  bf16 pooled output tile (channel-major => lane-dense stores)
    """
    w = w_ref[...]
    # Running max over the 4 pool offsets keeps the live f32 intermediate at [Cout, ts].
    z = jnp.dot(w, p_ref[0, 0], preferred_element_type=jnp.float32)
    for o in range(1, 4):
        z = jnp.maximum(z, jnp.dot(w, p_ref[o, 0],
                                   preferred_element_type=jnp.float32))
    # bias + ReLU after the max is exact (same bias per offset, ReLU monotone).
    z = jnp.maximum(z + b_ref[...], 0.0)
    o_ref[...] = z.astype(o_ref.dtype)[None]


def mlp_kernel(x_ref, w1_ref, b1_ref, w2_ref, b2_ref, w3_ref, b3_ref,
               o_ref, acc_ref):
    """K-tiled fc1 accumulation; fc2/fc3 fused at the last grid step."""
    k = pl.program_id(0)

    @pl.when(k == 0)
    def _():
        acc_ref[...] = jnp.zeros_like(acc_ref)

    acc_ref[...] += jnp.dot(x_ref[...], w1_ref[...],
                            preferred_element_type=jnp.float32)

    @pl.when(k == pl.num_programs(0) - 1)
    def _():
        h = jnp.maximum(acc_ref[...] + b1_ref[...], 0.0)
        h = jnp.maximum(
            jnp.dot(h, w2_ref[...], preferred_element_type=jnp.float32)
            + b2_ref[...], 0.0)
        o = jnp.dot(h, w3_ref[...], preferred_element_type=jnp.float32) + b3_ref[...]
        o_ref[...] = o.astype(o_ref.dtype)


# ------------------------------ Kernel wrappers ----------------------------- #

def conv_relu_pool(patches_t, w_mat, bias, *, s_tiles):
    """patches_t: [4, B, K, Sp] bf16; w_mat: [Cout, K] bf16; bias: [Cout, 1] f32."""
    noff, B, K, Sp = patches_t.shape
    Cout = w_mat.shape[0]
    assert Sp % s_tiles == 0
    ts = Sp // s_tiles
    assert ts % 128 == 0            # lane-dense tiles (8,128 rule on the last dim)

    return pl.pallas_call(
        conv_relu_pool_kernel,
        out_shape=jax.ShapeDtypeStruct((B, Cout, Sp), jnp.bfloat16),
        grid=(B, s_tiles),
        in_specs=[pl.BlockSpec((noff, 1, K, ts), lambda i, j: (0, i, 0, j)),
                  pl.BlockSpec((Cout, K), lambda i, j: (0, 0)),
                  pl.BlockSpec((Cout, 1), lambda i, j: (0, 0))],
        out_specs=pl.BlockSpec((1, Cout, ts), lambda i, j: (i, 0, j)),
        compiler_params=pltpu.CompilerParams(
            dimension_semantics=("parallel", "parallel"),
            vmem_limit_bytes=VMEM_LIMIT),
    )(patches_t, w_mat, bias)


def mlp(x, w1, b1, w2, b2, w3, b3, *, k_tiles):
    """x: [B, Kp] bf16 (Kp padded); w1: [Kp, 128] bf16; w2/w3: 128-padded f32."""
    B, Kp = x.shape
    N1, N2, N3 = w1.shape[1], w2.shape[1], w3.shape[1]
    assert Kp % k_tiles == 0
    tk = Kp // k_tiles
    assert tk % 128 == 0

    return pl.pallas_call(
        mlp_kernel,
        out_shape=jax.ShapeDtypeStruct((B, N3), jnp.float32),
        grid=(k_tiles,),
        in_specs=[pl.BlockSpec((B, tk), lambda k: (0, k)),
                  pl.BlockSpec((tk, N1), lambda k: (k, 0)),
                  pl.BlockSpec((1, N1), lambda k: (0, 0)),
                  pl.BlockSpec((N1, N2), lambda k: (0, 0)),
                  pl.BlockSpec((1, N2), lambda k: (0, 0)),
                  pl.BlockSpec((N2, N3), lambda k: (0, 0)),
                  pl.BlockSpec((1, N3), lambda k: (0, 0))],
        out_specs=pl.BlockSpec((B, N3), lambda k: (0, 0)),
        scratch_shapes=[pltpu.VMEM((B, N1), jnp.float32)],
        compiler_params=pltpu.CompilerParams(
            dimension_semantics=("arbitrary",),
            vmem_limit_bytes=VMEM_LIMIT),
    )(x, w1, b1, w2, b2, w3, b3)


# --------------------------------- Glue ------------------------------------ #

def extract_pool_patches_t(x, ksize, hp, wp, s_pad):
    """Transposed im2col grouped by the 4 pool-window offsets.

    x: [B, C, H, W] (channel-major, bf16).  Returns [4, B, K, s_pad] with
    K = C*ksize*ksize ordered (ci, kh, kw) and s = ph*wp + pw on the lane axis
    (zero-padded up to s_pad).
    """
    b, c, _, _ = x.shape
    offs = []
    for di in (0, 1):
        for dj in (0, 1):
            cols = []
            for kh in range(ksize):
                for kw in range(ksize):
                    cols.append(x[:, :, di + kh: di + kh + 2 * hp: 2,
                                        dj + kw: dj + kw + 2 * wp: 2])
            p = jnp.stack(cols, axis=2)                          # [B, C, 25, hp, wp]
            offs.append(p.reshape(b, c * ksize * ksize, hp * wp))
    pt = jnp.stack(offs, axis=0)                                 # [4, B, K, hp*wp]
    return jnp.pad(pt, ((0, 0), (0, 0), (0, 0), (0, s_pad - hp * wp)))


def prepare_params(params):
    """One-time preprocessing: reshape/transpose/pad all weights."""
    bf16, f32 = jnp.bfloat16, jnp.float32

    w1m = params["conv1_w"].reshape(6, 75).astype(bf16)          # [Cout, Cin*5*5]
    w2m = params["conv2_w"].reshape(16, 150).astype(bf16)
    cb1 = params["conv1_b"].reshape(-1, 1).astype(f32)
    cb2 = params["conv2_b"].reshape(-1, 1).astype(f32)

    # fc1: re-order columns from torch's flatten (c*1156 + s) to the padded
    # channel-major flatten (c*1280 + s).  Padded rows are zero, so the relu(bias)
    # values in conv2's padded spatial columns cannot leak into the output.
    fc1 = params["fc1_w"].reshape(120, 16, S2)
    fc1 = jnp.pad(fc1, ((0, 0), (0, 0), (0, S2_PAD - S2)))
    fc1 = fc1.reshape(120, FC1_IN_PAD).T                         # [20480, 120]
    fc1 = jnp.pad(fc1, ((0, 0), (0, 128 - 120))).astype(bf16)    # [20480, 128]
    fb1 = jnp.pad(params["fc1_b"], (0, 128 - 120)).reshape(1, -1).astype(f32)

    fc2 = jnp.pad(params["fc2_w"].T, ((0, 128 - 120), (0, 128 - 84))).astype(f32)
    fb2 = jnp.pad(params["fc2_b"], (0, 128 - 84)).reshape(1, -1).astype(f32)
    fc3 = jnp.pad(params["fc3_w"].T, ((0, 128 - 84), (0, 128 - 3))).astype(f32)
    fb3 = jnp.pad(params["fc3_b"], (0, 128 - 3)).reshape(1, -1).astype(f32)

    return dict(w1m=w1m, cb1=cb1, w2m=w2m, cb2=cb2,
                fc1_w=fc1, fc1_b=fb1, fc2_w=fc2, fc2_b=fb2, fc3_w=fc3, fc3_b=fb3)


def net_forward(x_nchw, prep):
    b = x_nchw.shape[0]
    x = x_nchw.astype(jnp.bfloat16)                              # [B, 3, 148, 148]

    # conv1 (3->6, 5x5) + ReLU + maxpool(2,2): 148 -> 144 -> 72
    p1 = extract_pool_patches_t(x, 5, 72, 72, S1_PAD)            # [4, B, 75, 5376]
    y1 = conv_relu_pool(p1, prep["w1m"], prep["cb1"],
                        s_tiles=S1_TILES)                        # [B, 6, 5376]
    y1 = y1[:, :, :S1].reshape(b, 6, 72, 72)                     # drop padded columns

    # conv2 (6->16, 5x5) + ReLU + maxpool(2,2): 72 -> 68 -> 34
    p2 = extract_pool_patches_t(y1, 5, 34, 34, S2_PAD)           # [4, B, 150, 1280]
    y2 = conv_relu_pool(p2, prep["w2m"], prep["cb2"],
                        s_tiles=S2_TILES)                        # [B, 16, 1280]

    # Channel-major flatten (matches torch's NCHW flatten; padded cols hit zero
    # fc1 weight rows), then the K-tiled fused MLP.
    feat = y2.reshape(b, FC1_IN_PAD)                             # [B, 20480]
    out = mlp(feat, prep["fc1_w"], prep["fc1_b"], prep["fc2_w"], prep["fc2_b"],
              prep["fc3_w"], prep["fc3_b"], k_tiles=FC1_K_TILES) # [B, 128]
    return out[:, :3]


# ------------------------------ Parameters ---------------------------------- #

def init_params(key):
    ks = jax.random.split(key, 10)

    def w(k, shape, fan_in):
        return jax.random.normal(k, shape, jnp.float32) / jnp.sqrt(float(fan_in))

    return {
        "conv1_w": w(ks[0], (6, 3, 5, 5), 3 * 5 * 5),
        "conv1_b": w(ks[1], (6,), 3 * 5 * 5),
        "conv2_w": w(ks[2], (16, 6, 5, 5), 6 * 5 * 5),
        "conv2_b": w(ks[3], (16,), 6 * 5 * 5),
        "fc1_w": w(ks[4], (120, FC1_IN), FC1_IN),
        "fc1_b": w(ks[5], (120,), FC1_IN),
        "fc2_w": w(ks[6], (84, 120), 120),
        "fc2_b": w(ks[7], (84,), 120),
        "fc3_w": w(ks[8], (3, 84), 84),
        "fc3_b": w(ks[9], (3,), 84),
    }


if __name__ == "__main__":
    key = jax.random.PRNGKey(0)
    pkey, xkey = jax.random.split(key)
    params = init_params(pkey)
    prep = prepare_params(params)          # one-time weight preprocessing

    # fc1 has 18496 = 16*34*34 input features, which forces a 148x148 input image.
    x = jax.random.normal(xkey, (2, 3, 148, 148), jnp.float32)

    fwd = jax.jit(net_forward)
    out = jax.block_until_ready(fwd(x, prep))
    assert out.shape == (2, 3) and out.dtype == jnp.float32
    print("KERNEL_OK")
</pallas_src>

<mosaic_0001>
module attributes {stable_mosaic.version = 11 : i64} {
  func.func @conv_relu_pool_kernel(%arg0: i32, %arg1: i32, %arg2: memref<4x1x75x2688xbf16, #tpu.memory_space<vmem>>, %arg3: memref<6x75xbf16, #tpu.memory_space<vmem>>, %arg4: memref<6x1xf32, #tpu.memory_space<vmem>>, %arg5: memref<1x6x2688xbf16, #tpu.memory_space<vmem>>) attributes {dimension_semantics = [#tpu.dimension_semantics<parallel>, #tpu.dimension_semantics<parallel>], iteration_bounds = array<i64: 2, 2>, scalar_prefetch = 0 : i64, scratch_operands = 0 : i64, tpu.core_type = #tpu.core_type<tc>, window_params = [{transform_indices = @transform_0, window_bounds = array<i64: 4, 1, 75, 2688>}, {pipeline_mode = #tpu.pipeline_mode<synchronous>, transform_indices = @transform_1, window_bounds = array<i64: 6, 75>}, {pipeline_mode = #tpu.pipeline_mode<synchronous>, transform_indices = @transform_2, window_bounds = array<i64: 6, 1>}, {transform_indices = @transform_3, window_bounds = array<i64: 1, 6, 2688>}]} {
    %c0 = arith.constant 0 : index
    %c0_0 = arith.constant 0 : index
    %0 = vector.load %arg3[%c0, %c0_0] : memref<6x75xbf16, #tpu.memory_space<vmem>>, vector<6x75xbf16>
    %c0_1 = arith.constant 0 : index
    %c0_2 = arith.constant 0 : index
    %c0_3 = arith.constant 0 : index
    %c0_4 = arith.constant 0 : index
    %1 = vector.load %arg2[%c0_1, %c0_2, %c0_3, %c0_4] : memref<4x1x75x2688xbf16, #tpu.memory_space<vmem>>, vector<1x1x75x2688xbf16>
    %2 = vector.shape_cast %1 : vector<1x1x75x2688xbf16> to vector<75x2688xbf16>
    %cst = arith.constant dense<0.000000e+00> : vector<6x2688xf32>
    %3 = tpu.matmul %0, %2, %cst {dimension_numbers = #tpu.dot_dimension_numbers<[1], [0], [0], [1], [0, 0, 1, 1], [], []>} : vector<6x75xbf16>, vector<75x2688xbf16>, vector<6x2688xf32> -> vector<6x2688xf32>
    %c1 = arith.constant 1 : index
    %c0_5 = arith.constant 0 : index
    %c0_6 = arith.constant 0 : index
    %c0_7 = arith.constant 0 : index
    %4 = vector.load %arg2[%c1, %c0_5, %c0_6, %c0_7] : memref<4x1x75x2688xbf16, #tpu.memory_space<vmem>>, vector<1x1x75x2688xbf16>
    %5 = vector.shape_cast %4 : vector<1x1x75x2688xbf16> to vector<75x2688xbf16>
    %cst_8 = arith.constant dense<0.000000e+00> : vector<6x2688xf32>
    %6 = tpu.matmul %0, %5, %cst_8 {dimension_numbers = #tpu.dot_dimension_numbers<[1], [0], [0], [1], [0, 0, 1, 1], [], []>} : vector<6x75xbf16>, vector<75x2688xbf16>, vector<6x2688xf32> -> vector<6x2688xf32>
    %7 = arith.maximumf %3, %6 : vector<6x2688xf32>
    %c2 = arith.constant 2 : index
    %c0_9 = arith.constant 0 : index
    %c0_10 = arith.constant 0 : index
    %c0_11 = arith.constant 0 : index
    %8 = vector.load %arg2[%c2, %c0_9, %c0_10, %c0_11] : memref<4x1x75x2688xbf16, #tpu.memory_space<vmem>>, vector<1x1x75x2688xbf16>
    %9 = vector.shape_cast %8 : vector<1x1x75x2688xbf16> to vector<75x2688xbf16>
    %cst_12 = arith.constant dense<0.000000e+00> : vector<6x2688xf32>
    %10 = tpu.matmul %0, %9, %cst_12 {dimension_numbers = #tpu.dot_dimension_numbers<[1], [0], [0], [1], [0, 0, 1, 1], [], []>} : vector<6x75xbf16>, vector<75x2688xbf16>, vector<6x2688xf32> -> vector<6x2688xf32>
    %11 = arith.maximumf %7, %10 : vector<6x2688xf32>
    %c3 = arith.constant 3 : index
    %c0_13 = arith.constant 0 : index
    %c0_14 = arith.constant 0 : index
    %c0_15 = arith.constant 0 : index
    %12 = vector.load %arg2[%c3, %c0_13, %c0_14, %c0_15] : memref<4x1x75x2688xbf16, #tpu.memory_space<vmem>>, vector<1x1x75x2688xbf16>
    %13 = vector.shape_cast %12 : vector<1x1x75x2688xbf16> to vector<75x2688xbf16>
    %cst_16 = arith.constant dense<0.000000e+00> : vector<6x2688xf32>
    %14 = tpu.matmul %0, %13, %cst_16 {dimension_numbers = #tpu.dot_dimension_numbers<[1], [0], [0], [1], [0, 0, 1, 1], [], []>} : vector<6x75xbf16>, vector<75x2688xbf16>, vector<6x2688xf32> -> vector<6x2688xf32>
    %15 = arith.maximumf %11, %14 : vector<6x2688xf32>
    %c0_17 = arith.constant 0 : index
    %c0_18 = arith.constant 0 : index
    %16 = vector.load %arg4[%c0_17, %c0_18] : memref<6x1xf32, #tpu.memory_space<vmem>>, vector<6x1xf32>
    %17 = vector.broadcast %16 : vector<6x1xf32> to vector<6x2688xf32>
    %18 = arith.addf %15, %17 : vector<6x2688xf32>
    %cst_19 = arith.constant 0.000000e+00 : f32
    %19 = vector.broadcast %cst_19 : f32 to vector<6x2688xf32>
    %20 = arith.maximumf %18, %19 : vector<6x2688xf32>
    %21 = arith.truncf %20 : vector<6x2688xf32> to vector<6x2688xbf16>
    %22 = vector.shape_cast %21 : vector<6x2688xbf16> to vector<1x6x2688xbf16>
    %c0_20 = arith.constant 0 : index
    %c0_21 = arith.constant 0 : index
    %c0_22 = arith.constant 0 : index
    %23 = vector.load %arg5[%c0_20, %c0_21, %c0_22] : memref<1x6x2688xbf16, #tpu.memory_space<vmem>>, vector<1x6x2688xbf16>
    tpu.vector_store %arg5[%c0_20, %c0_21, %c0_22], %22 {strides = array<i32>} : memref<1x6x2688xbf16, #tpu.memory_space<vmem>>, vector<1x6x2688xbf16>,
    return
  }
  func.func @transform_0(%arg0: i32, %arg1: i32) -> (i32, i32, i32, i32) {
    %c0_i32 = arith.constant 0 : i32
    %c0_i32_0 = arith.constant 0 : i32
    %c0_i32_1 = arith.constant 0 : i32
    return %c0_i32, %arg0, %c0_i32_0, %arg1 : i32, i32, i32, i32
  }
  func.func @transform_1(%arg0: i32, %arg1: i32) -> (i32, i32) {
    %c0_i32 = arith.constant 0 : i32
    %c0_i32_0 = arith.constant 0 : i32
    %c0_i32_1 = arith.constant 0 : i32
    return %c0_i32, %c0_i32_0 : i32, i32
  }
  func.func @transform_2(%arg0: i32, %arg1: i32) -> (i32, i32) {
    %c0_i32 = arith.constant 0 : i32
    %c0_i32_0 = arith.constant 0 : i32
    %c0_i32_1 = arith.constant 0 : i32
    return %c0_i32, %c0_i32_0 : i32, i32
  }
  func.func @transform_3(%arg0: i32, %arg1: i32) -> (i32, i32, i32) {
    %c0_i32 = arith.constant 0 : i32
    %c0_i32_0 = arith.constant 0 : i32
    return %arg0, %c0_i32, %arg1 : i32, i32, i32
  }
}

module attributes {stable_mosaic.version = 11 : i64} {
  func.func @conv_relu_pool_kernel(%arg0: i32, %arg1: i32, %arg2: memref<4x1x150x640xbf16, #tpu.memory_space<vmem>>, %arg3: memref<16x150xbf16, #tpu.memory_space<vmem>>, %arg4: memref<16x1xf32, #tpu.memory_space<vmem>>, %arg5: memref<1x16x640xbf16, #tpu.memory_space<vmem>>) attributes {dimension_semantics = [#tpu.dimension_semantics<parallel>, #tpu.dimension_semantics<parallel>], iteration_bounds = array<i64: 2, 2>, scalar_prefetch = 0 : i64, scratch_operands = 0 : i64, tpu.core_type = #tpu.core_type<tc>, window_params = [{transform_indices = @transform_0, window_bounds = array<i64: 4, 1, 150, 640>}, {pipeline_mode = #tpu.pipeline_mode<synchronous>, transform_indices = @transform_1, window_bounds = array<i64: 16, 150>}, {pipeline_mode = #tpu.pipeline_mode<synchronous>, transform_indices = @transform_2, window_bounds = array<i64: 16, 1>}, {transform_indices = @transform_3, window_bounds = array<i64: 1, 16, 640>}]} {
    %c0 = arith.constant 0 : index
    %c0_0 = arith.constant 0 : index
    %0 = vector.load %arg3[%c0, %c0_0] : memref<16x150xbf16, #tpu.memory_space<vmem>>, vector<16x150xbf16>
    %c0_1 = arith.constant 0 : index
    %c0_2 = arith.constant 0 : index
    %c0_3 = arith.constant 0 : index
    %c0_4 = arith.constant 0 : index
    %1 = vector.load %arg2[%c0_1, %c0_2, %c0_3, %c0_4] : memref<4x1x150x640xbf16, #tpu.memory_space<vmem>>, vector<1x1x150x640xbf16>
    %2 = vector.shape_cast %1 : vector<1x1x150x640xbf16> to vector<150x640xbf16>
    %cst = arith.constant dense<0.000000e+00> : vector<16x640xf32>
    %3 = tpu.matmul %0, %2, %cst {dimension_numbers = #tpu.dot_dimension_numbers<[1], [0], [0], [1], [0, 0, 1, 1], [], []>} : vector<16x150xbf16>, vector<150x640xbf16>, vector<16x640xf32> -> vector<16x640xf32>
    %c1 = arith.constant 1 : index
    %c0_5 = arith.constant 0 : index
    %c0_6 = arith.constant 0 : index
    %c0_7 = arith.constant 0 : index
    %4 = vector.load %arg2[%c1, %c0_5, %c0_6, %c0_7] : memref<4x1x150x640xbf16, #tpu.memory_space<vmem>>, vector<1x1x150x640xbf16>
    %5 = vector.shape_cast %4 : vector<1x1x150x640xbf16> to vector<150x640xbf16>
    %cst_8 = arith.constant dense<0.000000e+00> : vector<16x640xf32>
    %6 = tpu.matmul %0, %5, %cst_8 {dimension_numbers = #tpu.dot_dimension_numbers<[1], [0], [0], [1], [0, 0, 1, 1], [], []>} : vector<16x150xbf16>, vector<150x640xbf16>, vector<16x640xf32> -> vector<16x640xf32>
    %7 = arith.maximumf %3, %6 : vector<16x640xf32>
    %c2 = arith.constant 2 : index
    %c0_9 = arith.constant 0 : index
    %c0_10 = arith.constant 0 : index
    %c0_11 = arith.constant 0 : index
    %8 = vector.load %arg2[%c2, %c0_9, %c0_10, %c0_11] : memref<4x1x150x640xbf16, #tpu.memory_space<vmem>>, vector<1x1x150x640xbf16>
    %9 = vector.shape_cast %8 : vector<1x1x150x640xbf16> to vector<150x640xbf16>
    %cst_12 = arith.constant dense<0.000000e+00> : vector<16x640xf32>
    %10 = tpu.matmul %0, %9, %cst_12 {dimension_numbers = #tpu.dot_dimension_numbers<[1], [0], [0], [1], [0, 0, 1, 1], [], []>} : vector<16x150xbf16>, vector<150x640xbf16>, vector<16x640xf32> -> vector<16x640xf32>
    %11 = arith.maximumf %7, %10 : vector<16x640xf32>
    %c3 = arith.constant 3 : index
    %c0_13 = arith.constant 0 : index
    %c0_14 = arith.constant 0 : index
    %c0_15 = arith.constant 0 : index
    %12 = vector.load %arg2[%c3, %c0_13, %c0_14, %c0_15] : memref<4x1x150x640xbf16, #tpu.memory_space<vmem>>, vector<1x1x150x640xbf16>
    %13 = vector.shape_cast %12 : vector<1x1x150x640xbf16> to vector<150x640xbf16>
    %cst_16 = arith.constant dense<0.000000e+00> : vector<16x640xf32>
    %14 = tpu.matmul %0, %13, %cst_16 {dimension_numbers = #tpu.dot_dimension_numbers<[1], [0], [0], [1], [0, 0, 1, 1], [], []>} : vector<16x150xbf16>, vector<150x640xbf16>, vector<16x640xf32> -> vector<16x640xf32>
    %15 = arith.maximumf %11, %14 : vector<16x640xf32>
    %c0_17 = arith.constant 0 : index
    %c0_18 = arith.constant 0 : index
    %16 = vector.load %arg4[%c0_17, %c0_18] : memref<16x1xf32, #tpu.memory_space<vmem>>, vector<16x1xf32>
    %17 = vector.broadcast %16 : vector<16x1xf32> to vector<16x640xf32>
    %18 = arith.addf %15, %17 : vector<16x640xf32>
    %cst_19 = arith.constant 0.000000e+00 : f32
    %19 = vector.broadcast %cst_19 : f32 to vector<16x640xf32>
    %20 = arith.maximumf %18, %19 : vector<16x640xf32>
    %21 = arith.truncf %20 : vector<16x640xf32> to vector<16x640xbf16>
    %22 = vector.shape_cast %21 : vector<16x640xbf16> to vector<1x16x640xbf16>
    %c0_20 = arith.constant 0 : index
    %c0_21 = arith.constant 0 : index
    %c0_22 = arith.constant 0 : index
    %23 = vector.load %arg5[%c0_20, %c0_21, %c0_22] : memref<1x16x640xbf16, #tpu.memory_space<vmem>>, vector<1x16x640xbf16>
    tpu.vector_store %arg5[%c0_20, %c0_21, %c0_22], %22 {strides = array<i32>} : memref<1x16x640xbf16, #tpu.memory_space<vmem>>, vector<1x16x640xbf16>,
    return
  }
  func.func @transform_0(%arg0: i32, %arg1: i32) -> (i32, i32, i32, i32) {
    %c0_i32 = arith.constant 0 : i32
    %c0_i32_0 = arith.constant 0 : i32
    %c0_i32_1 = arith.constant 0 : i32
    return %c0_i32, %arg0, %c0_i32_0, %arg1 : i32, i32, i32, i32
  }
  func.func @transform_1(%arg0: i32, %arg1: i32) -> (i32, i32) {
    %c0_i32 = arith.constant 0 : i32
    %c0_i32_0 = arith.constant 0 : i32
    %c0_i32_1 = arith.constant 0 : i32
    return %c0_i32, %c0_i32_0 : i32, i32
  }
  func.func @transform_2(%arg0: i32, %arg1: i32) -> (i32, i32) {
    %c0_i32 = arith.constant 0 : i32
    %c0_i32_0 = arith.constant 0 : i32
    %c0_i32_1 = arith.constant 0 : i32
    return %c0_i32, %c0_i32_0 : i32, i32
  }
  func.func @transform_3(%arg0: i32, %arg1: i32) -> (i32, i32, i32) {
    %c0_i32 = arith.constant 0 : i32
    %c0_i32_0 = arith.constant 0 : i32
    return %arg0, %c0_i32, %arg1 : i32, i32, i32
  }
}

module attributes {stable_mosaic.version = 11 : i64} {
  func.func @mlp_kernel(%arg0: i32, %arg1: memref<2x10240xbf16, #tpu.memory_space<vmem>>, %arg2: memref<10240x128xbf16, #tpu.memory_space<vmem>>, %arg3: memref<1x128xf32, #tpu.memory_space<vmem>>, %arg4: memref<128x128xf32, #tpu.memory_space<vmem>>, %arg5: memref<1x128xf32, #tpu.memory_space<vmem>>, %arg6: memref<128x128xf32, #tpu.memory_space<vmem>>, %arg7: memref<1x128xf32, #tpu.memory_space<vmem>>, %arg8: memref<2x128xf32, #tpu.memory_space<vmem>>, %arg9: memref<2x128xf32, #tpu.memory_space<vmem>>) attributes {dimension_semantics = [#tpu.dimension_semantics<arbitrary>], iteration_bounds = array<i64: 2>, scalar_prefetch = 0 : i64, scratch_operands = 1 : i64, tpu.core_type = #tpu.core_type<tc>, window_params = [{transform_indices = @transform_0, window_bounds = array<i64: 2, 10240>}, {transform_indices = @transform_1, window_bounds = array<i64: 10240, 128>}, {pipeline_mode = #tpu.pipeline_mode<synchronous>, transform_indices = @transform_2, window_bounds = array<i64: 1, 128>}, {pipeline_mode = #tpu.pipeline_mode<synchronous>, transform_indices = @transform_3, window_bounds = array<i64: 128, 128>}, {pipeline_mode = #tpu.pipeline_mode<synchronous>, transform_indices = @transform_4, window_bounds = array<i64: 1, 128>}, {pipeline_mode = #tpu.pipeline_mode<synchronous>, transform_indices = @transform_5, window_bounds = array<i64: 128, 128>}, {pipeline_mode = #tpu.pipeline_mode<synchronous>, transform_indices = @transform_6, window_bounds = array<i64: 1, 128>}, {pipeline_mode = #tpu.pipeline_mode<synchronous>, transform_indices = @transform_7, window_bounds = array<i64: 2, 128>}]} {
    %c0_i32 = arith.constant 0 : i32
    %0 = arith.cmpi eq, %arg0, %c0_i32 : i32
    %1 = arith.extui %0 : i1 to i32
    %c0_i32_0 = arith.constant 0 : i32
    %2 = arith.cmpi ne, %1, %c0_i32_0 : i32
    scf.if %2 {
      %cst_9 = arith.constant 0.000000e+00 : f32
      %12 = vector.broadcast %cst_9 : f32 to vector<2x128xf32>
      %c0_10 = arith.constant 0 : index
      %c0_11 = arith.constant 0 : index
      %13 = vector.load %arg9[%c0_10, %c0_11] : memref<2x128xf32, #tpu.memory_space<vmem>>, vector<2x128xf32>
      tpu.vector_store %arg9[%c0_10, %c0_11], %12 {strides = array<i32>} : memref<2x128xf32, #tpu.memory_space<vmem>>, vector<2x128xf32>,
    } else {
    }
    %c0 = arith.constant 0 : index
    %c0_1 = arith.constant 0 : index
    %3 = vector.load %arg9[%c0, %c0_1] : memref<2x128xf32, #tpu.memory_space<vmem>>, vector<2x128xf32>
    %c0_2 = arith.constant 0 : index
    %c0_3 = arith.constant 0 : index
    %4 = vector.load %arg1[%c0_2, %c0_3] : memref<2x10240xbf16, #tpu.memory_space<vmem>>, vector<2x10240xbf16>
    %c0_4 = arith.constant 0 : index
    %c0_5 = arith.constant 0 : index
    %5 = vector.load %arg2[%c0_4, %c0_5] : memref<10240x128xbf16, #tpu.memory_space<vmem>>, vector<10240x128xbf16>
    %cst = arith.constant dense<0.000000e+00> : vector<2x128xf32>
    %6 = tpu.matmul %4, %5, %cst {dimension_numbers = #tpu.dot_dimension_numbers<[1], [0], [0], [1], [0, 0, 1, 1], [], []>} : vector<2x10240xbf16>, vector<10240x128xbf16>, vector<2x128xf32> -> vector<2x128xf32>
    %7 = arith.addf %3, %6 : vector<2x128xf32>
    %c0_6 = arith.constant 0 : index
    %c0_7 = arith.constant 0 : index
    %8 = vector.load %arg9[%c0_6, %c0_7] : memref<2x128xf32, #tpu.memory_space<vmem>>, vector<2x128xf32>
    tpu.vector_store %arg9[%c0_6, %c0_7], %7 {strides = array<i32>} : memref<2x128xf32, #tpu.memory_space<vmem>>, vector<2x128xf32>,
    %c1_i32 = arith.constant 1 : i32
    %9 = arith.cmpi eq, %arg0, %c1_i32 : i32
    %10 = arith.extui %9 : i1 to i32
    %c0_i32_8 = arith.constant 0 : i32
    %11 = arith.cmpi ne, %10, %c0_i32_8 : i32
    scf.if %11 {
      %c0_9 = arith.constant 0 : index
      %c0_10 = arith.constant 0 : index
      %12 = vector.load %arg9[%c0_9, %c0_10] : memref<2x128xf32, #tpu.memory_space<vmem>>, vector<2x128xf32>
      %c0_11 = arith.constant 0 : index
      %c0_12 = arith.constant 0 : index
      %13 = vector.load %arg3[%c0_11, %c0_12] : memref<1x128xf32, #tpu.memory_space<vmem>>, vector<1x128xf32>
      %14 = vector.broadcast %13 : vector<1x128xf32> to vector<2x128xf32>
      %15 = arith.addf %12, %14 : vector<2x128xf32>
      %cst_13 = arith.constant 0.000000e+00 : f32
      %16 = vector.broadcast %cst_13 : f32 to vector<2x128xf32>
      %17 = arith.maximumf %15, %16 : vector<2x128xf32>
      %c0_14 = arith.constant 0 : index
      %c0_15 = arith.constant 0 : index
      %18 = vector.load %arg4[%c0_14, %c0_15] : memref<128x128xf32, #tpu.memory_space<vmem>>, vector<128x128xf32>
      %cst_16 = arith.constant dense<0.000000e+00> : vector<2x128xf32>
      %19 = tpu.matmul %17, %18, %cst_16 {dimension_numbers = #tpu.dot_dimension_numbers<[1], [0], [0], [1], [0, 0, 1, 1], [], []>} : vector<2x128xf32>, vector<128x128xf32>, vector<2x128xf32> -> vector<2x128xf32>
      %c0_17 = arith.constant 0 : index
      %c0_18 = arith.constant 0 : index
      %20 = vector.load %arg5[%c0_17, %c0_18] : memref<1x128xf32, #tpu.memory_space<vmem>>, vector<1x128xf32>
      %21 = vector.broadcast %20 : vector<1x128xf32> to vector<2x128xf32>
      %22 = arith.addf %19, %21 : vector<2x128xf32>
      %cst_19 = arith.constant 0.000000e+00 : f32
      %23 = vector.broadcast %cst_19 : f32 to vector<2x128xf32>
      %24 = arith.maximumf %22, %23 : vector<2x128xf32>
      %c0_20 = arith.constant 0 : index
      %c0_21 = arith.constant 0 : index
      %25 = vector.load %arg6[%c0_20, %c0_21] : memref<128x128xf32, #tpu.memory_space<vmem>>, vector<128x128xf32>
      %cst_22 = arith.constant dense<0.000000e+00> : vector<2x128xf32>
      %26 = tpu.matmul %24, %25, %cst_22 {dimension_numbers = #tpu.dot_dimension_numbers<[1], [0], [0], [1], [0, 0, 1, 1], [], []>} : vector<2x128xf32>, vector<128x128xf32>, vector<2x128xf32> -> vector<2x128xf32>
      %c0_23 = arith.constant 0 : index
      %c0_24 = arith.constant 0 : index
      %27 = vector.load %arg7[%c0_23, %c0_24] : memref<1x128xf32, #tpu.memory_space<vmem>>, vector<1x128xf32>
      %28 = vector.broadcast %27 : vector<1x128xf32> to vector<2x128xf32>
      %29 = arith.addf %26, %28 : vector<2x128xf32>
      %c0_25 = arith.constant 0 : index
      %c0_26 = arith.constant 0 : index
      %30 = vector.load %arg8[%c0_25, %c0_26] : memref<2x128xf32, #tpu.memory_space<vmem>>, vector<2x128xf32>
      tpu.vector_store %arg8[%c0_25, %c0_26], %29 {strides = array<i32>} : memref<2x128xf32, #tpu.memory_space<vmem>>, vector<2x128xf32>,
    } else {
    }
    return
  }
  func.func @transform_0(%arg0: i32) -> (i32, i32) {
    %c0_i32 = arith.constant 0 : i32
    %c0_i32_0 = arith.constant 0 : i32
    return %c0_i32, %arg0 : i32, i32
  }
  func.func @transform_1(%arg0: i32) -> (i32, i32) {
    %c0_i32 = arith.constant 0 : i32
    %c0_i32_0 = arith.constant 0 : i32
    return %arg0, %c0_i32 : i32, i32
  }
  func.func @transform_2(%arg0: i32) -> (i32, i32) {
    %c0_i32 = arith.constant 0 : i32
    %c0_i32_0 = arith.constant 0 : i32
    %c0_i32_1 = arith.constant 0 : i32
    return %c0_i32, %c0_i32_0 : i32, i32
  }
  func.func @transform_3(%arg0: i32) -> (i32, i32) {
    %c0_i32 = arith.constant 0 : i32
    %c0_i32_0 = arith.constant 0 : i32
    %c0_i32_1 = arith.constant 0 : i32
    return %c0_i32, %c0_i32_0 : i32, i32
  }
  func.func @transform_4(%arg0: i32) -> (i32, i32) {
    %c0_i32 = arith.constant 0 : i32
    %c0_i32_0 = arith.constant 0 : i32
    %c0_i32_1 = arith.constant 0 : i32
    return %c0_i32, %c0_i32_0 : i32, i32
  }
  func.func @transform_5(%arg0: i32) -> (i32, i32) {
    %c0_i32 = arith.constant 0 : i32
    %c0_i32_0 = arith.constant 0 : i32
    %c0_i32_1 = arith.constant 0 : i32
    return %c0_i32, %c0_i32_0 : i32, i32
  }
  func.func @transform_6(%arg0: i32) -> (i32, i32) {
    %c0_i32 = arith.constant 0 : i32
    %c0_i32_0 = arith.constant 0 : i32
    %c0_i32_1 = arith.constant 0 : i32
    return %c0_i32, %c0_i32_0 : i32, i32
  }
  func.func @transform_7(%arg0: i32) -> (i32, i32) {
    %c0_i32 = arith.constant 0 : i32
    %c0_i32_0 = arith.constant 0 : i32
    %c0_i32_1 = arith.constant 0 : i32
    return %c0_i32, %c0_i32_0 : i32, i32
  }
}

</mosaic_0001>

<bundles_post_ra>
// kernel: net_forward.3
= control target key start
LH: loop header
LB: loop body
LE: loop exit
PB: predicated region body
PF: predicated region fallthrough
CT: control target
= control target key end

     0   :  { %s7704_s12 = smov 0   ;;  %s7706_s13 = smov 0   ;;  %s9586_s0 = inlined_call_operand.vmem [shape: bf16[4,2,75,5376], index: 0, kind: input, shape index: {}]   ;;  %s9587_s1 = inlined_call_operand.vmem [shape: bf16[6,75], index: 1, kind: input, shape index: {}]   ;;  %s9588_s2 = inlined_call_operand.vmem [shape: f32[6,1], index: 2, kind: input, shape index: {}]   ;;  %s9589_s3 = inlined_call_operand.vmem [shape: bf16[2,6,5376], index: 3, kind: output, shape index: {}]  }
   0x1   :  { %s7708_s14 = smov 0   ;;  %s7710_s15 = smov 0  }
   0x2   :  { %s7712_s16 = smov 0   ;;  %s7714_s17 = smov 0  }
   0x3   :  { %s7716_s18 = smov 0  }
   0x4 LB: > { %s22_s19 = sadd.s32 1, %s7670_s16  ;;  %s25_s20 = sadd.s32 1, %s7674_s17  ;;  %s7678_s18 = sphi %s7716_s18, %s13_s18   ;;  %s7674_s17 = sphi %s7714_s17, %s9595_s17   ;;  %s7670_s16 = sphi %s7712_s16, %s9594_s16   ;;  %s7666_s15 = sphi %s7710_s15, %s9593_s15   ;;  %s7662_s14 = sphi %s7708_s14, %s9592_s14   ;;  %s7658_s13 = sphi %s7706_s13, %s9591_s13   ;;  %s7654_s12 = sphi %s7704_s12, %s9590_s12  }
   0x5   : > { %p23_p0 = scmp.ge.s32.totalorder %s22_s19, 2  ;;  %p41_p1 = scmp.ne.s32.totalorder %s7658_s13, %s7654_s12 }
   0x6   : > { %p42_p2 = scmp.eq.s32.totalorder %s7678_s18, 0  ;;  %s34_s24 = sadd.s32 1, %s7658_s13 }
   0x7   : > { %s9597_s19 = smov (%p23_p0, %s22_s19), 0  ;;  %s9599_s20 = smov (!%p23_p0, %s25_s20), %s7674_s17 }
   0x8   : > { %p43_p3 = por %p42_p2, %p41_p1  ;;  %p27_p4 = scmp.ge.s32.totalorder %s9599_s20, 2 }
   0x9   : > { %s30_s21 = ssub.s32 %s7670_s16, %s9597_s19  ;;  %p5955_p6 = scmp.ge.s32.totalorder %s7678_s18, 4 }
   0xa   : > { %s9601_s20 = smov (%p27_p4, %s9599_s20), 0 }
   0xb   : > { %s29_s22 = ssub.s32 %s7674_s17, %s9601_s20  ;;  %143 = sbr.rel (%p5955_p6) target bundleno = 251 (0xfb), region = 24 }
   0xc   : > { %s31_s23 = sor.u32 %s30_s21, %s29_s22 }
   0xd   : > { %p32_p5 = scmp.eq.s32.totalorder %s31_s23, 0 }
   0xf   : > { %s7755_s25 = scalar_select %p32_p5, %s7658_s13, %s34_s24  }
  0x10   : > { %146 = sbr.rel (!%p43_p3) target bundleno = 251 (0xfb), region = 28  ;;  %s148_s26 = sand.u32 (%p43_p3), 1, %s7658_s13  }
  0x11   : > { %s151_s27 = smul.u32 (%p43_p3), 21, %s7670_s16 }
  0x12   : > { %s6937_s28 = smul.u32 (%p43_p3), 3360, %s148_s26 }
  0x13   : > { %s6938_s29 = smul.u32 (%p43_p3), 420, %s7674_s17 }
  0x14   : > { %s7769_s8 = scalar_lea.vmem (%p43_p3), [#allocation2], %s6937_s28 }
  0x15   : > { %s153_s30 = sadd.s32 %s6938_s29, %s151_s27 }
  0x16   : > { %s5956_s4 = sshll.u32 %s153_s30, 2 }
  0x17   : > { %s7764_s7 = scalar_lea.vmem %s9586_s0, %s5956_s4 }
  0x18   : > { %v170_v0 = vld [vmem:[%s7764_s7] sm:$0xff]  ;;  %v172_v1 = vld [vmem:[%s7764_s7 + $0x8] sm:$0xff]  ;;  %v174_v2 = vld [vmem:[%s7764_s7 + $0x10] sm:$0xff] }
  0x19   : > { %171 = vst [vmem:[%s7769_s8] sm:$0xff] %v170_v0  ;;  %173 = vst [vmem:[%s7769_s8 + $0x8] sm:$0xff] %v172_v1  ;;  %v176_v3 = vld [vmem:[%s7764_s7 + $0x18] sm:$0xff]  ;;  %v178_v4 = vld [vmem:[%s7764_s7 + $0x20] sm:$0xff] }
  0x1a   : > { %175 = vst [vmem:[%s7769_s8 + $0x10] sm:$0xff] %v174_v2  ;;  %v180_v5 = vld [vmem:[%s7764_s7 + $0x28] sm:$0xff]  ;;  %177 = vst [vmem:[%s7769_s8 + $0x18] sm:$0xff] %v176_v3  ;;  %v182_v6 = vld [vmem:[%s7764_s7 + $0x30] sm:$0xff] }
  0x1b   : > { %179 = vst [vmem:[%s7769_s8 + $0x20] sm:$0xff] %v178_v4  ;;  %181 = vst [vmem:[%s7769_s8 + $0x28] sm:$0xff] %v180_v5  ;;  %v184_v7 = vld [vmem:[%s7764_s7 + $0x38] sm:$0xff]  ;;  %v186_v8 = vld [vmem:[%s7764_s7 + $0x40] sm:$0xff] }
  0x1c   : > { %183 = vst [vmem:[%s7769_s8 + $0x30] sm:$0xff] %v182_v6  ;;  %185 = vst [vmem:[%s7769_s8 + $0x38] sm:$0xff] %v184_v7  ;;  %v188_v9 = vld [vmem:[%s7764_s7 + $0x48] sm:$0xff]  ;;  %v192_v11 = vld [vmem:[%s7764_s7 + $0xb0] sm:$0xff] }
  0x1d   : > { %187 = vst [vmem:[%s7769_s8 + $0x40] sm:$0xff] %v186_v8  ;;  %v190_v10 = vld [vmem:[%s7764_s7 + $0xa8] sm:$0xff]  ;;  %189 = vst [vmem:[%s7769_s8 + $0x48] sm:$0xff] %v188_v9  ;;  %v194_v12 = vld [vmem:[%s7764_s7 + $0xb8] sm:$0xff] }
  0x1e   : > { %191 = vst [vmem:[%s7769_s8 + $0x54] sm:$0xff] %v190_v10  ;;  %193 = vst [vmem:[%s7769_s8 + $0x5c] sm:$0xff] %v192_v11  ;;  %v196_v13 = vld [vmem:[%s7764_s7 + $0xc0] sm:$0xff]  ;;  %v198_v14 = vld [vmem:[%s7764_s7 + $0xc8] sm:$0xff] }
  0x1f   : > { %195 = vst [vmem:[%s7769_s8 + $0x64] sm:$0xff] %v194_v12  ;;  %197 = vst [vmem:[%s7769_s8 + $0x6c] sm:$0xff] %v196_v13  ;;  %v200_v15 = vld [vmem:[%s7764_s7 + $0xd0] sm:$0xff]  ;;  %v202_v16 = vld [vmem:[%s7764_s7 + $0xd8] sm:$0xff] }
  0x20   : > { %199 = vst [vmem:[%s7769_s8 + $0x74] sm:$0xff] %v198_v14  ;;  %v204_v17 = vld [vmem:[%s7764_s7 + $0xe0] sm:$0xff]  ;;  %201 = vst [vmem:[%s7769_s8 + $0x7c] sm:$0xff] %v200_v15  ;;  %v206_v18 = vld [vmem:[%s7764_s7 + $0xe8] sm:$0xff] }
  0x21   : > { %203 = vst [vmem:[%s7769_s8 + $0x84] sm:$0xff] %v202_v16  ;;  %205 = vst [vmem:[%s7769_s8 + $0x8c] sm:$0xff] %v204_v17  ;;  %v208_v19 = vld [vmem:[%s7764_s7 + $0xf0] sm:$0xff]  ;;  %v212_v21 = vld [vmem:[%s7764_s7 + $0x158] sm:$0xff] }
  0x22   : > { %v210_v20 = vld [vmem:[%s7764_s7 + $0x150] sm:$0xff]  ;;  %207 = vst [vmem:[%s7769_s8 + $0x94] sm:$0xff] %v206_v18  ;;  %209 = vst [vmem:[%s7769_s8 + $0x9c] sm:$0xff] %v208_v19  ;;  %v214_v22 = vld [vmem:[%s7764_s7 + $0x160] sm:$0xff] }
  0x23   : > { %211 = vst [vmem:[%s7769_s8 + $0xa8] sm:$0xff] %v210_v20  ;;  %v216_v23 = vld [vmem:[%s7764_s7 + $0x168] sm:$0xff]  ;;  %213 = vst [vmem:[%s7769_s8 + $0xb0] sm:$0xff] %v212_v21  ;;  %v218_v24 = vld [vmem:[%s7764_s7 + $0x170] sm:$0xff] }
  0x24   : > { %215 = vst [vmem:[%s7769_s8 + $0xb8] sm:$0xff] %v214_v22  ;;  %217 = vst [vmem:[%s7769_s8 + $0xc0] sm:$0xff] %v216_v23  ;;  %v220_v25 = vld [vmem:[%s7764_s7 + $0x178] sm:$0xff]  ;;  %v222_v26 = vld [vmem:[%s7764_s7 + $0x180] sm:$0xff] }
  0x25   : > { %219 = vst [vmem:[%s7769_s8 + $0xc8] sm:$0xff] %v218_v24  ;;  %221 = vst [vmem:[%s7769_s8 + $0xd0] sm:$0xff] %v220_v25  ;;  %v224_v27 = vld [vmem:[%s7764_s7 + $0x188] sm:$0xff]  ;;  %v226_v28 = vld [vmem:[%s7764_s7 + $0x190] sm:$0xff] }
  0x26   : > { %223 = vst [vmem:[%s7769_s8 + $0xd8] sm:$0xff] %v222_v26  ;;  %v228_v29 = vld [vmem:[%s7764_s7 + $0x198] sm:$0xff]  ;;  %225 = vst [vmem:[%s7769_s8 + $0xe0] sm:$0xff] %v224_v27  ;;  %v232_v31 = vld [vmem:[%s7764_s7 + $0x200] sm:$0xff] }
  0x27   : > { %227 = vst [vmem:[%s7769_s8 + $0xe8] sm:$0xff] %v226_v28  ;;  %229 = vst [vmem:[%s7769_s8 + $0xf0] sm:$0xff] %v228_v29  ;;  %v230_v30 = vld [vmem:[%s7764_s7 + $0x1f8] sm:$0xff]  ;;  %v234_v32 = vld [vmem:[%s7764_s7 + $0x208] sm:$0xff] }
  0x28   : > { %231 = vst [vmem:[%s7769_s8 + $0xfc] sm:$0xff] %v230_v30  ;;  %233 = vst [vmem:[%s7769_s8 + $0x104] sm:$0xff] %v232_v31  ;;  %v236_v33 = vld [vmem:[%s7764_s7 + $0x210] sm:$0xff]  ;;  %v238_v34 = vld [vmem:[%s7764_s7 + $0x218] sm:$0xff] }
  0x29   : > { %235 = vst [vmem:[%s7769_s8 + $0x10c] sm:$0xff] %v234_v32  ;;  %v240_v35 = vld [vmem:[%s7764_s7 + $0x220] sm:$0xff]  ;;  %237 = vst [vmem:[%s7769_s8 + $0x114] sm:$0xff] %v236_v33  ;;  %v242_v36 = vld [vmem:[%s7764_s7 + $0x228] sm:$0xff] }
  0x2a   : > { %239 = vst [vmem:[%s7769_s8 + $0x11c] sm:$0xff] %v238_v34  ;;  %241 = vst [vmem:[%s7769_s8 + $0x124] sm:$0xff] %v240_v35  ;;  %v244_v37 = vld [vmem:[%s7764_s7 + $0x230] sm:$0xff]  ;;  %v246_v38 = vld [vmem:[%s7764_s7 + $0x238] sm:$0xff] }
  0x2b   : > { %243 = vst [vmem:[%s7769_s8 + $0x12c] sm:$0xff] %v242_v36  ;;  %245 = vst [vmem:[%s7769_s8 + $0x134] sm:$0xff] %v244_v37  ;;  %v248_v39 = vld [vmem:[%s7764_s7 + $0x240] sm:$0xff]  ;;  %v252_v41 = vld [vmem:[%s7764_s7 + $0x2a8] sm:$0xff] }
  0x2c   : > { %247 = vst [vmem:[%s7769_s8 + $0x13c] sm:$0xff] %v246_v38  ;;  %v250_v40 = vld [vmem:[%s7764_s7 + $0x2a0] sm:$0xff]  ;;  %249 = vst [vmem:[%s7769_s8 + $0x144] sm:$0xff] %v248_v39  ;;  %v254_v42 = vld [vmem:[%s7764_s7 + $0x2b0] sm:$0xff] }
  0x2d   : > { %251 = vst [vmem:[%s7769_s8 + $0x150] sm:$0xff] %v250_v40  ;;  %253 = vst [vmem:[%s7769_s8 + $0x158] sm:$0xff] %v252_v41  ;;  %v256_v43 = vld [vmem:[%s7764_s7 + $0x2b8] sm:$0xff]  ;;  %v258_v44 = vld [vmem:[%s7764_s7 + $0x2c0] sm:$0xff] }
  0x2e   : > { %255 = vst [vmem:[%s7769_s8 + $0x160] sm:$0xff] %v254_v42  ;;  %257 = vst [vmem:[%s7769_s8 + $0x168] sm:$0xff] %v256_v43  ;;  %v260_v45 = vld [vmem:[%s7764_s7 + $0x2c8] sm:$0xff]  ;;  %v262_v46 = vld [vmem:[%s7764_s7 + $0x2d0] sm:$0xff] }
  0x2f   : > { %259 = vst [vmem:[%s7769_s8 + $0x170] sm:$0xff] %v258_v44  ;;  %v264_v47 = vld [vmem:[%s7764_s7 + $0x2d8] sm:$0xff]  ;;  %261 = vst [vmem:[%s7769_s8 + $0x178] sm:$0xff] %v260_v45  ;;  %v266_v48 = vld [vmem:[%s7764_s7 + $0x2e0] sm:$0xff] }
  0x30   : > { %263 = vst [vmem:[%s7769_s8 + $0x180] sm:$0xff] %v262_v46  ;;  %265 = vst [vmem:[%s7769_s8 + $0x188] sm:$0xff] %v264_v47  ;;  %v268_v49 = vld [vmem:[%s7764_s7 + $0x2e8] sm:$0xff]  ;;  %v272_v51 = vld [vmem:[%s7764_s7 + $0x350] sm:$0xff] }
  0x31   : > { %v270_v50 = vld [vmem:[%s7764_s7 + $0x348] sm:$0xff]  ;;  %267 = vst [vmem:[%s7769_s8 + $0x190] sm:$0xff] %v266_v48  ;;  %269 = vst [vmem:[%s7769_s8 + $0x198] sm:$0xff] %v268_v49  ;;  %v274_v52 = vld [vmem:[%s7764_s7 + $0x358] sm:$0xff] }
  0x32   : > { %271 = vst [vmem:[%s7769_s8 + $0x1a4] sm:$0xff] %v270_v50  ;;  %v276_v53 = vld [vmem:[%s7764_s7 + $0x360] sm:$0xff]  ;;  %273 = vst [vmem:[%s7769_s8 + $0x1ac] sm:$0xff] %v272_v51  ;;  %v278_v54 = vld [vmem:[%s7764_s7 + $0x368] sm:$0xff] }
  0x33   : > { %275 = vst [vmem:[%s7769_s8 + $0x1b4] sm:$0xff] %v274_v52  ;;  %277 = vst [vmem:[%s7769_s8 + $0x1bc] sm:$0xff] %v276_v53  ;;  %v280_v55 = vld [vmem:[%s7764_s7 + $0x370] sm:$0xff]  ;;  %v282_v56 = vld [vmem:[%s7764_s7 + $0x378] sm:$0xff] }
  0x34   : > { %279 = vst [vmem:[%s7769_s8 + $0x1c4] sm:$0xff] %v278_v54  ;;  %281 = vst [vmem:[%s7769_s8 + $0x1cc] sm:$0xff] %v280_v55  ;;  %v284_v57 = vld [vmem:[%s7764_s7 + $0x380] sm:$0xff]  ;;  %v286_v58 = vld [vmem:[%s7764_s7 + $0x388] sm:$0xff] }
  0x35   : > { %283 = vst [vmem:[%s7769_s8 + $0x1d4] sm:$0xff] %v282_v56  ;;  %v288_v59 = vld [vmem:[%s7764_s7 + $0x390] sm:$0xff]  ;;  %285 = vst [vmem:[%s7769_s8 + $0x1dc] sm:$0xff] %v284_v57  ;;  %v292_v61 = vld [vmem:[%s7764_s7 + $0x3f8] sm:$0xff] }
  0x36   : > { %287 = vst [vmem:[%s7769_s8 + $0x1e4] sm:$0xff] %v286_v58  ;;  %289 = vst [vmem:[%s7769_s8 + $0x1ec] sm:$0xff] %v288_v59  ;;  %v290_v60 = vld [vmem:[%s7764_s7 + $0x3f0] sm:$0xff]  ;;  %v294_v62 = vld [vmem:[%s7764_s7 + $0x400] sm:$0xff] }
  0x37   : > { %291 = vst [vmem:[%s7769_s8 + $0x1f8] sm:$0xff] %v290_v60  ;;  %293 = vst [vmem:[%s7769_s8 + $0x200] sm:$0xff] %v292_v61  ;;  %v296_v63 = vld [vmem:[%s7764_s7 + $0x408] sm:$0xff]  ;;  %v298_v0 = vld [vmem:[%s7764_s7 + $0x410] sm:$0xff] }
  0x38   : > { %295 = vst [vmem:[%s7769_s8 + $0x208] sm:$0xff] %v294_v62  ;;  %v300_v1 = vld [vmem:[%s7764_s7 + $0x418] sm:$0xff]  ;;  %297 = vst [vmem:[%s7769_s8 + $0x210] sm:$0xff] %v296_v63  ;;  %v302_v2 = vld [vmem:[%s7764_s7 + $0x420] sm:$0xff] }
  0x39   : > { %299 = vst [vmem:[%s7769_s8 + $0x218] sm:$0xff] %v298_v0  ;;  %301 = vst [vmem:[%s7769_s8 + $0x220] sm:$0xff] %v300_v1  ;;  %v304_v3 = vld [vmem:[%s7764_s7 + $0x428] sm:$0xff]  ;;  %v306_v4 = vld [vmem:[%s7764_s7 + $0x430] sm:$0xff] }
  0x3a   : > { %303 = vst [vmem:[%s7769_s8 + $0x228] sm:$0xff] %v302_v2  ;;  %305 = vst [vmem:[%s7769_s8 + $0x230] sm:$0xff] %v304_v3  ;;  %v308_v5 = vld [vmem:[%s7764_s7 + $0x438] sm:$0xff]  ;;  %v312_v7 = vld [vmem:[%s7764_s7 + $0x4a0] sm:$0xff] }
  0x3b   : > { %307 = vst [vmem:[%s7769_s8 + $0x238] sm:$0xff] %v306_v4  ;;  %v310_v6 = vld [vmem:[%s7764_s7 + $0x498] sm:$0xff]  ;;  %309 = vst [vmem:[%s7769_s8 + $0x240] sm:$0xff] %v308_v5  ;;  %v314_v8 = vld [vmem:[%s7764_s7 + $0x4a8] sm:$0xff] }
  0x3c   : > { %311 = vst [vmem:[%s7769_s8 + $0x24c] sm:$0xff] %v310_v6  ;;  %313 = vst [vmem:[%s7769_s8 + $0x254] sm:$0xff] %v312_v7  ;;  %v316_v9 = vld [vmem:[%s7764_s7 + $0x4b0] sm:$0xff]  ;;  %v318_v10 = vld [vmem:[%s7764_s7 + $0x4b8] sm:$0xff] }
  0x3d   : > { %315 = vst [vmem:[%s7769_s8 + $0x25c] sm:$0xff] %v314_v8  ;;  %317 = vst [vmem:[%s7769_s8 + $0x264] sm:$0xff] %v316_v9  ;;  %v320_v11 = vld [vmem:[%s7764_s7 + $0x4c0] sm:$0xff]  ;;  %v322_v12 = vld [vmem:[%s7764_s7 + $0x4c8] sm:$0xff] }
  0x3e   : > { %319 = vst [vmem:[%s7769_s8 + $0x26c] sm:$0xff] %v318_v10  ;;  %v324_v13 = vld [vmem:[%s7764_s7 + $0x4d0] sm:$0xff]  ;;  %321 = vst [vmem:[%s7769_s8 + $0x274] sm:$0xff] %v320_v11  ;;  %v326_v14 = vld [vmem:[%s7764_s7 + $0x4d8] sm:$0xff] }
  0x3f   : > { %323 = vst [vmem:[%s7769_s8 + $0x27c] sm:$0xff] %v322_v12  ;;  %325 = vst [vmem:[%s7769_s8 + $0x284] sm:$0xff] %v324_v13  ;;  %v328_v15 = vld [vmem:[%s7764_s7 + $0x4e0] sm:$0xff]  ;;  %v332_v17 = vld [vmem:[%s7764_s7 + $0x548] sm:$0xff] }
  0x40   : > { %v330_v16 = vld [vmem:[%s7764_s7 + $0x540] sm:$0xff]  ;;  %327 = vst [vmem:[%s7769_s8 + $0x28c] sm:$0xff] %v326_v14  ;;  %329 = vst [vmem:[%s7769_s8 + $0x294] sm:$0xff] %v328_v15  ;;  %v334_v18 = vld [vmem:[%s7764_s7 + $0x550] sm:$0xff] }
  0x41   : > { %331 = vst [vmem:[%s7769_s8 + $0x2a0] sm:$0xff] %v330_v16  ;;  %v336_v19 = vld [vmem:[%s7764_s7 + $0x558] sm:$0xff]  ;;  %333 = vst [vmem:[%s7769_s8 + $0x2a8] sm:$0xff] %v332_v17  ;;  %v338_v20 = vld [vmem:[%s7764_s7 + $0x560] sm:$0xff] }
  0x42   : > { %335 = vst [vmem:[%s7769_s8 + $0x2b0] sm:$0xff] %v334_v18  ;;  %337 = vst [vmem:[%s7769_s8 + $0x2b8] sm:$0xff] %v336_v19  ;;  %v340_v21 = vld [vmem:[%s7764_s7 + $0x568] sm:$0xff]  ;;  %v342_v22 = vld [vmem:[%s7764_s7 + $0x570] sm:$0xff] }
  0x43   : > { %339 = vst [vmem:[%s7769_s8 + $0x2c0] sm:$0xff] %v338_v20  ;;  %341 = vst [vmem:[%s7769_s8 + $0x2c8] sm:$0xff] %v340_v21  ;;  %v344_v23 = vld [vmem:[%s7764_s7 + $0x578] sm:$0xff]  ;;  %v346_v24 = vld [vmem:[%s7764_s7 + $0x580] sm:$0xff] }
  0x44   : > { %343 = vst [vmem:[%s7769_s8 + $0x2d0] sm:$0xff] %v342_v22  ;;  %v348_v25 = vld [vmem:[%s7764_s7 + $0x588] sm:$0xff]  ;;  %345 = vst [vmem:[%s7769_s8 + $0x2d8] sm:$0xff] %v344_v23  ;;  %v352_v27 = vld [vmem:[%s7764_s7 + $0x5f0] sm:$0xff] }
  0x45   : > { %347 = vst [vmem:[%s7769_s8 + $0x2e0] sm:$0xff] %v346_v24  ;;  %349 = vst [vmem:[%s7769_s8 + $0x2e8] sm:$0xff] %v348_v25  ;;  %v350_v26 = vld [vmem:[%s7764_s7 + $0x5e8] sm:$0xff]  ;;  %v354_v28 = vld [vmem:[%s7764_s7 + $0x5f8] sm:$0xff] }
  0x46   : > { %351 = vst [vmem:[%s7769_s8 + $0x2f4] sm:$0xff] %v350_v26  ;;  %353 = vst [vmem:[%s7769_s8 + $0x2fc] sm:$0xff] %v352_v27  ;;  %v356_v29 = vld [vmem:[%s7764_s7 + $0x600] sm:$0xff]  ;;  %v358_v30 = vld [vmem:[%s7764_s7 + $0x608] sm:$0xff] }
  0x47   : > { %355 = vst [vmem:[%s7769_s8 + $0x304] sm:$0xff] %v354_v28  ;;  %v360_v31 = vld [vmem:[%s7764_s7 + $0x610] sm:$0xff]  ;;  %357 = vst [vmem:[%s7769_s8 + $0x30c] sm:$0xff] %v356_v29  ;;  %v362_v32 = vld [vmem:[%s7764_s7 + $0x618] sm:$0xff] }
  0x48   : > { %359 = vst [vmem:[%s7769_s8 + $0x314] sm:$0xff] %v358_v30  ;;  %361 = vst [vmem:[%s7769_s8 + $0x31c] sm:$0xff] %v360_v31  ;;  %v364_v33 = vld [vmem:[%s7764_s7 + $0x620] sm:$0xff]  ;;  %v366_v34 = vld [vmem:[%s7764_s7 + $0x628] sm:$0xff] }
  0x49   : > { %363 = vst [vmem:[%s7769_s8 + $0x324] sm:$0xff] %v362_v32  ;;  %365 = vst [vmem:[%s7769_s8 + $0x32c] sm:$0xff] %v364_v33  ;;  %v368_v35 = vld [vmem:[%s7764_s7 + $0x630] sm:$0xff]  ;;  %v370_v36 = vld [vmem:[%s7764_s7 + $0xd20] sm:$0xff] }
  0x4a   : > { %367 = vst [vmem:[%s7769_s8 + $0x334] sm:$0xff] %v366_v34  ;;  %v372_v37 = vld [vmem:[%s7764_s7 + $0xd28] sm:$0xff]  ;;  %369 = vst [vmem:[%s7769_s8 + $0x33c] sm:$0xff] %v368_v35  ;;  %v374_v38 = vld [vmem:[%s7764_s7 + $0xd30] sm:$0xff] }
  0x4b   : > { %371 = vst [vmem:[%s7769_s8 + $0x348] sm:$0xff] %v370_v36  ;;  %373 = vst [vmem:[%s7769_s8 + $0x350] sm:$0xff] %v372_v37  ;;  %v376_v39 = vld [vmem:[%s7764_s7 + $0xd38] sm:$0xff]  ;;  %v378_v40 = vld [vmem:[%s7764_s7 + $0xd40] sm:$0xff] }
  0x4c   : > { %375 = vst [vmem:[%s7769_s8 + $0x358] sm:$0xff] %v374_v38  ;;  %377 = vst [vmem:[%s7769_s8 + $0x360] sm:$0xff] %v376_v39  ;;  %v380_v41 = vld [vmem:[%s7764_s7 + $0xd48] sm:$0xff]  ;;  %v382_v42 = vld [vmem:[%s7764_s7 + $0xd50] sm:$0xff] }
  0x4d   : > { %379 = vst [vmem:[%s7769_s8 + $0x368] sm:$0xff] %v378_v40  ;;  %v384_v43 = vld [vmem:[%s7764_s7 + $0xd58] sm:$0xff]  ;;  %381 = vst [vmem:[%s7769_s8 + $0x370] sm:$0xff] %v380_v41  ;;  %v386_v44 = vld [vmem:[%s7764_s7 + $0xd60] sm:$0xff] }
  0x4e   : > { %383 = vst [vmem:[%s7769_s8 + $0x378] sm:$0xff] %v382_v42  ;;  %385 = vst [vmem:[%s7769_s8 + $0x380] sm:$0xff] %v384_v43  ;;  %v388_v45 = vld [vmem:[%s7764_s7 + $0xd68] sm:$0xff]  ;;  %v392_v47 = vld [vmem:[%s7764_s7 + $0xdd0] sm:$0xff] }
  0x4f   : > { %v390_v46 = vld [vmem:[%s7764_s7 + $0xdc8] sm:$0xff]  ;;  %387 = vst [vmem:[%s7769_s8 + $0x388] sm:$0xff] %v386_v44  ;;  %389 = vst [vmem:[%s7769_s8 + $0x390] sm:$0xff] %v388_v45  ;;  %v394_v48 = vld [vmem:[%s7764_s7 + $0xdd8] sm:$0xff] }
  0x50   : > { %391 = vst [vmem:[%s7769_s8 + $0x39c] sm:$0xff] %v390_v46  ;;  %v396_v49 = vld [vmem:[%s7764_s7 + $0xde0] sm:$0xff]  ;;  %393 = vst [vmem:[%s7769_s8 + $0x3a4] sm:$0xff] %v392_v47  ;;  %v398_v50 = vld [vmem:[%s7764_s7 + $0xde8] sm:$0xff] }
  0x51   : > { %395 = vst [vmem:[%s7769_s8 + $0x3ac] sm:$0xff] %v394_v48  ;;  %397 = vst [vmem:[%s7769_s8 + $0x3b4] sm:$0xff] %v396_v49  ;;  %v400_v51 = vld [vmem:[%s7764_s7 + $0xdf0] sm:$0xff]  ;;  %v402_v52 = vld [vmem:[%s7764_s7 + $0xdf8] sm:$0xff] }
  0x52   : > { %399 = vst [vmem:[%s7769_s8 + $0x3bc] sm:$0xff] %v398_v50  ;;  %401 = vst [vmem:[%s7769_s8 + $0x3c4] sm:$0xff] %v400_v51  ;;  %v404_v53 = vld [vmem:[%s7764_s7 + $0xe00] sm:$0xff]  ;;  %v406_v54 = vld [vmem:[%s7764_s7 + $0xe08] sm:$0xff] }
  0x53   : > { %403 = vst [vmem:[%s7769_s8 + $0x3cc] sm:$0xff] %v402_v52  ;;  %v408_v55 = vld [vmem:[%s7764_s7 + $0xe10] sm:$0xff]  ;;  %405 = vst [vmem:[%s7769_s8 + $0x3d4] sm:$0xff] %v404_v53  ;;  %v412_v57 = vld [vmem:[%s7764_s7 + $0xe78] sm:$0xff] }
  0x54   : > { %407 = vst [vmem:[%s7769_s8 + $0x3dc] sm:$0xff] %v406_v54  ;;  %409 = vst [vmem:[%s7769_s8 + $0x3e4] sm:$0xff] %v408_v55  ;;  %v410_v56 = vld [vmem:[%s7764_s7 + $0xe70] sm:$0xff]  ;;  %v414_v58 = vld [vmem:[%s7764_s7 + $0xe80] sm:$0xff] }
  0x55   : > { %411 = vst [vmem:[%s7769_s8 + $0x3f0] sm:$0xff] %v410_v56  ;;  %413 = vst [vmem:[%s7769_s8 + $0x3f8] sm:$0xff] %v412_v57  ;;  %v416_v59 = vld [vmem:[%s7764_s7 + $0xe88] sm:$0xff]  ;;  %v418_v60 = vld [vmem:[%s7764_s7 + $0xe90] sm:$0xff] }
  0x56   : > { %415 = vst [vmem:[%s7769_s8 + $0x400] sm:$0xff] %v414_v58  ;;  %v420_v61 = vld [vmem:[%s7764_s7 + $0xe98] sm:$0xff]  ;;  %417 = vst [vmem:[%s7769_s8 + $0x408] sm:$0xff] %v416_v59  ;;  %v422_v62 = vld [vmem:[%s7764_s7 + $0xea0] sm:$0xff] }
  0x57   : > { %419 = vst [vmem:[%s7769_s8 + $0x410] sm:$0xff] %v418_v60  ;;  %421 = vst [vmem:[%s7769_s8 + $0x418] sm:$0xff] %v420_v61  ;;  %v424_v63 = vld [vmem:[%s7764_s7 + $0xea8] sm:$0xff]  ;;  %v426_v0 = vld [vmem:[%s7764_s7 + $0xeb0] sm:$0xff] }
  0x58   : > { %423 = vst [vmem:[%s7769_s8 + $0x420] sm:$0xff] %v422_v62  ;;  %425 = vst [vmem:[%s7769_s8 + $0x428] sm:$0xff] %v424_v63  ;;  %v428_v1 = vld [vmem:[%s7764_s7 + $0xeb8] sm:$0xff]  ;;  %v432_v3 = vld [vmem:[%s7764_s7 + $0xf20] sm:$0xff] }
  0x59   : > { %427 = vst [vmem:[%s7769_s8 + $0x430] sm:$0xff] %v426_v0  ;;  %v430_v2 = vld [vmem:[%s7764_s7 + $0xf18] sm:$0xff]  ;;  %429 = vst [vmem:[%s7769_s8 + $0x438] sm:$0xff] %v428_v1  ;;  %v434_v4 = vld [vmem:[%s7764_s7 + $0xf28] sm:$0xff] }
  0x5a   : > { %431 = vst [vmem:[%s7769_s8 + $0x444] sm:$0xff] %v430_v2  ;;  %433 = vst [vmem:[%s7769_s8 + $0x44c] sm:$0xff] %v432_v3  ;;  %v436_v5 = vld [vmem:[%s7764_s7 + $0xf30] sm:$0xff]  ;;  %v438_v6 = vld [vmem:[%s7764_s7 + $0xf38] sm:$0xff] }
  0x5b   : > { %435 = vst [vmem:[%s7769_s8 + $0x454] sm:$0xff] %v434_v4  ;;  %437 = vst [vmem:[%s7769_s8 + $0x45c] sm:$0xff] %v436_v5  ;;  %v440_v7 = vld [vmem:[%s7764_s7 + $0xf40] sm:$0xff]  ;;  %v442_v8 = vld [vmem:[%s7764_s7 + $0xf48] sm:$0xff] }
  0x5c   : > { %439 = vst [vmem:[%s7769_s8 + $0x464] sm:$0xff] %v438_v6  ;;  %v444_v9 = vld [vmem:[%s7764_s7 + $0xf50] sm:$0xff]  ;;  %441 = vst [vmem:[%s7769_s8 + $0x46c] sm:$0xff] %v440_v7  ;;  %v446_v10 = vld [vmem:[%s7764_s7 + $0xf58] sm:$0xff] }
  0x5d   : > { %443 = vst [vmem:[%s7769_s8 + $0x474] sm:$0xff] %v442_v8  ;;  %445 = vst [vmem:[%s7769_s8 + $0x47c] sm:$0xff] %v444_v9  ;;  %v448_v11 = vld [vmem:[%s7764_s7 + $0xf60] sm:$0xff]  ;;  %v452_v13 = vld [vmem:[%s7764_s7 + $0xfc8] sm:$0xff] }
  0x5e   : > { %v450_v12 = vld [vmem:[%s7764_s7 + $0xfc0] sm:$0xff]  ;;  %447 = vst [vmem:[%s7769_s8 + $0x484] sm:$0xff] %v446_v10  ;;  %449 = vst [vmem:[%s7769_s8 + $0x48c] sm:$0xff] %v448_v11  ;;  %v454_v14 = vld [vmem:[%s7764_s7 + $0xfd0] sm:$0xff] }
  0x5f   : > { %451 = vst [vmem:[%s7769_s8 + $0x498] sm:$0xff] %v450_v12  ;;  %v456_v15 = vld [vmem:[%s7764_s7 + $0xfd8] sm:$0xff]  ;;  %453 = vst [vmem:[%s7769_s8 + $0x4a0] sm:$0xff] %v452_v13  ;;  %v458_v16 = vld [vmem:[%s7764_s7 + $0xfe0] sm:$0xff] }
  0x60   : > { %455 = vst [vmem:[%s7769_s8 + $0x4a8] sm:$0xff] %v454_v14  ;;  %457 = vst [vmem:[%s7769_s8 + $0x4b0] sm:$0xff] %v456_v15  ;;  %v460_v17 = vld [vmem:[%s7764_s7 + $0xfe8] sm:$0xff]  ;;  %v462_v18 = vld [vmem:[%s7764_s7 + $0xff0] sm:$0xff] }
  0x61   : > { %459 = vst [vmem:[%s7769_s8 + $0x4b8] sm:$0xff] %v458_v16  ;;  %461 = vst [vmem:[%s7769_s8 + $0x4c0] sm:$0xff] %v460_v17  ;;  %v464_v19 = vld [vmem:[%s7764_s7 + $0xff8] sm:$0xff]  ;;  %v466_v20 = vld [vmem:[%s7764_s7 + $0x1000] sm:$0xff] }
  0x62   : > { %463 = vst [vmem:[%s7769_s8 + $0x4c8] sm:$0xff] %v462_v18  ;;  %v468_v21 = vld [vmem:[%s7764_s7 + $0x1008] sm:$0xff]  ;;  %465 = vst [vmem:[%s7769_s8 + $0x4d0] sm:$0xff] %v464_v19  ;;  %v472_v23 = vld [vmem:[%s7764_s7 + $0x1070] sm:$0xff] }
  0x63   : > { %467 = vst [vmem:[%s7769_s8 + $0x4d8] sm:$0xff] %v466_v20  ;;  %469 = vst [vmem:[%s7769_s8 + $0x4e0] sm:$0xff] %v468_v21  ;;  %v470_v22 = vld [vmem:[%s7764_s7 + $0x1068] sm:$0xff]  ;;  %v474_v24 = vld [vmem:[%s7764_s7 + $0x1078] sm:$0xff] }
  0x64   : > { %471 = vst [vmem:[%s7769_s8 + $0x4ec] sm:$0xff] %v470_v22  ;;  %473 = vst [vmem:[%s7769_s8 + $0x4f4] sm:$0xff] %v472_v23  ;;  %v476_v25 = vld [vmem:[%s7764_s7 + $0x1080] sm:$0xff]  ;;  %v478_v26 = vld [vmem:[%s7764_s7 + $0x1088] sm:$0xff] }
  0x65   : > { %475 = vst [vmem:[%s7769_s8 + $0x4fc] sm:$0xff] %v474_v24  ;;  %v480_v27 = vld [vmem:[%s7764_s7 + $0x1090] sm:$0xff]  ;;  %477 = vst [vmem:[%s7769_s8 + $0x504] sm:$0xff] %v476_v25  ;;  %v482_v28 = vld [vmem:[%s7764_s7 + $0x1098] sm:$0xff] }
  0x66   : > { %479 = vst [vmem:[%s7769_s8 + $0x50c] sm:$0xff] %v478_v26  ;;  %481 = vst [vmem:[%s7769_s8 + $0x514] sm:$0xff] %v480_v27  ;;  %v484_v29 = vld [vmem:[%s7764_s7 + $0x10a0] sm:$0xff]  ;;  %v486_v30 = vld [vmem:[%s7764_s7 + $0x10a8] sm:$0xff] }
  0x67   : > { %483 = vst [vmem:[%s7769_s8 + $0x51c] sm:$0xff] %v482_v28  ;;  %485 = vst [vmem:[%s7769_s8 + $0x524] sm:$0xff] %v484_v29  ;;  %v488_v31 = vld [vmem:[%s7764_s7 + $0x10b0] sm:$0xff]  ;;  %v492_v33 = vld [vmem:[%s7764_s7 + $0x1118] sm:$0xff] }
  0x68   : > { %487 = vst [vmem:[%s7769_s8 + $0x52c] sm:$0xff] %v486_v30  ;;  %v490_v32 = vld [vmem:[%s7764_s7 + $0x1110] sm:$0xff]  ;;  %489 = vst [vmem:[%s7769_s8 + $0x534] sm:$0xff] %v488_v31  ;;  %v494_v34 = vld [vmem:[%s7764_s7 + $0x1120] sm:$0xff] }
  0x69   : > { %491 = vst [vmem:[%s7769_s8 + $0x540] sm:$0xff] %v490_v32  ;;  %493 = vst [vmem:[%s7769_s8 + $0x548] sm:$0xff] %v492_v33  ;;  %v496_v35 = vld [vmem:[%s7764_s7 + $0x1128] sm:$0xff]  ;;  %v498_v36 = vld [vmem:[%s7764_s7 + $0x1130] sm:$0xff] }
  0x6a   : > { %495 = vst [vmem:[%s7769_s8 + $0x550] sm:$0xff] %v494_v34  ;;  %497 = vst [vmem:[%s7769_s8 + $0x558] sm:$0xff] %v496_v35  ;;  %v500_v37 = vld [vmem:[%s7764_s7 + $0x1138] sm:$0xff]  ;;  %v502_v38 = vld [vmem:[%s7764_s7 + $0x1140] sm:$0xff] }
  0x6b   : > { %499 = vst [vmem:[%s7769_s8 + $0x560] sm:$0xff] %v498_v36  ;;  %v504_v39 = vld [vmem:[%s7764_s7 + $0x1148] sm:$0xff]  ;;  %501 = vst [vmem:[%s7769_s8 + $0x568] sm:$0xff] %v500_v37  ;;  %v506_v40 = vld [vmem:[%s7764_s7 + $0x1150] sm:$0xff] }
  0x6c   : > { %503 = vst [vmem:[%s7769_s8 + $0x570] sm:$0xff] %v502_v38  ;;  %505 = vst [vmem:[%s7769_s8 + $0x578] sm:$0xff] %v504_v39  ;;  %v508_v41 = vld [vmem:[%s7764_s7 + $0x1158] sm:$0xff]  ;;  %v512_v43 = vld [vmem:[%s7764_s7 + $0x11c0] sm:$0xff] }
  0x6d   : > { %v510_v42 = vld [vmem:[%s7764_s7 + $0x11b8] sm:$0xff]  ;;  %507 = vst [vmem:[%s7769_s8 + $0x580] sm:$0xff] %v506_v40  ;;  %509 = vst [vmem:[%s7769_s8 + $0x588] sm:$0xff] %v508_v41  ;;  %v514_v44 = vld [vmem:[%s7764_s7 + $0x11c8] sm:$0xff] }
  0x6e   : > { %511 = vst [vmem:[%s7769_s8 + $0x594] sm:$0xff] %v510_v42  ;;  %v516_v45 = vld [vmem:[%s7764_s7 + $0x11d0] sm:$0xff]  ;;  %513 = vst [vmem:[%s7769_s8 + $0x59c] sm:$0xff] %v512_v43  ;;  %v518_v46 = vld [vmem:[%s7764_s7 + $0x11d8] sm:$0xff] }
  0x6f   : > { %515 = vst [vmem:[%s7769_s8 + $0x5a4] sm:$0xff] %v514_v44  ;;  %517 = vst [vmem:[%s7769_s8 + $0x5ac] sm:$0xff] %v516_v45  ;;  %v520_v47 = vld [vmem:[%s7764_s7 + $0x11e0] sm:$0xff]  ;;  %v522_v48 = vld [vmem:[%s7764_s7 + $0x11e8] sm:$0xff] }
  0x70   : > { %519 = vst [vmem:[%s7769_s8 + $0x5b4] sm:$0xff] %v518_v46  ;;  %521 = vst [vmem:[%s7769_s8 + $0x5bc] sm:$0xff] %v520_v47  ;;  %v524_v49 = vld [vmem:[%s7764_s7 + $0x11f0] sm:$0xff]  ;;  %v526_v50 = vld [vmem:[%s7764_s7 + $0x11f8] sm:$0xff] }
  0x71   : > { %523 = vst [vmem:[%s7769_s8 + $0x5c4] sm:$0xff] %v522_v48  ;;  %v528_v51 = vld [vmem:[%s7764_s7 + $0x1200] sm:$0xff]  ;;  %525 = vst [vmem:[%s7769_s8 + $0x5cc] sm:$0xff] %v524_v49  ;;  %v532_v53 = vld [vmem:[%s7764_s7 + $0x1268] sm:$0xff] }
  0x72   : > { %527 = vst [vmem:[%s7769_s8 + $0x5d4] sm:$0xff] %v526_v50  ;;  %529 = vst [vmem:[%s7769_s8 + $0x5dc] sm:$0xff] %v528_v51  ;;  %v530_v52 = vld [vmem:[%s7764_s7 + $0x1260] sm:$0xff]  ;;  %v534_v54 = vld [vmem:[%s7764_s7 + $0x1270] sm:$0xff] }
  0x73   : > { %531 = vst [vmem:[%s7769_s8 + $0x5e8] sm:$0xff] %v530_v52  ;;  %533 = vst [vmem:[%s7769_s8 + $0x5f0] sm:$0xff] %v532_v53  ;;  %v536_v55 = vld [vmem:[%s7764_s7 + $0x1278] sm:$0xff]  ;;  %v538_v56 = vld [vmem:[%s7764_s7 + $0x1280] sm:$0xff] }
  0x74   : > { %535 = vst [vmem:[%s7769_s8 + $0x5f8] sm:$0xff] %v534_v54  ;;  %v540_v57 = vld [vmem:[%s7764_s7 + $0x1288] sm:$0xff]  ;;  %537 = vst [vmem:[%s7769_s8 + $0x600] sm:$0xff] %v536_v55  ;;  %v542_v58 = vld [vmem:[%s7764_s7 + $0x1290] sm:$0xff] }
  0x75   : > { %539 = vst [vmem:[%s7769_s8 + $0x608] sm:$0xff] %v538_v56  ;;  %541 = vst [vmem:[%s7769_s8 + $0x610] sm:$0xff] %v540_v57  ;;  %v544_v59 = vld [vmem:[%s7764_s7 + $0x1298] sm:$0xff]  ;;  %v546_v60 = vld [vmem:[%s7764_s7 + $0x12a0] sm:$0xff] }
  0x76   : > { %543 = vst [vmem:[%s7769_s8 + $0x618] sm:$0xff] %v542_v58  ;;  %545 = vst [vmem:[%s7769_s8 + $0x620] sm:$0xff] %v544_v59  ;;  %v548_v61 = vld [vmem:[%s7764_s7 + $0x12a8] sm:$0xff]  ;;  %v552_v63 = vld [vmem:[%s7764_s7 + $0x1310] sm:$0xff] }
  0x77   : > { %547 = vst [vmem:[%s7769_s8 + $0x628] sm:$0xff] %v546_v60  ;;  %v550_v62 = vld [vmem:[%s7764_s7 + $0x1308] sm:$0xff]  ;;  %549 = vst [vmem:[%s7769_s8 + $0x630] sm:$0xff] %v548_v61  ;;  %v554_v0 = vld [vmem:[%s7764_s7 + $0x1318] sm:$0xff] }
  0x78   : > { %551 = vst [vmem:[%s7769_s8 + $0x63c] sm:$0xff] %v550_v62  ;;  %553 = vst [vmem:[%s7769_s8 + $0x644] sm:$0xff] %v552_v63  ;;  %v556_v1 = vld [vmem:[%s7764_s7 + $0x1320] sm:$0xff]  ;;  %v558_v2 = vld [vmem:[%s7764_s7 + $0x1328] sm:$0xff] }
  0x79   : > { %555 = vst [vmem:[%s7769_s8 + $0x64c] sm:$0xff] %v554_v0  ;;  %557 = vst [vmem:[%s7769_s8 + $0x654] sm:$0xff] %v556_v1  ;;  %v560_v3 = vld [vmem:[%s7764_s7 + $0x1330] sm:$0xff]  ;;  %v562_v4 = vld [vmem:[%s7764_s7 + $0x1338] sm:$0xff] }
  0x7a   : > { %559 = vst [vmem:[%s7769_s8 + $0x65c] sm:$0xff] %v558_v2  ;;  %v564_v5 = vld [vmem:[%s7764_s7 + $0x1340] sm:$0xff]  ;;  %561 = vst [vmem:[%s7769_s8 + $0x664] sm:$0xff] %v560_v3  ;;  %v566_v6 = vld [vmem:[%s7764_s7 + $0x1348] sm:$0xff] }
  0x7b   : > { %563 = vst [vmem:[%s7769_s8 + $0x66c] sm:$0xff] %v562_v4  ;;  %565 = vst [vmem:[%s7769_s8 + $0x674] sm:$0xff] %v564_v5  ;;  %v568_v7 = vld [vmem:[%s7764_s7 + $0x1350] sm:$0xff]  ;;  %v570_v8 = vld [vmem:[%s7764_s7 + $0x1a40] sm:$0xff] }
  0x7c   : > { %567 = vst [vmem:[%s7769_s8 + $0x67c] sm:$0xff] %v566_v6  ;;  %569 = vst [vmem:[%s7769_s8 + $0x684] sm:$0xff] %v568_v7  ;;  %v572_v9 = vld [vmem:[%s7764_s7 + $0x1a48] sm:$0xff]  ;;  %v574_v10 = vld [vmem:[%s7764_s7 + $0x1a50] sm:$0xff] }
  0x7d   : > { %571 = vst [vmem:[%s7769_s8 + $0x690] sm:$0xff] %v570_v8  ;;  %v576_v11 = vld [vmem:[%s7764_s7 + $0x1a58] sm:$0xff]  ;;  %573 = vst [vmem:[%s7769_s8 + $0x698] sm:$0xff] %v572_v9  ;;  %v578_v12 = vld [vmem:[%s7764_s7 + $0x1a60] sm:$0xff] }
  0x7e   : > { %575 = vst [vmem:[%s7769_s8 + $0x6a0] sm:$0xff] %v574_v10  ;;  %577 = vst [vmem:[%s7769_s8 + $0x6a8] sm:$0xff] %v576_v11  ;;  %v580_v13 = vld [vmem:[%s7764_s7 + $0x1a68] sm:$0xff]  ;;  %v582_v14 = vld [vmem:[%s7764_s7 + $0x1a70] sm:$0xff] }
  0x7f   : > { %579 = vst [vmem:[%s7769_s8 + $0x6b0] sm:$0xff] %v578_v12  ;;  %581 = vst [vmem:[%s7769_s8 + $0x6b8] sm:$0xff] %v580_v13  ;;  %v584_v15 = vld [vmem:[%s7764_s7 + $0x1a78] sm:$0xff]  ;;  %v586_v16 = vld [vmem:[%s7764_s7 + $0x1a80] sm:$0xff] }
  0x80   : > { %583 = vst [vmem:[%s7769_s8 + $0x6c0] sm:$0xff] %v582_v14  ;;  %v588_v17 = vld [vmem:[%s7764_s7 + $0x1a88] sm:$0xff]  ;;  %585 = vst [vmem:[%s7769_s8 + $0x6c8] sm:$0xff] %v584_v15  ;;  %v592_v19 = vld [vmem:[%s7764_s7 + $0x1af0] sm:$0xff] }
  0x81   : > { %587 = vst [vmem:[%s7769_s8 + $0x6d0] sm:$0xff] %v586_v16  ;;  %589 = vst [vmem:[%s7769_s8 + $0x6d8] sm:$0xff] %v588_v17  ;;  %v590_v18 = vld [vmem:[%s7764_s7 + $0x1ae8] sm:$0xff]  ;;  %v594_v20 = vld [vmem:[%s7764_s7 + $0x1af8] sm:$0xff] }
  0x82   : > { %591 = vst [vmem:[%s7769_s8 + $0x6e4] sm:$0xff] %v590_v18  ;;  %593 = vst [vmem:[%s7769_s8 + $0x6ec] sm:$0xff] %v592_v19  ;;  %v596_v21 = vld [vmem:[%s7764_s7 + $0x1b00] sm:$0xff]  ;;  %v598_v22 = vld [vmem:[%s7764_s7 + $0x1b08] sm:$0xff] }
  0x83   : > { %595 = vst [vmem:[%s7769_s8 + $0x6f4] sm:$0xff] %v594_v20  ;;  %v600_v23 = vld [vmem:[%s7764_s7 + $0x1b10] sm:$0xff]  ;;  %597 = vst [vmem:[%s7769_s8 + $0x6fc] sm:$0xff] %v596_v21  ;;  %v602_v24 = vld [vmem:[%s7764_s7 + $0x1b18] sm:$0xff] }
  0x84   : > { %599 = vst [vmem:[%s7769_s8 + $0x704] sm:$0xff] %v598_v22  ;;  %601 = vst [vmem:[%s7769_s8 + $0x70c] sm:$0xff] %v600_v23  ;;  %v604_v25 = vld [vmem:[%s7764_s7 + $0x1b20] sm:$0xff]  ;;  %v606_v26 = vld [vmem:[%s7764_s7 + $0x1b28] sm:$0xff] }
  0x85   : > { %603 = vst [vmem:[%s7769_s8 + $0x714] sm:$0xff] %v602_v24  ;;  %605 = vst [vmem:[%s7769_s8 + $0x71c] sm:$0xff] %v604_v25  ;;  %v608_v27 = vld [vmem:[%s7764_s7 + $0x1b30] sm:$0xff]  ;;  %v612_v29 = vld [vmem:[%s7764_s7 + $0x1b98] sm:$0xff] }
  0x86   : > { %607 = vst [vmem:[%s7769_s8 + $0x724] sm:$0xff] %v606_v26  ;;  %v610_v28 = vld [vmem:[%s7764_s7 + $0x1b90] sm:$0xff]  ;;  %609 = vst [vmem:[%s7769_s8 + $0x72c] sm:$0xff] %v608_v27  ;;  %v614_v30 = vld [vmem:[%s7764_s7 + $0x1ba0] sm:$0xff] }
  0x87   : > { %611 = vst [vmem:[%s7769_s8 + $0x738] sm:$0xff] %v610_v28  ;;  %613 = vst [vmem:[%s7769_s8 + $0x740] sm:$0xff] %v612_v29  ;;  %v616_v31 = vld [vmem:[%s7764_s7 + $0x1ba8] sm:$0xff]  ;;  %v618_v32 = vld [vmem:[%s7764_s7 + $0x1bb0] sm:$0xff] }
  0x88   : > { %615 = vst [vmem:[%s7769_s8 + $0x748] sm:$0xff] %v614_v30  ;;  %617 = vst [vmem:[%s7769_s8 + $0x750] sm:$0xff] %v616_v31  ;;  %v620_v33 = vld [vmem:[%s7764_s7 + $0x1bb8] sm:$0xff]  ;;  %v622_v34 = vld [vmem:[%s7764_s7 + $0x1bc0] sm:$0xff] }
  0x89   : > { %619 = vst [vmem:[%s7769_s8 + $0x758] sm:$0xff] %v618_v32  ;;  %v624_v35 = vld [vmem:[%s7764_s7 + $0x1bc8] sm:$0xff]  ;;  %621 = vst [vmem:[%s7769_s8 + $0x760] sm:$0xff] %v620_v33  ;;  %v626_v36 = vld [vmem:[%s7764_s7 + $0x1bd0] sm:$0xff] }
  0x8a   : > { %623 = vst [vmem:[%s7769_s8 + $0x768] sm:$0xff] %v622_v34  ;;  %625 = vst [vmem:[%s7769_s8 + $0x770] sm:$0xff] %v624_v35  ;;  %v628_v37 = vld [vmem:[%s7764_s7 + $0x1bd8] sm:$0xff]  ;;  %v632_v39 = vld [vmem:[%s7764_s7 + $0x1c40] sm:$0xff] }
  0x8b   : > { %v630_v38 = vld [vmem:[%s7764_s7 + $0x1c38] sm:$0xff]  ;;  %627 = vst [vmem:[%s7769_s8 + $0x778] sm:$0xff] %v626_v36  ;;  %629 = vst [vmem:[%s7769_s8 + $0x780] sm:$0xff] %v628_v37  ;;  %v634_v40 = vld [vmem:[%s7764_s7 + $0x1c48] sm:$0xff] }
  0x8c   : > { %631 = vst [vmem:[%s7769_s8 + $0x78c] sm:$0xff] %v630_v38  ;;  %v636_v41 = vld [vmem:[%s7764_s7 + $0x1c50] sm:$0xff]  ;;  %633 = vst [vmem:[%s7769_s8 + $0x794] sm:$0xff] %v632_v39  ;;  %v638_v42 = vld [vmem:[%s7764_s7 + $0x1c58] sm:$0xff] }
  0x8d   : > { %635 = vst [vmem:[%s7769_s8 + $0x79c] sm:$0xff] %v634_v40  ;;  %637 = vst [vmem:[%s7769_s8 + $0x7a4] sm:$0xff] %v636_v41  ;;  %v640_v43 = vld [vmem:[%s7764_s7 + $0x1c60] sm:$0xff]  ;;  %v642_v44 = vld [vmem:[%s7764_s7 + $0x1c68] sm:$0xff] }
  0x8e   : > { %639 = vst [vmem:[%s7769_s8 + $0x7ac] sm:$0xff] %v638_v42  ;;  %641 = vst [vmem:[%s7769_s8 + $0x7b4] sm:$0xff] %v640_v43  ;;  %v644_v45 = vld [vmem:[%s7764_s7 + $0x1c70] sm:$0xff]  ;;  %v646_v46 = vld [vmem:[%s7764_s7 + $0x1c78] sm:$0xff] }
  0x8f   : > { %643 = vst [vmem:[%s7769_s8 + $0x7bc] sm:$0xff] %v642_v44  ;;  %v648_v47 = vld [vmem:[%s7764_s7 + $0x1c80] sm:$0xff]  ;;  %645 = vst [vmem:[%s7769_s8 + $0x7c4] sm:$0xff] %v644_v45  ;;  %v652_v49 = vld [vmem:[%s7764_s7 + $0x1ce8] sm:$0xff] }
  0x90   : > { %647 = vst [vmem:[%s7769_s8 + $0x7cc] sm:$0xff] %v646_v46  ;;  %649 = vst [vmem:[%s7769_s8 + $0x7d4] sm:$0xff] %v648_v47  ;;  %v650_v48 = vld [vmem:[%s7764_s7 + $0x1ce0] sm:$0xff]  ;;  %v654_v50 = vld [vmem:[%s7764_s7 + $0x1cf0] sm:$0xff] }
  0x91   : > { %651 = vst [vmem:[%s7769_s8 + $0x7e0] sm:$0xff] %v650_v48  ;;  %653 = vst [vmem:[%s7769_s8 + $0x7e8] sm:$0xff] %v652_v49  ;;  %v656_v51 = vld [vmem:[%s7764_s7 + $0x1cf8] sm:$0xff]  ;;  %v658_v52 = vld [vmem:[%s7764_s7 + $0x1d00] sm:$0xff] }
  0x92   : > { %655 = vst [vmem:[%s7769_s8 + $0x7f0] sm:$0xff] %v654_v50  ;;  %v660_v53 = vld [vmem:[%s7764_s7 + $0x1d08] sm:$0xff]  ;;  %657 = vst [vmem:[%s7769_s8 + $0x7f8] sm:$0xff] %v656_v51  ;;  %v662_v54 = vld [vmem:[%s7764_s7 + $0x1d10] sm:$0xff] }
  0x93   : > { %659 = vst [vmem:[%s7769_s8 + $0x800] sm:$0xff] %v658_v52  ;;  %661 = vst [vmem:[%s7769_s8 + $0x808] sm:$0xff] %v660_v53  ;;  %v664_v55 = vld [vmem:[%s7764_s7 + $0x1d18] sm:$0xff]  ;;  %v666_v56 = vld [vmem:[%s7764_s7 + $0x1d20] sm:$0xff] }
  0x94   : > { %663 = vst [vmem:[%s7769_s8 + $0x810] sm:$0xff] %v662_v54  ;;  %665 = vst [vmem:[%s7769_s8 + $0x818] sm:$0xff] %v664_v55  ;;  %v668_v57 = vld [vmem:[%s7764_s7 + $0x1d28] sm:$0xff]  ;;  %v672_v59 = vld [vmem:[%s7764_s7 + $0x1d90] sm:$0xff] }
  0x95   : > { %667 = vst [vmem:[%s7769_s8 + $0x820] sm:$0xff] %v666_v56  ;;  %v670_v58 = vld [vmem:[%s7764_s7 + $0x1d88] sm:$0xff]  ;;  %669 = vst [vmem:[%s7769_s8 + $0x828] sm:$0xff] %v668_v57  ;;  %v674_v60 = vld [vmem:[%s7764_s7 + $0x1d98] sm:$0xff] }
  0x96   : > { %671 = vst [vmem:[%s7769_s8 + $0x834] sm:$0xff] %v670_v58  ;;  %673 = vst [vmem:[%s7769_s8 + $0x83c] sm:$0xff] %v672_v59  ;;  %v676_v61 = vld [vmem:[%s7764_s7 + $0x1da0] sm:$0xff]  ;;  %v678_v62 = vld [vmem:[%s7764_s7 + $0x1da8] sm:$0xff] }
  0x97   : > { %675 = vst [vmem:[%s7769_s8 + $0x844] sm:$0xff] %v674_v60  ;;  %677 = vst [vmem:[%s7769_s8 + $0x84c] sm:$0xff] %v676_v61  ;;  %v680_v63 = vld [vmem:[%s7764_s7 + $0x1db0] sm:$0xff]  ;;  %v682_v0 = vld [vmem:[%s7764_s7 + $0x1db8] sm:$0xff] }
  0x98   : > { %679 = vst [vmem:[%s7769_s8 + $0x854] sm:$0xff] %v678_v62  ;;  %v684_v1 = vld [vmem:[%s7764_s7 + $0x1dc0] sm:$0xff]  ;;  %681 = vst [vmem:[%s7769_s8 + $0x85c] sm:$0xff] %v680_v63  ;;  %v686_v2 = vld [vmem:[%s7764_s7 + $0x1dc8] sm:$0xff] }
  0x99   : > { %683 = vst [vmem:[%s7769_s8 + $0x864] sm:$0xff] %v682_v0  ;;  %685 = vst [vmem:[%s7769_s8 + $0x86c] sm:$0xff] %v684_v1  ;;  %v688_v3 = vld [vmem:[%s7764_s7 + $0x1dd0] sm:$0xff]  ;;  %v692_v5 = vld [vmem:[%s7764_s7 + $0x1e38] sm:$0xff] }
  0x9a   : > { %v690_v4 = vld [vmem:[%s7764_s7 + $0x1e30] sm:$0xff]  ;;  %687 = vst [vmem:[%s7769_s8 + $0x874] sm:$0xff] %v686_v2  ;;  %689 = vst [vmem:[%s7769_s8 + $0x87c] sm:$0xff] %v688_v3  ;;  %v694_v6 = vld [vmem:[%s7764_s7 + $0x1e40] sm:$0xff] }
  0x9b   : > { %691 = vst [vmem:[%s7769_s8 + $0x888] sm:$0xff] %v690_v4  ;;  %v696_v7 = vld [vmem:[%s7764_s7 + $0x1e48] sm:$0xff]  ;;  %693 = vst [vmem:[%s7769_s8 + $0x890] sm:$0xff] %v692_v5  ;;  %v698_v8 = vld [vmem:[%s7764_s7 + $0x1e50] sm:$0xff] }
  0x9c   : > { %695 = vst [vmem:[%s7769_s8 + $0x898] sm:$0xff] %v694_v6  ;;  %697 = vst [vmem:[%s7769_s8 + $0x8a0] sm:$0xff] %v696_v7  ;;  %v700_v9 = vld [vmem:[%s7764_s7 + $0x1e58] sm:$0xff]  ;;  %v702_v10 = vld [vmem:[%s7764_s7 + $0x1e60] sm:$0xff] }
  0x9d   : > { %699 = vst [vmem:[%s7769_s8 + $0x8a8] sm:$0xff] %v698_v8  ;;  %701 = vst [vmem:[%s7769_s8 + $0x8b0] sm:$0xff] %v700_v9  ;;  %v704_v11 = vld [vmem:[%s7764_s7 + $0x1e68] sm:$0xff]  ;;  %v706_v12 = vld [vmem:[%s7764_s7 + $0x1e70] sm:$0xff] }
  0x9e   : > { %703 = vst [vmem:[%s7769_s8 + $0x8b8] sm:$0xff] %v702_v10  ;;  %v708_v13 = vld [vmem:[%s7764_s7 + $0x1e78] sm:$0xff]  ;;  %705 = vst [vmem:[%s7769_s8 + $0x8c0] sm:$0xff] %v704_v11  ;;  %v712_v15 = vld [vmem:[%s7764_s7 + $0x1ee0] sm:$0xff] }
  0x9f   : > { %707 = vst [vmem:[%s7769_s8 + $0x8c8] sm:$0xff] %v706_v12  ;;  %709 = vst [vmem:[%s7769_s8 + $0x8d0] sm:$0xff] %v708_v13  ;;  %v710_v14 = vld [vmem:[%s7764_s7 + $0x1ed8] sm:$0xff]  ;;  %v714_v16 = vld [vmem:[%s7764_s7 + $0x1ee8] sm:$0xff] }
  0xa0   : > { %711 = vst [vmem:[%s7769_s8 + $0x8dc] sm:$0xff] %v710_v14  ;;  %713 = vst [vmem:[%s7769_s8 + $0x8e4] sm:$0xff] %v712_v15  ;;  %v716_v17 = vld [vmem:[%s7764_s7 + $0x1ef0] sm:$0xff]  ;;  %v718_v18 = vld [vmem:[%s7764_s7 + $0x1ef8] sm:$0xff] }
  0xa1   : > { %715 = vst [vmem:[%s7769_s8 + $0x8ec] sm:$0xff] %v714_v16  ;;  %v720_v19 = vld [vmem:[%s7764_s7 + $0x1f00] sm:$0xff]  ;;  %717 = vst [vmem:[%s7769_s8 + $0x8f4] sm:$0xff] %v716_v17  ;;  %v722_v20 = vld [vmem:[%s7764_s7 + $0x1f08] sm:$0xff] }
  0xa2   : > { %719 = vst [vmem:[%s7769_s8 + $0x8fc] sm:$0xff] %v718_v18  ;;  %721 = vst [vmem:[%s7769_s8 + $0x904] sm:$0xff] %v720_v19  ;;  %v724_v21 = vld [vmem:[%s7764_s7 + $0x1f10] sm:$0xff]  ;;  %v726_v22 = vld [vmem:[%s7764_s7 + $0x1f18] sm:$0xff] }
  0xa3   : > { %723 = vst [vmem:[%s7769_s8 + $0x90c] sm:$0xff] %v722_v20  ;;  %725 = vst [vmem:[%s7769_s8 + $0x914] sm:$0xff] %v724_v21  ;;  %v728_v23 = vld [vmem:[%s7764_s7 + $0x1f20] sm:$0xff]  ;;  %v732_v25 = vld [vmem:[%s7764_s7 + $0x1f88] sm:$0xff] }
  0xa4   : > { %727 = vst [vmem:[%s7769_s8 + $0x91c] sm:$0xff] %v726_v22  ;;  %v730_v24 = vld [vmem:[%s7764_s7 + $0x1f80] sm:$0xff]  ;;  %729 = vst [vmem:[%s7769_s8 + $0x924] sm:$0xff] %v728_v23  ;;  %v734_v26 = vld [vmem:[%s7764_s7 + $0x1f90] sm:$0xff] }
  0xa5   : > { %731 = vst [vmem:[%s7769_s8 + $0x930] sm:$0xff] %v730_v24  ;;  %733 = vst [vmem:[%s7769_s8 + $0x938] sm:$0xff] %v732_v25  ;;  %v736_v27 = vld [vmem:[%s7764_s7 + $0x1f98] sm:$0xff]  ;;  %v738_v28 = vld [vmem:[%s7764_s7 + $0x1fa0] sm:$0xff] }
  0xa6   : > { %735 = vst [vmem:[%s7769_s8 + $0x940] sm:$0xff] %v734_v26  ;;  %737 = vst [vmem:[%s7769_s8 + $0x948] sm:$0xff] %v736_v27  ;;  %v740_v29 = vld [vmem:[%s7764_s7 + $0x1fa8] sm:$0xff]  ;;  %v742_v30 = vld [vmem:[%s7764_s7 + $0x1fb0] sm:$0xff] }
  0xa7   : > { %739 = vst [vmem:[%s7769_s8 + $0x950] sm:$0xff] %v738_v28  ;;  %v744_v31 = vld [vmem:[%s7764_s7 + $0x1fb8] sm:$0xff]  ;;  %741 = vst [vmem:[%s7769_s8 + $0x958] sm:$0xff] %v740_v29  ;;  %v746_v32 = vld [vmem:[%s7764_s7 + $0x1fc0] sm:$0xff] }
  0xa8   : > { %743 = vst [vmem:[%s7769_s8 + $0x960] sm:$0xff] %v742_v30  ;;  %745 = vst [vmem:[%s7769_s8 + $0x968] sm:$0xff] %v744_v31  ;;  %v748_v33 = vld [vmem:[%s7764_s7 + $0x1fc8] sm:$0xff]  ;;  %v752_v35 = vld [vmem:[%s7764_s7 + $0x2030] sm:$0xff] }
  0xa9   : > { %v750_v34 = vld [vmem:[%s7764_s7 + $0x2028] sm:$0xff]  ;;  %747 = vst [vmem:[%s7769_s8 + $0x970] sm:$0xff] %v746_v32  ;;  %749 = vst [vmem:[%s7769_s8 + $0x978] sm:$0xff] %v748_v33  ;;  %v754_v36 = vld [vmem:[%s7764_s7 + $0x2038] sm:$0xff] }
  0xaa   : > { %751 = vst [vmem:[%s7769_s8 + $0x984] sm:$0xff] %v750_v34  ;;  %v756_v37 = vld [vmem:[%s7764_s7 + $0x2040] sm:$0xff]  ;;  %753 = vst [vmem:[%s7769_s8 + $0x98c] sm:$0xff] %v752_v35  ;;  %v758_v38 = vld [vmem:[%s7764_s7 + $0x2048] sm:$0xff] }
  0xab   : > { %755 = vst [vmem:[%s7769_s8 + $0x994] sm:$0xff] %v754_v36  ;;  %757 = vst [vmem:[%s7769_s8 + $0x99c] sm:$0xff] %v756_v37  ;;  %v760_v39 = vld [vmem:[%s7764_s7 + $0x2050] sm:$0xff]  ;;  %v762_v40 = vld [vmem:[%s7764_s7 + $0x2058] sm:$0xff] }
  0xac   : > { %759 = vst [vmem:[%s7769_s8 + $0x9a4] sm:$0xff] %v758_v38  ;;  %761 = vst [vmem:[%s7769_s8 + $0x9ac] sm:$0xff] %v760_v39  ;;  %v764_v41 = vld [vmem:[%s7764_s7 + $0x2060] sm:$0xff]  ;;  %v766_v42 = vld [vmem:[%s7764_s7 + $0x2068] sm:$0xff] }
  0xad   : > { %763 = vst [vmem:[%s7769_s8 + $0x9b4] sm:$0xff] %v762_v40  ;;  %v768_v43 = vld [vmem:[%s7764_s7 + $0x2070] sm:$0xff]  ;;  %765 = vst [vmem:[%s7769_s8 + $0x9bc] sm:$0xff] %v764_v41  ;;  %v770_v44 = vld [vmem:[%s7764_s7 + $0x2760] sm:$0xff] }
  0xae   : > { %767 = vst [vmem:[%s7769_s8 + $0x9c4] sm:$0xff] %v766_v42  ;;  %769 = vst [vmem:[%s7769_s8 + $0x9cc] sm:$0xff] %v768_v43  ;;  %v772_v45 = vld [vmem:[%s7764_s7 + $0x2768] sm:$0xff]  ;;  %v774_v46 = vld [vmem:[%s7764_s7 + $0x2770] sm:$0xff] }
  0xaf   : > { %771 = vst [vmem:[%s7769_s8 + $0x9d8] sm:$0xff] %v770_v44  ;;  %773 = vst [vmem:[%s7769_s8 + $0x9e0] sm:$0xff] %v772_v45  ;;  %v776_v47 = vld [vmem:[%s7764_s7 + $0x2778] sm:$0xff]  ;;  %v778_v48 = vld [vmem:[%s7764_s7 + $0x2780] sm:$0xff] }
  0xb0   : > { %775 = vst [vmem:[%s7769_s8 + $0x9e8] sm:$0xff] %v774_v46  ;;  %v780_v49 = vld [vmem:[%s7764_s7 + $0x2788] sm:$0xff]  ;;  %777 = vst [vmem:[%s7769_s8 + $0x9f0] sm:$0xff] %v776_v47  ;;  %v782_v50 = vld [vmem:[%s7764_s7 + $0x2790] sm:$0xff] }
  0xb1   : > { %779 = vst [vmem:[%s7769_s8 + $0x9f8] sm:$0xff] %v778_v48  ;;  %781 = vst [vmem:[%s7769_s8 + $0xa00] sm:$0xff] %v780_v49  ;;  %v784_v51 = vld [vmem:[%s7764_s7 + $0x2798] sm:$0xff]  ;;  %v786_v52 = vld [vmem:[%s7764_s7 + $0x27a0] sm:$0xff] }
  0xb2   : > { %783 = vst [vmem:[%s7769_s8 + $0xa08] sm:$0xff] %v782_v50  ;;  %785 = vst [vmem:[%s7769_s8 + $0xa10] sm:$0xff] %v784_v51  ;;  %v788_v53 = vld [vmem:[%s7764_s7 + $0x27a8] sm:$0xff]  ;;  %v792_v55 = vld [vmem:[%s7764_s7 + $0x2810] sm:$0xff] }
  0xb3   : > { %787 = vst [vmem:[%s7769_s8 + $0xa18] sm:$0xff] %v786_v52  ;;  %v790_v54 = vld [vmem:[%s7764_s7 + $0x2808] sm:$0xff]  ;;  %789 = vst [vmem:[%s7769_s8 + $0xa20] sm:$0xff] %v788_v53  ;;  %v794_v56 = vld [vmem:[%s7764_s7 + $0x2818] sm:$0xff] }
  0xb4   : > { %791 = vst [vmem:[%s7769_s8 + $0xa2c] sm:$0xff] %v790_v54  ;;  %793 = vst [vmem:[%s7769_s8 + $0xa34] sm:$0xff] %v792_v55  ;;  %v796_v57 = vld [vmem:[%s7764_s7 + $0x2820] sm:$0xff]  ;;  %v798_v58 = vld [vmem:[%s7764_s7 + $0x2828] sm:$0xff] }
  0xb5   : > { %795 = vst [vmem:[%s7769_s8 + $0xa3c] sm:$0xff] %v794_v56  ;;  %797 = vst [vmem:[%s7769_s8 + $0xa44] sm:$0xff] %v796_v57  ;;  %v800_v59 = vld [vmem:[%s7764_s7 + $0x2830] sm:$0xff]  ;;  %v802_v60 = vld [vmem:[%s7764_s7 + $0x2838] sm:$0xff] }
  0xb6   : > { %799 = vst [vmem:[%s7769_s8 + $0xa4c] sm:$0xff] %v798_v58  ;;  %v804_v61 = vld [vmem:[%s7764_s7 + $0x2840] sm:$0xff]  ;;  %801 = vst [vmem:[%s7769_s8 + $0xa54] sm:$0xff] %v800_v59  ;;  %v806_v62 = vld [vmem:[%s7764_s7 + $0x2848] sm:$0xff] }
  0xb7   : > { %803 = vst [vmem:[%s7769_s8 + $0xa5c] sm:$0xff] %v802_v60  ;;  %805 = vst [vmem:[%s7769_s8 + $0xa64] sm:$0xff] %v804_v61  ;;  %v808_v63 = vld [vmem:[%s7764_s7 + $0x2850] sm:$0xff]  ;;  %v812_v1 = vld [vmem:[%s7764_s7 + $0x28b8] sm:$0xff] }
  0xb8   : > { %v810_v0 = vld [vmem:[%s7764_s7 + $0x28b0] sm:$0xff]  ;;  %807 = vst [vmem:[%s7769_s8 + $0xa6c] sm:$0xff] %v806_v62  ;;  %809 = vst [vmem:[%s7769_s8 + $0xa74] sm:$0xff] %v808_v63  ;;  %v814_v2 = vld [vmem:[%s7764_s7 + $0x28c0] sm:$0xff] }
  0xb9   : > { %811 = vst [vmem:[%s7769_s8 + $0xa80] sm:$0xff] %v810_v0  ;;  %v816_v3 = vld [vmem:[%s7764_s7 + $0x28c8] sm:$0xff]  ;;  %813 = vst [vmem:[%s7769_s8 + $0xa88] sm:$0xff] %v812_v1  ;;  %v818_v4 = vld [vmem:[%s7764_s7 + $0x28d0] sm:$0xff] }
  0xba   : > { %815 = vst [vmem:[%s7769_s8 + $0xa90] sm:$0xff] %v814_v2  ;;  %817 = vst [vmem:[%s7769_s8 + $0xa98] sm:$0xff] %v816_v3  ;;  %v820_v5 = vld [vmem:[%s7764_s7 + $0x28d8] sm:$0xff]  ;;  %v822_v6 = vld [vmem:[%s7764_s7 + $0x28e0] sm:$0xff] }
  0xbb   : > { %819 = vst [vmem:[%s7769_s8 + $0xaa0] sm:$0xff] %v818_v4  ;;  %821 = vst [vmem:[%s7769_s8 + $0xaa8] sm:$0xff] %v820_v5  ;;  %v824_v7 = vld [vmem:[%s7764_s7 + $0x28e8] sm:$0xff]  ;;  %v826_v8 = vld [vmem:[%s7764_s7 + $0x28f0] sm:$0xff] }
  0xbc   : > { %823 = vst [vmem:[%s7769_s8 + $0xab0] sm:$0xff] %v822_v6  ;;  %v828_v9 = vld [vmem:[%s7764_s7 + $0x28f8] sm:$0xff]  ;;  %825 = vst [vmem:[%s7769_s8 + $0xab8] sm:$0xff] %v824_v7  ;;  %v832_v11 = vld [vmem:[%s7764_s7 + $0x2960] sm:$0xff] }
  0xbd   : > { %827 = vst [vmem:[%s7769_s8 + $0xac0] sm:$0xff] %v826_v8  ;;  %829 = vst [vmem:[%s7769_s8 + $0xac8] sm:$0xff] %v828_v9  ;;  %v830_v10 = vld [vmem:[%s7764_s7 + $0x2958] sm:$0xff]  ;;  %v834_v12 = vld [vmem:[%s7764_s7 + $0x2968] sm:$0xff] }
  0xbe   : > { %831 = vst [vmem:[%s7769_s8 + $0xad4] sm:$0xff] %v830_v10  ;;  %833 = vst [vmem:[%s7769_s8 + $0xadc] sm:$0xff] %v832_v11  ;;  %v836_v13 = vld [vmem:[%s7764_s7 + $0x2970] sm:$0xff]  ;;  %v838_v14 = vld [vmem:[%s7764_s7 + $0x2978] sm:$0xff] }
  0xbf   : > { %835 = vst [vmem:[%s7769_s8 + $0xae4] sm:$0xff] %v834_v12  ;;  %v840_v15 = vld [vmem:[%s7764_s7 + $0x2980] sm:$0xff]  ;;  %837 = vst [vmem:[%s7769_s8 + $0xaec] sm:$0xff] %v836_v13  ;;  %v842_v16 = vld [vmem:[%s7764_s7 + $0x2988] sm:$0xff] }
  0xc0   : > { %839 = vst [vmem:[%s7769_s8 + $0xaf4] sm:$0xff] %v838_v14  ;;  %841 = vst [vmem:[%s7769_s8 + $0xafc] sm:$0xff] %v840_v15  ;;  %v844_v17 = vld [vmem:[%s7764_s7 + $0x2990] sm:$0xff]  ;;  %v846_v18 = vld [vmem:[%s7764_s7 + $0x2998] sm:$0xff] }
  0xc1   : > { %843 = vst [vmem:[%s7769_s8 + $0xb04] sm:$0xff] %v842_v16  ;;  %845 = vst [vmem:[%s7769_s8 + $0xb0c] sm:$0xff] %v844_v17  ;;  %v848_v19 = vld [vmem:[%s7764_s7 + $0x29a0] sm:$0xff]  ;;  %v852_v21 = vld [vmem:[%s7764_s7 + $0x2a08] sm:$0xff] }
  0xc2   : > { %847 = vst [vmem:[%s7769_s8 + $0xb14] sm:$0xff] %v846_v18  ;;  %v850_v20 = vld [vmem:[%s7764_s7 + $0x2a00] sm:$0xff]  ;;  %849 = vst [vmem:[%s7769_s8 + $0xb1c] sm:$0xff] %v848_v19  ;;  %v854_v22 = vld [vmem:[%s7764_s7 + $0x2a10] sm:$0xff] }
  0xc3   : > { %851 = vst [vmem:[%s7769_s8 + $0xb28] sm:$0xff] %v850_v20  ;;  %853 = vst [vmem:[%s7769_s8 + $0xb30] sm:$0xff] %v852_v21  ;;  %v856_v23 = vld [vmem:[%s7764_s7 + $0x2a18] sm:$0xff]  ;;  %v858_v24 = vld [vmem:[%s7764_s7 + $0x2a20] sm:$0xff] }
  0xc4   : > { %855 = vst [vmem:[%s7769_s8 + $0xb38] sm:$0xff] %v854_v22  ;;  %857 = vst [vmem:[%s7769_s8 + $0xb40] sm:$0xff] %v856_v23  ;;  %v860_v25 = vld [vmem:[%s7764_s7 + $0x2a28] sm:$0xff]  ;;  %v862_v26 = vld [vmem:[%s7764_s7 + $0x2a30] sm:$0xff] }
  0xc5   : > { %859 = vst [vmem:[%s7769_s8 + $0xb48] sm:$0xff] %v858_v24  ;;  %v864_v27 = vld [vmem:[%s7764_s7 + $0x2a38] sm:$0xff]  ;;  %861 = vst [vmem:[%s7769_s8 + $0xb50] sm:$0xff] %v860_v25  ;;  %v866_v28 = vld [vmem:[%s7764_s7 + $0x2a40] sm:$0xff] }
  0xc6   : > { %863 = vst [vmem:[%s7769_s8 + $0xb58] sm:$0xff] %v862_v26  ;;  %865 = vst [vmem:[%s7769_s8 + $0xb60] sm:$0xff] %v864_v27  ;;  %v868_v29 = vld [vmem:[%s7764_s7 + $0x2a48] sm:$0xff]  ;;  %v872_v31 = vld [vmem:[%s7764_s7 + $0x2ab0] sm:$0xff] }
  0xc7   : > { %v870_v30 = vld [vmem:[%s7764_s7 + $0x2aa8] sm:$0xff]  ;;  %867 = vst [vmem:[%s7769_s8 + $0xb68] sm:$0xff] %v866_v28  ;;  %869 = vst [vmem:[%s7769_s8 + $0xb70] sm:$0xff] %v868_v29  ;;  %v874_v32 = vld [vmem:[%s7764_s7 + $0x2ab8] sm:$0xff] }
  0xc8   : > { %871 = vst [vmem:[%s7769_s8 + $0xb7c] sm:$0xff] %v870_v30  ;;  %v876_v33 = vld [vmem:[%s7764_s7 + $0x2ac0] sm:$0xff]  ;;  %873 = vst [vmem:[%s7769_s8 + $0xb84] sm:$0xff] %v872_v31  ;;  %v878_v34 = vld [vmem:[%s7764_s7 + $0x2ac8] sm:$0xff] }
  0xc9   : > { %875 = vst [vmem:[%s7769_s8 + $0xb8c] sm:$0xff] %v874_v32  ;;  %877 = vst [vmem:[%s7769_s8 + $0xb94] sm:$0xff] %v876_v33  ;;  %v880_v35 = vld [vmem:[%s7764_s7 + $0x2ad0] sm:$0xff]  ;;  %v882_v36 = vld [vmem:[%s7764_s7 + $0x2ad8] sm:$0xff] }
  0xca   : > { %879 = vst [vmem:[%s7769_s8 + $0xb9c] sm:$0xff] %v878_v34  ;;  %881 = vst [vmem:[%s7769_s8 + $0xba4] sm:$0xff] %v880_v35  ;;  %v884_v37 = vld [vmem:[%s7764_s7 + $0x2ae0] sm:$0xff]  ;;  %v886_v38 = vld [vmem:[%s7764_s7 + $0x2ae8] sm:$0xff] }
  0xcb   : > { %883 = vst [vmem:[%s7769_s8 + $0xbac] sm:$0xff] %v882_v36  ;;  %v888_v39 = vld [vmem:[%s7764_s7 + $0x2af0] sm:$0xff]  ;;  %885 = vst [vmem:[%s7769_s8 + $0xbb4] sm:$0xff] %v884_v37  ;;  %v892_v41 = vld [vmem:[%s7764_s7 + $0x2b58] sm:$0xff] }
  0xcc   : > { %887 = vst [vmem:[%s7769_s8 + $0xbbc] sm:$0xff] %v886_v38  ;;  %889 = vst [vmem:[%s7769_s8 + $0xbc4] sm:$0xff] %v888_v39  ;;  %v890_v40 = vld [vmem:[%s7764_s7 + $0x2b50] sm:$0xff]  ;;  %v894_v42 = vld [vmem:[%s7764_s7 + $0x2b60] sm:$0xff] }
  0xcd   : > { %891 = vst [vmem:[%s7769_s8 + $0xbd0] sm:$0xff] %v890_v40  ;;  %893 = vst [vmem:[%s7769_s8 + $0xbd8] sm:$0xff] %v892_v41  ;;  %v896_v43 = vld [vmem:[%s7764_s7 + $0x2b68] sm:$0xff]  ;;  %v898_v44 = vld [vmem:[%s7764_s7 + $0x2b70] sm:$0xff] }
  0xce   : > { %895 = vst [vmem:[%s7769_s8 + $0xbe0] sm:$0xff] %v894_v42  ;;  %v900_v45 = vld [vmem:[%s7764_s7 + $0x2b78] sm:$0xff]  ;;  %897 = vst [vmem:[%s7769_s8 + $0xbe8] sm:$0xff] %v896_v43  ;;  %v902_v46 = vld [vmem:[%s7764_s7 + $0x2b80] sm:$0xff] }
  0xcf   : > { %899 = vst [vmem:[%s7769_s8 + $0xbf0] sm:$0xff] %v898_v44  ;;  %901 = vst [vmem:[%s7769_s8 + $0xbf8] sm:$0xff] %v900_v45  ;;  %v904_v47 = vld [vmem:[%s7764_s7 + $0x2b88] sm:$0xff]  ;;  %v906_v48 = vld [vmem:[%s7764_s7 + $0x2b90] sm:$0xff] }
  0xd0   : > { %903 = vst [vmem:[%s7769_s8 + $0xc00] sm:$0xff] %v902_v46  ;;  %905 = vst [vmem:[%s7769_s8 + $0xc08] sm:$0xff] %v904_v47  ;;  %v908_v49 = vld [vmem:[%s7764_s7 + $0x2b98] sm:$0xff]  ;;  %v912_v51 = vld [vmem:[%s7764_s7 + $0x2c00] sm:$0xff] }
  0xd1   : > { %907 = vst [vmem:[%s7769_s8 + $0xc10] sm:$0xff] %v906_v48  ;;  %v910_v50 = vld [vmem:[%s7764_s7 + $0x2bf8] sm:$0xff]  ;;  %909 = vst [vmem:[%s7769_s8 + $0xc18] sm:$0xff] %v908_v49  ;;  %v914_v52 = vld [vmem:[%s7764_s7 + $0x2c08] sm:$0xff] }
  0xd2   : > { %911 = vst [vmem:[%s7769_s8 + $0xc24] sm:$0xff] %v910_v50  ;;  %913 = vst [vmem:[%s7769_s8 + $0xc2c] sm:$0xff] %v912_v51  ;;  %v916_v53 = vld [vmem:[%s7764_s7 + $0x2c10] sm:$0xff]  ;;  %v918_v54 = vld [vmem:[%s7764_s7 + $0x2c18] sm:$0xff] }
  0xd3   : > { %915 = vst [vmem:[%s7769_s8 + $0xc34] sm:$0xff] %v914_v52  ;;  %917 = vst [vmem:[%s7769_s8 + $0xc3c] sm:$0xff] %v916_v53  ;;  %v920_v55 = vld [vmem:[%s7764_s7 + $0x2c20] sm:$0xff]  ;;  %v922_v56 = vld [vmem:[%s7764_s7 + $0x2c28] sm:$0xff] }
  0xd4   : > { %919 = vst [vmem:[%s7769_s8 + $0xc44] sm:$0xff] %v918_v54  ;;  %v924_v57 = vld [vmem:[%s7764_s7 + $0x2c30] sm:$0xff]  ;;  %921 = vst [vmem:[%s7769_s8 + $0xc4c] sm:$0xff] %v920_v55  ;;  %v926_v58 = vld [vmem:[%s7764_s7 + $0x2c38] sm:$0xff] }
  0xd5   : > { %923 = vst [vmem:[%s7769_s8 + $0xc54] sm:$0xff] %v922_v56  ;;  %925 = vst [vmem:[%s7769_s8 + $0xc5c] sm:$0xff] %v924_v57  ;;  %v928_v59 = vld [vmem:[%s7764_s7 + $0x2c40] sm:$0xff]  ;;  %v932_v61 = vld [vmem:[%s7764_s7 + $0x2ca8] sm:$0xff] }
  0xd6   : > { %v930_v60 = vld [vmem:[%s7764_s7 + $0x2ca0] sm:$0xff]  ;;  %927 = vst [vmem:[%s7769_s8 + $0xc64] sm:$0xff] %v926_v58  ;;  %929 = vst [vmem:[%s7769_s8 + $0xc6c] sm:$0xff] %v928_v59  ;;  %v934_v62 = vld [vmem:[%s7764_s7 + $0x2cb0] sm:$0xff] }
  0xd7   : > { %931 = vst [vmem:[%s7769_s8 + $0xc78] sm:$0xff] %v930_v60  ;;  %v936_v63 = vld [vmem:[%s7764_s7 + $0x2cb8] sm:$0xff]  ;;  %933 = vst [vmem:[%s7769_s8 + $0xc80] sm:$0xff] %v932_v61  ;;  %v938_v0 = vld [vmem:[%s7764_s7 + $0x2cc0] sm:$0xff] }
  0xd8   : > { %935 = vst [vmem:[%s7769_s8 + $0xc88] sm:$0xff] %v934_v62  ;;  %937 = vst [vmem:[%s7769_s8 + $0xc90] sm:$0xff] %v936_v63  ;;  %v940_v1 = vld [vmem:[%s7764_s7 + $0x2cc8] sm:$0xff]  ;;  %v942_v2 = vld [vmem:[%s7764_s7 + $0x2cd0] sm:$0xff] }
  0xd9   : > { %939 = vst [vmem:[%s7769_s8 + $0xc98] sm:$0xff] %v938_v0  ;;  %941 = vst [vmem:[%s7769_s8 + $0xca0] sm:$0xff] %v940_v1  ;;  %v944_v3 = vld [vmem:[%s7764_s7 + $0x2cd8] sm:$0xff]  ;;  %v946_v4 = vld [vmem:[%s7764_s7 + $0x2ce0] sm:$0xff] }
  0xda   : > { %943 = vst [vmem:[%s7769_s8 + $0xca8] sm:$0xff] %v942_v2  ;;  %v948_v5 = vld [vmem:[%s7764_s7 + $0x2ce8] sm:$0xff]  ;;  %945 = vst [vmem:[%s7769_s8 + $0xcb0] sm:$0xff] %v944_v3  ;;  %v952_v7 = vld [vmem:[%s7764_s7 + $0x2d50] sm:$0xff] }
  0xdb   : > { %947 = vst [vmem:[%s7769_s8 + $0xcb8] sm:$0xff] %v946_v4  ;;  %949 = vst [vmem:[%s7769_s8 + $0xcc0] sm:$0xff] %v948_v5  ;;  %v950_v6 = vld [vmem:[%s7764_s7 + $0x2d48] sm:$0xff]  ;;  %v954_v8 = vld [vmem:[%s7764_s7 + $0x2d58] sm:$0xff] }
  0xdc   : > { %951 = vst [vmem:[%s7769_s8 + $0xccc] sm:$0xff] %v950_v6  ;;  %953 = vst [vmem:[%s7769_s8 + $0xcd4] sm:$0xff] %v952_v7  ;;  %v956_v9 = vld [vmem:[%s7764_s7 + $0x2d60] sm:$0xff]  ;;  %v958_v10 = vld [vmem:[%s7764_s7 + $0x2d68] sm:$0xff] }
  0xdd   : > { %955 = vst [vmem:[%s7769_s8 + $0xcdc] sm:$0xff] %v954_v8  ;;  %v960_v11 = vld [vmem:[%s7764_s7 + $0x2d70] sm:$0xff]  ;;  %957 = vst [vmem:[%s7769_s8 + $0xce4] sm:$0xff] %v956_v9  ;;  %v962_v12 = vld [vmem:[%s7764_s7 + $0x2d78] sm:$0xff] }
  0xde   : > { %959 = vst [vmem:[%s7769_s8 + $0xcec] sm:$0xff] %v958_v10  ;;  %961 = vst [vmem:[%s7769_s8 + $0xcf4] sm:$0xff] %v960_v11  ;;  %v964_v13 = vld [vmem:[%s7764_s7 + $0x2d80] sm:$0xff]  ;;  %v966_v14 = vld [vmem:[%s7764_s7 + $0x2d88] sm:$0xff] }
  0xdf   : > { %963 = vst [vmem:[%s7769_s8 + $0xcfc] sm:$0xff] %v962_v12  ;;  %965 = vst [vmem:[%s7769_s8 + $0xd04] sm:$0xff] %v964_v13  ;;  %v968_v15 = vld [vmem:[%s7764_s7 + $0x2d90] sm:$0xff]  ;;  %v5959_v17 = vld [vmem:[%s7764_s7 + $0xf8] sm:$0xf] }
  0xe0   : > { %967 = vst [vmem:[%s7769_s8 + $0xd0c] sm:$0xff] %v966_v14  ;;  %v5957_v16 = vld [vmem:[%s7764_s7 + $0x50] sm:$0xf]  ;;  %969 = vst [vmem:[%s7769_s8 + $0xd14] sm:$0xff] %v968_v15  ;;  %v5961_v18 = vld [vmem:[%s7764_s7 + $0x1a0] sm:$0xf] }
  0xe1   : > { %5958 = vst [vmem:[%s7769_s8 + $0x50] sm:$0xf] %v5957_v16  ;;  %5960 = vst [vmem:[%s7769_s8 + $0xa4] sm:$0xf] %v5959_v17  ;;  %v5963_v19 = vld [vmem:[%s7764_s7 + $0x248] sm:$0xf] }
  0xe2   : > { %v5965_v20 = vld [vmem:[%s7764_s7 + $0x2f0] sm:$0xf]  ;;  %5962 = vst [vmem:[%s7769_s8 + $0xf8] sm:$0xf] %v5961_v18  ;;  %5964 = vst [vmem:[%s7769_s8 + $0x14c] sm:$0xf] %v5963_v19 }
  0xe3   : > { %5966 = vst [vmem:[%s7769_s8 + $0x1a0] sm:$0xf] %v5965_v20  ;;  %v5967_v21 = vld [vmem:[%s7764_s7 + $0x398] sm:$0xf]  ;;  %v5969_v22 = vld [vmem:[%s7764_s7 + $0x440] sm:$0xf] }
  0xe4   : > { %v5971_v23 = vld [vmem:[%s7764_s7 + $0x4e8] sm:$0xf]  ;;  %5968 = vst [vmem:[%s7769_s8 + $0x1f4] sm:$0xf] %v5967_v21  ;;  %5970 = vst [vmem:[%s7769_s8 + $0x248] sm:$0xf] %v5969_v22 }
  0xe5   : > { %5972 = vst [vmem:[%s7769_s8 + $0x29c] sm:$0xf] %v5971_v23  ;;  %v5973_v24 = vld [vmem:[%s7764_s7 + $0x590] sm:$0xf]  ;;  %v5975_v25 = vld [vmem:[%s7764_s7 + $0x638] sm:$0xf] }
  0xe6   : > { %v5977_v26 = vld [vmem:[%s7764_s7 + $0xd70] sm:$0xf]  ;;  %5974 = vst [vmem:[%s7769_s8 + $0x2f0] sm:$0xf] %v5973_v24  ;;  %5976 = vst [vmem:[%s7769_s8 + $0x344] sm:$0xf] %v5975_v25 }
  0xe7   : > { %5978 = vst [vmem:[%s7769_s8 + $0x398] sm:$0xf] %v5977_v26  ;;  %v5979_v27 = vld [vmem:[%s7764_s7 + $0xe18] sm:$0xf]  ;;  %v5981_v28 = vld [vmem:[%s7764_s7 + $0xec0] sm:$0xf] }
  0xe8   : > { %v5983_v29 = vld [vmem:[%s7764_s7 + $0xf68] sm:$0xf]  ;;  %5980 = vst [vmem:[%s7769_s8 + $0x3ec] sm:$0xf] %v5979_v27  ;;  %5982 = vst [vmem:[%s7769_s8 + $0x440] sm:$0xf] %v5981_v28 }
  0xe9   : > { %5984 = vst [vmem:[%s7769_s8 + $0x494] sm:$0xf] %v5983_v29  ;;  %v5985_v30 = vld [vmem:[%s7764_s7 + $0x1010] sm:$0xf]  ;;  %v5987_v31 = vld [vmem:[%s7764_s7 + $0x10b8] sm:$0xf] }
  0xea   : > { %v5989_v32 = vld [vmem:[%s7764_s7 + $0x1160] sm:$0xf]  ;;  %5986 = vst [vmem:[%s7769_s8 + $0x4e8] sm:$0xf] %v5985_v30  ;;  %5988 = vst [vmem:[%s7769_s8 + $0x53c] sm:$0xf] %v5987_v31 }
  0xeb   : > { %5990 = vst [vmem:[%s7769_s8 + $0x590] sm:$0xf] %v5989_v32  ;;  %v5991_v33 = vld [vmem:[%s7764_s7 + $0x1208] sm:$0xf]  ;;  %v5993_v34 = vld [vmem:[%s7764_s7 + $0x12b0] sm:$0xf] }
  0xec   : > { %v5995_v35 = vld [vmem:[%s7764_s7 + $0x1358] sm:$0xf]  ;;  %5992 = vst [vmem:[%s7769_s8 + $0x5e4] sm:$0xf] %v5991_v33  ;;  %5994 = vst [vmem:[%s7769_s8 + $0x638] sm:$0xf] %v5993_v34 }
  0xed   : > { %5996 = vst [vmem:[%s7769_s8 + $0x68c] sm:$0xf] %v5995_v35  ;;  %v5997_v36 = vld [vmem:[%s7764_s7 + $0x1a90] sm:$0xf]  ;;  %v5999_v37 = vld [vmem:[%s7764_s7 + $0x1b38] sm:$0xf] }
  0xee   : > { %v6001_v38 = vld [vmem:[%s7764_s7 + $0x1be0] sm:$0xf]  ;;  %5998 = vst [vmem:[%s7769_s8 + $0x6e0] sm:$0xf] %v5997_v36  ;;  %6000 = vst [vmem:[%s7769_s8 + $0x734] sm:$0xf] %v5999_v37 }
  0xef   : > { %6002 = vst [vmem:[%s7769_s8 + $0x788] sm:$0xf] %v6001_v38  ;;  %v6003_v39 = vld [vmem:[%s7764_s7 + $0x1c88] sm:$0xf]  ;;  %v6005_v40 = vld [vmem:[%s7764_s7 + $0x1d30] sm:$0xf] }
  0xf0   : > { %v6007_v41 = vld [vmem:[%s7764_s7 + $0x1dd8] sm:$0xf]  ;;  %6004 = vst [vmem:[%s7769_s8 + $0x7dc] sm:$0xf] %v6003_v39  ;;  %6006 = vst [vmem:[%s7769_s8 + $0x830] sm:$0xf] %v6005_v40 }
  0xf1   : > { %6008 = vst [vmem:[%s7769_s8 + $0x884] sm:$0xf] %v6007_v41  ;;  %v6009_v42 = vld [vmem:[%s7764_s7 + $0x1e80] sm:$0xf]  ;;  %v6011_v43 = vld [vmem:[%s7764_s7 + $0x1f28] sm:$0xf] }
  0xf2   : > { %v6013_v44 = vld [vmem:[%s7764_s7 + $0x1fd0] sm:$0xf]  ;;  %6010 = vst [vmem:[%s7769_s8 + $0x8d8] sm:$0xf] %v6009_v42  ;;  %6012 = vst [vmem:[%s7769_s8 + $0x92c] sm:$0xf] %v6011_v43 }
  0xf3   : > { %6014 = vst [vmem:[%s7769_s8 + $0x980] sm:$0xf] %v6013_v44  ;;  %v6015_v45 = vld [vmem:[%s7764_s7 + $0x2078] sm:$0xf]  ;;  %v6017_v46 = vld [vmem:[%s7764_s7 + $0x27b0] sm:$0xf] }
  0xf4   : > { %v6019_v47 = vld [vmem:[%s7764_s7 + $0x2858] sm:$0xf]  ;;  %6016 = vst [vmem:[%s7769_s8 + $0x9d4] sm:$0xf] %v6015_v45  ;;  %6018 = vst [vmem:[%s7769_s8 + $0xa28] sm:$0xf] %v6017_v46 }
  0xf5   : > { %6020 = vst [vmem:[%s7769_s8 + $0xa7c] sm:$0xf] %v6019_v47  ;;  %v6021_v48 = vld [vmem:[%s7764_s7 + $0x2900] sm:$0xf]  ;;  %v6023_v49 = vld [vmem:[%s7764_s7 + $0x29a8] sm:$0xf] }
  0xf6   : > { %v6025_v50 = vld [vmem:[%s7764_s7 + $0x2a50] sm:$0xf]  ;;  %6022 = vst [vmem:[%s7769_s8 + $0xad0] sm:$0xf] %v6021_v48  ;;  %6024 = vst [vmem:[%s7769_s8 + $0xb24] sm:$0xf] %v6023_v49 }
  0xf7   : > { %6026 = vst [vmem:[%s7769_s8 + $0xb78] sm:$0xf] %v6025_v50  ;;  %v6027_v51 = vld [vmem:[%s7764_s7 + $0x2af8] sm:$0xf]  ;;  %v6029_v52 = vld [vmem:[%s7764_s7 + $0x2ba0] sm:$0xf] }
  0xf8   : > { %v6031_v53 = vld [vmem:[%s7764_s7 + $0x2c48] sm:$0xf]  ;;  %6028 = vst [vmem:[%s7769_s8 + $0xbcc] sm:$0xf] %v6027_v51  ;;  %6030 = vst [vmem:[%s7769_s8 + $0xc20] sm:$0xf] %v6029_v52 }
  0xf9   : > { %6032 = vst [vmem:[%s7769_s8 + $0xc74] sm:$0xf] %v6031_v53  ;;  %v6033_v54 = vld [vmem:[%s7764_s7 + $0x2cf0] sm:$0xf]  ;;  %v6035_v55 = vld [vmem:[%s7764_s7 + $0x2d98] sm:$0xf] }
  0xfa   : > { %6034 = vst [vmem:[%s7769_s8 + $0xcc8] sm:$0xf] %v6033_v54  ;;  %6036 = vst [vmem:[%s7769_s8 + $0xd1c] sm:$0xf] %v6035_v55 }
  0xfb PF: > { %p6037_p7 = scmp.ge.s32.totalorder %s7678_s18, 1  ;;  %p1062_p8 = scmp.lt.s32.totalorder %s7678_s18, 5 }
  0xfd   : > { %p1063_p9 = pnand %p6037_p7, %p1062_p8 }
  0xfe   : > { %s1069_s9 = sand.u32 (!%p1063_p9), 1, %s7654_s12   ;;  %p1098_p10 = scmp.lt.s32.totalorder (!%p1063_p9), %s7666_s15, 1 }
  0xff   : > { %1066 = sbr.rel (%p1063_p9) target bundleno = 909 (0x38d), region = 54 }
 0x100   : > { %s6939_s10 = smul.u32 (!%p1063_p9), 3360, %s1069_s9 }
 0x101   : > { %s1097_s29 = smul.u32 (!%p1063_p9), 21, %s7662_s14 }
 0x102   : > { %s8656_s11 = scalar_lea.vmem (!%p1063_p9), [#allocation2], %s6939_s10 }
 0x103   : > { %p1100_p11 = scmp.lt.s32.totalorder (!%p1063_p9), %s1097_s29, 41 }
 0x104   : > { %vm1732_vm0 = vcmask 1044480   ;;  %vm1733_vm1 = vcmask 1045504   ;;  %v7680_v56 = vmov 65535   ;;  %v7681_v58 = vmov 0   ;;  %v7008_v2 = vld [vmem:[%s8656_s11 + $0x1fc] ss:$84 sps:$4 sm:$0xff]  }
 0x105   : > { %v1734_v57 = vsel %vm1732_vm0, 4294967295, %v7680_v56  ;;  %1831 = vmatprep.mubr.bf16.mxu0 %v7681_v58  ;;  %1872 = vmatprep.mubr.bf16.mxu1 %v7681_v58  ;;  %v7002_v60 = vld [vmem:[%s8656_s11 + $0x2a4] ss:$84 sps:$4 sm:$0x3f]   ;;  %v7013_v7 = vld [vmem:[%s8656_s11 + $0x200] ss:$84 sps:$4 sm:$0xff]  }
 0x106   : > { %7001 = vset.pattern.permute.xlu0 %v7681_v58  ;;  %v8654_v59 = vsel %vm1733_vm1, %v1734_v57, 0  ;;  %v7004_v61 = vld [vmem:[%s8656_s11 + $0x2ac] ss:$84 sps:$4 sm:$0x3f]   ;;  %v7010_v5 = vld [vmem:[%s8656_s11 + $0x204] ss:$84 sps:$4 sm:$0xff]  }
 0x107   : > { %v1740_v62 = vand.u32 %v7002_v60, %v8654_v59  ;;  %v7006_v63 = vld [vmem:[%s8656_s11 + $0x2a0] ss:$84 sps:$4 sm:$0x3f]   ;;  %v7007_v0 = vld [vmem:[%s8656_s11 + $0x2a8] ss:$84 sps:$4 sm:$0x3f]   ;;  %v1746_v1 = vand.u32 %v7004_v61, %v8654_v59 }
 0x108   : > { %v1737_v3 = vand.u32 %v7006_v63, %v8654_v59  ;;  %v1743_v4 = vand.u32 %v7007_v0, %v8654_v59  ;;  %v7012_v6 = vld [vmem:[%s8656_s11 + $0x1f8] ss:$84 sps:$4 sm:$0xff]   ;;  %v7014_v8 = vld [vmem:[%s8656_s11 + $0x154] ss:$84 sps:$4 sm:$0xff]   ;;  %v7016_v9 = vld [vmem:[%s8656_s11 + $0x15c] ss:$84 sps:$4 sm:$0xff]  }
 0x109   : > { %1805 = vmatprep.subr.bf16.mxu0 %v1740_v62  ;;  %1846 = vmatprep.subr.bf16.mxu1 %v1746_v1  ;;  %v7018_v10 = vld [vmem:[%s8656_s11 + $0x150] ss:$84 sps:$4 sm:$0xff]   ;;  %v7019_v11 = vld [vmem:[%s8656_s11 + $0x158] ss:$84 sps:$4 sm:$0xff]   ;;  %v7022_v13 = vld [vmem:[%s8656_s11 + $0xb4] ss:$84 sps:$4 sm:$0xff]  }
 0x10a   : > { %1806 = vmatpush1.bf16.msra.mxu0 %v1737_v3  ;;  %1847 = vmatpush1.bf16.msra.mxu1 %v1743_v4  ;;  %v7020_v12 = vld [vmem:[%s8656_s11 + $0xac] ss:$84 sps:$4 sm:$0xff]   ;;  %v7024_v14 = vld [vmem:[%s8656_s11 + $0xa8] ss:$84 sps:$4 sm:$0xff]   ;;  %v7025_v15 = vld [vmem:[%s8656_s11 + $0xb0] ss:$84 sps:$4 sm:$0xff]  }
 0x10b   : > { %1807 = vmatprep.subr.bf16.mxu0 %v7008_v2  ;;  %1848 = vmatprep.subr.bf16.mxu1 %v7010_v5  ;;  %v7026_v16 = vld [vmem:[%s8656_s11 + $0x4] ss:$84 sps:$4 sm:$0xff]   ;;  %v7028_v17 = vld [vmem:[%s8656_s11 + $0xc] ss:$84 sps:$4 sm:$0xff]   ;;  %v7031_v21 = vld [vmem:[%s8656_s11 + $0x8] ss:$84 sps:$4 sm:$0xff]  }
 0x10c   : > { %v7034_v18 = vld [vmem:[%s8656_s11 + $0x2b4] ss:$84 sps:$4 sm:$0x3f]   ;;  %v7037_v20 = vld [vmem:[%s8656_s11 + $0x2bc] ss:$84 sps:$4 sm:$0x3f]  }
 0x10d   : > { %v7030_v19 = vld [vmem:[%s8656_s11] ss:$84 sps:$4 sm:$0xff]   ;;  %v7032_v22 = vld [vmem:[%s8656_s11 + $0x2b0] ss:$84 sps:$4 sm:$0x3f]   ;;  %v1752_v24 = vand.u32 %v7034_v18, %v8654_v59  ;;  %v1758_v25 = vand.u32 %v7037_v20, %v8654_v59  ;;  %vm1728_vm2 = vcmask 613376  }
 0x10e   : > { %1808 = vmatpush1.bf16.msra.mxu0 %v7012_v6  ;;  %1849 = vmatpush1.bf16.msra.mxu1 %v7013_v7  ;;  %v7035_v23 = vld [vmem:[%s8656_s11 + $0x2b8] ss:$84 sps:$4 sm:$0x3f]   ;;  %v8691_v26 = vld [vmem:[%s9587_s1] sm:$0x7]  ;;  %v1749_v27 = vand.u32 %v7032_v22, %v8654_v59  ;;  %vm7683_vm3 = vmmov 0  }
 0x10f   : > { %1809 = vmatprep.subr.bf16.mxu0 %v7014_v8  ;;  %1850 = vmatprep.subr.bf16.mxu1 %v7016_v9  ;;  %v1755_v28 = vand.u32 %v7035_v23, %v8654_v59  ;;  %v7040_v29 = vld [vmem:[%s8656_s11 + $0x20c] ss:$84 sps:$4 sm:$0xff]   ;;  %v7043_v30 = vld [vmem:[%s8656_s11 + $0x214] ss:$84 sps:$4 sm:$0xff]   ;;  %v7041_v32 = vld [vmem:[%s8656_s11 + $0x210] ss:$84 sps:$4 sm:$0xff]  }
 0x110   : > { %v7038_v31 = vld [vmem:[%s8656_s11 + $0x208] ss:$84 sps:$4 sm:$0xff]   ;;  %v7046_v33 = vld [vmem:[%s8656_s11 + $0x164] ss:$84 sps:$4 sm:$0xff]   ;;  %v7049_v34 = vld [vmem:[%s8656_s11 + $0x16c] ss:$84 sps:$4 sm:$0xff]  }
 0x111   : > { %v7044_v35 = vld [vmem:[%s8656_s11 + $0x160] ss:$84 sps:$4 sm:$0xff]   ;;  %v7047_v36 = vld [vmem:[%s8656_s11 + $0x168] ss:$84 sps:$4 sm:$0xff]   ;;  %v7055_v38 = vld [vmem:[%s8656_s11 + $0xc4] ss:$84 sps:$4 sm:$0xff]  }
 0x112   : > { %1810 = vmatpush1.bf16.msra.mxu0 %v7018_v10  ;;  %1851 = vmatpush1.bf16.msra.mxu1 %v7019_v11  ;;  %v7052_v37 = vld [vmem:[%s8656_s11 + $0xbc] ss:$84 sps:$4 sm:$0xff]   ;;  %v7050_v39 = vld [vmem:[%s8656_s11 + $0xb8] ss:$84 sps:$4 sm:$0xff]   ;;  %v7053_v40 = vld [vmem:[%s8656_s11 + $0xc0] ss:$84 sps:$4 sm:$0xff]  }
 0x113   : > { %1811 = vmatprep.subr.bf16.mxu0 %v7020_v12  ;;  %1852 = vmatprep.subr.bf16.mxu1 %v7022_v13  ;;  %v7058_v41 = vld [vmem:[%s8656_s11 + $0x14] ss:$84 sps:$4 sm:$0xff]   ;;  %v7064_v42 = vld [vmem:[%s8656_s11 + $0x2c4] ss:$84 sps:$4 sm:$0x3f]   ;;  %s9603_s15 = smov (!%p1098_p10, %s7666_s15), 1 }
 0x114   : > { %v7061_v43 = vld [vmem:[%s8656_s11 + $0x1c] ss:$84 sps:$4 sm:$0xff]   ;;  %v7067_v44 = vld [vmem:[%s8656_s11 + $0x2cc] ss:$84 sps:$4 sm:$0x3f]   ;;  %v1764_v49 = vand.u32 %v7064_v42, %v8654_v59  ;;  %s6940_s30 = smul.u32 42, %s9603_s15 }
 0x115   : > { %v7056_v45 = vld [vmem:[%s8656_s11 + $0x10] ss:$84 sps:$4 sm:$0xff]   ;;  %v7059_v46 = vld [vmem:[%s8656_s11 + $0x18] ss:$84 sps:$4 sm:$0xff]   ;;  %v1770_v50 = vand.u32 %v7067_v44, %v8654_v59  ;;  %v7071_v56 = vld [vmem:[%s8656_s11 + $0x220] ss:$84 sps:$4 sm:$0xff]  }
 0x116   : > { %1812 = vmatpush1.bf16.msra.mxu0 %v7024_v14  ;;  %1853 = vmatpush1.bf16.msra.mxu1 %v7025_v15  ;;  %v7062_v47 = vld [vmem:[%s8656_s11 + $0x2c0] ss:$84 sps:$4 sm:$0x3f]   ;;  %v7065_v48 = vld [vmem:[%s8656_s11 + $0x2c8] ss:$84 sps:$4 sm:$0x3f]  }
 0x117   : > { %1813 = vmatprep.subr.bf16.mxu0 %v7026_v16  ;;  %1854 = vmatprep.subr.bf16.mxu1 %v7028_v17  ;;  %v1761_v51 = vand.u32 %v7062_v47, %v8654_v59  ;;  %v1767_v52 = vand.u32 %v7065_v48, %v8654_v59  ;;  %v7070_v53 = vld [vmem:[%s8656_s11 + $0x21c] ss:$84 sps:$4 sm:$0xff]   ;;  %v7073_v54 = vld [vmem:[%s8656_s11 + $0x224] ss:$84 sps:$4 sm:$0xff]   ;;  %v7076_v57 = vld [vmem:[%s8656_s11 + $0x174] ss:$84 sps:$4 sm:$0xff]  }
 0x118   : > { %v7068_v55 = vld [vmem:[%s8656_s11 + $0x218] ss:$84 sps:$4 sm:$0xff]   ;;  %v7079_v60 = vld [vmem:[%s8656_s11 + $0x17c] ss:$84 sps:$4 sm:$0xff]   ;;  %v7085_v0 = vld [vmem:[%s8656_s11 + $0xd4] ss:$84 sps:$4 sm:$0xff]  }
 0x119   : > { %v7074_v61 = vld [vmem:[%s8656_s11 + $0x170] ss:$84 sps:$4 sm:$0xff]   ;;  %v7077_v62 = vld [vmem:[%s8656_s11 + $0x178] ss:$84 sps:$4 sm:$0xff]   ;;  %v7080_v1 = vld [vmem:[%s8656_s11 + $0xc8] ss:$84 sps:$4 sm:$0xff]  }
 0x11a   : > { %1814 = vmatpush1.bf16.msra.mxu0 %v7030_v19  ;;  %1855 = vmatpush1.bf16.msra.mxu1 %v7031_v21  ;;  %v7082_v63 = vld [vmem:[%s8656_s11 + $0xcc] ss:$84 sps:$4 sm:$0xff]   ;;  %v7083_v2 = vld [vmem:[%s8656_s11 + $0xd0] ss:$84 sps:$4 sm:$0xff]   ;;  %v7089_v9 = vld [vmem:[%s8656_s11 + $0x28] ss:$84 sps:$4 sm:$0xff]  }
 0x11b   : > { %1887 = vmatprep.subr.bf16.mxu0 %v1752_v24  ;;  %1928 = vmatprep.subr.bf16.mxu1 %v1758_v25  ;;  %v7088_v3 = vld [vmem:[%s8656_s11 + $0x24] ss:$84 sps:$4 sm:$0xff]   ;;  %v7091_v4 = vld [vmem:[%s8656_s11 + $0x2c] ss:$84 sps:$4 sm:$0xff]   ;;  %v7103_v16 = vld [vmem:[%s8656_s11 + $0x234] ss:$84 sps:$4 sm:$0xff]  }
 0x11c   : > { %v7094_v5 = vld [vmem:[%s8656_s11 + $0x2d4] ss:$84 sps:$4 sm:$0x3f]   ;;  %v7097_v6 = vld [vmem:[%s8656_s11 + $0x2dc] ss:$84 sps:$4 sm:$0x3f]  }
 0x11d   : > { %6144 = vmatmul.mubr.msk.bf16.vlgmr.msra.gmra.mxu0 %vm1728_vm2, %v8691_v26  ;;  %6145 = vmatmul.mubr.msk.bf16.vlgmr.msra.gmra.mxu1 %vm1728_vm2, %v8691_v26  ;;  %v7086_v7 = vld [vmem:[%s8656_s11 + $0x20] ss:$84 sps:$4 sm:$0xff]   ;;  %v7092_v8 = vld [vmem:[%s8656_s11 + $0x2d0] ss:$84 sps:$4 sm:$0x3f]   ;;  %v1776_v11 = vand.u32 %v7094_v5, %v8654_v59  ;;  %v1782_v12 = vand.u32 %v7097_v6, %v8654_v59  ;;  %s9605_s29 = smov (!%p1100_p11, %s1097_s29), 41 }
 0x11e   : > { %1888 = vmatpush1.bf16.msra.mxu0 %v1749_v27  ;;  %1929 = vmatpush1.bf16.msra.mxu1 %v1755_v28  ;;  %v7095_v10 = vld [vmem:[%s8656_s11 + $0x2d8] ss:$84 sps:$4 sm:$0x3f]   ;;  %v1773_v13 = vand.u32 %v7092_v8, %v8654_v59  ;;  %v7098_v17 = vld [vmem:[%s8656_s11 + $0x228] ss:$84 sps:$4 sm:$0xff]   ;;  %s1103_s4 = sadd.s32 %s6940_s30, %s9605_s29 }
 0x11f   : > { %1889 = vmatprep.subr.bf16.mxu0 %v7040_v29  ;;  %1930 = vmatprep.subr.bf16.mxu1 %v7043_v30  ;;  %v1779_v14 = vand.u32 %v7095_v10, %v8654_v59  ;;  %v7100_v15 = vld [vmem:[%s8656_s11 + $0x22c] ss:$84 sps:$4 sm:$0xff]   ;;  %v7101_v18 = vld [vmem:[%s8656_s11 + $0x230] ss:$84 sps:$4 sm:$0xff]   ;;  %v7107_v22 = vld [vmem:[%s8656_s11 + $0x188] ss:$84 sps:$4 sm:$0xff]  }
 0x120   : > { %1913 = vmatprep.mubr.bf16.mxu0 %v7681_v58  ;;  %1954 = vmatprep.mubr.bf16.mxu1 %v7681_v58  ;;  %v7106_v19 = vld [vmem:[%s8656_s11 + $0x184] ss:$84 sps:$4 sm:$0xff]   ;;  %v7109_v20 = vld [vmem:[%s8656_s11 + $0x18c] ss:$84 sps:$4 sm:$0xff]   ;;  %v7112_v23 = vld [vmem:[%s8656_s11 + $0xdc] ss:$84 sps:$4 sm:$0xff]  }
 0x121   : > { %v7104_v21 = vld [vmem:[%s8656_s11 + $0x180] ss:$84 sps:$4 sm:$0xff]   ;;  %v7115_v24 = vld [vmem:[%s8656_s11 + $0xe4] ss:$84 sps:$4 sm:$0xff]   ;;  %v7121_v29 = vld [vmem:[%s8656_s11 + $0x3c] ss:$84 sps:$4 sm:$0xff]  }
 0x122   : > { %1890 = vmatpush1.bf16.msra.mxu0 %v7038_v31  ;;  %1931 = vmatpush1.bf16.msra.mxu1 %v7041_v32  ;;  %v7110_v25 = vld [vmem:[%s8656_s11 + $0xd8] ss:$84 sps:$4 sm:$0xff]   ;;  %v7113_v27 = vld [vmem:[%s8656_s11 + $0xe0] ss:$84 sps:$4 sm:$0xff]   ;;  %v7116_v32 = vld [vmem:[%s8656_s11 + $0x30] ss:$84 sps:$4 sm:$0xff]  }
 0x123   : > { %1891 = vmatprep.subr.bf16.mxu0 %v7046_v33  ;;  %1932 = vmatprep.subr.bf16.mxu1 %v7049_v34  ;;  %v7118_v28 = vld [vmem:[%s8656_s11 + $0x34] ss:$84 sps:$4 sm:$0xff]   ;;  %v7124_v30 = vld [vmem:[%s8656_s11 + $0x2e4] ss:$84 sps:$4 sm:$0x3f]   ;;  %s6038_s14 = sshll.u32 %s1103_s4, 2 }
 0x124   : > { %v7127_v31 = vld [vmem:[%s8656_s11 + $0x2ec] ss:$84 sps:$4 sm:$0x3f]   ;;  %v7136_v44 = vld [vmem:[%s8656_s11 + $0x194] ss:$84 sps:$4 sm:$0xff]   ;;  %s9514_s6 = scalar_lea.vmem %s9589_s3, %s6038_s14 }
 0x125   : > { %v7122_v33 = vld [vmem:[%s8656_s11 + $0x2e0] ss:$84 sps:$4 sm:$0x3f]   ;;  %v7119_v34 = vld [vmem:[%s8656_s11 + $0x38] ss:$84 sps:$4 sm:$0xff]  }
 0x126   : > { %1892 = vmatpush1.bf16.msra.mxu0 %v7044_v35  ;;  %1933 = vmatpush1.bf16.msra.mxu1 %v7047_v36  ;;  %v7125_v35 = vld [vmem:[%s8656_s11 + $0x2e8] ss:$84 sps:$4 sm:$0x3f]   ;;  %v1788_v36 = vand.u32 %v7124_v30, %v8654_v59  ;;  %v7128_v42 = vld [vmem:[%s8656_s11 + $0x238] ss:$84 sps:$4 sm:$0xff]  }
 0x127   : > { %1893 = vmatprep.subr.bf16.mxu0 %v7052_v37  ;;  %1934 = vmatprep.subr.bf16.mxu1 %v7055_v38  ;;  %v1794_v37 = vand.u32 %v7127_v31, %v8654_v59  ;;  %v1785_v38 = vand.u32 %v7122_v33, %v8654_v59  ;;  %v7137_v47 = vld [vmem:[%s8656_s11 + $0x198] ss:$84 sps:$4 sm:$0xff]   ;;  %v7163_v6 = vld [vmem:[%s8656_s11 + $0x1a0] ss:$84 sps:$4 sm:$0xff]   ;;  %v7164_v8 = vld [vmem:[%s8656_s11 + $0x3f0] ss:$84 sps:$4 sm:$0xff]  }
 0x128   : > { %v7142_v48 = vld [vmem:[%s8656_s11 + $0xec] ss:$84 sps:$4 sm:$0xff]   ;;  %v7174_v10 = vld [vmem:[%s8656_s11 + $0x5f4] ss:$84 sps:$4 sm:$0x3f]  }
 0x129   : > { %v7160_v5 = vld [vmem:[%s8656_s11 + $0x498] ss:$84 sps:$4 sm:$0xff]   ;;  %v7192_v30 = vld [vmem:[%s8656_s11 + $0x3fc] ss:$84 sps:$4 sm:$0xff]   ;;  %v7193_v33 = vld [vmem:[%s8656_s11 + $0x400] ss:$84 sps:$4 sm:$0xff]  }
 0x12a   : > { %1894 = vmatpush1.bf16.msra.mxu0 %v7050_v39  ;;  %1935 = vmatpush1.bf16.msra.mxu1 %v7053_v40  ;;  %v1791_v39 = vand.u32 %v7125_v35, %v8654_v59  ;;  %v7130_v40 = vld [vmem:[%s8656_s11 + $0x23c] ss:$84 sps:$4 sm:$0xff]   ;;  %v7195_v31 = vld [vmem:[%s8656_s11 + $0x404] ss:$84 sps:$4 sm:$0xff]  }
 0x12b   : > { %1895 = vmatprep.subr.bf16.mxu0 %v7058_v41  ;;  %1936 = vmatprep.subr.bf16.mxu1 %v7061_v43  ;;  %v7133_v41 = vld [vmem:[%s8656_s11 + $0x244] ss:$84 sps:$4 sm:$0xff]   ;;  %v7131_v43 = vld [vmem:[%s8656_s11 + $0x240] ss:$84 sps:$4 sm:$0xff]   ;;  %v7201_v35 = vld [vmem:[%s8656_s11 + $0x35c] ss:$84 sps:$4 sm:$0xff]  }
 0x12e   : > { %1896 = vmatpush1.bf16.msra.mxu0 %v7056_v45  ;;  %1937 = vmatpush1.bf16.msra.mxu1 %v7059_v46  ;;  %v7139_v45 = vld [vmem:[%s8656_s11 + $0x19c] ss:$84 sps:$4 sm:$0xff]  }
 0x12f   : > { %1969 = vmatprep.subr.bf16.mxu0 %v1764_v49  ;;  %2010 = vmatprep.subr.bf16.mxu1 %v1770_v50  ;;  %v7134_v46 = vld [vmem:[%s8656_s11 + $0x190] ss:$84 sps:$4 sm:$0xff]   ;;  %v7145_v49 = vld [vmem:[%s8656_s11 + $0xf4] ss:$84 sps:$4 sm:$0xff]  }
 0x130   : > { %v7140_v50 = vld [vmem:[%s8656_s11 + $0xe8] ss:$84 sps:$4 sm:$0xff]  }
 0x131   : > { %6146 = vmatmul.mubr.msk.bf16.vlgmr.msra.gmra.mxu0 %vm1728_vm2, %v8691_v26  ;;  %6147 = vmatmul.mubr.msk.bf16.vlgmr.msra.gmra.mxu1 %vm1728_vm2, %v8691_v26 }
 0x132   : > { %1970 = vmatpush1.bf16.msra.mxu0 %v1761_v51  ;;  %2011 = vmatpush1.bf16.msra.mxu1 %v1767_v52  ;;  %v7143_v51 = vld [vmem:[%s8656_s11 + $0xf0] ss:$84 sps:$4 sm:$0xff]  }
 0x133   : > { %1971 = vmatprep.subr.bf16.mxu0 %v7070_v53  ;;  %2012 = vmatprep.subr.bf16.mxu1 %v7073_v54  ;;  %v7148_v52 = vld [vmem:[%s8656_s11 + $0x44] ss:$84 sps:$4 sm:$0xff]   ;;  %v7151_v53 = vld [vmem:[%s8656_s11 + $0x4c] ss:$84 sps:$4 sm:$0xff]  }
 0x134   : > { %1995 = vmatprep.mubr.bf16.mxu0 %v7681_v58  ;;  %2036 = vmatprep.mubr.bf16.mxu1 %v7681_v58  ;;  %v7154_v54 = vld [vmem:[%s8656_s11 + $0x5ec] ss:$84 sps:$4 sm:$0x3f]  }
 0x136   : > { %1972 = vmatpush1.bf16.msra.mxu0 %v7068_v55  ;;  %2013 = vmatpush1.bf16.msra.mxu1 %v7071_v56  ;;  %v7146_v55 = vld [vmem:[%s8656_s11 + $0x40] ss:$84 sps:$4 sm:$0xff]   ;;  %v7149_v56 = vld [vmem:[%s8656_s11 + $0x48] ss:$84 sps:$4 sm:$0xff]  }
 0x137   : > { %1973 = vmatprep.subr.bf16.mxu0 %v7076_v57  ;;  %2014 = vmatprep.subr.bf16.mxu1 %v7079_v60  ;;  %v7152_v57 = vld [vmem:[%s8656_s11 + $0x5e8] ss:$84 sps:$4 sm:$0x3f]   ;;  %v7155_v60 = vld [vmem:[%s8656_s11 + $0x2f0] ss:$84 sps:$4 sm:$0x3f]  }
 0x13a   : > { %1974 = vmatpush1.bf16.msra.mxu0 %v7074_v61  ;;  %2015 = vmatpush1.bf16.msra.mxu1 %v7077_v62  ;;  %v2873_v61 = vand.u32 %v7154_v54, %v8654_v59  ;;  %v1797_v62 = vand.u32 %v7155_v60, %v8654_v59  ;;  %v7225_v54 = vld [vmem:[%s8656_s11 + $0x414] ss:$84 sps:$4 sm:$0xff]   ;;  %v7231_v60 = vld [vmem:[%s8656_s11 + $0x36c] ss:$84 sps:$4 sm:$0xff]  }
 0x13b   : > { %1975 = vmatprep.subr.bf16.mxu0 %v7082_v63  ;;  %2016 = vmatprep.subr.bf16.mxu1 %v7085_v0  ;;  %v2870_v63 = vand.u32 %v7152_v57, %v8654_v59  ;;  %v7682_v0 = vmov 0.0   ;;  %v7228_v57 = vld [vmem:[%s8656_s11 + $0x364] ss:$84 sps:$4 sm:$0xff]  }
 0x13e   : > { %1976 = vmatpush1.bf16.msra.mxu0 %v7080_v1  ;;  %2017 = vmatpush1.bf16.msra.mxu1 %v7083_v2  ;;  %v7158_v1 = vld [vmem:[%s8656_s11 + $0x544] ss:$84 sps:$4 sm:$0xff]   ;;  %v7156_v2 = vld [vmem:[%s8656_s11 + $0x540] ss:$84 sps:$4 sm:$0xff]  }
 0x13f   : > { %1977 = vmatprep.subr.bf16.mxu0 %v7088_v3  ;;  %2018 = vmatprep.subr.bf16.mxu1 %v7091_v4  ;;  %v7159_v3 = vld [vmem:[%s8656_s11 + $0x248] ss:$84 sps:$4 sm:$0xff]  }
 0x140   : > { %v7162_v4 = vld [vmem:[%s8656_s11 + $0x49c] ss:$84 sps:$4 sm:$0xff]  }
 0x142   : > { %1978 = vmatpush1.bf16.msra.mxu0 %v7086_v7  ;;  %2019 = vmatpush1.bf16.msra.mxu1 %v7089_v9  ;;  %v7166_v7 = vld [vmem:[%s8656_s11 + $0x3f4] ss:$84 sps:$4 sm:$0xff]   ;;  %v7167_v9 = vld [vmem:[%s8656_s11 + $0xf8] ss:$84 sps:$4 sm:$0xff]  }
 0x143   : > { %2051 = vmatprep.subr.bf16.mxu0 %v1776_v11  ;;  %2092 = vmatprep.subr.bf16.mxu1 %v1782_v12  ;;  %v7170_v11 = vld [vmem:[%s8656_s11 + $0x34c] ss:$84 sps:$4 sm:$0xff]   ;;  %v7177_v12 = vld [vmem:[%s8656_s11 + $0x5fc] ss:$84 sps:$4 sm:$0x3f]  }
 0x145   : > { %6148 = vmatmul.mubr.msk.bf16.vlgmr.msra.gmra.mxu0 %vm1728_vm2, %v8691_v26  ;;  %6149 = vmatmul.mubr.msk.bf16.vlgmr.msra.gmra.mxu1 %vm1728_vm2, %v8691_v26 }
 0x146   : > { %2052 = vmatpush1.bf16.msra.mxu0 %v1773_v13  ;;  %2093 = vmatpush1.bf16.msra.mxu1 %v1779_v14  ;;  %v7168_v13 = vld [vmem:[%s8656_s11 + $0x348] ss:$84 sps:$4 sm:$0xff]   ;;  %v7172_v14 = vld [vmem:[%s8656_s11 + $0x5f0] ss:$84 sps:$4 sm:$0x3f]  }
 0x147   : > { %2053 = vmatprep.subr.bf16.mxu0 %v7100_v15  ;;  %2094 = vmatprep.subr.bf16.mxu1 %v7103_v16  ;;  %v7171_v15 = vld [vmem:[%s8656_s11 + $0x50] ss:$84 sps:$4 sm:$0xff]   ;;  %v7175_v16 = vld [vmem:[%s8656_s11 + $0x5f8] ss:$84 sps:$4 sm:$0x3f]  }
 0x148   : > { %2077 = vmatprep.mubr.bf16.mxu0 %v7681_v58  ;;  %2118 = vmatprep.mubr.bf16.mxu1 %v7681_v58 }
 0x14a   : > { %2054 = vmatpush1.bf16.msra.mxu0 %v7098_v17  ;;  %2095 = vmatpush1.bf16.msra.mxu1 %v7101_v18  ;;  %v2879_v17 = vand.u32 %v7174_v10, %v8654_v59  ;;  %v2885_v18 = vand.u32 %v7177_v12, %v8654_v59  ;;  %v8910_v10 = vld [vmem:[%s9587_s1] sm:$0x7]  ;;  %v7241_v12 = vld [vmem:[%s8656_s11 + $0x570] ss:$84 sps:$4 sm:$0xff]  }
 0x14b   : > { %2055 = vmatprep.subr.bf16.mxu0 %v7106_v19  ;;  %2096 = vmatprep.subr.bf16.mxu1 %v7109_v20  ;;  %v2876_v19 = vand.u32 %v7172_v14, %v8654_v59  ;;  %v2882_v20 = vand.u32 %v7175_v16, %v8654_v59  ;;  %v7249_v14 = vld [vmem:[%s8656_s11 + $0x4cc] ss:$84 sps:$4 sm:$0xff]   ;;  %v7247_v16 = vld [vmem:[%s8656_s11 + $0x4c8] ss:$84 sps:$4 sm:$0xff]  }
 0x14e   : > { %2056 = vmatpush1.bf16.msra.mxu0 %v7104_v21  ;;  %2097 = vmatpush1.bf16.msra.mxu1 %v7107_v22  ;;  %v7180_v21 = vld [vmem:[%s8656_s11 + $0x54c] ss:$84 sps:$4 sm:$0xff]   ;;  %v7183_v22 = vld [vmem:[%s8656_s11 + $0x554] ss:$84 sps:$4 sm:$0xff]  }
 0x14f   : > { %2057 = vmatprep.subr.bf16.mxu0 %v7112_v23  ;;  %2098 = vmatprep.subr.bf16.mxu1 %v7115_v24  ;;  %v7178_v23 = vld [vmem:[%s8656_s11 + $0x548] ss:$84 sps:$4 sm:$0xff]   ;;  %v7181_v24 = vld [vmem:[%s8656_s11 + $0x550] ss:$84 sps:$4 sm:$0xff]  }
 0x152   : > { %2058 = vmatpush1.bf16.msra.mxu0 %v7110_v25  ;;  %2099 = vmatpush1.bf16.msra.mxu1 %v7113_v27  ;;  %v7186_v25 = vld [vmem:[%s8656_s11 + $0x4a4] ss:$84 sps:$4 sm:$0xff]   ;;  %v7189_v27 = vld [vmem:[%s8656_s11 + $0x4ac] ss:$84 sps:$4 sm:$0xff]  }
 0x153   : > { %2059 = vmatprep.subr.bf16.mxu0 %v7118_v28  ;;  %2100 = vmatprep.subr.bf16.mxu1 %v7121_v29  ;;  %v7184_v28 = vld [vmem:[%s8656_s11 + $0x4a0] ss:$84 sps:$4 sm:$0xff]   ;;  %v7187_v29 = vld [vmem:[%s8656_s11 + $0x4a8] ss:$84 sps:$4 sm:$0xff]  }
 0x156   : > { %2060 = vmatpush1.bf16.msra.mxu0 %v7116_v32  ;;  %2101 = vmatpush1.bf16.msra.mxu1 %v7119_v34  ;;  %v7190_v32 = vld [vmem:[%s8656_s11 + $0x3f8] ss:$84 sps:$4 sm:$0xff]   ;;  %v7198_v34 = vld [vmem:[%s8656_s11 + $0x354] ss:$84 sps:$4 sm:$0xff]  }
 0x157   : > { %2133 = vmatprep.subr.bf16.mxu0 %v1788_v36  ;;  %2174 = vmatprep.subr.bf16.mxu1 %v1794_v37  ;;  %v7204_v36 = vld [vmem:[%s8656_s11 + $0x604] ss:$84 sps:$4 sm:$0x3f]   ;;  %v7207_v37 = vld [vmem:[%s8656_s11 + $0x60c] ss:$84 sps:$4 sm:$0x3f]  }
 0x159   : > { %6150 = vmatmul.mubr.msk.bf16.vlgmr.msra.gmra.mxu0 %vm1728_vm2, %v8691_v26  ;;  %6151 = vmatmul.mubr.msk.bf16.vlgmr.msra.gmra.mxu1 %vm1728_vm2, %v8691_v26 }
 0x15a   : > { %2134 = vmatpush1.bf16.msra.mxu0 %v1785_v38  ;;  %2175 = vmatpush1.bf16.msra.mxu1 %v1791_v39  ;;  %v7196_v38 = vld [vmem:[%s8656_s11 + $0x350] ss:$84 sps:$4 sm:$0xff]   ;;  %v7199_v39 = vld [vmem:[%s8656_s11 + $0x358] ss:$84 sps:$4 sm:$0xff]  }
 0x15b   : > { %2135 = vmatprep.subr.bf16.mxu0 %v7130_v40  ;;  %2176 = vmatprep.subr.bf16.mxu1 %v7133_v41  ;;  %v7202_v40 = vld [vmem:[%s8656_s11 + $0x600] ss:$84 sps:$4 sm:$0x3f]   ;;  %v7205_v41 = vld [vmem:[%s8656_s11 + $0x608] ss:$84 sps:$4 sm:$0x3f]  }
 0x15c   : > { %2159 = vmatprep.mubr.bf16.mxu0 %v7681_v58  ;;  %2200 = vmatprep.mubr.bf16.mxu1 %v7681_v58 }
 0x15e   : > { %2136 = vmatpush1.bf16.msra.mxu0 %v7128_v42  ;;  %2177 = vmatpush1.bf16.msra.mxu1 %v7131_v43  ;;  %v2891_v42 = vand.u32 %v7204_v36, %v8654_v59  ;;  %v2897_v43 = vand.u32 %v7207_v37, %v8654_v59  ;;  %v7268_v36 = vld [vmem:[%s8656_s11 + $0x578] ss:$84 sps:$4 sm:$0xff]   ;;  %v7271_v37 = vld [vmem:[%s8656_s11 + $0x580] ss:$84 sps:$4 sm:$0xff]  }
 0x15f   : > { %2137 = vmatprep.subr.bf16.mxu0 %v7136_v44  ;;  %2178 = vmatprep.subr.bf16.mxu1 %v7139_v45  ;;  %v2888_v44 = vand.u32 %v7202_v40, %v8654_v59  ;;  %v2894_v45 = vand.u32 %v7205_v41, %v8654_v59  ;;  %v7274_v40 = vld [vmem:[%s8656_s11 + $0x4d0] ss:$84 sps:$4 sm:$0xff]   ;;  %v7277_v41 = vld [vmem:[%s8656_s11 + $0x4d8] ss:$84 sps:$4 sm:$0xff]  }
 0x162   : > { %2138 = vmatpush1.bf16.msra.mxu0 %v7134_v46  ;;  %2179 = vmatpush1.bf16.msra.mxu1 %v7137_v47  ;;  %v7210_v46 = vld [vmem:[%s8656_s11 + $0x55c] ss:$84 sps:$4 sm:$0xff]   ;;  %v7213_v47 = vld [vmem:[%s8656_s11 + $0x564] ss:$84 sps:$4 sm:$0xff]  }
 0x163   : > { %2139 = vmatprep.subr.bf16.mxu0 %v7142_v48  ;;  %2180 = vmatprep.subr.bf16.mxu1 %v7145_v49  ;;  %v7208_v48 = vld [vmem:[%s8656_s11 + $0x558] ss:$84 sps:$4 sm:$0xff]   ;;  %v7211_v49 = vld [vmem:[%s8656_s11 + $0x560] ss:$84 sps:$4 sm:$0xff]  }
 0x166   : > { %2140 = vmatpush1.bf16.msra.mxu0 %v7140_v50  ;;  %2181 = vmatpush1.bf16.msra.mxu1 %v7143_v51  ;;  %v7216_v50 = vld [vmem:[%s8656_s11 + $0x4b4] ss:$84 sps:$4 sm:$0xff]   ;;  %v7219_v51 = vld [vmem:[%s8656_s11 + $0x4bc] ss:$84 sps:$4 sm:$0xff]  }
 0x167   : > { %2141 = vmatprep.subr.bf16.mxu0 %v7148_v52  ;;  %2182 = vmatprep.subr.bf16.mxu1 %v7151_v53  ;;  %v7214_v52 = vld [vmem:[%s8656_s11 + $0x4b0] ss:$84 sps:$4 sm:$0xff]   ;;  %v7222_v53 = vld [vmem:[%s8656_s11 + $0x40c] ss:$84 sps:$4 sm:$0xff]  }
 0x16a   : > { %2142 = vmatpush1.bf16.msra.mxu0 %v7146_v55  ;;  %2183 = vmatpush1.bf16.msra.mxu1 %v7149_v56  ;;  %v7220_v55 = vld [vmem:[%s8656_s11 + $0x408] ss:$84 sps:$4 sm:$0xff]   ;;  %v7223_v56 = vld [vmem:[%s8656_s11 + $0x410] ss:$84 sps:$4 sm:$0xff]  }
 0x16b   : > { %6881 = vmatprep.subr.bf16.mxu0 %v7682_v0  ;;  %2938 = vmatprep.subr.bf16.mxu1 %v2873_v61  ;;  %v7234_v61 = vld [vmem:[%s8656_s11 + $0x614] ss:$84 sps:$4 sm:$0x3f]  }
 0x16d   : > { %6152 = vmatmul.mubr.msk.bf16.vlgmr.msra.gmra.mxu0 %vm1728_vm2, %v8691_v26  ;;  %6153 = vmatmul.mubr.msk.bf16.vlgmr.msra.gmra.mxu1 %vm1728_vm2, %v8691_v26 }
 0x16e   : > { %6882 = vmatpush3.bf16.msra.mxu0 %v1797_v62  ;;  %2939 = vmatpush1.bf16.msra.mxu1 %v2870_v63  ;;  %v7237_v62 = vld [vmem:[%s8656_s11 + $0x61c] ss:$84 sps:$4 sm:$0x3f]   ;;  %v7226_v63 = vld [vmem:[%s8656_s11 + $0x360] ss:$84 sps:$4 sm:$0xff]  }
 0x16f   : > { %6883 = vmatprep.subr.bf16.mxu0 %v7682_v0  ;;  %2940 = vmatprep.subr.bf16.mxu1 %v7158_v1  ;;  %v7232_v1 = vld [vmem:[%s8656_s11 + $0x610] ss:$84 sps:$4 sm:$0x3f]  }
 0x170   : > { %6891 = vmatprep.mubr.msk.bf16.mxu0 %vm7683_vm3, %v7682_v0  ;;  %2964 = vmatprep.mubr.bf16.mxu1 %v7681_v58 }
 0x172   : > { %6884 = vmatpush3.bf16.msra.mxu0 %v7159_v3  ;;  %2941 = vmatpush1.bf16.msra.mxu1 %v7156_v2  ;;  %v7229_v2 = vld [vmem:[%s8656_s11 + $0x368] ss:$84 sps:$4 sm:$0xff]   ;;  %v7235_v3 = vld [vmem:[%s8656_s11 + $0x618] ss:$84 sps:$4 sm:$0x3f]  }
 0x173   : > { %6885 = vmatprep.subr.bf16.mxu0 %v7682_v0  ;;  %2942 = vmatprep.subr.bf16.mxu1 %v7162_v4  ;;  %v2903_v4 = vand.u32 %v7234_v61, %v8654_v59  ;;  %v7300_v61 = vld [vmem:[%s8656_s11 + $0x4e0] ss:$84 sps:$4 sm:$0xff]  }
 0x176   : > { %6886 = vmatpush3.bf16.msra.mxu0 %v7163_v6  ;;  %2943 = vmatpush1.bf16.msra.mxu1 %v7160_v5  ;;  %v2909_v5 = vand.u32 %v7237_v62, %v8654_v59  ;;  %v2900_v6 = vand.u32 %v7232_v1, %v8654_v59  ;;  %v7303_v62 = vld [vmem:[%s8656_s11 + $0x4e8] ss:$84 sps:$4 sm:$0xff]   ;;  %v7304_v1 = vld [vmem:[%s8656_s11 + $0x438] ss:$84 sps:$4 sm:$0xff]  }
 0x177   : > { %6887 = vmatprep.subr.bf16.mxu0 %v7682_v0  ;;  %2944 = vmatprep.subr.bf16.mxu1 %v7166_v7  ;;  %v2906_v7 = vand.u32 %v7235_v3, %v8654_v59  ;;  %v7310_v3 = vld [vmem:[%s8656_s11 + $0x394] ss:$84 sps:$4 sm:$0xff]  }
 0x17a   : > { %6888 = vmatpush3.bf16.msra.mxu0 %v7167_v9  ;;  %2945 = vmatpush1.bf16.msra.mxu1 %v7164_v8  ;;  %v7240_v8 = vld [vmem:[%s8656_s11 + $0x56c] ss:$84 sps:$4 sm:$0xff]   ;;  %v7243_v9 = vld [vmem:[%s8656_s11 + $0x574] ss:$84 sps:$4 sm:$0xff]  }
 0x17b   : > { %6889 = vmatprep.subr.bf16.mxu0 %v7682_v0  ;;  %2946 = vmatprep.subr.bf16.mxu1 %v7170_v11  ;;  %v7238_v11 = vld [vmem:[%s8656_s11 + $0x568] ss:$84 sps:$4 sm:$0xff]  }
 0x17e   : > { %6890 = vmatpush3.bf16.msra.mxu0 %v7171_v15  ;;  %2947 = vmatpush1.bf16.msra.mxu1 %v7168_v13  ;;  %v7246_v13 = vld [vmem:[%s8656_s11 + $0x4c4] ss:$84 sps:$4 sm:$0xff]   ;;  %v7244_v15 = vld [vmem:[%s8656_s11 + $0x4c0] ss:$84 sps:$4 sm:$0xff]  }
 0x17f   : > { %2979 = vmatprep.subr.bf16.mxu0 %v2879_v17  ;;  %3020 = vmatprep.subr.bf16.mxu1 %v2885_v18  ;;  %v7252_v17 = vld [vmem:[%s8656_s11 + $0x41c] ss:$84 sps:$4 sm:$0xff]   ;;  %v7255_v18 = vld [vmem:[%s8656_s11 + $0x424] ss:$84 sps:$4 sm:$0xff]  }
 0x181   : > { %6892 = vmatmul.mubr.msk.bf16.vlgmr.msra.gmra.mxu0 %vm1728_vm2, %v8691_v26  ;;  %6370 = vmatmul.mubr.msk.bf16.vlgmr.msra.gmra.mxu1 %vm1728_vm2, %v8691_v26 }
 0x182   : > { %2980 = vmatpush1.bf16.msra.mxu0 %v2876_v19  ;;  %3021 = vmatpush1.bf16.msra.mxu1 %v2882_v20  ;;  %v7250_v19 = vld [vmem:[%s8656_s11 + $0x418] ss:$84 sps:$4 sm:$0xff]   ;;  %v7253_v20 = vld [vmem:[%s8656_s11 + $0x420] ss:$84 sps:$4 sm:$0xff]  }
 0x183   : > { %2981 = vmatprep.subr.bf16.mxu0 %v7180_v21  ;;  %3022 = vmatprep.subr.bf16.mxu1 %v7183_v22  ;;  %v7258_v21 = vld [vmem:[%s8656_s11 + $0x374] ss:$84 sps:$4 sm:$0xff]   ;;  %v7261_v22 = vld [vmem:[%s8656_s11 + $0x37c] ss:$84 sps:$4 sm:$0xff]  }
 0x184   : > { %3005 = vmatprep.mubr.bf16.mxu0 %v7681_v58  ;;  %3046 = vmatprep.mubr.bf16.mxu1 %v7681_v58 }
 0x186   : > { %2982 = vmatpush1.bf16.msra.mxu0 %v7178_v23  ;;  %3023 = vmatpush1.bf16.msra.mxu1 %v7181_v24  ;;  %v7264_v23 = vld [vmem:[%s8656_s11 + $0x624] ss:$84 sps:$4 sm:$0x3f]   ;;  %v7267_v24 = vld [vmem:[%s8656_s11 + $0x62c] ss:$84 sps:$4 sm:$0x3f]  }
 0x187   : > { %2983 = vmatprep.subr.bf16.mxu0 %v7186_v25  ;;  %3024 = vmatprep.subr.bf16.mxu1 %v7189_v27  ;;  %v7256_v25 = vld [vmem:[%s8656_s11 + $0x370] ss:$84 sps:$4 sm:$0xff]   ;;  %v7259_v27 = vld [vmem:[%s8656_s11 + $0x378] ss:$84 sps:$4 sm:$0xff]  }
 0x18a   : > { %2984 = vmatpush1.bf16.msra.mxu0 %v7184_v28  ;;  %3025 = vmatpush1.bf16.msra.mxu1 %v7187_v29  ;;  %v7262_v28 = vld [vmem:[%s8656_s11 + $0x620] ss:$84 sps:$4 sm:$0x3f]   ;;  %v7265_v29 = vld [vmem:[%s8656_s11 + $0x628] ss:$84 sps:$4 sm:$0x3f]  }
 0x18b   : > { %2985 = vmatprep.subr.bf16.mxu0 %v7192_v30  ;;  %3026 = vmatprep.subr.bf16.mxu1 %v7195_v31  ;;  %v2915_v30 = vand.u32 %v7264_v23, %v8654_v59  ;;  %v2921_v31 = vand.u32 %v7267_v24, %v8654_v59  ;;  %v7323_v24 = vld [vmem:[%s8656_s11 + $0x894] ss:$84 sps:$4 sm:$0xff]  }
 0x18e   : > { %2986 = vmatpush1.bf16.msra.mxu0 %v7190_v32  ;;  %3027 = vmatpush1.bf16.msra.mxu1 %v7193_v33  ;;  %v2912_v32 = vand.u32 %v7262_v28, %v8654_v59  ;;  %v2918_v33 = vand.u32 %v7265_v29, %v8654_v59  ;;  %v7326_v28 = vld [vmem:[%s8656_s11 + $0x7e4] ss:$84 sps:$4 sm:$0xff]   ;;  %v7329_v29 = vld [vmem:[%s8656_s11 + $0x7ec] ss:$84 sps:$4 sm:$0xff]  }
 0x18f   : > { %2987 = vmatprep.subr.bf16.mxu0 %v7198_v34  ;;  %3028 = vmatprep.subr.bf16.mxu1 %v7201_v35  ;;  %v7270_v34 = vld [vmem:[%s8656_s11 + $0x57c] ss:$84 sps:$4 sm:$0xff]   ;;  %v7273_v35 = vld [vmem:[%s8656_s11 + $0x584] ss:$84 sps:$4 sm:$0xff]  }
 0x192   : > { %2988 = vmatpush1.bf16.msra.mxu0 %v7196_v38  ;;  %3029 = vmatpush1.bf16.msra.mxu1 %v7199_v39  ;;  %v7276_v38 = vld [vmem:[%s8656_s11 + $0x4d4] ss:$84 sps:$4 sm:$0xff]   ;;  %v7279_v39 = vld [vmem:[%s8656_s11 + $0x4dc] ss:$84 sps:$4 sm:$0xff]  }
 0x193   : > { %3061 = vmatprep.subr.bf16.mxu0 %v2891_v42  ;;  %3102 = vmatprep.subr.bf16.mxu1 %v2897_v43  ;;  %v7282_v42 = vld [vmem:[%s8656_s11 + $0x42c] ss:$84 sps:$4 sm:$0xff]   ;;  %v7285_v43 = vld [vmem:[%s8656_s11 + $0x434] ss:$84 sps:$4 sm:$0xff]  }
 0x195   : > { %6371 = vmatmul.mubr.msk.bf16.vlgmr.msra.gmra.mxu0 %vm1728_vm2, %v8691_v26  ;;  %6372 = vmatmul.mubr.msk.bf16.vlgmr.msra.gmra.mxu1 %vm1728_vm2, %v8691_v26  ;;  %v7217_v26 = vld [vmem:[%s8656_s11 + $0x4b8] ss:$84 sps:$4 sm:$0xff]  }
 0x196   : > { %3062 = vmatpush1.bf16.msra.mxu0 %v2888_v44  ;;  %3103 = vmatpush1.bf16.msra.mxu1 %v2894_v45  ;;  %v7280_v44 = vld [vmem:[%s8656_s11 + $0x428] ss:$84 sps:$4 sm:$0xff]   ;;  %v7283_v45 = vld [vmem:[%s8656_s11 + $0x430] ss:$84 sps:$4 sm:$0xff]  }
 0x197   : > { %3063 = vmatprep.subr.bf16.mxu0 %v7210_v46  ;;  %3104 = vmatprep.subr.bf16.mxu1 %v7213_v47  ;;  %v7288_v46 = vld [vmem:[%s8656_s11 + $0x384] ss:$84 sps:$4 sm:$0xff]   ;;  %v7291_v47 = vld [vmem:[%s8656_s11 + $0x38c] ss:$84 sps:$4 sm:$0xff]  }
 0x198   : > { %3087 = vmatprep.mubr.bf16.mxu0 %v7681_v58  ;;  %3128 = vmatprep.mubr.bf16.mxu1 %v7681_v58 }
 0x19a   : > { %3064 = vmatpush1.bf16.msra.mxu0 %v7208_v48  ;;  %3105 = vmatpush1.bf16.msra.mxu1 %v7211_v49  ;;  %v7294_v48 = vld [vmem:[%s8656_s11 + $0x634] ss:$84 sps:$4 sm:$0x3f]  }
 0x19b   : > { %3065 = vmatprep.subr.bf16.mxu0 %v7216_v50  ;;  %3106 = vmatprep.subr.bf16.mxu1 %v7219_v51  ;;  %v7286_v49 = vld [vmem:[%s8656_s11 + $0x380] ss:$84 sps:$4 sm:$0xff]   ;;  %v7292_v50 = vld [vmem:[%s8656_s11 + $0x630] ss:$84 sps:$4 sm:$0x3f]  }
 0x19c   : > { %v7289_v51 = vld [vmem:[%s8656_s11 + $0x388] ss:$84 sps:$4 sm:$0xff]  }
 0x19e   : > { %3066 = vmatpush1.bf16.msra.mxu0 %v7214_v52  ;;  %3107 = vmatpush1.bf16.msra.mxu1 %v7217_v26  ;;  %v7295_v52 = vld [vmem:[%s8656_s11 + $0x638] ss:$84 sps:$4 sm:$0x3f]   ;;  %v2927_v26 = vand.u32 %v7294_v48, %v8654_v59 }
 0x19f   : > { %3067 = vmatprep.subr.bf16.mxu0 %v7222_v53  ;;  %3108 = vmatprep.subr.bf16.mxu1 %v7225_v54  ;;  %v2924_v53 = vand.u32 %v7292_v50, %v8654_v59  ;;  %v2930_v54 = vand.u32 %v7295_v52, %v8654_v59 }
 0x1a2   : > { %3068 = vmatpush1.bf16.msra.mxu0 %v7220_v55  ;;  %3109 = vmatpush1.bf16.msra.mxu1 %v7223_v56  ;;  %v7298_v55 = vld [vmem:[%s8656_s11 + $0x58c] ss:$84 sps:$4 sm:$0xff]   ;;  %v7296_v56 = vld [vmem:[%s8656_s11 + $0x588] ss:$84 sps:$4 sm:$0xff]  }
 0x1a3   : > { %3069 = vmatprep.subr.bf16.mxu0 %v7228_v57  ;;  %3110 = vmatprep.subr.bf16.mxu1 %v7231_v60  ;;  %v7299_v57 = vld [vmem:[%s8656_s11 + $0x590] ss:$84 sps:$4 sm:$0xff]  }
 0x1a4   : > { %v7302_v60 = vld [vmem:[%s8656_s11 + $0x4e4] ss:$84 sps:$4 sm:$0xff]  }
 0x1a6   : > { %3070 = vmatpush1.bf16.msra.mxu0 %v7226_v63  ;;  %3111 = vmatpush1.bf16.msra.mxu1 %v7229_v2  ;;  %v7306_v63 = vld [vmem:[%s8656_s11 + $0x43c] ss:$84 sps:$4 sm:$0xff]   ;;  %v7307_v2 = vld [vmem:[%s8656_s11 + $0x440] ss:$84 sps:$4 sm:$0xff]  }
 0x1a7   : > { %3143 = vmatprep.subr.bf16.mxu0 %v2903_v4  ;;  %3184 = vmatprep.subr.bf16.mxu1 %v2909_v5  ;;  %v7314_v4 = vld [vmem:[%s8656_s11 + $0x934] ss:$84 sps:$4 sm:$0x3f]   ;;  %v7317_v5 = vld [vmem:[%s8656_s11 + $0x93c] ss:$84 sps:$4 sm:$0x3f]  }
 0x1a9   : > { %6373 = vmatmul.mubr.msk.bf16.vlgmr.msra.gmra.mxu0 %vm1728_vm2, %v8910_v10  ;;  %6374 = vmatmul.mubr.msk.bf16.vlgmr.msra.gmra.mxu1 %vm1728_vm2, %v8910_v10 }
 0x1aa   : > { %3144 = vmatpush1.bf16.msra.mxu0 %v2900_v6  ;;  %3185 = vmatpush1.bf16.msra.mxu1 %v2906_v7  ;;  %v7308_v6 = vld [vmem:[%s8656_s11 + $0x390] ss:$84 sps:$4 sm:$0xff]   ;;  %v7311_v7 = vld [vmem:[%s8656_s11 + $0x398] ss:$84 sps:$4 sm:$0xff]  }
 0x1ab   : > { %3145 = vmatprep.subr.bf16.mxu0 %v7240_v8  ;;  %3186 = vmatprep.subr.bf16.mxu1 %v7243_v9 }
 0x1ac   : > { %3169 = vmatprep.mubr.bf16.mxu0 %v7681_v58  ;;  %3210 = vmatprep.mubr.bf16.mxu1 %v7681_v58 }
 0x1ae   : > { %3146 = vmatpush1.bf16.msra.mxu0 %v7238_v11  ;;  %3187 = vmatpush1.bf16.msra.mxu1 %v7241_v12  ;;  %v7312_v11 = vld [vmem:[%s8656_s11 + $0x930] ss:$84 sps:$4 sm:$0x3f]   ;;  %v7315_v12 = vld [vmem:[%s8656_s11 + $0x938] ss:$84 sps:$4 sm:$0x3f]  }
 0x1af   : > { %3147 = vmatprep.subr.bf16.mxu0 %v7246_v13  ;;  %3188 = vmatprep.subr.bf16.mxu1 %v7249_v14 }
 0x1b2   : > { %3148 = vmatpush1.bf16.msra.mxu0 %v7244_v15  ;;  %3189 = vmatpush1.bf16.msra.mxu1 %v7247_v16  ;;  %v4027_v15 = vand.u32 %v7314_v4, %v8654_v59  ;;  %v4033_v16 = vand.u32 %v7317_v5, %v8654_v59  ;;  %v7360_v4 = vld [vmem:[%s8656_s11 + $0x748] ss:$84 sps:$4 sm:$0xff]   ;;  %v7363_v5 = vld [vmem:[%s8656_s11 + $0x750] ss:$84 sps:$4 sm:$0xff]  }
 0x1b3   : > { %3149 = vmatprep.subr.bf16.mxu0 %v7252_v17  ;;  %3190 = vmatprep.subr.bf16.mxu1 %v7255_v18 }
 0x1b6   : > { %3150 = vmatpush1.bf16.msra.mxu0 %v7250_v19  ;;  %3191 = vmatpush1.bf16.msra.mxu1 %v7253_v20  ;;  %v4024_v19 = vand.u32 %v7312_v11, %v8654_v59  ;;  %v4030_v20 = vand.u32 %v7315_v12, %v8654_v59  ;;  %v7374_v11 = vld [vmem:[%s8656_s11 + $0x954] ss:$84 sps:$4 sm:$0x3f]   ;;  %v7377_v12 = vld [vmem:[%s8656_s11 + $0x95c] ss:$84 sps:$4 sm:$0x3f]  }
 0x1b7   : > { %3151 = vmatprep.subr.bf16.mxu0 %v7258_v21  ;;  %3192 = vmatprep.subr.bf16.mxu1 %v7261_v22  ;;  %v7320_v21 = vld [vmem:[%s8656_s11 + $0x88c] ss:$84 sps:$4 sm:$0xff]  }
 0x1ba   : > { %3152 = vmatpush1.bf16.msra.mxu0 %v7256_v25  ;;  %3193 = vmatpush1.bf16.msra.mxu1 %v7259_v27  ;;  %v7318_v25 = vld [vmem:[%s8656_s11 + $0x888] ss:$84 sps:$4 sm:$0xff]   ;;  %v7321_v27 = vld [vmem:[%s8656_s11 + $0x890] ss:$84 sps:$4 sm:$0xff]  }
 0x1bb   : > { %3225 = vmatprep.subr.bf16.mxu0 %v2915_v30  ;;  %3266 = vmatprep.subr.bf16.mxu1 %v2921_v31  ;;  %v7324_v30 = vld [vmem:[%s8656_s11 + $0x7e0] ss:$84 sps:$4 sm:$0xff]   ;;  %v7327_v31 = vld [vmem:[%s8656_s11 + $0x7e8] ss:$84 sps:$4 sm:$0xff]  }
 0x1bd   : > { %6375 = vmatmul.mubr.msk.bf16.vlgmr.msra.gmra.mxu0 %vm1728_vm2, %v8910_v10  ;;  %6376 = vmatmul.mubr.msk.bf16.vlgmr.msra.gmra.mxu1 %vm1728_vm2, %v8910_v10 }
 0x1be   : > { %3226 = vmatpush1.bf16.msra.mxu0 %v2912_v32  ;;  %3267 = vmatpush1.bf16.msra.mxu1 %v2918_v33  ;;  %v7332_v32 = vld [vmem:[%s8656_s11 + $0x73c] ss:$84 sps:$4 sm:$0xff]   ;;  %v7335_v33 = vld [vmem:[%s8656_s11 + $0x744] ss:$84 sps:$4 sm:$0xff]  }
 0x1bf   : > { %3227 = vmatprep.subr.bf16.mxu0 %v7270_v34  ;;  %3268 = vmatprep.subr.bf16.mxu1 %v7273_v35  ;;  %v7330_v34 = vld [vmem:[%s8656_s11 + $0x738] ss:$84 sps:$4 sm:$0xff]   ;;  %v7333_v35 = vld [vmem:[%s8656_s11 + $0x740] ss:$84 sps:$4 sm:$0xff]  }
 0x1c0   : > { %3251 = vmatprep.mubr.bf16.mxu0 %v7681_v58  ;;  %3292 = vmatprep.mubr.bf16.mxu1 %v7681_v58 }
 0x1c2   : > { %3228 = vmatpush1.bf16.msra.mxu0 %v7268_v36  ;;  %3269 = vmatpush1.bf16.msra.mxu1 %v7271_v37  ;;  %v7338_v36 = vld [vmem:[%s8656_s11 + $0x694] ss:$84 sps:$4 sm:$0xff]   ;;  %v7341_v37 = vld [vmem:[%s8656_s11 + $0x69c] ss:$84 sps:$4 sm:$0xff]  }
 0x1c3   : > { %3229 = vmatprep.subr.bf16.mxu0 %v7276_v38  ;;  %3270 = vmatprep.subr.bf16.mxu1 %v7279_v39  ;;  %v7344_v38 = vld [vmem:[%s8656_s11 + $0x944] ss:$84 sps:$4 sm:$0x3f]   ;;  %v7347_v39 = vld [vmem:[%s8656_s11 + $0x94c] ss:$84 sps:$4 sm:$0x3f]  }
 0x1c4   : > { %v4039_v48 = vand.u32 %v7344_v38, %v8654_v59  ;;  %v7384_v38 = vld [vmem:[%s8656_s11 + $0x800] ss:$84 sps:$4 sm:$0xff]  }
 0x1c6   : > { %3230 = vmatpush1.bf16.msra.mxu0 %v7274_v40  ;;  %3271 = vmatpush1.bf16.msra.mxu1 %v7277_v41 }
 0x1c7   : > { %3231 = vmatprep.subr.bf16.mxu0 %v7282_v42  ;;  %3272 = vmatprep.subr.bf16.mxu1 %v7285_v43  ;;  %v7336_v42 = vld [vmem:[%s8656_s11 + $0x690] ss:$84 sps:$4 sm:$0xff]   ;;  %v7342_v43 = vld [vmem:[%s8656_s11 + $0x940] ss:$84 sps:$4 sm:$0x3f]  }
 0x1c8   : > { %v4036_v52 = vand.u32 %v7342_v43, %v8654_v59  ;;  %v7395_v43 = vld [vmem:[%s8656_s11 + $0x764] ss:$84 sps:$4 sm:$0xff]  }
 0x1ca   : > { %3232 = vmatpush1.bf16.msra.mxu0 %v7280_v44  ;;  %3273 = vmatpush1.bf16.msra.mxu1 %v7283_v45  ;;  %v7339_v44 = vld [vmem:[%s8656_s11 + $0x698] ss:$84 sps:$4 sm:$0xff]   ;;  %v7345_v45 = vld [vmem:[%s8656_s11 + $0x948] ss:$84 sps:$4 sm:$0x3f]  }
 0x1cb   : > { %3233 = vmatprep.subr.bf16.mxu0 %v7288_v46  ;;  %3274 = vmatprep.subr.bf16.mxu1 %v7291_v47 }
 0x1ce   : > { %3234 = vmatpush1.bf16.msra.mxu0 %v7286_v49  ;;  %3275 = vmatpush1.bf16.msra.mxu1 %v7289_v51  ;;  %v4045_v49 = vand.u32 %v7347_v39, %v8654_v59  ;;  %v7387_v39 = vld [vmem:[%s8656_s11 + $0x808] ss:$84 sps:$4 sm:$0xff]  }
 0x1cf   : > { %3307 = vmatprep.subr.bf16.mxu0 %v2927_v26  ;;  %6895 = vmatprep.subr.bf16.mxu1 %v7682_v0  ;;  %v4042_v26 = vand.u32 %v7345_v45, %v8654_v59  ;;  %v7393_v45 = vld [vmem:[%s8656_s11 + $0x760] ss:$84 sps:$4 sm:$0xff]  }
 0x1d1   : > { %6377 = vmatmul.mubr.msk.bf16.vlgmr.msra.gmra.mxu0 %vm1728_vm2, %v8910_v10  ;;  %6378 = vmatmul.mubr.msk.bf16.vlgmr.msra.gmra.mxu1 %vm1728_vm2, %v8910_v10 }
 0x1d2   : > { %3308 = vmatpush1.bf16.msra.mxu0 %v2924_v53  ;;  %6896 = vmatpush3.bf16.msra.mxu1 %v2930_v54  ;;  %v7350_v53 = vld [vmem:[%s8656_s11 + $0x89c] ss:$84 sps:$4 sm:$0xff]  }
 0x1d3   : > { %3309 = vmatprep.subr.bf16.mxu0 %v7298_v55  ;;  %6897 = vmatprep.subr.bf16.mxu1 %v7682_v0 }
 0x1d4   : > { %3333 = vmatprep.mubr.bf16.mxu0 %v7681_v58  ;;  %6905 = vmatprep.mubr.msk.bf16.mxu1 %vm7683_vm3, %v7682_v0 }
 0x1d6   : > { %3310 = vmatpush1.bf16.msra.mxu0 %v7296_v56  ;;  %6898 = vmatpush3.bf16.msra.mxu1 %v7299_v57  ;;  %v7353_v56 = vld [vmem:[%s8656_s11 + $0x8a4] ss:$84 sps:$4 sm:$0xff]  }
 0x1d7   : > { %3311 = vmatprep.subr.bf16.mxu0 %v7302_v60  ;;  %6899 = vmatprep.subr.bf16.mxu1 %v7682_v0  ;;  %v7348_v57 = vld [vmem:[%s8656_s11 + $0x898] ss:$84 sps:$4 sm:$0xff]   ;;  %v7351_v60 = vld [vmem:[%s8656_s11 + $0x8a0] ss:$84 sps:$4 sm:$0xff]  }
 0x1da   : > { %3312 = vmatpush1.bf16.msra.mxu0 %v7300_v61  ;;  %6900 = vmatpush3.bf16.msra.mxu1 %v7303_v62  ;;  %v7356_v61 = vld [vmem:[%s8656_s11 + $0x7f4] ss:$84 sps:$4 sm:$0xff]   ;;  %v7359_v62 = vld [vmem:[%s8656_s11 + $0x7fc] ss:$84 sps:$4 sm:$0xff]  }
 0x1db   : > { %3313 = vmatprep.subr.bf16.mxu0 %v7306_v63  ;;  %6901 = vmatprep.subr.bf16.mxu1 %v7682_v0  ;;  %v7354_v63 = vld [vmem:[%s8656_s11 + $0x7f0] ss:$84 sps:$4 sm:$0xff]  }
 0x1dd   : > { %v8993_v8 = vpop.f32.mrf.mxu0  ;;  %v8995_v9 = vpop.f32.mrf.mxu1 }
 0x1de   : > { %3314 = vmatpush1.bf16.msra.mxu0 %v7304_v1  ;;  %6902 = vmatpush3.bf16.msra.mxu1 %v7307_v2  ;;  %v7357_v1 = vld [vmem:[%s8656_s11 + $0x7f8] ss:$84 sps:$4 sm:$0xff]  }
 0x1df   : > { %v8999_v13 = vpop.f32.mrf.mxu0  ;;  %v9001_v14 = vpop.f32.mrf.mxu1  ;;  %3315 = vmatprep.subr.bf16.mxu0 %v7310_v3  ;;  %6903 = vmatprep.subr.bf16.mxu1 %v7682_v0  ;;  %v7362_v2 = vld [vmem:[%s8656_s11 + $0x74c] ss:$84 sps:$4 sm:$0xff]   ;;  %v7365_v3 = vld [vmem:[%s8656_s11 + $0x754] ss:$84 sps:$4 sm:$0xff]  }
 0x1e1   : > { %v1837_v17 = vpop.f32.mrf.mxu0  ;;  %v1878_v18 = vpop.f32.mrf.mxu1 }
 0x1e2   : > { %3316 = vmatpush1.bf16.msra.mxu0 %v7308_v6  ;;  %6904 = vmatpush3.bf16.msra.mxu1 %v7311_v7  ;;  %v7368_v6 = vld [vmem:[%s8656_s11 + $0x6a4] ss:$84 sps:$4 sm:$0xff]   ;;  %v7371_v7 = vld [vmem:[%s8656_s11 + $0x6ac] ss:$84 sps:$4 sm:$0xff]  }
 0x1e3   : > { %v1838_v22 = vpop.f32.mrf.mxu0  ;;  %v1879_v23 = vpop.f32.mrf.mxu1  ;;  %4092 = vmatprep.subr.bf16.mxu0 %v4027_v15  ;;  %4133 = vmatprep.subr.bf16.mxu1 %v4033_v16  ;;  %v7366_v15 = vld [vmem:[%s8656_s11 + $0x6a0] ss:$84 sps:$4 sm:$0xff]   ;;  %v7372_v16 = vld [vmem:[%s8656_s11 + $0x950] ss:$84 sps:$4 sm:$0x3f]  }
 0x1e4   : > { %v4051_v23 = vand.u32 %v7374_v11, %v8654_v59  ;;  %v7408_v11 = vld [vmem:[%s8656_s11 + $0x8b8] ss:$84 sps:$4 sm:$0xff]  }
 0x1e5   : > { %6379 = vmatmul.mubr.msk.bf16.vlgmr.msra.gmra.mxu0 %vm1728_vm2, %v8910_v10  ;;  %6906 = vmatmul.mubr.msk.bf16.vlgmr.msra.gmra.mxu1 %vm1728_vm2, %v8910_v10 }
 0x1e6   : > { %4093 = vmatpush1.bf16.msra.mxu0 %v4024_v19  ;;  %4134 = vmatpush1.bf16.msra.mxu1 %v4030_v20  ;;  %v7369_v19 = vld [vmem:[%s8656_s11 + $0x6a8] ss:$84 sps:$4 sm:$0xff]   ;;  %v7375_v20 = vld [vmem:[%s8656_s11 + $0x958] ss:$84 sps:$4 sm:$0x3f]  }
 0x1e7   : > { %4094 = vmatprep.subr.bf16.mxu0 %v7320_v21  ;;  %4135 = vmatprep.subr.bf16.mxu1 %v7323_v24  ;;  %v4057_v24 = vand.u32 %v7377_v12, %v8654_v59  ;;  %v7411_v12 = vld [vmem:[%s8656_s11 + $0x8c0] ss:$84 sps:$4 sm:$0xff]  }
 0x1e8   : > { %4118 = vmatprep.mubr.bf16.mxu0 %v7681_v58  ;;  %4159 = vmatprep.mubr.bf16.mxu1 %v7681_v58 }
 0x1ea   : > { %4095 = vmatpush1.bf16.msra.mxu0 %v7318_v25  ;;  %4136 = vmatpush1.bf16.msra.mxu1 %v7321_v27 }
 0x1eb   : > { %4096 = vmatprep.subr.bf16.mxu0 %v7326_v28  ;;  %4137 = vmatprep.subr.bf16.mxu1 %v7329_v29  ;;  %v4048_v28 = vand.u32 %v7372_v16, %v8654_v59  ;;  %v4054_v29 = vand.u32 %v7375_v20, %v8654_v59  ;;  %v7416_v16 = vld [vmem:[%s8656_s11 + $0x814] ss:$84 sps:$4 sm:$0xff]   ;;  %v7417_v20 = vld [vmem:[%s8656_s11 + $0x818] ss:$84 sps:$4 sm:$0xff]  }
 0x1ee   : > { %4097 = vmatpush1.bf16.msra.mxu0 %v7324_v30  ;;  %4138 = vmatpush1.bf16.msra.mxu1 %v7327_v31 }
 0x1ef   : > { %4098 = vmatprep.subr.bf16.mxu0 %v7332_v32  ;;  %4139 = vmatprep.subr.bf16.mxu1 %v7335_v33  ;;  %v7380_v32 = vld [vmem:[%s8656_s11 + $0x8ac] ss:$84 sps:$4 sm:$0xff]   ;;  %v7383_v33 = vld [vmem:[%s8656_s11 + $0x8b4] ss:$84 sps:$4 sm:$0xff]  }
 0x1f1   : > { %v9030_v40 = vpop.f32.mrf.mxu0  ;;  %v9032_v41 = vpop.f32.mrf.mxu1 }
 0x1f2   : > { %4099 = vmatpush1.bf16.msra.mxu0 %v7330_v34  ;;  %4140 = vmatpush1.bf16.msra.mxu1 %v7333_v35  ;;  %v7378_v34 = vld [vmem:[%s8656_s11 + $0x8a8] ss:$84 sps:$4 sm:$0xff]   ;;  %v7381_v35 = vld [vmem:[%s8656_s11 + $0x8b0] ss:$84 sps:$4 sm:$0xff]  }
 0x1f3   : > { %v9038_v46 = vpop.f32.mrf.mxu0  ;;  %v9040_v47 = vpop.f32.mrf.mxu1  ;;  %4100 = vmatprep.subr.bf16.mxu0 %v7338_v36  ;;  %4141 = vmatprep.subr.bf16.mxu1 %v7341_v37  ;;  %v7386_v36 = vld [vmem:[%s8656_s11 + $0x804] ss:$84 sps:$4 sm:$0xff]   ;;  %v7389_v37 = vld [vmem:[%s8656_s11 + $0x80c] ss:$84 sps:$4 sm:$0xff]  }
 0x1f5   : > { %v1919_v50 = vpop.f32.mrf.mxu0  ;;  %v1960_v51 = vpop.f32.mrf.mxu1 }
 0x1f6   : > { %4101 = vmatpush1.bf16.msra.mxu0 %v7336_v42  ;;  %4142 = vmatpush1.bf16.msra.mxu1 %v7339_v44  ;;  %v7392_v42 = vld [vmem:[%s8656_s11 + $0x75c] ss:$84 sps:$4 sm:$0xff]   ;;  %v7390_v44 = vld [vmem:[%s8656_s11 + $0x758] ss:$84 sps:$4 sm:$0xff]  }
 0x1f7   : > { %v1920_v54 = vpop.f32.mrf.mxu0  ;;  %v1961_v55 = vpop.f32.mrf.mxu1  ;;  %4174 = vmatprep.subr.bf16.mxu0 %v4039_v48  ;;  %4215 = vmatprep.subr.bf16.mxu1 %v4045_v49  ;;  %v7398_v48 = vld [vmem:[%s8656_s11 + $0x6b4] ss:$84 sps:$4 sm:$0xff]   ;;  %v7401_v49 = vld [vmem:[%s8656_s11 + $0x6bc] ss:$84 sps:$4 sm:$0xff]  }
 0x1f8   : > { %v7404_v50 = vld [vmem:[%s8656_s11 + $0x964] ss:$84 sps:$4 sm:$0x3f]   ;;  %v7407_v51 = vld [vmem:[%s8656_s11 + $0x96c] ss:$84 sps:$4 sm:$0x3f]  }
 0x1f9   : > { %6596 = vmatmul.mubr.msk.bf16.vlgmr.msra.gmra.mxu0 %vm1728_vm2, %v8910_v10  ;;  %6597 = vmatmul.mubr.msk.bf16.vlgmr.msra.gmra.mxu1 %vm1728_vm2, %v8910_v10  ;;  %v7399_v55 = vld [vmem:[%s8656_s11 + $0x6b8] ss:$84 sps:$4 sm:$0xff]  }
 0x1fa   : > { %4175 = vmatpush1.bf16.msra.mxu0 %v4036_v52  ;;  %4216 = vmatpush1.bf16.msra.mxu1 %v4042_v26  ;;  %v7396_v52 = vld [vmem:[%s8656_s11 + $0x6b0] ss:$84 sps:$4 sm:$0xff]   ;;  %v7402_v26 = vld [vmem:[%s8656_s11 + $0x960] ss:$84 sps:$4 sm:$0x3f]  }
 0x1fb   : > { %4176 = vmatprep.subr.bf16.mxu0 %v7350_v53  ;;  %4217 = vmatprep.subr.bf16.mxu1 %v7353_v56  ;;  %v7405_v56 = vld [vmem:[%s8656_s11 + $0x968] ss:$84 sps:$4 sm:$0x3f]  }
 0x1fc   : > { %4200 = vmatprep.mubr.bf16.mxu0 %v7681_v58  ;;  %4241 = vmatprep.mubr.bf16.mxu1 %v7681_v58 }
 0x1fe   : > { %4177 = vmatpush1.bf16.msra.mxu0 %v7348_v57  ;;  %4218 = vmatpush1.bf16.msra.mxu1 %v7351_v60 }
 0x1ff   : > { %4178 = vmatprep.subr.bf16.mxu0 %v7356_v61  ;;  %4219 = vmatprep.subr.bf16.mxu1 %v7359_v62  ;;  %v4063_v61 = vand.u32 %v7404_v50, %v8654_v59  ;;  %v4069_v62 = vand.u32 %v7407_v51, %v8654_v59 }
 0x202   : > { %4179 = vmatpush1.bf16.msra.mxu0 %v7354_v63  ;;  %4220 = vmatpush1.bf16.msra.mxu1 %v7357_v1 }
 0x203   : > { %4180 = vmatprep.subr.bf16.mxu0 %v7362_v2  ;;  %4221 = vmatprep.subr.bf16.mxu1 %v7365_v3  ;;  %v4060_v2 = vand.u32 %v7402_v26, %v8654_v59  ;;  %v4066_v3 = vand.u32 %v7405_v56, %v8654_v59  ;;  %v7443_v26 = vld [vmem:[%s8656_s11 + $0x8d4] ss:$84 sps:$4 sm:$0xff]  }
 0x204   : > { %v7438_v56 = vld [vmem:[%s8656_s11 + $0x8c8] ss:$84 sps:$4 sm:$0xff]  }
 0x205   : > { %v9070_v17 = vpop.f32.mrf.mxu0  ;;  %v9072_v18 = vpop.f32.mrf.mxu1 }
 0x206   : > { %4181 = vmatpush1.bf16.msra.mxu0 %v7360_v4  ;;  %4222 = vmatpush1.bf16.msra.mxu1 %v7363_v5 }
 0x207   : > { %v9076_v21 = vpop.f32.mrf.mxu0  ;;  %v9078_v22 = vpop.f32.mrf.mxu1  ;;  %4182 = vmatprep.subr.bf16.mxu0 %v7368_v6  ;;  %4223 = vmatprep.subr.bf16.mxu1 %v7371_v7  ;;  %v7410_v6 = vld [vmem:[%s8656_s11 + $0x8bc] ss:$84 sps:$4 sm:$0xff]   ;;  %v7413_v7 = vld [vmem:[%s8656_s11 + $0x8c4] ss:$84 sps:$4 sm:$0xff]  }
 0x209   : > { %v2001_v25 = vpop.f32.mrf.mxu0  ;;  %v2042_v27 = vpop.f32.mrf.mxu1 }
 0x20a   : > { %4183 = vmatpush1.bf16.msra.mxu0 %v7366_v15  ;;  %4224 = vmatpush1.bf16.msra.mxu1 %v7369_v19  ;;  %v5711_v15 = vld [vmem:[%s9588_s2] sm:$0x3f]  ;;  %v7419_v19 = vld [vmem:[%s8656_s11 + $0x81c] ss:$84 sps:$4 sm:$0xff]  }
 0x20b   : > { %v2002_v30 = vpop.f32.mrf.mxu0  ;;  %v2043_v31 = vpop.f32.mrf.mxu1  ;;  %4256 = vmatprep.subr.bf16.mxu0 %v4051_v23  ;;  %4297 = vmatprep.subr.bf16.mxu1 %v4057_v24  ;;  %v7422_v23 = vld [vmem:[%s8656_s11 + $0x76c] ss:$84 sps:$4 sm:$0xff]   ;;  %v7425_v24 = vld [vmem:[%s8656_s11 + $0x774] ss:$84 sps:$4 sm:$0xff]   ;;  %v7423_v27 = vld [vmem:[%s8656_s11 + $0x770] ss:$84 sps:$4 sm:$0xff]  }
 0x20c   : > { %5714 = vperm.xlu0 %7001, %v5711_v15   ;;  %v7420_v25 = vld [vmem:[%s8656_s11 + $0x768] ss:$84 sps:$4 sm:$0xff]  }
 0x20d   : > { %6598 = vmatmul.mubr.msk.bf16.vlgmr.msra.gmra.mxu0 %vm1728_vm2, %v8910_v10  ;;  %6599 = vmatmul.mubr.msk.bf16.vlgmr.msra.gmra.mxu1 %vm1728_vm2, %v8910_v10  ;;  %v7434_v30 = vld [vmem:[%s8656_s11 + $0x974] ss:$84 sps:$4 sm:$0x3f]   ;;  %v7437_v31 = vld [vmem:[%s8656_s11 + $0x97c] ss:$84 sps:$4 sm:$0x3f]  }
 0x20e   : > { %4257 = vmatpush1.bf16.msra.mxu0 %v4048_v28  ;;  %4298 = vmatpush1.bf16.msra.mxu1 %v4054_v29  ;;  %v7428_v28 = vld [vmem:[%s8656_s11 + $0x6c4] ss:$84 sps:$4 sm:$0xff]   ;;  %v7431_v29 = vld [vmem:[%s8656_s11 + $0x6cc] ss:$84 sps:$4 sm:$0xff]  }
 0x20f   : > { %4258 = vmatprep.subr.bf16.mxu0 %v7380_v32  ;;  %4299 = vmatprep.subr.bf16.mxu1 %v7383_v33 }
 0x210   : > { %4282 = vmatprep.mubr.bf16.mxu0 %v7681_v58  ;;  %4323 = vmatprep.mubr.bf16.mxu1 %v7681_v58 }
 0x212   : > { %4259 = vmatpush1.bf16.msra.mxu0 %v7378_v34  ;;  %4300 = vmatpush1.bf16.msra.mxu1 %v7381_v35  ;;  %v7426_v34 = vld [vmem:[%s8656_s11 + $0x6c0] ss:$84 sps:$4 sm:$0xff]   ;;  %v7429_v35 = vld [vmem:[%s8656_s11 + $0x6c8] ss:$84 sps:$4 sm:$0xff]  }
 0x213   : > { %4260 = vmatprep.subr.bf16.mxu0 %v7386_v36  ;;  %4301 = vmatprep.subr.bf16.mxu1 %v7389_v37  ;;  %v7432_v36 = vld [vmem:[%s8656_s11 + $0x970] ss:$84 sps:$4 sm:$0x3f]   ;;  %v7435_v37 = vld [vmem:[%s8656_s11 + $0x978] ss:$84 sps:$4 sm:$0x3f]  }
 0x216   : > { %4261 = vmatpush1.bf16.msra.mxu0 %v7384_v38  ;;  %4302 = vmatpush1.bf16.msra.mxu1 %v7387_v39 }
 0x217   : > { %4262 = vmatprep.subr.bf16.mxu0 %v7392_v42  ;;  %4303 = vmatprep.subr.bf16.mxu1 %v7395_v43  ;;  %v4075_v42 = vand.u32 %v7434_v30, %v8654_v59  ;;  %v4081_v43 = vand.u32 %v7437_v31, %v8654_v59 }
 0x219   : > { %v9108_v53 = vpop.f32.mrf.mxu0  ;;  %v9110_v54 = vpop.f32.mrf.mxu1 }
 0x21a   : > { %4263 = vmatpush1.bf16.msra.mxu0 %v7390_v44  ;;  %4304 = vmatpush1.bf16.msra.mxu1 %v7393_v45 }
 0x21b   : > { %v9114_v57 = vpop.f32.mrf.mxu0  ;;  %v9116_v60 = vpop.f32.mrf.mxu1  ;;  %4264 = vmatprep.subr.bf16.mxu0 %v7398_v48  ;;  %4305 = vmatprep.subr.bf16.mxu1 %v7401_v49  ;;  %v4072_v48 = vand.u32 %v7432_v36, %v8654_v59  ;;  %v4078_v49 = vand.u32 %v7435_v37, %v8654_v59  ;;  %v7468_v36 = vld [vmem:[%s8656_s11 + $0xbd4] ss:$84 sps:$4 sm:$0xff]   ;;  %v7466_v37 = vld [vmem:[%s8656_s11 + $0xbd0] ss:$84 sps:$4 sm:$0xff]  }
 0x21d   : > { %v2083_v63 = vpop.f32.mrf.mxu0  ;;  %v2124_v1 = vpop.f32.mrf.mxu1 }
 0x21e   : > { %4265 = vmatpush1.bf16.msra.mxu0 %v7396_v52  ;;  %4306 = vmatpush1.bf16.msra.mxu1 %v7399_v55  ;;  %v7440_v52 = vld [vmem:[%s8656_s11 + $0x8cc] ss:$84 sps:$4 sm:$0xff]  }
 0x21f   : > { %v2084_v4 = vpop.f32.mrf.mxu0  ;;  %v2125_v5 = vpop.f32.mrf.mxu1  ;;  %4338 = vmatprep.subr.bf16.mxu0 %v4063_v61  ;;  %4379 = vmatprep.subr.bf16.mxu1 %v4069_v62  ;;  %v9168_v55 = vld [vmem:[%s9587_s1] sm:$0x7]  ;;  %v7441_v61 = vld [vmem:[%s8656_s11 + $0x8d0] ss:$84 sps:$4 sm:$0xff]  }
 0x220   : > { %v7446_v62 = vld [vmem:[%s8656_s11 + $0x824] ss:$84 sps:$4 sm:$0xff]   ;;  %v7449_v63 = vld [vmem:[%s8656_s11 + $0x82c] ss:$84 sps:$4 sm:$0xff]  }
 0x221   : > { %6600 = vmatmul.mubr.msk.bf16.vlgmr.msra.gmra.mxu0 %vm1728_vm2, %v8910_v10  ;;  %6601 = vmatmul.mubr.msk.bf16.vlgmr.msra.gmra.mxu1 %vm1728_vm2, %v8910_v10  ;;  %v7414_v10 = vld [vmem:[%s8656_s11 + $0x810] ss:$84 sps:$4 sm:$0xff]   ;;  %v7444_v1 = vld [vmem:[%s8656_s11 + $0x820] ss:$84 sps:$4 sm:$0xff]   ;;  %v7450_v5 = vld [vmem:[%s8656_s11 + $0x778] ss:$84 sps:$4 sm:$0xff]  }
 0x222   : > { %4339 = vmatpush1.bf16.msra.mxu0 %v4060_v2  ;;  %4380 = vmatpush1.bf16.msra.mxu1 %v4066_v3  ;;  %v7447_v2 = vld [vmem:[%s8656_s11 + $0x828] ss:$84 sps:$4 sm:$0xff]   ;;  %v7455_v4 = vld [vmem:[%s8656_s11 + $0x784] ss:$84 sps:$4 sm:$0xff]  }
 0x223   : > { %4340 = vmatprep.subr.bf16.mxu0 %v7410_v6  ;;  %4381 = vmatprep.subr.bf16.mxu1 %v7413_v7  ;;  %v7452_v3 = vld [vmem:[%s8656_s11 + $0x77c] ss:$84 sps:$4 sm:$0xff]   ;;  %v7453_v6 = vld [vmem:[%s8656_s11 + $0x780] ss:$84 sps:$4 sm:$0xff]  }
 0x224   : > { %4364 = vmatprep.mubr.bf16.mxu0 %v7681_v58  ;;  %4405 = vmatprep.mubr.bf16.mxu1 %v7681_v58  ;;  %v7458_v7 = vld [vmem:[%s8656_s11 + $0x6d4] ss:$84 sps:$4 sm:$0xff]  }
 0x226   : > { %4341 = vmatpush1.bf16.msra.mxu0 %v7408_v11  ;;  %4382 = vmatpush1.bf16.msra.mxu1 %v7411_v12  ;;  %v7461_v11 = vld [vmem:[%s8656_s11 + $0x6dc] ss:$84 sps:$4 sm:$0xff]  }
 0x227   : > { %4342 = vmatprep.subr.bf16.mxu0 %v7416_v16  ;;  %4383 = vmatprep.subr.bf16.mxu1 %v7419_v19  ;;  %v7464_v12 = vld [vmem:[%s8656_s11 + $0xc7c] ss:$84 sps:$4 sm:$0x3f]  }
 0x228   : > { %v7456_v19 = vld [vmem:[%s8656_s11 + $0x6d0] ss:$84 sps:$4 sm:$0xff]  }
 0x22a   : > { %4343 = vmatpush1.bf16.msra.mxu0 %v7414_v10  ;;  %4384 = vmatpush1.bf16.msra.mxu1 %v7417_v20  ;;  %v7459_v10 = vld [vmem:[%s8656_s11 + $0x6d8] ss:$84 sps:$4 sm:$0xff]  }
 0x22b   : > { %4344 = vmatprep.subr.bf16.mxu0 %v7422_v23  ;;  %4385 = vmatprep.subr.bf16.mxu1 %v7425_v24  ;;  %v7462_v20 = vld [vmem:[%s8656_s11 + $0xc78] ss:$84 sps:$4 sm:$0x3f]   ;;  %v7465_v23 = vld [vmem:[%s8656_s11 + $0x980] ss:$84 sps:$4 sm:$0x3f]  }
 0x22c   : > { %v4084_v30 = vand.u32 %v7465_v23, %v8654_v59  ;;  %v5178_v31 = vand.u32 %v7462_v20, %v8654_v59  ;;  %v7490_v23 = vld [vmem:[%s8656_s11 + $0xbdc] ss:$84 sps:$4 sm:$0xff]  }
 0x22d   : > { %v9147_v32 = vpop.f32.mrf.mxu0  ;;  %v9149_v33 = vpop.f32.mrf.mxu1 }
 0x22e   : > { %4345 = vmatpush1.bf16.msra.mxu0 %v7420_v25  ;;  %4386 = vmatpush1.bf16.msra.mxu1 %v7423_v27  ;;  %v5181_v27 = vand.u32 %v7464_v12, %v8654_v59 }
 0x22f   : > { %v9155_v38 = vpop.f32.mrf.mxu0  ;;  %v9157_v39 = vpop.f32.mrf.mxu1  ;;  %4346 = vmatprep.subr.bf16.mxu0 %v7428_v28  ;;  %4387 = vmatprep.subr.bf16.mxu1 %v7431_v29 }
 0x231   : > { %v2165_v44 = vpop.f32.mrf.mxu0  ;;  %v2206_v45 = vpop.f32.mrf.mxu1 }
 0x232   : > { %4347 = vmatpush1.bf16.msra.mxu0 %v7426_v34  ;;  %4388 = vmatpush1.bf16.msra.mxu1 %v7429_v35  ;;  %v7470_v44 = vld [vmem:[%s8656_s11 + $0xb28] ss:$84 sps:$4 sm:$0xff]   ;;  %v7473_v45 = vld [vmem:[%s8656_s11 + $0x830] ss:$84 sps:$4 sm:$0xff]  }
 0x233   : > { %v2166_v50 = vpop.f32.mrf.mxu0  ;;  %v2207_v51 = vpop.f32.mrf.mxu1  ;;  %4420 = vmatprep.subr.bf16.mxu0 %v4075_v42  ;;  %4461 = vmatprep.subr.bf16.mxu1 %v4081_v43  ;;  %v7469_v42 = vld [vmem:[%s8656_s11 + $0x8d8] ss:$84 sps:$4 sm:$0xff]  }
 0x234   : > { %v7472_v43 = vld [vmem:[%s8656_s11 + $0xb2c] ss:$84 sps:$4 sm:$0xff]   ;;  %v7477_v50 = vld [vmem:[%s8656_s11 + $0x788] ss:$84 sps:$4 sm:$0xff]  }
 0x235   : > { %6602 = vmatmul.mubr.msk.bf16.vlgmr.msra.gmra.mxu0 %vm1728_vm2, %v9168_v55  ;;  %6603 = vmatmul.mubr.msk.bf16.vlgmr.msra.gmra.mxu1 %vm1728_vm2, %v9168_v55  ;;  %v7480_v51 = vld [vmem:[%s8656_s11 + $0x9dc] ss:$84 sps:$4 sm:$0xff]  }
 0x236   : > { %4421 = vmatpush1.bf16.msra.mxu0 %v4072_v48  ;;  %4462 = vmatpush1.bf16.msra.mxu1 %v4078_v49  ;;  %v7476_v48 = vld [vmem:[%s8656_s11 + $0xa84] ss:$84 sps:$4 sm:$0xff]   ;;  %v7474_v49 = vld [vmem:[%s8656_s11 + $0xa80] ss:$84 sps:$4 sm:$0xff]  }
 0x237   : > { %4422 = vmatprep.subr.bf16.mxu0 %v7440_v52  ;;  %4463 = vmatprep.subr.bf16.mxu1 %v7443_v26  ;;  %v7484_v52 = vld [vmem:[%s8656_s11 + $0xc84] ss:$84 sps:$4 sm:$0x3f]   ;;  %v7487_v26 = vld [vmem:[%s8656_s11 + $0xc8c] ss:$84 sps:$4 sm:$0x3f]  }
 0x238   : > { %4446 = vmatprep.mubr.bf16.mxu0 %v7681_v58  ;;  %4487 = vmatprep.mubr.bf16.mxu1 %v7681_v58 }
 0x23a   : > { %4423 = vmatpush1.bf16.msra.mxu0 %v7438_v56  ;;  %4464 = vmatpush1.bf16.msra.mxu1 %v7441_v61 }
 0x23b   : > { %4424 = vmatprep.subr.bf16.mxu0 %v7446_v62  ;;  %4465 = vmatprep.subr.bf16.mxu1 %v7449_v63  ;;  %v7478_v62 = vld [vmem:[%s8656_s11 + $0x9d8] ss:$84 sps:$4 sm:$0xff]   ;;  %v7481_v63 = vld [vmem:[%s8656_s11 + $0x6e0] ss:$84 sps:$4 sm:$0xff]  }
 0x23e   : > { %4425 = vmatpush1.bf16.msra.mxu0 %v7444_v1  ;;  %4466 = vmatpush1.bf16.msra.mxu1 %v7447_v2  ;;  %v7482_v1 = vld [vmem:[%s8656_s11 + $0xc80] ss:$84 sps:$4 sm:$0x3f]   ;;  %v7485_v2 = vld [vmem:[%s8656_s11 + $0xc88] ss:$84 sps:$4 sm:$0x3f]  }
 0x23f   : > { %4426 = vmatprep.subr.bf16.mxu0 %v7452_v3  ;;  %4467 = vmatprep.subr.bf16.mxu1 %v7455_v4  ;;  %v5184_v12 = vand.u32 %v7482_v1, %v8654_v59 }
 0x241   : > { %v9189_v15 = vpop.f32.mrf.mxu0  ;;  %v9191_v16 = vpop.f32.mrf.mxu1 }
 0x242   : > { %4427 = vmatpush1.bf16.msra.mxu0 %v7450_v5  ;;  %4468 = vmatpush1.bf16.msra.mxu1 %v7453_v6  ;;  %v5187_v5 = vand.u32 %v7484_v52, %v8654_v59  ;;  %v5193_v6 = vand.u32 %v7487_v26, %v8654_v59  ;;  %v7509_v52 = vld [vmem:[%s8656_s11 + $0x9e8] ss:$84 sps:$4 sm:$0xff]   ;;  %v7512_v26 = vld [vmem:[%s8656_s11 + $0xc90] ss:$84 sps:$4 sm:$0x3f]  }
 0x243   : > { %v6893_v24 = vpop.f32.mrf.mxu0  ;;  %v9197_v25 = vpop.f32.mrf.mxu1  ;;  %4428 = vmatprep.subr.bf16.mxu0 %v7458_v7  ;;  %4469 = vmatprep.subr.bf16.mxu1 %v7461_v11 }
 0x244   : > { %v7493_v24 = vld [vmem:[%s8656_s11 + $0xbe4] ss:$84 sps:$4 sm:$0xff]  }
 0x245   : > { %v2246_v28 = vpop.f32.mrf.mxu0  ;;  %v2970_v29 = vpop.f32.mrf.mxu1 }
 0x246   : > { %4429 = vmatpush1.bf16.msra.mxu0 %v7456_v19  ;;  %4470 = vmatpush1.bf16.msra.mxu1 %v7459_v10  ;;  %v5190_v19 = vand.u32 %v7485_v2, %v8654_v59  ;;  %v7491_v28 = vld [vmem:[%s8656_s11 + $0xbe0] ss:$84 sps:$4 sm:$0xff]  }
 0x247   : > { %v6894_v34 = vpop.f32.mrf.mxu0  ;;  %v2971_v35 = vpop.f32.mrf.mxu1  ;;  %6909 = vmatprep.subr.bf16.mxu0 %v7682_v0  ;;  %5246 = vmatprep.subr.bf16.mxu1 %v5181_v27  ;;  %v7488_v27 = vld [vmem:[%s8656_s11 + $0xbd8] ss:$84 sps:$4 sm:$0xff]   ;;  %v7496_v29 = vld [vmem:[%s8656_s11 + $0xb34] ss:$84 sps:$4 sm:$0xff]  }
 0x248   : > { %v7497_v34 = vld [vmem:[%s8656_s11 + $0xb38] ss:$84 sps:$4 sm:$0xff]  }
 0x249   : > { %6604 = vmatmul.mubr.msk.bf16.vlgmr.msra.gmra.mxu0 %vm1728_vm2, %v9168_v55  ;;  %6605 = vmatmul.mubr.msk.bf16.vlgmr.msra.gmra.mxu1 %vm1728_vm2, %v9168_v55  ;;  %v7502_v35 = vld [vmem:[%s8656_s11 + $0xa8c] ss:$84 sps:$4 sm:$0xff]  }
 0x24a   : > { %6910 = vmatpush3.bf16.msra.mxu0 %v4084_v30  ;;  %5247 = vmatpush1.bf16.msra.mxu1 %v5178_v31  ;;  %v7499_v30 = vld [vmem:[%s8656_s11 + $0xb3c] ss:$84 sps:$4 sm:$0xff]  }
 0x24b   : > { %6911 = vmatprep.subr.bf16.mxu0 %v7682_v0  ;;  %5248 = vmatprep.subr.bf16.mxu1 %v7468_v36  ;;  %v7494_v31 = vld [vmem:[%s8656_s11 + $0xb30] ss:$84 sps:$4 sm:$0xff]   ;;  %v7505_v36 = vld [vmem:[%s8656_s11 + $0xa94] ss:$84 sps:$4 sm:$0xff]  }
 0x24c   : > { %6919 = vmatprep.mubr.msk.bf16.mxu0 %vm7683_vm3, %v7682_v0  ;;  %5272 = vmatprep.mubr.bf16.mxu1 %v7681_v58 }
 0x24e   : > { %6912 = vmatpush3.bf16.msra.mxu0 %v7469_v42  ;;  %5249 = vmatpush1.bf16.msra.mxu1 %v7466_v37  ;;  %v7500_v37 = vld [vmem:[%s8656_s11 + $0xa88] ss:$84 sps:$4 sm:$0xff]   ;;  %v7503_v42 = vld [vmem:[%s8656_s11 + $0xa90] ss:$84 sps:$4 sm:$0xff]  }
 0x24f   : > { %6913 = vmatprep.subr.bf16.mxu0 %v7682_v0  ;;  %5250 = vmatprep.subr.bf16.mxu1 %v7472_v43  ;;  %v7508_v43 = vld [vmem:[%s8656_s11 + $0x9e4] ss:$84 sps:$4 sm:$0xff]  }
 0x252   : > { %6914 = vmatpush3.bf16.msra.mxu0 %v7473_v45  ;;  %5251 = vmatpush1.bf16.msra.mxu1 %v7470_v44  ;;  %v7511_v44 = vld [vmem:[%s8656_s11 + $0x9ec] ss:$84 sps:$4 sm:$0xff]   ;;  %v7514_v45 = vld [vmem:[%s8656_s11 + $0xc94] ss:$84 sps:$4 sm:$0x3f]  }
 0x253   : > { %6915 = vmatprep.subr.bf16.mxu0 %v7682_v0  ;;  %5252 = vmatprep.subr.bf16.mxu1 %v7476_v48  ;;  %v7517_v48 = vld [vmem:[%s8656_s11 + $0xc9c] ss:$84 sps:$4 sm:$0x3f]   ;;  %v5199_v2 = vand.u32 %v7514_v45, %v8654_v59  ;;  %v7547_v45 = vld [vmem:[%s8656_s11 + $0xcac] ss:$84 sps:$4 sm:$0x3f]  }
 0x255   : > { %v9225_v56 = vpop.f32.mrf.mxu0  ;;  %v9227_v61 = vpop.f32.mrf.mxu1 }
 0x256   : > { %6916 = vmatpush3.bf16.msra.mxu0 %v7477_v50  ;;  %5253 = vmatpush1.bf16.msra.mxu1 %v7474_v49 }
 0x257   : > { %v9233_v3 = vpop.f32.mrf.mxu0  ;;  %v9235_v4 = vpop.f32.mrf.mxu1  ;;  %6917 = vmatprep.subr.bf16.mxu0 %v7682_v0  ;;  %5254 = vmatprep.subr.bf16.mxu1 %v7480_v51  ;;  %v7506_v51 = vld [vmem:[%s8656_s11 + $0x9e0] ss:$84 sps:$4 sm:$0xff]  }
 0x259   : > { %v3011_v7 = vpop.f32.mrf.mxu0  ;;  %v3052_v11 = vpop.f32.mrf.mxu1 }
 0x25a   : > { %6918 = vmatpush3.bf16.msra.mxu0 %v7481_v63  ;;  %5255 = vmatpush1.bf16.msra.mxu1 %v7478_v62  ;;  %v7515_v62 = vld [vmem:[%s8656_s11 + $0xc98] ss:$84 sps:$4 sm:$0x3f]   ;;  %v5196_v11 = vand.u32 %v7512_v26, %v8654_v59 }
 0x25b   : > { %v3012_v10 = vpop.f32.mrf.mxu0  ;;  %v3053_v20 = vpop.f32.mrf.mxu1  ;;  %5287 = vmatprep.subr.bf16.mxu0 %v5187_v5  ;;  %5328 = vmatprep.subr.bf16.mxu1 %v5193_v6  ;;  %v5205_v5 = vand.u32 %v7517_v48, %v8654_v59  ;;  %v7539_v26 = vld [vmem:[%s8656_s11 + $0x9f8] ss:$84 sps:$4 sm:$0xff]  }
 0x25c   : > { %v7520_v20 = vld [vmem:[%s8656_s11 + $0xbec] ss:$84 sps:$4 sm:$0xff]  }
 0x25d   : > { %6920 = vmatmul.mubr.msk.bf16.vlgmr.msra.gmra.mxu0 %vm1728_vm2, %v9168_v55  ;;  %6822 = vmatmul.mubr.msk.bf16.vlgmr.msra.gmra.mxu1 %vm1728_vm2, %v9168_v55 }
 0x25e   : > { %5288 = vmatpush1.bf16.msra.mxu0 %v5184_v12  ;;  %5329 = vmatpush1.bf16.msra.mxu1 %v5190_v19  ;;  %v5202_v12 = vand.u32 %v7515_v62, %v8654_v59  ;;  %v7542_v62 = vld [vmem:[%s8656_s11 + $0xca0] ss:$84 sps:$4 sm:$0x3f]  }
 0x25f   : > { %5289 = vmatprep.subr.bf16.mxu0 %v7490_v23  ;;  %5330 = vmatprep.subr.bf16.mxu1 %v7493_v24  ;;  %v7523_v23 = vld [vmem:[%s8656_s11 + $0xbf4] ss:$84 sps:$4 sm:$0xff]  }
 0x260   : > { %5313 = vmatprep.mubr.bf16.mxu0 %v7681_v58  ;;  %5354 = vmatprep.mubr.bf16.mxu1 %v7681_v58  ;;  %v7518_v24 = vld [vmem:[%s8656_s11 + $0xbe8] ss:$84 sps:$4 sm:$0xff]  }
 0x262   : > { %5290 = vmatpush1.bf16.msra.mxu0 %v7488_v27  ;;  %5331 = vmatpush1.bf16.msra.mxu1 %v7491_v28  ;;  %v7521_v27 = vld [vmem:[%s8656_s11 + $0xbf0] ss:$84 sps:$4 sm:$0xff]  }
 0x263   : > { %5291 = vmatprep.subr.bf16.mxu0 %v7496_v29  ;;  %5332 = vmatprep.subr.bf16.mxu1 %v7499_v30  ;;  %v7526_v28 = vld [vmem:[%s8656_s11 + $0xb44] ss:$84 sps:$4 sm:$0xff]   ;;  %v7529_v29 = vld [vmem:[%s8656_s11 + $0xb4c] ss:$84 sps:$4 sm:$0xff]  }
 0x264   : > { %v7524_v30 = vld [vmem:[%s8656_s11 + $0xb40] ss:$84 sps:$4 sm:$0xff]  }
 0x266   : > { %5292 = vmatpush1.bf16.msra.mxu0 %v7494_v31  ;;  %5333 = vmatpush1.bf16.msra.mxu1 %v7497_v34  ;;  %v7527_v31 = vld [vmem:[%s8656_s11 + $0xb48] ss:$84 sps:$4 sm:$0xff]  }
 0x267   : > { %5293 = vmatprep.subr.bf16.mxu0 %v7502_v35  ;;  %5334 = vmatprep.subr.bf16.mxu1 %v7505_v36  ;;  %v7532_v34 = vld [vmem:[%s8656_s11 + $0xa9c] ss:$84 sps:$4 sm:$0xff]   ;;  %v7535_v35 = vld [vmem:[%s8656_s11 + $0xaa4] ss:$84 sps:$4 sm:$0xff]  }
 0x268   : > { %v7530_v36 = vld [vmem:[%s8656_s11 + $0xa98] ss:$84 sps:$4 sm:$0xff]  }
 0x269   : > { %v9264_v49 = vpop.f32.mrf.mxu0  ;;  %v9266_v50 = vpop.f32.mrf.mxu1 }
 0x26a   : > { %5294 = vmatpush1.bf16.msra.mxu0 %v7500_v37  ;;  %5335 = vmatpush1.bf16.msra.mxu1 %v7503_v42  ;;  %v7533_v37 = vld [vmem:[%s8656_s11 + $0xaa0] ss:$84 sps:$4 sm:$0xff]  }
 0x26b   : > { %v9272_v63 = vpop.f32.mrf.mxu0  ;;  %v9274_v1 = vpop.f32.mrf.mxu1  ;;  %5295 = vmatprep.subr.bf16.mxu0 %v7508_v43  ;;  %5336 = vmatprep.subr.bf16.mxu1 %v7511_v44  ;;  %v7538_v42 = vld [vmem:[%s8656_s11 + $0x9f4] ss:$84 sps:$4 sm:$0xff]   ;;  %v7541_v43 = vld [vmem:[%s8656_s11 + $0x9fc] ss:$84 sps:$4 sm:$0xff]  }
 0x26c   : > { %v7544_v44 = vld [vmem:[%s8656_s11 + $0xca4] ss:$84 sps:$4 sm:$0x3f]  }
 0x26d   : > { %v3093_v6 = vpop.f32.mrf.mxu0  ;;  %v3134_v7 = vpop.f32.mrf.mxu1 }
 0x26e   : > { %5296 = vmatpush1.bf16.msra.mxu0 %v7506_v51  ;;  %5337 = vmatpush1.bf16.msra.mxu1 %v7509_v52  ;;  %v7536_v52 = vld [vmem:[%s8656_s11 + $0x9f0] ss:$84 sps:$4 sm:$0xff]   ;;  %v5211_v7 = vand.u32 %v7544_v44, %v8654_v59 }
 0x26f   : > { %v3094_v19 = vpop.f32.mrf.mxu0  ;;  %v3135_v10 = vpop.f32.mrf.mxu1  ;;  %5369 = vmatprep.subr.bf16.mxu0 %v5199_v2  ;;  %5410 = vmatprep.subr.bf16.mxu1 %v5205_v5  ;;  %v7545_v2 = vld [vmem:[%s8656_s11 + $0xca8] ss:$84 sps:$4 sm:$0x3f]   ;;  %v7563_v44 = vld [vmem:[%s8656_s11 + $0xab0] ss:$84 sps:$4 sm:$0xff]  }
 0x270   : > { %v5208_v10 = vand.u32 %v7542_v62, %v8654_v59  ;;  %v7577_v62 = vld [vmem:[%s8656_s11 + $0xcbc] ss:$84 sps:$4 sm:$0x3f]  }
 0x271   : > { %6823 = vmatmul.mubr.msk.bf16.vlgmr.msra.gmra.mxu0 %vm1728_vm2, %v9168_v55  ;;  %6824 = vmatmul.mubr.msk.bf16.vlgmr.msra.gmra.mxu1 %vm1728_vm2, %v9168_v55 }
 0x272   : > { %5370 = vmatpush1.bf16.msra.mxu0 %v5196_v11  ;;  %5411 = vmatpush1.bf16.msra.mxu1 %v5202_v12  ;;  %v5217_v11 = vand.u32 %v7547_v45, %v8654_v59  ;;  %v7568_v45 = vld [vmem:[%s8656_s11 + $0xa04] ss:$84 sps:$4 sm:$0xff]  }
 0x273   : > { %5371 = vmatprep.subr.bf16.mxu0 %v7520_v20  ;;  %5412 = vmatprep.subr.bf16.mxu1 %v7523_v23  ;;  %v5214_v20 = vand.u32 %v7545_v2, %v8654_v59 }
 0x274   : > { %5395 = vmatprep.mubr.bf16.mxu0 %v7681_v58  ;;  %5436 = vmatprep.mubr.bf16.mxu1 %v7681_v58 }
 0x276   : > { %5372 = vmatpush1.bf16.msra.mxu0 %v7518_v24  ;;  %5413 = vmatpush1.bf16.msra.mxu1 %v7521_v27  ;;  %v7550_v27 = vld [vmem:[%s8656_s11 + $0xbfc] ss:$84 sps:$4 sm:$0xff]  }
 0x277   : > { %5373 = vmatprep.subr.bf16.mxu0 %v7526_v28  ;;  %5414 = vmatprep.subr.bf16.mxu1 %v7529_v29  ;;  %v7553_v28 = vld [vmem:[%s8656_s11 + $0xc04] ss:$84 sps:$4 sm:$0xff]  }
 0x278   : > { %v7548_v29 = vld [vmem:[%s8656_s11 + $0xbf8] ss:$84 sps:$4 sm:$0xff]  }
 0x27a   : > { %5374 = vmatpush1.bf16.msra.mxu0 %v7524_v30  ;;  %5415 = vmatpush1.bf16.msra.mxu1 %v7527_v31  ;;  %v7551_v30 = vld [vmem:[%s8656_s11 + $0xc00] ss:$84 sps:$4 sm:$0xff]  }
 0x27b   : > { %5375 = vmatprep.subr.bf16.mxu0 %v7532_v34  ;;  %5416 = vmatprep.subr.bf16.mxu1 %v7535_v35  ;;  %v7556_v31 = vld [vmem:[%s8656_s11 + $0xb54] ss:$84 sps:$4 sm:$0xff]   ;;  %v7559_v34 = vld [vmem:[%s8656_s11 + $0xb5c] ss:$84 sps:$4 sm:$0xff]  }
 0x27c   : > { %v7554_v35 = vld [vmem:[%s8656_s11 + $0xb50] ss:$84 sps:$4 sm:$0xff]  }
 0x27d   : > { %v9302_v48 = vpop.f32.mrf.mxu0  ;;  %v9304_v51 = vpop.f32.mrf.mxu1 }
 0x27e   : > { %5376 = vmatpush1.bf16.msra.mxu0 %v7530_v36  ;;  %5417 = vmatpush1.bf16.msra.mxu1 %v7533_v37  ;;  %v7557_v36 = vld [vmem:[%s8656_s11 + $0xb58] ss:$84 sps:$4 sm:$0xff]  }
 0x27f   : > { %v9310_v5 = vpop.f32.mrf.mxu0  ;;  %v9312_v6 = vpop.f32.mrf.mxu1  ;;  %5377 = vmatprep.subr.bf16.mxu0 %v7538_v42  ;;  %5418 = vmatprep.subr.bf16.mxu1 %v7541_v43  ;;  %v7562_v37 = vld [vmem:[%s8656_s11 + $0xaac] ss:$84 sps:$4 sm:$0xff]   ;;  %v7565_v42 = vld [vmem:[%s8656_s11 + $0xab4] ss:$84 sps:$4 sm:$0xff]  }
 0x280   : > { %v7560_v43 = vld [vmem:[%s8656_s11 + $0xaa8] ss:$84 sps:$4 sm:$0xff]  }
 0x281   : > { %v3175_v12 = vpop.f32.mrf.mxu0  ;;  %v3216_v19 = vpop.f32.mrf.mxu1 }
 0x282   : > { %5378 = vmatpush1.bf16.msra.mxu0 %v7536_v52  ;;  %5419 = vmatpush1.bf16.msra.mxu1 %v7539_v26  ;;  %v7571_v52 = vld [vmem:[%s8656_s11 + $0xa0c] ss:$84 sps:$4 sm:$0xff]   ;;  %v7574_v26 = vld [vmem:[%s8656_s11 + $0xcb4] ss:$84 sps:$4 sm:$0x3f]  }
 0x283   : > { %v3176_v23 = vpop.f32.mrf.mxu0  ;;  %v3217_v24 = vpop.f32.mrf.mxu1  ;;  %5451 = vmatprep.subr.bf16.mxu0 %v5211_v7  ;;  %5492 = vmatprep.subr.bf16.mxu1 %v5217_v11  ;;  %v7566_v11 = vld [vmem:[%s8656_s11 + $0xa00] ss:$84 sps:$4 sm:$0xff]   ;;  %v7569_v12 = vld [vmem:[%s8656_s11 + $0xa08] ss:$84 sps:$4 sm:$0xff]  }
 0x284   : > { %v7572_v19 = vld [vmem:[%s8656_s11 + $0xcb0] ss:$84 sps:$4 sm:$0x3f]   ;;  %v5223_v24 = vand.u32 %v7574_v26, %v8654_v59  ;;  %v7587_v26 = vld [vmem:[%s8656_s11 + $0xb68] ss:$84 sps:$4 sm:$0xff]  }
 0x285   : > { %6825 = vmatmul.mubr.msk.bf16.vlgmr.msra.gmra.mxu0 %vm1728_vm2, %v9168_v55  ;;  %6826 = vmatmul.mubr.msk.bf16.vlgmr.msra.gmra.mxu1 %vm1728_vm2, %v9168_v55 }
 0x286   : > { %5452 = vmatpush1.bf16.msra.mxu0 %v5208_v10  ;;  %5493 = vmatpush1.bf16.msra.mxu1 %v5214_v20  ;;  %v7575_v10 = vld [vmem:[%s8656_s11 + $0xcb8] ss:$84 sps:$4 sm:$0x3f]  }
 0x287   : > { %5453 = vmatprep.subr.bf16.mxu0 %v7550_v27  ;;  %5494 = vmatprep.subr.bf16.mxu1 %v7553_v28  ;;  %v5229_v27 = vand.u32 %v7577_v62, %v8654_v59  ;;  %v7592_v62 = vld [vmem:[%s8656_s11 + $0xabc] ss:$84 sps:$4 sm:$0xff]  }
 0x288   : > { %5477 = vmatprep.mubr.bf16.mxu0 %v7681_v58  ;;  %5518 = vmatprep.mubr.bf16.mxu1 %v7681_v58 }
 0x28a   : > { %5454 = vmatpush1.bf16.msra.mxu0 %v7548_v29  ;;  %5495 = vmatpush1.bf16.msra.mxu1 %v7551_v30  ;;  %v5220_v30 = vand.u32 %v7572_v19, %v8654_v59  ;;  %v7593_v19 = vld [vmem:[%s8656_s11 + $0xac0] ss:$84 sps:$4 sm:$0xff]  }
 0x28b   : > { %5455 = vmatprep.subr.bf16.mxu0 %v7556_v31  ;;  %5496 = vmatprep.subr.bf16.mxu1 %v7559_v34  ;;  %v5226_v31 = vand.u32 %v7575_v10, %v8654_v59  ;;  %v7598_v10 = vld [vmem:[%s8656_s11 + $0xa14] ss:$84 sps:$4 sm:$0xff]  }
 0x28e   : > { %5456 = vmatpush1.bf16.msra.mxu0 %v7554_v35  ;;  %5497 = vmatpush1.bf16.msra.mxu1 %v7557_v36  ;;  %v7580_v36 = vld [vmem:[%s8656_s11 + $0xc0c] ss:$84 sps:$4 sm:$0xff]  }
 0x28f   : > { %5457 = vmatprep.subr.bf16.mxu0 %v7562_v37  ;;  %5498 = vmatprep.subr.bf16.mxu1 %v7565_v42  ;;  %v7583_v37 = vld [vmem:[%s8656_s11 + $0xc14] ss:$84 sps:$4 sm:$0xff]  }
 0x290   : > { %v7578_v42 = vld [vmem:[%s8656_s11 + $0xc08] ss:$84 sps:$4 sm:$0xff]  }
 0x291   : > { %v9340_v2 = vpop.f32.mrf.mxu0  ;;  %v9342_v7 = vpop.f32.mrf.mxu1 }
 0x292   : > { %5458 = vmatpush1.bf16.msra.mxu0 %v7560_v43  ;;  %5499 = vmatpush1.bf16.msra.mxu1 %v7563_v44  ;;  %v7581_v43 = vld [vmem:[%s8656_s11 + $0xc10] ss:$84 sps:$4 sm:$0xff]  }
 0x293   : > { %v9348_v20 = vpop.f32.mrf.mxu0  ;;  %v9350_v23 = vpop.f32.mrf.mxu1  ;;  %5459 = vmatprep.subr.bf16.mxu0 %v7568_v45  ;;  %5500 = vmatprep.subr.bf16.mxu1 %v7571_v52  ;;  %v7586_v44 = vld [vmem:[%s8656_s11 + $0xb64] ss:$84 sps:$4 sm:$0xff]   ;;  %v7589_v45 = vld [vmem:[%s8656_s11 + $0xb6c] ss:$84 sps:$4 sm:$0xff]  }
 0x294   : > { %v7584_v52 = vld [vmem:[%s8656_s11 + $0xb60] ss:$84 sps:$4 sm:$0xff]  }
 0x295   : > { %v3257_v28 = vpop.f32.mrf.mxu0  ;;  %v3298_v29 = vpop.f32.mrf.mxu1 }
 0x296   : > { %5460 = vmatpush1.bf16.msra.mxu0 %v7566_v11  ;;  %5501 = vmatpush1.bf16.msra.mxu1 %v7569_v12  ;;  %v7595_v11 = vld [vmem:[%s8656_s11 + $0xac4] ss:$84 sps:$4 sm:$0xff]  }
 0x297   : > { %v3258_v34 = vpop.f32.mrf.mxu0  ;;  %v3299_v35 = vpop.f32.mrf.mxu1  ;;  %5533 = vmatprep.subr.bf16.mxu0 %v5223_v24  ;;  %5574 = vmatprep.subr.bf16.mxu1 %v5229_v27  ;;  %v7590_v12 = vld [vmem:[%s8656_s11 + $0xab8] ss:$84 sps:$4 sm:$0xff]   ;;  %v7601_v24 = vld [vmem:[%s8656_s11 + $0xa1c] ss:$84 sps:$4 sm:$0xff]  }
 0x298   : > { %v7604_v27 = vld [vmem:[%s8656_s11 + $0xcc4] ss:$84 sps:$4 sm:$0x3f]   ;;  %v7602_v34 = vld [vmem:[%s8656_s11 + $0xcc0] ss:$84 sps:$4 sm:$0x3f]  }
 0x299   : > { %6827 = vmatmul.mubr.msk.bf16.vlgmr.msra.gmra.mxu0 %vm1728_vm2, %v9168_v55  ;;  %6828 = vmatmul.mubr.msk.bf16.vlgmr.msra.gmra.mxu1 %vm1728_vm2, %v9168_v55  ;;  %v7605_v35 = vld [vmem:[%s8656_s11 + $0xcc8] ss:$84 sps:$4 sm:$0x3f]  }
 0x29a   : > { %5534 = vmatpush1.bf16.msra.mxu0 %v5220_v30  ;;  %5575 = vmatpush1.bf16.msra.mxu1 %v5226_v31  ;;  %v7596_v30 = vld [vmem:[%s8656_s11 + $0xa10] ss:$84 sps:$4 sm:$0xff]   ;;  %v7599_v31 = vld [vmem:[%s8656_s11 + $0xa18] ss:$84 sps:$4 sm:$0xff]  }
 0x29b   : > { %5535 = vmatprep.subr.bf16.mxu0 %v7580_v36  ;;  %5576 = vmatprep.subr.bf16.mxu1 %v7583_v37 }
 0x29c   : > { %5559 = vmatprep.mubr.bf16.mxu0 %v7681_v58  ;;  %5600 = vmatprep.mubr.bf16.mxu1 %v7681_v58 }
 0x29e   : > { %5536 = vmatpush1.bf16.msra.mxu0 %v7578_v42  ;;  %5577 = vmatpush1.bf16.msra.mxu1 %v7581_v43  ;;  %v5235_v42 = vand.u32 %v7604_v27, %v8654_v59  ;;  %v7616_v27 = vld [vmem:[%s8656_s11 + $0xacc] ss:$84 sps:$4 sm:$0xff]  }
 0x29f   : > { %5537 = vmatprep.subr.bf16.mxu0 %v7586_v44  ;;  %5578 = vmatprep.subr.bf16.mxu1 %v7589_v45  ;;  %v5232_v45 = vand.u32 %v7602_v34, %v8654_v59  ;;  %v3382_v34 = vmax.f32 %v8993_v8, %v9191_v16 }
 0x2a2   : > { %5538 = vmatpush1.bf16.msra.mxu0 %v7584_v52  ;;  %5579 = vmatpush1.bf16.msra.mxu1 %v7587_v26  ;;  %v5238_v52 = vand.u32 %v7605_v35, %v8654_v59  ;;  %v7609_v59 = vld [vmem:[%s8656_s11 + $0xc20] ss:$84 sps:$4 sm:$0xff]   ;;  %v3384_v35 = vmax.f32 %v8995_v9, %v9225_v56 }
 0x2a3   : > { %5539 = vmatprep.subr.bf16.mxu0 %v7592_v62  ;;  %5580 = vmatprep.subr.bf16.mxu1 %v7595_v11  ;;  %v7608_v11 = vld [vmem:[%s8656_s11 + $0xc1c] ss:$84 sps:$4 sm:$0xff]  }
 0x2a5   : > { %v9377_v28 = vpop.f32.mrf.mxu0  ;;  %v9379_v29 = vpop.f32.mrf.mxu1 }
 0x2a6   : > { %5540 = vmatpush1.bf16.msra.mxu0 %v7590_v12  ;;  %5581 = vmatpush1.bf16.msra.mxu1 %v7593_v19  ;;  %v7606_v12 = vld [vmem:[%s8656_s11 + $0xc18] ss:$84 sps:$4 sm:$0xff]   ;;  %v7612_v19 = vld [vmem:[%s8656_s11 + $0xb74] ss:$84 sps:$4 sm:$0xff]  }
 0x2a7   : > { %v9385_v36 = vpop.f32.mrf.mxu0  ;;  %v6907_v37 = vpop.f32.mrf.mxu1  ;;  %5541 = vmatprep.subr.bf16.mxu0 %v7598_v10  ;;  %5582 = vmatprep.subr.bf16.mxu1 %v7601_v24  ;;  %v7610_v10 = vld [vmem:[%s8656_s11 + $0xb70] ss:$84 sps:$4 sm:$0xff]   ;;  %v7613_v24 = vld [vmem:[%s8656_s11 + $0xb78] ss:$84 sps:$4 sm:$0xff]  }
 0x2a8   : > { %v3383_v37 = vmax.f32 %v8999_v13, %v9197_v25 }
 0x2a9   : > { %v3339_v43 = vpop.f32.mrf.mxu0  ;;  %v3379_v44 = vpop.f32.mrf.mxu1 }
 0x2aa   : > { %5542 = vmatpush1.bf16.msra.mxu0 %v7596_v30  ;;  %5583 = vmatpush1.bf16.msra.mxu1 %v7599_v31  ;;  %v7614_v30 = vld [vmem:[%s8656_s11 + $0xac8] ss:$84 sps:$4 sm:$0xff]   ;;  %v7617_v31 = vld [vmem:[%s8656_s11 + $0xad0] ss:$84 sps:$4 sm:$0xff]   ;;  %v3385_v44 = vmax.f32 %v9001_v14, %v9233_v3 }
 0x2ab   : > { %v3340_v26 = vpop.f32.mrf.mxu0  ;;  %v6908_v62 = vpop.f32.mrf.mxu1  ;;  %5615 = vmatprep.subr.bf16.mxu0 %v5235_v42  ;;  %6923 = vmatprep.subr.bf16.mxu1 %v7682_v0 }
 0x2ac   : > { %v7618_v26 = vld [vmem:[%s8656_s11 + $0xa20] ss:$84 sps:$4 sm:$0xff]   ;;  %v7621_v62 = vld [vmem:[%s8656_s11 + $0xa28] ss:$84 sps:$4 sm:$0xff]  }
 0x2ad   : > { %6829 = vmatmul.mubr.msk.bf16.vlgmr.msra.gmra.mxu0 %vm1728_vm2, %v9168_v55  ;;  %6830 = vmatmul.mubr.msk.bf16.vlgmr.msra.gmra.mxu1 %vm1728_vm2, %v9168_v55 }
 0x2ae   : > { %5616 = vmatpush1.bf16.msra.mxu0 %v5232_v45  ;;  %6924 = vmatpush3.bf16.msra.mxu1 %v5238_v52 }
 0x2af   : > { %5617 = vmatprep.subr.bf16.mxu0 %v7608_v11  ;;  %6925 = vmatprep.subr.bf16.mxu1 %v7682_v0  ;;  %v3386_v11 = vmax.f32 %v9030_v40, %v9227_v61 }
 0x2b0   : > { %5641 = vmatprep.mubr.bf16.mxu0 %v7681_v58  ;;  %6933 = vmatprep.mubr.msk.bf16.mxu1 %vm7683_vm3, %v7682_v0  ;;  %v7620_v58 = vld [vmem:[%s8656_s11 + $0xa24] ss:$84 sps:$4 sm:$0xff]  }
 0x2b2   : > { %5618 = vmatpush1.bf16.msra.mxu0 %v7606_v12  ;;  %6926 = vmatpush3.bf16.msra.mxu1 %v7609_v59 }
 0x2b3   : > { %5619 = vmatprep.subr.bf16.mxu0 %v7612_v19  ;;  %6927 = vmatprep.subr.bf16.mxu1 %v7682_v0  ;;  %v3387_v19 = vmax.f32 %v9038_v46, %v9235_v4  ;;  %v3390_v46 = vmax.f32 %v9070_v17, %v9266_v50 }
 0x2b6   : > { %5620 = vmatpush1.bf16.msra.mxu0 %v7610_v10  ;;  %6928 = vmatpush3.bf16.msra.mxu1 %v7613_v24  ;;  %v3389_v10 = vmax.f32 %v9040_v47, %v9272_v63  ;;  %v3392_v47 = vmax.f32 %v9072_v18, %v9302_v48 }
 0x2b7   : > { %5621 = vmatprep.subr.bf16.mxu0 %v7616_v27  ;;  %6929 = vmatprep.subr.bf16.mxu1 %v7682_v0 }
 0x2b9   : > { %v4120_v42 = vpop.f32.mrf.mxu0  ;;  %v4161_v43 = vpop.f32.mrf.mxu1 }
 0x2ba   : > { %v9419_v45 = vmax.f32 %v3382_v34, %v4120_v42  ;;  %v9421_v52 = vmax.f32 %v3384_v35, %v4161_v43  ;;  %5622 = vmatpush1.bf16.msra.mxu0 %v7614_v30  ;;  %6930 = vmatpush3.bf16.msra.mxu1 %v7617_v31  ;;  %v3391_v34 = vmax.f32 %v9076_v21, %v9274_v1 }
 0x2bb   : > { %v4122_v8 = vpop.f32.mrf.mxu0  ;;  %v4163_v16 = vpop.f32.mrf.mxu1  ;;  %5623 = vmatprep.subr.bf16.mxu0 %v7620_v58  ;;  %6931 = vmatprep.subr.bf16.mxu1 %v7682_v0  ;;  %v3388_v0 = vmax.f32 %v9032_v41, %v9264_v49  ;;  %v3393_v35 = vmax.f32 %v9078_v22, %v9310_v5  ;;  %v3394_v21 = vmax.f32 %v9108_v53, %v9304_v51 }
 0x2bc   : > { %v9426_v9 = vmax.f32 %v3383_v37, %v4122_v8  ;;  %v9428_v13 = vmax.f32 %v3385_v44, %v4163_v16  ;;  %v3396_v22 = vmax.f32 %v9110_v54, %v9340_v2  ;;  %v3395_v8 = vmax.f32 %v9114_v57, %v9312_v6 }
 0x2bd   : > { %v4124_v25 = vpop.f32.mrf.mxu0  ;;  %v4165_v56 = vpop.f32.mrf.mxu1  ;;  %v3397_v16 = vmax.f32 %v9116_v60, %v9348_v20  ;;  %v3398_v57 = vmax.f32 %v9147_v32, %v9342_v7  ;;  %v3400_v60 = vmax.f32 %v9149_v33, %v9377_v28 }
 0x2be   : > { %5624 = vmatpush1.bf16.msra.mxu0 %v7618_v26  ;;  %6932 = vmatpush3.bf16.msra.mxu1 %v7621_v62 }
 0x2bf   : > { %v4125_v14 = vpop.f32.mrf.mxu0  ;;  %v4166_v3 = vpop.f32.mrf.mxu1 }
 0x2c1   : > { %6831 = vmatmul.mubr.msk.bf16.vlgmr.msra.gmra.mxu0 %vm1728_vm2, %v9168_v55  ;;  %6934 = vmatmul.mubr.msk.bf16.vlgmr.msra.gmra.mxu1 %vm1728_vm2, %v9168_v55 }
 0x2cd   : > { %v4202_v12 = vpop.f32.mrf.mxu0  ;;  %v4243_v59 = vpop.f32.mrf.mxu1 }
 0x2ce   : > { %v9442_v24 = vmax.f32 %v3386_v11, %v4202_v12  ;;  %v9444_v27 = vmax.f32 %v3388_v0, %v4243_v59  ;;  %v3399_v12 = vmax.f32 %v9155_v38, %v9350_v23  ;;  %v3401_v59 = vmax.f32 %v9157_v39, %v9385_v36  ;;  %v9503_v39 = vpop.permute.xlu0 %5714 }
 0x2cf   : > { %v4204_v30 = vpop.f32.mrf.mxu0  ;;  %v4245_v55 = vpop.f32.mrf.mxu1  ;;  %v3402_v38 = vmax.f32 %v9189_v15, %v9379_v29 }
 0x2d0   : > { %v9446_v31 = vmax.f32 %v3387_v19, %v4204_v30  ;;  %v9448_v40 = vmax.f32 %v3389_v10, %v4245_v55 }
 0x2d1   : > { %v4206_v61 = vpop.f32.mrf.mxu0  ;;  %v4247_v41 = vpop.f32.mrf.mxu1 }
 0x2d3   : > { %v4207_v49 = vpop.f32.mrf.mxu0  ;;  %v4248_v58 = vpop.f32.mrf.mxu1 }
 0x2e1   : > { %v4284_v4 = vpop.f32.mrf.mxu0  ;;  %v4325_v63 = vpop.f32.mrf.mxu1 }
 0x2e2   : > { %v9458_v37 = vmax.f32 %v3390_v46, %v4284_v4  ;;  %v9460_v42 = vmax.f32 %v3392_v47, %v4325_v63 }
 0x2e3   : > { %v4286_v43 = vpop.f32.mrf.mxu0  ;;  %v4327_v44 = vpop.f32.mrf.mxu1 }
 0x2e4   : > { %v9462_v26 = vmax.f32 %v3391_v34, %v4286_v43  ;;  %v9464_v17 = vmax.f32 %v3393_v35, %v4327_v44 }
 0x2e5   : > { %v4288_v50 = vpop.f32.mrf.mxu0  ;;  %v4329_v18 = vpop.f32.mrf.mxu1 }
 0x2e7   : > { %v4289_v48 = vpop.f32.mrf.mxu0  ;;  %v4330_v62 = vpop.f32.mrf.mxu1 }
 0x2f5   : > { %v4366_v1 = vpop.f32.mrf.mxu0  ;;  %v4407_v5 = vpop.f32.mrf.mxu1 }
 0x2f6   : > { %v9474_v25 = vmax.f32 %v3394_v21, %v4366_v1  ;;  %v9476_v56 = vmax.f32 %v3396_v22, %v4407_v5 }
 0x2f7   : > { %v4368_v14 = vpop.f32.mrf.mxu0  ;;  %v4409_v3 = vpop.f32.mrf.mxu1 }
 0x2f8   : > { %v9478_v11 = vmax.f32 %v3395_v8, %v4368_v14  ;;  %v9480_v53 = vmax.f32 %v3397_v16, %v4409_v3 }
 0x2f9   : > { %v4370_v51 = vpop.f32.mrf.mxu0  ;;  %v4411_v54 = vpop.f32.mrf.mxu1 }
 0x2fb   : > { %v4371_v2 = vpop.f32.mrf.mxu0  ;;  %v4412_v0 = vpop.f32.mrf.mxu1 }
 0x309   : > { %v4448_v6 = vpop.f32.mrf.mxu0  ;;  %v4489_v20 = vpop.f32.mrf.mxu1 }
 0x30a   : > { %v9490_v19 = vmax.f32 %v3398_v57, %v4448_v6  ;;  %v9492_v10 = vmax.f32 %v3400_v60, %v4489_v20 }
 0x30b   : > { %v4450_v30 = vpop.f32.mrf.mxu0  ;;  %v4491_v32 = vpop.f32.mrf.mxu1 }
 0x30c   : > { %v9494_v7 = vmax.f32 %v3399_v12, %v4450_v30  ;;  %v9496_v55 = vmax.f32 %v3401_v59, %v4491_v32 }
 0x30d   : > { %v4452_v33 = vpop.f32.mrf.mxu0  ;;  %v4493_v28 = vpop.f32.mrf.mxu1 }
 0x30f   : > { %v4453_v61 = vpop.f32.mrf.mxu0  ;;  %v4494_v41 = vpop.f32.mrf.mxu1 }
 0x31d   : > { %v4530_v23 = vpop.f32.mrf.mxu0  ;;  %v5274_v36 = vpop.f32.mrf.mxu1 }
 0x31e   : > { %v9505_v49 = vmax.f32 %v3402_v38, %v4530_v23  ;;  %v5690_v58 = vmax.f32 %v9419_v45, %v5274_v36 }
 0x31f   : > { %v6921_v46 = vpop.f32.mrf.mxu0  ;;  %v5276_v47 = vpop.f32.mrf.mxu1 }
 0x320   : > { %v5691_v4 = vmax.f32 %v9426_v9, %v5276_v47  ;;  %v5717_v63 = vadd.f32 %v9503_v39, %v5690_v58 }
 0x321   : > { %v4533_v34 = vpop.f32.mrf.mxu0  ;;  %v5278_v35 = vpop.f32.mrf.mxu1 }
 0x322   : > { %v5718_v15 = vadd.f32 %v9503_v39, %v5691_v4  ;;  %v5738_v44 = vmax.f32 %v5717_v63, 0.0 }
 0x323   : > { %v6922_v29 = vpop.f32.mrf.mxu0  ;;  %v5279_v43 = vpop.f32.mrf.mxu1 }
 0x324   : > { %v5739_v50 = vmax.f32 %v5718_v15, 0.0 }
 0x326   : > { %v6846_v45 = vpack.c.bf16 %v5739_v50, %v5738_v44 }
 0x328   : > { %5844 = vst [vmem:[%s9514_s6] sm:$0x77] %v6846_v45 }
 0x331   : > { %v5315_v9 = vpop.f32.mrf.mxu0  ;;  %v5356_v18 = vpop.f32.mrf.mxu1 }
 0x332   : > { %v5692_v48 = vmax.f32 %v9421_v52, %v5315_v9  ;;  %v5694_v62 = vmax.f32 %v9442_v24, %v5356_v18 }
 0x333   : > { %v5317_v21 = vpop.f32.mrf.mxu0  ;;  %v5358_v22 = vpop.f32.mrf.mxu1 }
 0x334   : > { %v5719_v1 = vadd.f32 %v9503_v39, %v5692_v48  ;;  %v5721_v5 = vadd.f32 %v9503_v39, %v5694_v62  ;;  %v5693_v8 = vmax.f32 %v9428_v13, %v5317_v21  ;;  %v5695_v16 = vmax.f32 %v9446_v31, %v5358_v22 }
 0x335   : > { %v5319_v14 = vpop.f32.mrf.mxu0  ;;  %v5360_v3 = vpop.f32.mrf.mxu1 }
 0x336   : > { %v5720_v51 = vadd.f32 %v9503_v39, %v5693_v8  ;;  %v5722_v52 = vadd.f32 %v9503_v39, %v5695_v16  ;;  %v5740_v2 = vmax.f32 %v5719_v1, 0.0  ;;  %v5742_v0 = vmax.f32 %v5721_v5, 0.0 }
 0x337   : > { %v5320_v54 = vpop.f32.mrf.mxu0  ;;  %v5361_v24 = vpop.f32.mrf.mxu1 }
 0x338   : > { %v5741_v57 = vmax.f32 %v5720_v51, 0.0  ;;  %v5743_v60 = vmax.f32 %v5722_v52, 0.0 }
 0x33a   : > { %v6847_v6 = vpack.c.bf16 %v5741_v57, %v5740_v2  ;;  %v6848_v20 = vpack.c.bf16 %v5743_v60, %v5742_v0 }
 0x33c   : > { %5845 = vst [vmem:[%s9514_s6 + $0x8] sm:$0x77] %v6847_v6  ;;  %5846 = vst [vmem:[%s9514_s6 + $0x10] sm:$0x77] %v6848_v20 }
 0x345   : > { %v5397_v12 = vpop.f32.mrf.mxu0  ;;  %v5438_v13 = vpop.f32.mrf.mxu1 }
 0x346   : > { %v5696_v31 = vmax.f32 %v9444_v27, %v5397_v12  ;;  %v5698_v59 = vmax.f32 %v9458_v37, %v5438_v13 }
 0x347   : > { %v5399_v30 = vpop.f32.mrf.mxu0  ;;  %v5440_v32 = vpop.f32.mrf.mxu1 }
 0x348   : > { %v5723_v33 = vadd.f32 %v9503_v39, %v5696_v31  ;;  %v5725_v28 = vadd.f32 %v9503_v39, %v5698_v59  ;;  %v5697_v61 = vmax.f32 %v9448_v40, %v5399_v30  ;;  %v5699_v41 = vmax.f32 %v9462_v26, %v5440_v32 }
 0x349   : > { %v5401_v38 = vpop.f32.mrf.mxu0  ;;  %v5442_v23 = vpop.f32.mrf.mxu1 }
 0x34a   : > { %v5724_v36 = vadd.f32 %v9503_v39, %v5697_v61  ;;  %v5726_v27 = vadd.f32 %v9503_v39, %v5699_v41  ;;  %v5744_v46 = vmax.f32 %v5723_v33, 0.0  ;;  %v5746_v47 = vmax.f32 %v5725_v28, 0.0 }
 0x34b   : > { %v5402_v58 = vpop.f32.mrf.mxu0  ;;  %v5443_v37 = vpop.f32.mrf.mxu1 }
 0x34c   : > { %v5745_v4 = vmax.f32 %v5724_v36, 0.0  ;;  %v5747_v63 = vmax.f32 %v5726_v27, 0.0 }
 0x34e   : > { %v6849_v34 = vpack.c.bf16 %v5745_v4, %v5744_v46  ;;  %v6850_v35 = vpack.c.bf16 %v5747_v63, %v5746_v47 }
 0x350   : > { %5847 = vst [vmem:[%s9514_s6 + $0x18] sm:$0x77] %v6849_v34  ;;  %5848 = vst [vmem:[%s9514_s6 + $0x20] sm:$0x77] %v6850_v35 }
 0x359   : > { %v5479_v15 = vpop.f32.mrf.mxu0  ;;  %v5520_v40 = vpop.f32.mrf.mxu1 }
 0x35a   : > { %v5700_v26 = vmax.f32 %v9460_v42, %v5479_v15  ;;  %v5702_v29 = vmax.f32 %v9474_v25, %v5520_v40 }
 0x35b   : > { %v5481_v43 = vpop.f32.mrf.mxu0  ;;  %v5522_v44 = vpop.f32.mrf.mxu1 }
 0x35c   : > { %v5727_v50 = vadd.f32 %v9503_v39, %v5700_v26  ;;  %v5729_v45 = vadd.f32 %v9503_v39, %v5702_v29  ;;  %v5701_v9 = vmax.f32 %v9464_v17, %v5481_v43  ;;  %v5703_v18 = vmax.f32 %v9478_v11, %v5522_v44 }
 0x35d   : > { %v5483_v48 = vpop.f32.mrf.mxu0  ;;  %v5524_v62 = vpop.f32.mrf.mxu1 }
 0x35e   : > { %v5728_v21 = vadd.f32 %v9503_v39, %v5701_v9  ;;  %v5730_v42 = vadd.f32 %v9503_v39, %v5703_v18  ;;  %v5748_v1 = vmax.f32 %v5727_v50, 0.0  ;;  %v5750_v5 = vmax.f32 %v5729_v45, 0.0 }
 0x35f   : > { %v5484_v22 = vpop.f32.mrf.mxu0  ;;  %v5525_v25 = vpop.f32.mrf.mxu1 }
 0x360   : > { %v5749_v8 = vmax.f32 %v5728_v21, 0.0  ;;  %v5751_v16 = vmax.f32 %v5730_v42, 0.0 }
 0x362   : > { %v6851_v14 = vpack.c.bf16 %v5749_v8, %v5748_v1  ;;  %v6852_v3 = vpack.c.bf16 %v5751_v16, %v5750_v5 }
 0x364   : > { %5849 = vst [vmem:[%s9514_s6 + $0x28] sm:$0x77] %v6851_v14  ;;  %5850 = vst [vmem:[%s9514_s6 + $0x30] sm:$0x77] %v6852_v3 }
 0x36d   : > { %v5561_v51 = vpop.f32.mrf.mxu0  ;;  %v5602_v17 = vpop.f32.mrf.mxu1 }
 0x36e   : > { %v5704_v11 = vmax.f32 %v9476_v56, %v5561_v51  ;;  %v5706_v52 = vmax.f32 %v9490_v19, %v5602_v17 }
 0x36f   : > { %v5563_v54 = vpop.f32.mrf.mxu0  ;;  %v5604_v24 = vpop.f32.mrf.mxu1 }
 0x370   : > { %v5731_v2 = vadd.f32 %v9503_v39, %v5704_v11  ;;  %v5733_v0 = vadd.f32 %v9503_v39, %v5706_v52  ;;  %v5705_v57 = vmax.f32 %v9480_v53, %v5563_v54  ;;  %v5707_v60 = vmax.f32 %v9494_v7, %v5604_v24 }
 0x371   : > { %v5565_v6 = vpop.f32.mrf.mxu0  ;;  %v5606_v20 = vpop.f32.mrf.mxu1 }
 0x372   : > { %v5732_v12 = vadd.f32 %v9503_v39, %v5705_v57  ;;  %v5734_v56 = vadd.f32 %v9503_v39, %v5707_v60  ;;  %v5752_v31 = vmax.f32 %v5731_v2, 0.0  ;;  %v5754_v59 = vmax.f32 %v5733_v0, 0.0 }
 0x373   : > { %v5566_v13 = vpop.f32.mrf.mxu0  ;;  %v5607_v19 = vpop.f32.mrf.mxu1 }
 0x374   : > { %v5753_v30 = vmax.f32 %v5732_v12, 0.0  ;;  %v5755_v32 = vmax.f32 %v5734_v56, 0.0 }
 0x376   : > { %v6853_v33 = vpack.c.bf16 %v5753_v30, %v5752_v31  ;;  %v6854_v28 = vpack.c.bf16 %v5755_v32, %v5754_v59 }
 0x378   : > { %5851 = vst [vmem:[%s9514_s6 + $0x38] sm:$0x77] %v6853_v33  ;;  %5852 = vst [vmem:[%s9514_s6 + $0x40] sm:$0x77] %v6854_v28 }
 0x381   : > { %v5643_v61 = vpop.f32.mrf.mxu0  ;;  %v5684_v53 = vpop.f32.mrf.mxu1 }
 0x382   : > { %v5708_v7 = vmax.f32 %v9492_v10, %v5643_v61  ;;  %v5710_v41 = vmax.f32 %v9505_v49, %v5684_v53 }
 0x383   : > { %v5645_v38 = vpop.f32.mrf.mxu0  ;;  %v6935_v23 = vpop.f32.mrf.mxu1 }
 0x384   : > { %v5735_v36 = vadd.f32 %v9503_v39, %v5708_v7  ;;  %v5737_v27 = vadd.f32 %v9503_v39, %v5710_v41  ;;  %v5709_v58 = vmax.f32 %v9496_v55, %v5645_v38 }
 0x385   : > { %v5647_v37 = vpop.f32.mrf.mxu0  ;;  %v5687_v46 = vpop.f32.mrf.mxu1 }
 0x386   : > { %v5758_v47 = vmax.f32 %v5737_v27, 0.0  ;;  %v5736_v4 = vadd.f32 %v9503_v39, %v5709_v58  ;;  %v5756_v10 = vmax.f32 %v5735_v36, 0.0 }
 0x387   : > { %v5648_v63 = vpop.f32.mrf.mxu0  ;;  %v6936_v34 = vpop.f32.mrf.mxu1 }
 0x388   : > { %v6856_v35 = vpack.c.bf16 %v5758_v47, %v5758_v47  ;;  %v5757_v15 = vmax.f32 %v5736_v4, 0.0 }
 0x38a   : > { %5854 = vst [vmem:[%s9514_s6 + $0x50] sm:$0x7] %v6856_v35  ;;  %v6855_v49 = vpack.c.bf16 %v5757_v15, %v5756_v10 }
 0x38c   : > { %5853 = vst [vmem:[%s9514_s6 + $0x48] sm:$0x77] %v6855_v49 }
 0x38d PF: > { %s13_s18 = sadd.s32 1, %s7678_s18   ;;  %s9590_s12 = smov %s7658_s13 }
 0x38e   : > { %p10_p12 = scmp.ge.s32.totalorder %s13_s18, 6   ;;  %s9591_s13 = smov %s7755_s25 }
 0x38f   : > { %s9592_s14 = smov %s7670_s16  ;;  %s9593_s15 = smov %s7674_s17 }
 0x390   : > { %s9594_s16 = smov %s9597_s19  ;;  %s9595_s17 = smov %s9601_s20 }
 0x391   :  { %12 = sbr.rel (!%p10_p12) target bundleno = 4 (0x4), region = 102 }

// kernel: net_forward.4
= control target key start
LH: loop header
LB: loop body
LE: loop exit
PB: predicated region body
PF: predicated region fallthrough
CT: control target
= control target key end

     0   :  { %s3691_s12 = smov 0   ;;  %s3693_s13 = smov 0   ;;  %s4602_s0 = inlined_call_operand.vmem [shape: bf16[4,2,150,1280], index: 0, kind: input, shape index: {}]   ;;  %s4603_s1 = inlined_call_operand.vmem [shape: bf16[16,150], index: 1, kind: input, shape index: {}]   ;;  %s4604_s2 = inlined_call_operand.vmem [shape: f32[16,1], index: 2, kind: input, shape index: {}]   ;;  %s4605_s3 = inlined_call_operand.vmem [shape: bf16[2,16,1280], index: 3, kind: output, shape index: {}]  }
   0x1   :  { %s3695_s14 = smov 0   ;;  %s3697_s15 = smov 0  }
   0x2   :  { %s3699_s16 = smov 0   ;;  %s3701_s17 = smov 0  }
   0x3   :  { %s3703_s18 = smov 0  }
   0x4 LB: > { %s22_s19 = sadd.s32 1, %s3660_s16  ;;  %s25_s20 = sadd.s32 1, %s3664_s17  ;;  %s3668_s18 = sphi %s3703_s18, %s13_s18   ;;  %s3664_s17 = sphi %s3701_s17, %s4612_s17   ;;  %s3660_s16 = sphi %s3699_s16, %s4611_s16   ;;  %s3656_s15 = sphi %s3697_s15, %s4610_s15   ;;  %s3652_s14 = sphi %s3695_s14, %s4609_s14   ;;  %s3648_s13 = sphi %s3693_s13, %s4608_s13   ;;  %s3644_s12 = sphi %s3691_s12, %s4607_s12  }
   0x5   : > { %p23_p0 = scmp.ge.s32.totalorder %s22_s19, 2  ;;  %s2704_s21 = sadd.s32 4294967295, %s3668_s18  }
   0x6   : > { %p41_p1 = scmp.ne.s32.totalorder %s3648_s13, %s3644_s12  ;;  %p42_p2 = scmp.eq.s32.totalorder %s3668_s18, 0 }
   0x7   : > { %s4614_s19 = smov (%p23_p0, %s22_s19), 0  ;;  %s4616_s20 = smov (!%p23_p0, %s25_s20), %s3664_s17 }
   0x8   : > { %p27_p3 = scmp.ge.s32.totalorder %s4616_s20, 2  ;;  %p115_p4 = scmp.eq.s32.totalorder %s2704_s21, 3 }
   0x9   : > { %s30_s22 = ssub.s32 %s3660_s16, %s4614_s19  ;;  %p43_p5 = por %p42_p2, %p41_p1 }
   0xa   : > { %s4618_s20 = smov (%p27_p3, %s4616_s20), 0  ;;  %p3739_p6 = por %p115_p4, %p41_p1 }
   0xb   : > { %s29_s24 = ssub.s32 %s3664_s17, %s4618_s20  ;;  %s34_s26 = sadd.s32 1, %s3648_s13 }
   0xc   : > { %s31_s25 = sor.u32 %s30_s22, %s29_s24  ;;  %p2707_p8 = scmp.ge.s32.totalorder %s3668_s18, 4 }
   0xd   : > { %p32_p7 = scmp.eq.s32.totalorder %s31_s25, 0 }
   0xe   : > { %143 = sbr.rel (%p2707_p8) target bundleno = 154 (0x9a), region = 24 }
   0xf   : > { %s3747_s27 = scalar_select %p32_p7, %s3648_s13, %s34_s26  }
  0x13   : > { %146 = sbr.rel (!%p43_p5) target bundleno = 154 (0x9a), region = 28  ;;  %s148_s28 = sand.u32 (%p43_p5), 1, %s3648_s13  }
  0x14   : > { %s151_s29 = smul.u32 (%p43_p5), 5, %s3660_s16 }
  0x15   : > { %s3274_s30 = smul.u32 (%p43_p5), 1520, %s148_s28 }
  0x16   : > { %s3275_s4 = smul.u32 (%p43_p5), 190, %s3664_s17 }
  0x17   : > { %s3761_s10 = scalar_lea.vmem (%p43_p5), [#allocation2], %s3274_s30 }
  0x18   : > { %s153_s5 = sadd.s32 %s3275_s4, %s151_s29 }
  0x19   : > { %s2708_s6 = sshll.u32 %s153_s5, 2 }
  0x1a   : > { %s3756_s9 = scalar_lea.vmem %s4602_s0, %s2708_s6 }
  0x1b   : > { %v170_v0 = vld [vmem:[%s3756_s9] sm:$0xff]  ;;  %v172_v1 = vld [vmem:[%s3756_s9 + $0x8] sm:$0xff]  ;;  %v176_v3 = vld [vmem:[%s3756_s9 + $0x30] sm:$0xff] }
  0x1c   : > { %v174_v2 = vld [vmem:[%s3756_s9 + $0x28] sm:$0xff]  ;;  %171 = vst [vmem:[%s3761_s10] sm:$0xff] %v170_v0  ;;  %173 = vst [vmem:[%s3761_s10 + $0x8] sm:$0xff] %v172_v1  ;;  %v178_v4 = vld [vmem:[%s3756_s9 + $0x50] sm:$0xff] }
  0x1d   : > { %175 = vst [vmem:[%s3761_s10 + $0x14] sm:$0xff] %v174_v2  ;;  %v180_v5 = vld [vmem:[%s3756_s9 + $0x58] sm:$0xff]  ;;  %177 = vst [vmem:[%s3761_s10 + $0x1c] sm:$0xff] %v176_v3  ;;  %v184_v7 = vld [vmem:[%s3756_s9 + $0x80] sm:$0xff] }
  0x1e   : > { %179 = vst [vmem:[%s3761_s10 + $0x28] sm:$0xff] %v178_v4  ;;  %181 = vst [vmem:[%s3761_s10 + $0x30] sm:$0xff] %v180_v5  ;;  %v182_v6 = vld [vmem:[%s3756_s9 + $0x78] sm:$0xff]  ;;  %v186_v8 = vld [vmem:[%s3756_s9 + $0xa0] sm:$0xff] }
  0x1f   : > { %183 = vst [vmem:[%s3761_s10 + $0x3c] sm:$0xff] %v182_v6  ;;  %185 = vst [vmem:[%s3761_s10 + $0x44] sm:$0xff] %v184_v7  ;;  %v188_v9 = vld [vmem:[%s3756_s9 + $0xa8] sm:$0xff]  ;;  %v192_v11 = vld [vmem:[%s3756_s9 + $0xd0] sm:$0xff] }
  0x20   : > { %187 = vst [vmem:[%s3761_s10 + $0x50] sm:$0xff] %v186_v8  ;;  %v190_v10 = vld [vmem:[%s3756_s9 + $0xc8] sm:$0xff]  ;;  %189 = vst [vmem:[%s3761_s10 + $0x58] sm:$0xff] %v188_v9  ;;  %v194_v12 = vld [vmem:[%s3756_s9 + $0xf0] sm:$0xff] }
  0x21   : > { %191 = vst [vmem:[%s3761_s10 + $0x64] sm:$0xff] %v190_v10  ;;  %193 = vst [vmem:[%s3761_s10 + $0x6c] sm:$0xff] %v192_v11  ;;  %v196_v13 = vld [vmem:[%s3756_s9 + $0xf8] sm:$0xff]  ;;  %v200_v15 = vld [vmem:[%s3756_s9 + $0x120] sm:$0xff] }
  0x22   : > { %v198_v14 = vld [vmem:[%s3756_s9 + $0x118] sm:$0xff]  ;;  %195 = vst [vmem:[%s3761_s10 + $0x78] sm:$0xff] %v194_v12  ;;  %197 = vst [vmem:[%s3761_s10 + $0x80] sm:$0xff] %v196_v13  ;;  %v202_v16 = vld [vmem:[%s3756_s9 + $0x140] sm:$0xff] }
  0x23   : > { %199 = vst [vmem:[%s3761_s10 + $0x8c] sm:$0xff] %v198_v14  ;;  %v204_v17 = vld [vmem:[%s3756_s9 + $0x148] sm:$0xff]  ;;  %201 = vst [vmem:[%s3761_s10 + $0x94] sm:$0xff] %v200_v15  ;;  %v208_v19 = vld [vmem:[%s3756_s9 + $0x170] sm:$0xff] }
  0x24   : > { %203 = vst [vmem:[%s3761_s10 + $0xa0] sm:$0xff] %v202_v16  ;;  %205 = vst [vmem:[%s3761_s10 + $0xa8] sm:$0xff] %v204_v17  ;;  %v206_v18 = vld [vmem:[%s3756_s9 + $0x168] sm:$0xff]  ;;  %v210_v20 = vld [vmem:[%s3756_s9 + $0x190] sm:$0xff] }
  0x25   : > { %207 = vst [vmem:[%s3761_s10 + $0xb4] sm:$0xff] %v206_v18  ;;  %209 = vst [vmem:[%s3761_s10 + $0xbc] sm:$0xff] %v208_v19  ;;  %v212_v21 = vld [vmem:[%s3756_s9 + $0x198] sm:$0xff]  ;;  %v216_v23 = vld [vmem:[%s3756_s9 + $0x1c0] sm:$0xff] }
  0x26   : > { %211 = vst [vmem:[%s3761_s10 + $0xc8] sm:$0xff] %v210_v20  ;;  %v214_v22 = vld [vmem:[%s3756_s9 + $0x1b8] sm:$0xff]  ;;  %213 = vst [vmem:[%s3761_s10 + $0xd0] sm:$0xff] %v212_v21  ;;  %v218_v24 = vld [vmem:[%s3756_s9 + $0x1e0] sm:$0xff] }
  0x27   : > { %215 = vst [vmem:[%s3761_s10 + $0xdc] sm:$0xff] %v214_v22  ;;  %217 = vst [vmem:[%s3761_s10 + $0xe4] sm:$0xff] %v216_v23  ;;  %v220_v25 = vld [vmem:[%s3756_s9 + $0x1e8] sm:$0xff]  ;;  %v224_v27 = vld [vmem:[%s3756_s9 + $0x210] sm:$0xff] }
  0x28   : > { %v222_v26 = vld [vmem:[%s3756_s9 + $0x208] sm:$0xff]  ;;  %219 = vst [vmem:[%s3761_s10 + $0xf0] sm:$0xff] %v218_v24  ;;  %221 = vst [vmem:[%s3761_s10 + $0xf8] sm:$0xff] %v220_v25  ;;  %v226_v28 = vld [vmem:[%s3756_s9 + $0x230] sm:$0xff] }
  0x29   : > { %223 = vst [vmem:[%s3761_s10 + $0x104] sm:$0xff] %v222_v26  ;;  %v228_v29 = vld [vmem:[%s3756_s9 + $0x238] sm:$0xff]  ;;  %225 = vst [vmem:[%s3761_s10 + $0x10c] sm:$0xff] %v224_v27  ;;  %v232_v31 = vld [vmem:[%s3756_s9 + $0x260] sm:$0xff] }
  0x2a   : > { %227 = vst [vmem:[%s3761_s10 + $0x118] sm:$0xff] %v226_v28  ;;  %229 = vst [vmem:[%s3761_s10 + $0x120] sm:$0xff] %v228_v29  ;;  %v230_v30 = vld [vmem:[%s3756_s9 + $0x258] sm:$0xff]  ;;  %v234_v32 = vld [vmem:[%s3756_s9 + $0x280] sm:$0xff] }
  0x2b   : > { %231 = vst [vmem:[%s3761_s10 + $0x12c] sm:$0xff] %v230_v30  ;;  %233 = vst [vmem:[%s3761_s10 + $0x134] sm:$0xff] %v232_v31  ;;  %v236_v33 = vld [vmem:[%s3756_s9 + $0x288] sm:$0xff]  ;;  %v240_v35 = vld [vmem:[%s3756_s9 + $0x2b0] sm:$0xff] }
  0x2c   : > { %235 = vst [vmem:[%s3761_s10 + $0x140] sm:$0xff] %v234_v32  ;;  %v238_v34 = vld [vmem:[%s3756_s9 + $0x2a8] sm:$0xff]  ;;  %237 = vst [vmem:[%s3761_s10 + $0x148] sm:$0xff] %v236_v33  ;;  %v242_v36 = vld [vmem:[%s3756_s9 + $0x2d0] sm:$0xff] }
  0x2d   : > { %239 = vst [vmem:[%s3761_s10 + $0x154] sm:$0xff] %v238_v34  ;;  %241 = vst [vmem:[%s3761_s10 + $0x15c] sm:$0xff] %v240_v35  ;;  %v244_v37 = vld [vmem:[%s3756_s9 + $0x2d8] sm:$0xff]  ;;  %v246_v38 = vld [vmem:[%s3756_s9 + $0x5f0] sm:$0xff] }
  0x2e   : > { %243 = vst [vmem:[%s3761_s10 + $0x168] sm:$0xff] %v242_v36  ;;  %245 = vst [vmem:[%s3761_s10 + $0x170] sm:$0xff] %v244_v37  ;;  %v248_v39 = vld [vmem:[%s3756_s9 + $0x5f8] sm:$0xff]  ;;  %v252_v41 = vld [vmem:[%s3756_s9 + $0x620] sm:$0xff] }
  0x2f   : > { %247 = vst [vmem:[%s3761_s10 + $0x17c] sm:$0xff] %v246_v38  ;;  %v250_v40 = vld [vmem:[%s3756_s9 + $0x618] sm:$0xff]  ;;  %249 = vst [vmem:[%s3761_s10 + $0x184] sm:$0xff] %v248_v39  ;;  %v254_v42 = vld [vmem:[%s3756_s9 + $0x640] sm:$0xff] }
  0x30   : > { %251 = vst [vmem:[%s3761_s10 + $0x190] sm:$0xff] %v250_v40  ;;  %253 = vst [vmem:[%s3761_s10 + $0x198] sm:$0xff] %v252_v41  ;;  %v256_v43 = vld [vmem:[%s3756_s9 + $0x648] sm:$0xff]  ;;  %v260_v45 = vld [vmem:[%s3756_s9 + $0x670] sm:$0xff] }
  0x31   : > { %v258_v44 = vld [vmem:[%s3756_s9 + $0x668] sm:$0xff]  ;;  %255 = vst [vmem:[%s3761_s10 + $0x1a4] sm:$0xff] %v254_v42  ;;  %257 = vst [vmem:[%s3761_s10 + $0x1ac] sm:$0xff] %v256_v43  ;;  %v262_v46 = vld [vmem:[%s3756_s9 + $0x690] sm:$0xff] }
  0x32   : > { %259 = vst [vmem:[%s3761_s10 + $0x1b8] sm:$0xff] %v258_v44  ;;  %v264_v47 = vld [vmem:[%s3756_s9 + $0x698] sm:$0xff]  ;;  %261 = vst [vmem:[%s3761_s10 + $0x1c0] sm:$0xff] %v260_v45  ;;  %v268_v49 = vld [vmem:[%s3756_s9 + $0x6c0] sm:$0xff] }
  0x33   : > { %263 = vst [vmem:[%s3761_s10 + $0x1cc] sm:$0xff] %v262_v46  ;;  %265 = vst [vmem:[%s3761_s10 + $0x1d4] sm:$0xff] %v264_v47  ;;  %v266_v48 = vld [vmem:[%s3756_s9 + $0x6b8] sm:$0xff]  ;;  %v270_v50 = vld [vmem:[%s3756_s9 + $0x6e0] sm:$0xff] }
  0x34   : > { %267 = vst [vmem:[%s3761_s10 + $0x1e0] sm:$0xff] %v266_v48  ;;  %269 = vst [vmem:[%s3761_s10 + $0x1e8] sm:$0xff] %v268_v49  ;;  %v272_v51 = vld [vmem:[%s3756_s9 + $0x6e8] sm:$0xff]  ;;  %v276_v53 = vld [vmem:[%s3756_s9 + $0x710] sm:$0xff] }
  0x35   : > { %271 = vst [vmem:[%s3761_s10 + $0x1f4] sm:$0xff] %v270_v50  ;;  %v274_v52 = vld [vmem:[%s3756_s9 + $0x708] sm:$0xff]  ;;  %273 = vst [vmem:[%s3761_s10 + $0x1fc] sm:$0xff] %v272_v51  ;;  %v278_v54 = vld [vmem:[%s3756_s9 + $0x730] sm:$0xff] }
  0x36   : > { %275 = vst [vmem:[%s3761_s10 + $0x208] sm:$0xff] %v274_v52  ;;  %277 = vst [vmem:[%s3761_s10 + $0x210] sm:$0xff] %v276_v53  ;;  %v280_v55 = vld [vmem:[%s3756_s9 + $0x738] sm:$0xff]  ;;  %v284_v57 = vld [vmem:[%s3756_s9 + $0x760] sm:$0xff] }
  0x37   : > { %v282_v56 = vld [vmem:[%s3756_s9 + $0x758] sm:$0xff]  ;;  %279 = vst [vmem:[%s3761_s10 + $0x21c] sm:$0xff] %v278_v54  ;;  %281 = vst [vmem:[%s3761_s10 + $0x224] sm:$0xff] %v280_v55  ;;  %v286_v58 = vld [vmem:[%s3756_s9 + $0x780] sm:$0xff] }
  0x38   : > { %283 = vst [vmem:[%s3761_s10 + $0x230] sm:$0xff] %v282_v56  ;;  %v288_v59 = vld [vmem:[%s3756_s9 + $0x788] sm:$0xff]  ;;  %285 = vst [vmem:[%s3761_s10 + $0x238] sm:$0xff] %v284_v57  ;;  %v292_v61 = vld [vmem:[%s3756_s9 + $0x7b0] sm:$0xff] }
  0x39   : > { %287 = vst [vmem:[%s3761_s10 + $0x244] sm:$0xff] %v286_v58  ;;  %289 = vst [vmem:[%s3761_s10 + $0x24c] sm:$0xff] %v288_v59  ;;  %v290_v60 = vld [vmem:[%s3756_s9 + $0x7a8] sm:$0xff]  ;;  %v294_v62 = vld [vmem:[%s3756_s9 + $0x7d0] sm:$0xff] }
  0x3a   : > { %291 = vst [vmem:[%s3761_s10 + $0x258] sm:$0xff] %v290_v60  ;;  %293 = vst [vmem:[%s3761_s10 + $0x260] sm:$0xff] %v292_v61  ;;  %v296_v63 = vld [vmem:[%s3756_s9 + $0x7d8] sm:$0xff]  ;;  %v300_v1 = vld [vmem:[%s3756_s9 + $0x800] sm:$0xff] }
  0x3b   : > { %295 = vst [vmem:[%s3761_s10 + $0x26c] sm:$0xff] %v294_v62  ;;  %v298_v0 = vld [vmem:[%s3756_s9 + $0x7f8] sm:$0xff]  ;;  %297 = vst [vmem:[%s3761_s10 + $0x274] sm:$0xff] %v296_v63  ;;  %v302_v2 = vld [vmem:[%s3756_s9 + $0x820] sm:$0xff] }
  0x3c   : > { %299 = vst [vmem:[%s3761_s10 + $0x280] sm:$0xff] %v298_v0  ;;  %301 = vst [vmem:[%s3761_s10 + $0x288] sm:$0xff] %v300_v1  ;;  %v304_v3 = vld [vmem:[%s3756_s9 + $0x828] sm:$0xff]  ;;  %v308_v5 = vld [vmem:[%s3756_s9 + $0x850] sm:$0xff] }
  0x3d   : > { %v306_v4 = vld [vmem:[%s3756_s9 + $0x848] sm:$0xff]  ;;  %303 = vst [vmem:[%s3761_s10 + $0x294] sm:$0xff] %v302_v2  ;;  %305 = vst [vmem:[%s3761_s10 + $0x29c] sm:$0xff] %v304_v3  ;;  %v310_v6 = vld [vmem:[%s3756_s9 + $0x870] sm:$0xff] }
  0x3e   : > { %307 = vst [vmem:[%s3761_s10 + $0x2a8] sm:$0xff] %v306_v4  ;;  %v312_v7 = vld [vmem:[%s3756_s9 + $0x878] sm:$0xff]  ;;  %309 = vst [vmem:[%s3761_s10 + $0x2b0] sm:$0xff] %v308_v5  ;;  %v316_v9 = vld [vmem:[%s3756_s9 + $0x8a0] sm:$0xff] }
  0x3f   : > { %311 = vst [vmem:[%s3761_s10 + $0x2bc] sm:$0xff] %v310_v6  ;;  %313 = vst [vmem:[%s3761_s10 + $0x2c4] sm:$0xff] %v312_v7  ;;  %v314_v8 = vld [vmem:[%s3756_s9 + $0x898] sm:$0xff]  ;;  %v318_v10 = vld [vmem:[%s3756_s9 + $0x8c0] sm:$0xff] }
  0x40   : > { %315 = vst [vmem:[%s3761_s10 + $0x2d0] sm:$0xff] %v314_v8  ;;  %317 = vst [vmem:[%s3761_s10 + $0x2d8] sm:$0xff] %v316_v9  ;;  %v320_v11 = vld [vmem:[%s3756_s9 + $0x8c8] sm:$0xff]  ;;  %v322_v12 = vld [vmem:[%s3756_s9 + $0xbe0] sm:$0xff] }
  0x41   : > { %319 = vst [vmem:[%s3761_s10 + $0x2e4] sm:$0xff] %v318_v10  ;;  %v324_v13 = vld [vmem:[%s3756_s9 + $0xbe8] sm:$0xff]  ;;  %321 = vst [vmem:[%s3761_s10 + $0x2ec] sm:$0xff] %v320_v11  ;;  %v328_v15 = vld [vmem:[%s3756_s9 + $0xc10] sm:$0xff] }
  0x42   : > { %323 = vst [vmem:[%s3761_s10 + $0x2f8] sm:$0xff] %v322_v12  ;;  %325 = vst [vmem:[%s3761_s10 + $0x300] sm:$0xff] %v324_v13  ;;  %v326_v14 = vld [vmem:[%s3756_s9 + $0xc08] sm:$0xff]  ;;  %v330_v16 = vld [vmem:[%s3756_s9 + $0xc30] sm:$0xff] }
  0x43   : > { %327 = vst [vmem:[%s3761_s10 + $0x30c] sm:$0xff] %v326_v14  ;;  %329 = vst [vmem:[%s3761_s10 + $0x314] sm:$0xff] %v328_v15  ;;  %v332_v17 = vld [vmem:[%s3756_s9 + $0xc38] sm:$0xff]  ;;  %v336_v19 = vld [vmem:[%s3756_s9 + $0xc60] sm:$0xff] }
  0x44   : > { %331 = vst [vmem:[%s3761_s10 + $0x320] sm:$0xff] %v330_v16  ;;  %v334_v18 = vld [vmem:[%s3756_s9 + $0xc58] sm:$0xff]  ;;  %333 = vst [vmem:[%s3761_s10 + $0x328] sm:$0xff] %v332_v17  ;;  %v338_v20 = vld [vmem:[%s3756_s9 + $0xc80] sm:$0xff] }
  0x45   : > { %335 = vst [vmem:[%s3761_s10 + $0x334] sm:$0xff] %v334_v18  ;;  %337 = vst [vmem:[%s3761_s10 + $0x33c] sm:$0xff] %v336_v19  ;;  %v340_v21 = vld [vmem:[%s3756_s9 + $0xc88] sm:$0xff]  ;;  %v344_v23 = vld [vmem:[%s3756_s9 + $0xcb0] sm:$0xff] }
  0x46   : > { %v342_v22 = vld [vmem:[%s3756_s9 + $0xca8] sm:$0xff]  ;;  %339 = vst [vmem:[%s3761_s10 + $0x348] sm:$0xff] %v338_v20  ;;  %341 = vst [vmem:[%s3761_s10 + $0x350] sm:$0xff] %v340_v21  ;;  %v346_v24 = vld [vmem:[%s3756_s9 + $0xcd0] sm:$0xff] }
  0x47   : > { %343 = vst [vmem:[%s3761_s10 + $0x35c] sm:$0xff] %v342_v22  ;;  %v348_v25 = vld [vmem:[%s3756_s9 + $0xcd8] sm:$0xff]  ;;  %345 = vst [vmem:[%s3761_s10 + $0x364] sm:$0xff] %v344_v23  ;;  %v352_v27 = vld [vmem:[%s3756_s9 + $0xd00] sm:$0xff] }
  0x48   : > { %347 = vst [vmem:[%s3761_s10 + $0x370] sm:$0xff] %v346_v24  ;;  %349 = vst [vmem:[%s3761_s10 + $0x378] sm:$0xff] %v348_v25  ;;  %v350_v26 = vld [vmem:[%s3756_s9 + $0xcf8] sm:$0xff]  ;;  %v354_v28 = vld [vmem:[%s3756_s9 + $0xd20] sm:$0xff] }
  0x49   : > { %351 = vst [vmem:[%s3761_s10 + $0x384] sm:$0xff] %v350_v26  ;;  %353 = vst [vmem:[%s3761_s10 + $0x38c] sm:$0xff] %v352_v27  ;;  %v356_v29 = vld [vmem:[%s3756_s9 + $0xd28] sm:$0xff]  ;;  %v360_v31 = vld [vmem:[%s3756_s9 + $0xd50] sm:$0xff] }
  0x4a   : > { %355 = vst [vmem:[%s3761_s10 + $0x398] sm:$0xff] %v354_v28  ;;  %v358_v30 = vld [vmem:[%s3756_s9 + $0xd48] sm:$0xff]  ;;  %357 = vst [vmem:[%s3761_s10 + $0x3a0] sm:$0xff] %v356_v29  ;;  %v362_v32 = vld [vmem:[%s3756_s9 + $0xd70] sm:$0xff] }
  0x4b   : > { %359 = vst [vmem:[%s3761_s10 + $0x3ac] sm:$0xff] %v358_v30  ;;  %361 = vst [vmem:[%s3761_s10 + $0x3b4] sm:$0xff] %v360_v31  ;;  %v364_v33 = vld [vmem:[%s3756_s9 + $0xd78] sm:$0xff]  ;;  %v368_v35 = vld [vmem:[%s3756_s9 + $0xda0] sm:$0xff] }
  0x4c   : > { %v366_v34 = vld [vmem:[%s3756_s9 + $0xd98] sm:$0xff]  ;;  %363 = vst [vmem:[%s3761_s10 + $0x3c0] sm:$0xff] %v362_v32  ;;  %365 = vst [vmem:[%s3761_s10 + $0x3c8] sm:$0xff] %v364_v33  ;;  %v370_v36 = vld [vmem:[%s3756_s9 + $0xdc0] sm:$0xff] }
  0x4d   : > { %367 = vst [vmem:[%s3761_s10 + $0x3d4] sm:$0xff] %v366_v34  ;;  %v372_v37 = vld [vmem:[%s3756_s9 + $0xdc8] sm:$0xff]  ;;  %369 = vst [vmem:[%s3761_s10 + $0x3dc] sm:$0xff] %v368_v35  ;;  %v376_v39 = vld [vmem:[%s3756_s9 + $0xdf0] sm:$0xff] }
  0x4e   : > { %371 = vst [vmem:[%s3761_s10 + $0x3e8] sm:$0xff] %v370_v36  ;;  %373 = vst [vmem:[%s3761_s10 + $0x3f0] sm:$0xff] %v372_v37  ;;  %v374_v38 = vld [vmem:[%s3756_s9 + $0xde8] sm:$0xff]  ;;  %v378_v40 = vld [vmem:[%s3756_s9 + $0xe10] sm:$0xff] }
  0x4f   : > { %375 = vst [vmem:[%s3761_s10 + $0x3fc] sm:$0xff] %v374_v38  ;;  %377 = vst [vmem:[%s3761_s10 + $0x404] sm:$0xff] %v376_v39  ;;  %v380_v41 = vld [vmem:[%s3756_s9 + $0xe18] sm:$0xff]  ;;  %v384_v43 = vld [vmem:[%s3756_s9 + $0xe40] sm:$0xff] }
  0x50   : > { %379 = vst [vmem:[%s3761_s10 + $0x410] sm:$0xff] %v378_v40  ;;  %v382_v42 = vld [vmem:[%s3756_s9 + $0xe38] sm:$0xff]  ;;  %381 = vst [vmem:[%s3761_s10 + $0x418] sm:$0xff] %v380_v41  ;;  %v386_v44 = vld [vmem:[%s3756_s9 + $0xe60] sm:$0xff] }
  0x51   : > { %383 = vst [vmem:[%s3761_s10 + $0x424] sm:$0xff] %v382_v42  ;;  %385 = vst [vmem:[%s3761_s10 + $0x42c] sm:$0xff] %v384_v43  ;;  %v388_v45 = vld [vmem:[%s3756_s9 + $0xe68] sm:$0xff]  ;;  %v392_v47 = vld [vmem:[%s3756_s9 + $0xe90] sm:$0xff] }
  0x52   : > { %v390_v46 = vld [vmem:[%s3756_s9 + $0xe88] sm:$0xff]  ;;  %387 = vst [vmem:[%s3761_s10 + $0x438] sm:$0xff] %v386_v44  ;;  %389 = vst [vmem:[%s3761_s10 + $0x440] sm:$0xff] %v388_v45  ;;  %v394_v48 = vld [vmem:[%s3756_s9 + $0xeb0] sm:$0xff] }
  0x53   : > { %391 = vst [vmem:[%s3761_s10 + $0x44c] sm:$0xff] %v390_v46  ;;  %v396_v49 = vld [vmem:[%s3756_s9 + $0xeb8] sm:$0xff]  ;;  %393 = vst [vmem:[%s3761_s10 + $0x454] sm:$0xff] %v392_v47  ;;  %v398_v50 = vld [vmem:[%s3756_s9 + $0x11d0] sm:$0xff] }
  0x54   : > { %395 = vst [vmem:[%s3761_s10 + $0x460] sm:$0xff] %v394_v48  ;;  %397 = vst [vmem:[%s3761_s10 + $0x468] sm:$0xff] %v396_v49  ;;  %v400_v51 = vld [vmem:[%s3756_s9 + $0x11d8] sm:$0xff]  ;;  %v404_v53 = vld [vmem:[%s3756_s9 + $0x1200] sm:$0xff] }
  0x55   : > { %v402_v52 = vld [vmem:[%s3756_s9 + $0x11f8] sm:$0xff]  ;;  %399 = vst [vmem:[%s3761_s10 + $0x474] sm:$0xff] %v398_v50  ;;  %401 = vst [vmem:[%s3761_s10 + $0x47c] sm:$0xff] %v400_v51  ;;  %v406_v54 = vld [vmem:[%s3756_s9 + $0x1220] sm:$0xff] }
  0x56   : > { %403 = vst [vmem:[%s3761_s10 + $0x488] sm:$0xff] %v402_v52  ;;  %v408_v55 = vld [vmem:[%s3756_s9 + $0x1228] sm:$0xff]  ;;  %405 = vst [vmem:[%s3761_s10 + $0x490] sm:$0xff] %v404_v53  ;;  %v412_v57 = vld [vmem:[%s3756_s9 + $0x1250] sm:$0xff] }
  0x57   : > { %407 = vst [vmem:[%s3761_s10 + $0x49c] sm:$0xff] %v406_v54  ;;  %409 = vst [vmem:[%s3761_s10 + $0x4a4] sm:$0xff] %v408_v55  ;;  %v410_v56 = vld [vmem:[%s3756_s9 + $0x1248] sm:$0xff]  ;;  %v414_v58 = vld [vmem:[%s3756_s9 + $0x1270] sm:$0xff] }
  0x58   : > { %411 = vst [vmem:[%s3761_s10 + $0x4b0] sm:$0xff] %v410_v56  ;;  %413 = vst [vmem:[%s3761_s10 + $0x4b8] sm:$0xff] %v412_v57  ;;  %v416_v59 = vld [vmem:[%s3756_s9 + $0x1278] sm:$0xff]  ;;  %v420_v61 = vld [vmem:[%s3756_s9 + $0x12a0] sm:$0xff] }
  0x59   : > { %415 = vst [vmem:[%s3761_s10 + $0x4c4] sm:$0xff] %v414_v58  ;;  %v418_v60 = vld [vmem:[%s3756_s9 + $0x1298] sm:$0xff]  ;;  %417 = vst [vmem:[%s3761_s10 + $0x4cc] sm:$0xff] %v416_v59  ;;  %v422_v62 = vld [vmem:[%s3756_s9 + $0x12c0] sm:$0xff] }
  0x5a   : > { %419 = vst [vmem:[%s3761_s10 + $0x4d8] sm:$0xff] %v418_v60  ;;  %421 = vst [vmem:[%s3761_s10 + $0x4e0] sm:$0xff] %v420_v61  ;;  %v424_v63 = vld [vmem:[%s3756_s9 + $0x12c8] sm:$0xff]  ;;  %v428_v1 = vld [vmem:[%s3756_s9 + $0x12f0] sm:$0xff] }
  0x5b   : > { %v426_v0 = vld [vmem:[%s3756_s9 + $0x12e8] sm:$0xff]  ;;  %423 = vst [vmem:[%s3761_s10 + $0x4ec] sm:$0xff] %v422_v62  ;;  %425 = vst [vmem:[%s3761_s10 + $0x4f4] sm:$0xff] %v424_v63  ;;  %v430_v2 = vld [vmem:[%s3756_s9 + $0x1310] sm:$0xff] }
  0x5c   : > { %427 = vst [vmem:[%s3761_s10 + $0x500] sm:$0xff] %v426_v0  ;;  %v432_v3 = vld [vmem:[%s3756_s9 + $0x1318] sm:$0xff]  ;;  %429 = vst [vmem:[%s3761_s10 + $0x508] sm:$0xff] %v428_v1  ;;  %v436_v5 = vld [vmem:[%s3756_s9 + $0x1340] sm:$0xff] }
  0x5d   : > { %431 = vst [vmem:[%s3761_s10 + $0x514] sm:$0xff] %v430_v2  ;;  %433 = vst [vmem:[%s3761_s10 + $0x51c] sm:$0xff] %v432_v3  ;;  %v434_v4 = vld [vmem:[%s3756_s9 + $0x1338] sm:$0xff]  ;;  %v438_v6 = vld [vmem:[%s3756_s9 + $0x1360] sm:$0xff] }
  0x5e   : > { %435 = vst [vmem:[%s3761_s10 + $0x528] sm:$0xff] %v434_v4  ;;  %437 = vst [vmem:[%s3761_s10 + $0x530] sm:$0xff] %v436_v5  ;;  %v440_v7 = vld [vmem:[%s3756_s9 + $0x1368] sm:$0xff]  ;;  %v444_v9 = vld [vmem:[%s3756_s9 + $0x1390] sm:$0xff] }
  0x5f   : > { %439 = vst [vmem:[%s3761_s10 + $0x53c] sm:$0xff] %v438_v6  ;;  %v442_v8 = vld [vmem:[%s3756_s9 + $0x1388] sm:$0xff]  ;;  %441 = vst [vmem:[%s3761_s10 + $0x544] sm:$0xff] %v440_v7  ;;  %v446_v10 = vld [vmem:[%s3756_s9 + $0x13b0] sm:$0xff] }
  0x60   : > { %443 = vst [vmem:[%s3761_s10 + $0x550] sm:$0xff] %v442_v8  ;;  %445 = vst [vmem:[%s3761_s10 + $0x558] sm:$0xff] %v444_v9  ;;  %v448_v11 = vld [vmem:[%s3756_s9 + $0x13b8] sm:$0xff]  ;;  %v452_v13 = vld [vmem:[%s3756_s9 + $0x13e0] sm:$0xff] }
  0x61   : > { %v450_v12 = vld [vmem:[%s3756_s9 + $0x13d8] sm:$0xff]  ;;  %447 = vst [vmem:[%s3761_s10 + $0x564] sm:$0xff] %v446_v10  ;;  %449 = vst [vmem:[%s3761_s10 + $0x56c] sm:$0xff] %v448_v11  ;;  %v454_v14 = vld [vmem:[%s3756_s9 + $0x1400] sm:$0xff] }
  0x62   : > { %451 = vst [vmem:[%s3761_s10 + $0x578] sm:$0xff] %v450_v12  ;;  %v456_v15 = vld [vmem:[%s3756_s9 + $0x1408] sm:$0xff]  ;;  %453 = vst [vmem:[%s3761_s10 + $0x580] sm:$0xff] %v452_v13  ;;  %v460_v17 = vld [vmem:[%s3756_s9 + $0x1430] sm:$0xff] }
  0x63   : > { %455 = vst [vmem:[%s3761_s10 + $0x58c] sm:$0xff] %v454_v14  ;;  %457 = vst [vmem:[%s3761_s10 + $0x594] sm:$0xff] %v456_v15  ;;  %v458_v16 = vld [vmem:[%s3756_s9 + $0x1428] sm:$0xff]  ;;  %v462_v18 = vld [vmem:[%s3756_s9 + $0x1450] sm:$0xff] }
  0x64   : > { %459 = vst [vmem:[%s3761_s10 + $0x5a0] sm:$0xff] %v458_v16  ;;  %461 = vst [vmem:[%s3761_s10 + $0x5a8] sm:$0xff] %v460_v17  ;;  %v464_v19 = vld [vmem:[%s3756_s9 + $0x1458] sm:$0xff]  ;;  %v468_v21 = vld [vmem:[%s3756_s9 + $0x1480] sm:$0xff] }
  0x65   : > { %463 = vst [vmem:[%s3761_s10 + $0x5b4] sm:$0xff] %v462_v18  ;;  %v466_v20 = vld [vmem:[%s3756_s9 + $0x1478] sm:$0xff]  ;;  %465 = vst [vmem:[%s3761_s10 + $0x5bc] sm:$0xff] %v464_v19  ;;  %v470_v22 = vld [vmem:[%s3756_s9 + $0x14a0] sm:$0xff] }
  0x66   : > { %467 = vst [vmem:[%s3761_s10 + $0x5c8] sm:$0xff] %v466_v20  ;;  %469 = vst [vmem:[%s3761_s10 + $0x5d0] sm:$0xff] %v468_v21  ;;  %v472_v23 = vld [vmem:[%s3756_s9 + $0x14a8] sm:$0xff]  ;;  %v2709_v24 = vld [vmem:[%s3756_s9 + $0x10] sm:$0xf] }
  0x67   : > { %471 = vst [vmem:[%s3761_s10 + $0x5dc] sm:$0xff] %v470_v22  ;;  %473 = vst [vmem:[%s3761_s10 + $0x5e4] sm:$0xff] %v472_v23  ;;  %v2711_v25 = vld [vmem:[%s3756_s9 + $0x38] sm:$0xf]  ;;  %v2713_v26 = vld [vmem:[%s3756_s9 + $0x60] sm:$0xf] }
  0x68   : > { %2710 = vst [vmem:[%s3761_s10 + $0x10] sm:$0xf] %v2709_v24  ;;  %v2715_v27 = vld [vmem:[%s3756_s9 + $0x88] sm:$0xf]  ;;  %2712 = vst [vmem:[%s3761_s10 + $0x24] sm:$0xf] %v2711_v25 }
  0x69   : > { %2714 = vst [vmem:[%s3761_s10 + $0x38] sm:$0xf] %v2713_v26  ;;  %2716 = vst [vmem:[%s3761_s10 + $0x4c] sm:$0xf] %v2715_v27  ;;  %v2717_v28 = vld [vmem:[%s3756_s9 + $0xb0] sm:$0xf] }
  0x6a   : > { %v2719_v29 = vld [vmem:[%s3756_s9 + $0xd8] sm:$0xf]  ;;  %v2721_v30 = vld [vmem:[%s3756_s9 + $0x100] sm:$0xf]  ;;  %2718 = vst [vmem:[%s3761_s10 + $0x60] sm:$0xf] %v2717_v28 }
  0x6b   : > { %2720 = vst [vmem:[%s3761_s10 + $0x74] sm:$0xf] %v2719_v29  ;;  %2722 = vst [vmem:[%s3761_s10 + $0x88] sm:$0xf] %v2721_v30  ;;  %v2723_v31 = vld [vmem:[%s3756_s9 + $0x128] sm:$0xf] }
  0x6c   : > { %v2725_v32 = vld [vmem:[%s3756_s9 + $0x150] sm:$0xf]  ;;  %v2727_v33 = vld [vmem:[%s3756_s9 + $0x178] sm:$0xf]  ;;  %2724 = vst [vmem:[%s3761_s10 + $0x9c] sm:$0xf] %v2723_v31 }
  0x6d   : > { %2726 = vst [vmem:[%s3761_s10 + $0xb0] sm:$0xf] %v2725_v32  ;;  %2728 = vst [vmem:[%s3761_s10 + $0xc4] sm:$0xf] %v2727_v33  ;;  %v2729_v34 = vld [vmem:[%s3756_s9 + $0x1a0] sm:$0xf] }
  0x6e   : > { %v2731_v35 = vld [vmem:[%s3756_s9 + $0x1c8] sm:$0xf]  ;;  %v2733_v36 = vld [vmem:[%s3756_s9 + $0x1f0] sm:$0xf]  ;;  %2730 = vst [vmem:[%s3761_s10 + $0xd8] sm:$0xf] %v2729_v34 }
  0x6f   : > { %2732 = vst [vmem:[%s3761_s10 + $0xec] sm:$0xf] %v2731_v35  ;;  %2734 = vst [vmem:[%s3761_s10 + $0x100] sm:$0xf] %v2733_v36  ;;  %v2735_v37 = vld [vmem:[%s3756_s9 + $0x218] sm:$0xf] }
  0x70   : > { %v2737_v38 = vld [vmem:[%s3756_s9 + $0x240] sm:$0xf]  ;;  %v2739_v39 = vld [vmem:[%s3756_s9 + $0x268] sm:$0xf]  ;;  %2736 = vst [vmem:[%s3761_s10 + $0x114] sm:$0xf] %v2735_v37 }
  0x71   : > { %2738 = vst [vmem:[%s3761_s10 + $0x128] sm:$0xf] %v2737_v38  ;;  %2740 = vst [vmem:[%s3761_s10 + $0x13c] sm:$0xf] %v2739_v39  ;;  %v2741_v40 = vld [vmem:[%s3756_s9 + $0x290] sm:$0xf] }
  0x72   : > { %v2743_v41 = vld [vmem:[%s3756_s9 + $0x2b8] sm:$0xf]  ;;  %v2745_v42 = vld [vmem:[%s3756_s9 + $0x2e0] sm:$0xf]  ;;  %2742 = vst [vmem:[%s3761_s10 + $0x150] sm:$0xf] %v2741_v40 }
  0x73   : > { %2744 = vst [vmem:[%s3761_s10 + $0x164] sm:$0xf] %v2743_v41  ;;  %2746 = vst [vmem:[%s3761_s10 + $0x178] sm:$0xf] %v2745_v42  ;;  %v2747_v43 = vld [vmem:[%s3756_s9 + $0x600] sm:$0xf] }
  0x74   : > { %v2749_v44 = vld [vmem:[%s3756_s9 + $0x628] sm:$0xf]  ;;  %v2751_v45 = vld [vmem:[%s3756_s9 + $0x650] sm:$0xf]  ;;  %2748 = vst [vmem:[%s3761_s10 + $0x18c] sm:$0xf] %v2747_v43 }
  0x75   : > { %2750 = vst [vmem:[%s3761_s10 + $0x1a0] sm:$0xf] %v2749_v44  ;;  %2752 = vst [vmem:[%s3761_s10 + $0x1b4] sm:$0xf] %v2751_v45  ;;  %v2753_v46 = vld [vmem:[%s3756_s9 + $0x678] sm:$0xf] }
  0x76   : > { %v2755_v47 = vld [vmem:[%s3756_s9 + $0x6a0] sm:$0xf]  ;;  %v2757_v48 = vld [vmem:[%s3756_s9 + $0x6c8] sm:$0xf]  ;;  %2754 = vst [vmem:[%s3761_s10 + $0x1c8] sm:$0xf] %v2753_v46 }
  0x77   : > { %2756 = vst [vmem:[%s3761_s10 + $0x1dc] sm:$0xf] %v2755_v47  ;;  %2758 = vst [vmem:[%s3761_s10 + $0x1f0] sm:$0xf] %v2757_v48  ;;  %v2759_v49 = vld [vmem:[%s3756_s9 + $0x6f0] sm:$0xf] }
  0x78   : > { %v2761_v50 = vld [vmem:[%s3756_s9 + $0x718] sm:$0xf]  ;;  %v2763_v51 = vld [vmem:[%s3756_s9 + $0x740] sm:$0xf]  ;;  %2760 = vst [vmem:[%s3761_s10 + $0x204] sm:$0xf] %v2759_v49 }
  0x79   : > { %2762 = vst [vmem:[%s3761_s10 + $0x218] sm:$0xf] %v2761_v50  ;;  %2764 = vst [vmem:[%s3761_s10 + $0x22c] sm:$0xf] %v2763_v51  ;;  %v2765_v52 = vld [vmem:[%s3756_s9 + $0x768] sm:$0xf] }
  0x7a   : > { %v2767_v53 = vld [vmem:[%s3756_s9 + $0x790] sm:$0xf]  ;;  %v2769_v54 = vld [vmem:[%s3756_s9 + $0x7b8] sm:$0xf]  ;;  %2766 = vst [vmem:[%s3761_s10 + $0x240] sm:$0xf] %v2765_v52 }
  0x7b   : > { %2768 = vst [vmem:[%s3761_s10 + $0x254] sm:$0xf] %v2767_v53  ;;  %2770 = vst [vmem:[%s3761_s10 + $0x268] sm:$0xf] %v2769_v54  ;;  %v2771_v55 = vld [vmem:[%s3756_s9 + $0x7e0] sm:$0xf] }
  0x7c   : > { %v2773_v56 = vld [vmem:[%s3756_s9 + $0x808] sm:$0xf]  ;;  %v2775_v57 = vld [vmem:[%s3756_s9 + $0x830] sm:$0xf]  ;;  %2772 = vst [vmem:[%s3761_s10 + $0x27c] sm:$0xf] %v2771_v55 }
  0x7d   : > { %2774 = vst [vmem:[%s3761_s10 + $0x290] sm:$0xf] %v2773_v56  ;;  %2776 = vst [vmem:[%s3761_s10 + $0x2a4] sm:$0xf] %v2775_v57  ;;  %v2777_v58 = vld [vmem:[%s3756_s9 + $0x858] sm:$0xf] }
  0x7e   : > { %v2779_v59 = vld [vmem:[%s3756_s9 + $0x880] sm:$0xf]  ;;  %v2781_v60 = vld [vmem:[%s3756_s9 + $0x8a8] sm:$0xf]  ;;  %2778 = vst [vmem:[%s3761_s10 + $0x2b8] sm:$0xf] %v2777_v58 }
  0x7f   : > { %2780 = vst [vmem:[%s3761_s10 + $0x2cc] sm:$0xf] %v2779_v59  ;;  %2782 = vst [vmem:[%s3761_s10 + $0x2e0] sm:$0xf] %v2781_v60  ;;  %v2783_v61 = vld [vmem:[%s3756_s9 + $0x8d0] sm:$0xf] }
  0x80   : > { %v2785_v62 = vld [vmem:[%s3756_s9 + $0xbf0] sm:$0xf]  ;;  %v2787_v63 = vld [vmem:[%s3756_s9 + $0xc18] sm:$0xf]  ;;  %2784 = vst [vmem:[%s3761_s10 + $0x2f4] sm:$0xf] %v2783_v61 }
  0x81   : > { %2786 = vst [vmem:[%s3761_s10 + $0x308] sm:$0xf] %v2785_v62  ;;  %2788 = vst [vmem:[%s3761_s10 + $0x31c] sm:$0xf] %v2787_v63  ;;  %v2789_v0 = vld [vmem:[%s3756_s9 + $0xc40] sm:$0xf] }
  0x82   : > { %v2791_v1 = vld [vmem:[%s3756_s9 + $0xc68] sm:$0xf]  ;;  %v2793_v2 = vld [vmem:[%s3756_s9 + $0xc90] sm:$0xf]  ;;  %2790 = vst [vmem:[%s3761_s10 + $0x330] sm:$0xf] %v2789_v0 }
  0x83   : > { %2792 = vst [vmem:[%s3761_s10 + $0x344] sm:$0xf] %v2791_v1  ;;  %2794 = vst [vmem:[%s3761_s10 + $0x358] sm:$0xf] %v2793_v2  ;;  %v2795_v3 = vld [vmem:[%s3756_s9 + $0xcb8] sm:$0xf] }
  0x84   : > { %v2797_v4 = vld [vmem:[%s3756_s9 + $0xce0] sm:$0xf]  ;;  %v2799_v5 = vld [vmem:[%s3756_s9 + $0xd08] sm:$0xf]  ;;  %2796 = vst [vmem:[%s3761_s10 + $0x36c] sm:$0xf] %v2795_v3 }
  0x85   : > { %2798 = vst [vmem:[%s3761_s10 + $0x380] sm:$0xf] %v2797_v4  ;;  %2800 = vst [vmem:[%s3761_s10 + $0x394] sm:$0xf] %v2799_v5  ;;  %v2801_v6 = vld [vmem:[%s3756_s9 + $0xd30] sm:$0xf] }
  0x86   : > { %v2803_v7 = vld [vmem:[%s3756_s9 + $0xd58] sm:$0xf]  ;;  %v2805_v8 = vld [vmem:[%s3756_s9 + $0xd80] sm:$0xf]  ;;  %2802 = vst [vmem:[%s3761_s10 + $0x3a8] sm:$0xf] %v2801_v6 }
  0x87   : > { %2804 = vst [vmem:[%s3761_s10 + $0x3bc] sm:$0xf] %v2803_v7  ;;  %2806 = vst [vmem:[%s3761_s10 + $0x3d0] sm:$0xf] %v2805_v8  ;;  %v2807_v9 = vld [vmem:[%s3756_s9 + $0xda8] sm:$0xf] }
  0x88   : > { %v2809_v10 = vld [vmem:[%s3756_s9 + $0xdd0] sm:$0xf]  ;;  %v2811_v11 = vld [vmem:[%s3756_s9 + $0xdf8] sm:$0xf]  ;;  %2808 = vst [vmem:[%s3761_s10 + $0x3e4] sm:$0xf] %v2807_v9 }
  0x89   : > { %2810 = vst [vmem:[%s3761_s10 + $0x3f8] sm:$0xf] %v2809_v10  ;;  %2812 = vst [vmem:[%s3761_s10 + $0x40c] sm:$0xf] %v2811_v11  ;;  %v2813_v12 = vld [vmem:[%s3756_s9 + $0xe20] sm:$0xf] }
  0x8a   : > { %v2815_v13 = vld [vmem:[%s3756_s9 + $0xe48] sm:$0xf]  ;;  %v2817_v14 = vld [vmem:[%s3756_s9 + $0xe70] sm:$0xf]  ;;  %2814 = vst [vmem:[%s3761_s10 + $0x420] sm:$0xf] %v2813_v12 }
  0x8b   : > { %2816 = vst [vmem:[%s3761_s10 + $0x434] sm:$0xf] %v2815_v13  ;;  %2818 = vst [vmem:[%s3761_s10 + $0x448] sm:$0xf] %v2817_v14  ;;  %v2819_v15 = vld [vmem:[%s3756_s9 + $0xe98] sm:$0xf] }
  0x8c   : > { %v2821_v16 = vld [vmem:[%s3756_s9 + $0xec0] sm:$0xf]  ;;  %2820 = vst [vmem:[%s3761_s10 + $0x45c] sm:$0xf] %v2819_v15  ;;  %v2825_v18 = vld [vmem:[%s3756_s9 + $0x1208] sm:$0xf] }
  0x8d   : > { %v2823_v17 = vld [vmem:[%s3756_s9 + $0x11e0] sm:$0xf]  ;;  %2822 = vst [vmem:[%s3761_s10 + $0x470] sm:$0xf] %v2821_v16  ;;  %v2827_v19 = vld [vmem:[%s3756_s9 + $0x1230] sm:$0xf] }
  0x8e   : > { %2824 = vst [vmem:[%s3761_s10 + $0x484] sm:$0xf] %v2823_v17  ;;  %v2829_v20 = vld [vmem:[%s3756_s9 + $0x1258] sm:$0xf]  ;;  %2826 = vst [vmem:[%s3761_s10 + $0x498] sm:$0xf] %v2825_v18 }
  0x8f   : > { %2828 = vst [vmem:[%s3761_s10 + $0x4ac] sm:$0xf] %v2827_v19  ;;  %2830 = vst [vmem:[%s3761_s10 + $0x4c0] sm:$0xf] %v2829_v20  ;;  %v2831_v21 = vld [vmem:[%s3756_s9 + $0x1280] sm:$0xf] }
  0x90   : > { %v2833_v22 = vld [vmem:[%s3756_s9 + $0x12a8] sm:$0xf]  ;;  %v2835_v23 = vld [vmem:[%s3756_s9 + $0x12d0] sm:$0xf]  ;;  %2832 = vst [vmem:[%s3761_s10 + $0x4d4] sm:$0xf] %v2831_v21 }
  0x91   : > { %2834 = vst [vmem:[%s3761_s10 + $0x4e8] sm:$0xf] %v2833_v22  ;;  %2836 = vst [vmem:[%s3761_s10 + $0x4fc] sm:$0xf] %v2835_v23  ;;  %v2837_v24 = vld [vmem:[%s3756_s9 + $0x12f8] sm:$0xf] }
  0x92   : > { %v2839_v25 = vld [vmem:[%s3756_s9 + $0x1320] sm:$0xf]  ;;  %v2841_v26 = vld [vmem:[%s3756_s9 + $0x1348] sm:$0xf]  ;;  %2838 = vst [vmem:[%s3761_s10 + $0x510] sm:$0xf] %v2837_v24 }
  0x93   : > { %2840 = vst [vmem:[%s3761_s10 + $0x524] sm:$0xf] %v2839_v25  ;;  %2842 = vst [vmem:[%s3761_s10 + $0x538] sm:$0xf] %v2841_v26  ;;  %v2843_v27 = vld [vmem:[%s3756_s9 + $0x1370] sm:$0xf] }
  0x94   : > { %v2845_v28 = vld [vmem:[%s3756_s9 + $0x1398] sm:$0xf]  ;;  %v2847_v29 = vld [vmem:[%s3756_s9 + $0x13c0] sm:$0xf]  ;;  %2844 = vst [vmem:[%s3761_s10 + $0x54c] sm:$0xf] %v2843_v27 }
  0x95   : > { %2846 = vst [vmem:[%s3761_s10 + $0x560] sm:$0xf] %v2845_v28  ;;  %2848 = vst [vmem:[%s3761_s10 + $0x574] sm:$0xf] %v2847_v29  ;;  %v2849_v30 = vld [vmem:[%s3756_s9 + $0x13e8] sm:$0xf] }
  0x96   : > { %v2851_v31 = vld [vmem:[%s3756_s9 + $0x1410] sm:$0xf]  ;;  %v2853_v32 = vld [vmem:[%s3756_s9 + $0x1438] sm:$0xf]  ;;  %2850 = vst [vmem:[%s3761_s10 + $0x588] sm:$0xf] %v2849_v30 }
  0x97   : > { %2852 = vst [vmem:[%s3761_s10 + $0x59c] sm:$0xf] %v2851_v31  ;;  %2854 = vst [vmem:[%s3761_s10 + $0x5b0] sm:$0xf] %v2853_v32  ;;  %v2855_v33 = vld [vmem:[%s3756_s9 + $0x1460] sm:$0xf] }
  0x98   : > { %v2857_v34 = vld [vmem:[%s3756_s9 + $0x1488] sm:$0xf]  ;;  %v2859_v35 = vld [vmem:[%s3756_s9 + $0x14b0] sm:$0xf]  ;;  %2856 = vst [vmem:[%s3761_s10 + $0x5c4] sm:$0xf] %v2855_v33 }
  0x99   : > { %2858 = vst [vmem:[%s3761_s10 + $0x5d8] sm:$0xf] %v2857_v34  ;;  %2860 = vst [vmem:[%s3761_s10 + $0x5ec] sm:$0xf] %v2859_v35 }
  0x9a PF: > { %p2861_p9 = scmp.ge.s32.totalorder %s3668_s18, 1  ;;  %p638_p10 = scmp.lt.s32.totalorder %s3668_s18, 5 }
  0x9c   : > { %p639_p11 = pnand %p2861_p9, %p638_p10 }
  0x9d   : > { %s645_s11 = sand.u32 (!%p639_p11), 1, %s3644_s12  }
  0x9e   : > { %642 = sbr.rel (%p639_p11) target bundleno = 621 (0x26d), region = 54 }
  0x9f   : > { %s3276_s24 = smul.u32 (!%p639_p11), 1520, %s645_s11 }
  0xa0   : > { %s3277_s10 = smul.u32 (!%p639_p11), 40, %s645_s11 }
  0xa1   : > { %s4231_s25 = scalar_lea.vmem (!%p639_p11), [#allocation2], %s3276_s24 }
  0xa2   : > { %s4553_s21 = scalar_lea.vmem (!%p639_p11), [#allocation3], %s3277_s10 }
  0xa3   : > { %v4222_v36 = vld [vmem:[%s4603_s1 + $0x4] ss:$8 sps:$4 sm:$0xff]   ;;  %vm985_vm0 = vcmask 179200   ;;  %v3670_v37 = vmov 0   ;;  %vm989_vm1 = vcmask 1042432   ;;  %s2580_s12 = smul.u32 (%p3739_p6), 5, %s3652_s14 }
  0xa4   : > { %2915 = vmatprep.mubr.msk.bf16.mxu0 %vm985_vm0, %v4222_v36  ;;  %2917 = vmatprep.mubr.msk.bf16.mxu1 %vm985_vm0, %v4222_v36  ;;  %v3337_v38 = vld [vmem:[%s4231_s25 + $0x11c] ss:$20 sps:$4 sm:$0xff]   ;;  %v3339_v39 = vld [vmem:[%s4231_s25 + $0x124] ss:$20 sps:$4 sm:$0xff]   ;;  %v3342_v41 = vld [vmem:[%s4231_s25 + $0x120] ss:$20 sps:$4 sm:$0xff]  }
  0xa5   : > { %3336 = vset.pattern.permute.xlu0 %v3670_v37  ;;  %1005 = vmatprep.subr.bf16.mxu0 %v3337_v38  ;;  %v3341_v40 = vld [vmem:[%s4231_s25 + $0x118] ss:$20 sps:$4 sm:$0xff]   ;;  %v3343_v42 = vld [vmem:[%s4231_s25 + $0xf4] ss:$20 sps:$4 sm:$0xff]   ;;  %v3345_v43 = vld [vmem:[%s4231_s25 + $0xfc] ss:$20 sps:$4 sm:$0xff]  }
  0xa6   : > { %1048 = vmatprep.subr.bf16.mxu1 %v3339_v39  ;;  %1006 = vmatpush1.bf16.msra.mxu0 %v3341_v40  ;;  %v3347_v44 = vld [vmem:[%s4231_s25 + $0xf0] ss:$20 sps:$4 sm:$0xff]   ;;  %v3348_v45 = vld [vmem:[%s4231_s25 + $0xf8] ss:$20 sps:$4 sm:$0xff]   ;;  %v3351_v47 = vld [vmem:[%s4231_s25 + $0xd4] ss:$20 sps:$4 sm:$0xff]  }
  0xa7   : > { %1049 = vmatpush1.bf16.msra.mxu1 %v3342_v41  ;;  %1007 = vmatprep.subr.bf16.mxu0 %v3343_v42  ;;  %v3349_v46 = vld [vmem:[%s4231_s25 + $0xcc] ss:$20 sps:$4 sm:$0xff]   ;;  %v3353_v48 = vld [vmem:[%s4231_s25 + $0xc8] ss:$20 sps:$4 sm:$0xff]   ;;  %v3354_v49 = vld [vmem:[%s4231_s25 + $0xd0] ss:$20 sps:$4 sm:$0xff]  }
  0xa8   : > { %1050 = vmatprep.subr.bf16.mxu1 %v3345_v43  ;;  %v3355_v50 = vld [vmem:[%s4231_s25 + $0xa4] ss:$20 sps:$4 sm:$0xff]   ;;  %v3357_v51 = vld [vmem:[%s4231_s25 + $0xac] ss:$20 sps:$4 sm:$0xff]   ;;  %v3360_v53 = vld [vmem:[%s4231_s25 + $0xa8] ss:$20 sps:$4 sm:$0xff]  }
  0xa9   : > { %v3359_v52 = vld [vmem:[%s4231_s25 + $0xa0] ss:$20 sps:$4 sm:$0xff]   ;;  %v3361_v54 = vld [vmem:[%s4231_s25 + $0x7c] ss:$20 sps:$4 sm:$0xff]   ;;  %v3363_v55 = vld [vmem:[%s4231_s25 + $0x84] ss:$20 sps:$4 sm:$0xff]  }
  0xaa   : > { %1008 = vmatpush1.bf16.msra.mxu0 %v3347_v44  ;;  %v3365_v56 = vld [vmem:[%s4231_s25 + $0x78] ss:$20 sps:$4 sm:$0xff]   ;;  %v3366_v57 = vld [vmem:[%s4231_s25 + $0x80] ss:$20 sps:$4 sm:$0xff]   ;;  %v3369_v59 = vld [vmem:[%s4231_s25 + $0x5c] ss:$20 sps:$4 sm:$0xff]  }
  0xab   : > { %1051 = vmatpush1.bf16.msra.mxu1 %v3348_v45  ;;  %1009 = vmatprep.subr.bf16.mxu0 %v3349_v46  ;;  %v3367_v58 = vld [vmem:[%s4231_s25 + $0x54] ss:$20 sps:$4 sm:$0xff]   ;;  %v3371_v60 = vld [vmem:[%s4231_s25 + $0x50] ss:$20 sps:$4 sm:$0xff]   ;;  %v3372_v61 = vld [vmem:[%s4231_s25 + $0x58] ss:$20 sps:$4 sm:$0xff]  }
  0xac   : > { %1052 = vmatprep.subr.bf16.mxu1 %v3351_v47  ;;  %v3373_v62 = vld [vmem:[%s4231_s25 + $0x2c] ss:$20 sps:$4 sm:$0xff]   ;;  %v3375_v63 = vld [vmem:[%s4231_s25 + $0x34] ss:$20 sps:$4 sm:$0xff]   ;;  %v3378_v1 = vld [vmem:[%s4231_s25 + $0x30] ss:$20 sps:$4 sm:$0xff]  }
  0xad   : > { %v3377_v0 = vld [vmem:[%s4231_s25 + $0x28] ss:$20 sps:$4 sm:$0xff]   ;;  %v3379_v2 = vld [vmem:[%s4231_s25 + $0x4] ss:$20 sps:$4 sm:$0xff]   ;;  %v3381_v3 = vld [vmem:[%s4231_s25 + $0xc] ss:$20 sps:$4 sm:$0xff]  }
  0xae   : > { %1010 = vmatpush1.bf16.msra.mxu0 %v3353_v48  ;;  %v726_v4 = vld [vmem:[%s4231_s25 + $0x168] sm:$0x77]  ;;  %v727_v5 = vld [vmem:[%s4231_s25 + $0x170] sm:$0x77]  ;;  %v3389_v12 = vld [vmem:[%s4231_s25 + $0x144] ss:$20 sps:$4 sm:$0xff]  }
  0xaf   : > { %1053 = vmatpush1.bf16.msra.mxu1 %v3354_v49  ;;  %1011 = vmatprep.subr.bf16.mxu0 %v3355_v50  ;;  %v3383_v6 = vld [vmem:[%s4231_s25] ss:$20 sps:$4 sm:$0xff]   ;;  %v3384_v7 = vld [vmem:[%s4231_s25 + $0x8] ss:$20 sps:$4 sm:$0xff]   ;;  %v2910_v8 = vcombine.high %v726_v4, %v726_v4  ;;  %v2912_v9 = vcombine.high %v727_v5, %v727_v5  ;;  %v2909_v10 = vcombine.low %v726_v4, %v726_v4  ;;  %v3400_v18 = vld [vmem:[%s4231_s25 + $0x298] ss:$20 sps:$4 sm:$0xff]  }
  0xb0   : > { %1054 = vmatprep.subr.bf16.mxu1 %v3357_v51  ;;  %v2911_v11 = vcombine.low %v727_v5, %v727_v5  ;;  %v3391_v13 = vld [vmem:[%s4231_s25 + $0x14c] ss:$20 sps:$4 sm:$0xff]   ;;  %v3394_v17 = vld [vmem:[%s4231_s25 + $0x148] ss:$20 sps:$4 sm:$0xff]   ;;  %v3404_v22 = vld [vmem:[%s4231_s25 + $0x270] ss:$20 sps:$4 sm:$0xff]  }
  0xb1   : > { %v991_v14 = vsel %vm989_vm1, %v2909_v10, 0  ;;  %v3393_v16 = vld [vmem:[%s4231_s25 + $0x140] ss:$20 sps:$4 sm:$0xff]   ;;  %v3401_v21 = vld [vmem:[%s4231_s25 + $0x128] ss:$20 sps:$4 sm:$0xff]   ;;  %s3278_s11 = smul.u32 (%p3739_p6), 20, %s3656_s15 }
  0xb2   : > { %1012 = vmatpush1.bf16.msra.mxu0 %v3359_v52  ;;  %v997_v15 = vsel %vm989_vm1, %v2911_v11, 0  ;;  %v4279_v19 = vld [vmem:[%s4603_s1] ss:$8 sps:$4 sm:$0xff]  }
  0xb3   : > { %1055 = vmatpush1.bf16.msra.mxu1 %v3360_v53  ;;  %1013 = vmatprep.subr.bf16.mxu0 %v3361_v54  ;;  %v3398_v20 = vld [vmem:[%s4231_s25 + $0x294] ss:$20 sps:$4 sm:$0xff]   ;;  %v3402_v23 = vld [vmem:[%s4231_s25 + $0x26c] ss:$20 sps:$4 sm:$0xff]   ;;  %v3406_v26 = vld [vmem:[%s4231_s25 + $0x244] ss:$20 sps:$4 sm:$0xff]   ;;  %s2582_s22 = sadd.s32 (%p3739_p6), %s3278_s11, %s2580_s12 }
  0xb4   : > { %1056 = vmatprep.subr.bf16.mxu1 %v3363_v55  ;;  %v3405_v24 = vld [vmem:[%s4231_s25 + $0x100] ss:$20 sps:$4 sm:$0xff]   ;;  %v3408_v25 = vld [vmem:[%s4231_s25 + $0x248] ss:$20 sps:$4 sm:$0xff]   ;;  %v3409_v27 = vld [vmem:[%s4231_s25 + $0xd8] ss:$20 sps:$4 sm:$0xff]  }
  0xb5   : > { %v3412_v28 = vld [vmem:[%s4231_s25 + $0x220] ss:$20 sps:$4 sm:$0xff]   ;;  %v3410_v29 = vld [vmem:[%s4231_s25 + $0x21c] ss:$20 sps:$4 sm:$0xff]   ;;  %v3416_v31 = vld [vmem:[%s4231_s25 + $0x1f8] ss:$20 sps:$4 sm:$0xff]  }
  0xb6   : > { %1014 = vmatpush1.bf16.msra.mxu0 %v3365_v56  ;;  %v3413_v30 = vld [vmem:[%s4231_s25 + $0xb0] ss:$20 sps:$4 sm:$0xff]   ;;  %v3414_v32 = vld [vmem:[%s4231_s25 + $0x1f4] ss:$20 sps:$4 sm:$0xff]   ;;  %v3418_v35 = vld [vmem:[%s4231_s25 + $0x1cc] ss:$20 sps:$4 sm:$0xff]  }
  0xb7   : > { %1057 = vmatpush1.bf16.msra.mxu1 %v3366_v57  ;;  %1015 = vmatprep.subr.bf16.mxu0 %v3367_v58  ;;  %v3417_v33 = vld [vmem:[%s4231_s25 + $0x88] ss:$20 sps:$4 sm:$0xff]   ;;  %v3420_v34 = vld [vmem:[%s4231_s25 + $0x1d0] ss:$20 sps:$4 sm:$0xff]   ;;  %v3421_v38 = vld [vmem:[%s4231_s25 + $0x60] ss:$20 sps:$4 sm:$0xff]  }
  0xb8   : > { %1058 = vmatprep.subr.bf16.mxu1 %v3369_v59  ;;  %v3424_v39 = vld [vmem:[%s4231_s25 + $0x1a8] ss:$20 sps:$4 sm:$0xff]   ;;  %v3422_v40 = vld [vmem:[%s4231_s25 + $0x1a4] ss:$20 sps:$4 sm:$0xff]   ;;  %v3428_v42 = vld [vmem:[%s4231_s25 + $0x180] ss:$20 sps:$4 sm:$0xff]  }
  0xb9   : > { %v3425_v41 = vld [vmem:[%s4231_s25 + $0x38] ss:$20 sps:$4 sm:$0xff]   ;;  %v2973_v43 = vld [vmem:[%s4231_s25 + $0x2e4] sm:$0x77]  ;;  %v3426_v44 = vld [vmem:[%s4231_s25 + $0x17c] ss:$20 sps:$4 sm:$0xff]  }
  0xba   : > { %1016 = vmatpush1.bf16.msra.mxu0 %v3371_v60  ;;  %v3429_v45 = vld [vmem:[%s4231_s25 + $0x10] ss:$20 sps:$4 sm:$0xff]   ;;  %v3022_v46 = vcombine.high %v2973_v43, %v2973_v43  ;;  %v3431_v47 = vld [vmem:[%s4231_s25 + $0x178] ss:$0 sps:$4 sm:$0x77]   ;;  %v3021_v48 = vcombine.low %v2973_v43, %v2973_v43  ;;  %s3261_s24 = sshll.u32 (%p3739_p6), %s2582_s22, 2 }
  0xbb   : > { %1059 = vmatpush1.bf16.msra.mxu1 %v3372_v61  ;;  %1017 = vmatprep.subr.bf16.mxu0 %v3373_v62  ;;  %v1003_v49 = vsel %vm989_vm1, %v3431_v47, 0  ;;  %v3435_v51 = vld [vmem:[%s4231_s25 + $0x2c0] ss:$20 sps:$4 sm:$0xff]   ;;  %v3433_v52 = vld [vmem:[%s4231_s25 + $0x2bc] ss:$20 sps:$4 sm:$0xff]   ;;  %s2584_s26 = scalar_lea.vmem (%p3739_p6), %s4605_s3, %s3261_s24 }
  0xbc   : > { %1060 = vmatprep.subr.bf16.mxu1 %v3375_v63  ;;  %v1438_v50 = vsel %vm989_vm1, %v3021_v48, 0  ;;  %v3436_v53 = vld [vmem:[%s4231_s25 + $0x150] ss:$20 sps:$4 sm:$0xff]   ;;  %v3439_v54 = vld [vmem:[%s4231_s25 + $0x2a0] ss:$20 sps:$4 sm:$0xff]  }
  0xbd   : > { %v3437_v55 = vld [vmem:[%s4231_s25 + $0x29c] ss:$20 sps:$4 sm:$0xff]   ;;  %v3440_v56 = vld [vmem:[%s4231_s25 + $0x2a4] ss:$20 sps:$4 sm:$0xff]   ;;  %v3441_v58 = vld [vmem:[%s4231_s25 + $0x274] ss:$20 sps:$4 sm:$0xff]  }
  0xbe   : > { %1018 = vmatpush1.bf16.msra.mxu0 %v3377_v0  ;;  %v3443_v57 = vld [vmem:[%s4231_s25 + $0x278] ss:$20 sps:$4 sm:$0xff]   ;;  %v3444_v59 = vld [vmem:[%s4231_s25 + $0x27c] ss:$20 sps:$4 sm:$0xff]   ;;  %v3448_v62 = vld [vmem:[%s4231_s25 + $0x254] ss:$20 sps:$4 sm:$0xff]  }
  0xbf   : > { %1061 = vmatpush1.bf16.msra.mxu1 %v3378_v1  ;;  %1019 = vmatprep.subr.bf16.mxu0 %v3379_v2  ;;  %v3447_v60 = vld [vmem:[%s4231_s25 + $0x250] ss:$20 sps:$4 sm:$0xff]   ;;  %v3445_v61 = vld [vmem:[%s4231_s25 + $0x24c] ss:$20 sps:$4 sm:$0xff]   ;;  %v3451_v63 = vld [vmem:[%s4231_s25 + $0x228] ss:$20 sps:$4 sm:$0xff]  }
  0xc0   : > { %1062 = vmatprep.subr.bf16.mxu1 %v3381_v3  ;;  %v3449_v0 = vld [vmem:[%s4231_s25 + $0x224] ss:$20 sps:$4 sm:$0xff]   ;;  %v3452_v1 = vld [vmem:[%s4231_s25 + $0x22c] ss:$20 sps:$4 sm:$0xff]   ;;  %v3453_v3 = vld [vmem:[%s4231_s25 + $0x1fc] ss:$20 sps:$4 sm:$0xff]  }
  0xc1   : > { %v3455_v2 = vld [vmem:[%s4231_s25 + $0x200] ss:$20 sps:$4 sm:$0xff]   ;;  %v3456_v4 = vld [vmem:[%s4231_s25 + $0x204] ss:$20 sps:$4 sm:$0xff]   ;;  %v3467_v11 = vld [vmem:[%s4231_s25 + $0x188] ss:$20 sps:$4 sm:$0xff]  }
  0xc2   : > { %1020 = vmatpush1.bf16.msra.mxu0 %v3383_v6  ;;  %v3459_v5 = vld [vmem:[%s4231_s25 + $0x1d8] ss:$20 sps:$4 sm:$0xff]   ;;  %v3457_v6 = vld [vmem:[%s4231_s25 + $0x1d4] ss:$20 sps:$4 sm:$0xff]   ;;  %v3500_v43 = vld [vmem:[%s4231_s25 + $0x370] ss:$20 sps:$4 sm:$0xff]  }
  0xc3   : > { %1063 = vmatpush1.bf16.msra.mxu1 %v3384_v7  ;;  %2914 = vmatprep.subr.msk.bf16.mxu0 %vm989_vm1, %v2910_v8  ;;  %v3460_v7 = vld [vmem:[%s4231_s25 + $0x1dc] ss:$20 sps:$4 sm:$0xff]   ;;  %v3464_v10 = vld [vmem:[%s4231_s25 + $0x1b4] ss:$20 sps:$4 sm:$0xff]  }
  0xc4   : > { %2916 = vmatprep.subr.msk.bf16.mxu1 %vm989_vm1, %v2912_v9  ;;  %v3463_v8 = vld [vmem:[%s4231_s25 + $0x1b0] ss:$20 sps:$4 sm:$0xff]   ;;  %v3461_v9 = vld [vmem:[%s4231_s25 + $0x1ac] ss:$20 sps:$4 sm:$0xff]   ;;  %v3506_v48 = vld [vmem:[%s4231_s25 + $0x348] ss:$20 sps:$4 sm:$0xff]  }
  0xc5   : > { %v2503_v47 = vld [vmem:[%s4604_s2] sm:$0xff] }
  0xc6   : > { %1034 = vmatpush2.bf16.msra.mxu0 %v991_v14  ;;  %v3468_v14 = vld [vmem:[%s4231_s25 + $0x18c] ss:$20 sps:$4 sm:$0xff]   ;;  %2507 = vperm.xlu0 %3336, %v2503_v47  }
  0xc7   : > { %1077 = vmatpush2.bf16.msra.mxu1 %v997_v15  ;;  %1035 = vmatprep.subr.bf16.mxu0 %v3389_v12  ;;  %v3465_v12 = vld [vmem:[%s4231_s25 + $0x184] ss:$20 sps:$4 sm:$0xff]   ;;  %v3471_v15 = vld [vmem:[%s4231_s25 + $0x2f4] ss:$0 sps:$4 sm:$0x77]  }
  0xc8   : > { %1078 = vmatprep.subr.bf16.mxu1 %v3391_v13  ;;  %v2974_v13 = vld [vmem:[%s4231_s25 + $0x2ec] sm:$0x77] }
  0xc9   : > { %v3577_v47 = vld [vmem:[%s4231_s25 + $0x56c] ss:$20 sps:$4 sm:$0xff]  }
  0xca   : > { %1036 = vmatpush2.bf16.msra.mxu0 %v3393_v16  ;;  %v3024_v16 = vcombine.high %v2974_v13, %v2974_v13 }
  0xcb   : > { %1079 = vmatpush2.bf16.msra.mxu1 %v3394_v17  ;;  %1091 = vmatprep.subr.bf16.mxu0 %v3670_v37  ;;  %v3023_v17 = vcombine.low %v2974_v13, %v2974_v13  ;;  %v3544_v13 = vld [vmem:[%s4231_s25 + $0x540] ss:$20 sps:$4 sm:$0xff]  }
  0xcc   : > { %1452 = vmatprep.subr.bf16.mxu1 %v3400_v18  ;;  %v3474_v18 = vld [vmem:[%s4231_s25 + $0x2c8] ss:$20 sps:$4 sm:$0xff]  }
  0xcd   : > { %1038 = vmatmul.mubr.bf16.vlgmr.msra.gmra.mxu0 %v4279_v19 }
  0xce   : > { %1081 = vmatmul.mubr.bf16.vlgmr.msra.gmra.mxu1 %v4279_v19  ;;  %1092 = vmatpush1.bf16.msra.mxu0 %v3401_v21  ;;  %v1450_v21 = vsel %vm989_vm1, %v3471_v15, 0  ;;  %v3542_v15 = vld [vmem:[%s4231_s25 + $0x53c] ss:$20 sps:$4 sm:$0xff]  }
  0xcf   : > { %1453 = vmatpush1.bf16.msra.mxu1 %v3398_v20  ;;  %1093 = vmatprep.subr.bf16.mxu0 %v3670_v37  ;;  %v1444_v20 = vsel %vm989_vm1, %v3023_v17, 0  ;;  %v3548_v17 = vld [vmem:[%s4231_s25 + $0x518] ss:$20 sps:$4 sm:$0xff]  }
  0xd0   : > { %1454 = vmatprep.subr.bf16.mxu1 %v3404_v22  ;;  %2918 = vmatprep.mubr.msk.bf16.mxu0 %vm985_vm0, %v4222_v36  ;;  %v3472_v22 = vld [vmem:[%s4231_s25 + $0x2c4] ss:$20 sps:$4 sm:$0xff]  }
  0xd1   : > { %3027 = vmatprep.mubr.msk.bf16.mxu1 %vm985_vm0, %v4222_v36 }
  0xd2   : > { %1094 = vmatpush1.bf16.msra.mxu0 %v3405_v24  ;;  %v3478_v24 = vld [vmem:[%s4231_s25 + $0x414] ss:$20 sps:$4 sm:$0xff]  }
  0xd3   : > { %1455 = vmatpush1.bf16.msra.mxu1 %v3402_v23  ;;  %1095 = vmatprep.subr.bf16.mxu0 %v3670_v37  ;;  %v3475_v23 = vld [vmem:[%s4231_s25 + $0x2cc] ss:$20 sps:$4 sm:$0xff]  }
  0xd4   : > { %1456 = vmatprep.subr.bf16.mxu1 %v3408_v25  ;;  %v3481_v25 = vld [vmem:[%s4231_s25 + $0x41c] ss:$20 sps:$4 sm:$0xff]  }
  0xd6   : > { %1096 = vmatpush1.bf16.msra.mxu0 %v3409_v27  ;;  %v3479_v27 = vld [vmem:[%s4231_s25 + $0x418] ss:$20 sps:$4 sm:$0xff]  }
  0xd7   : > { %1457 = vmatpush1.bf16.msra.mxu1 %v3406_v26  ;;  %1097 = vmatprep.subr.bf16.mxu0 %v3670_v37  ;;  %v3476_v26 = vld [vmem:[%s4231_s25 + $0x410] ss:$20 sps:$4 sm:$0xff]  }
  0xd8   : > { %1458 = vmatprep.subr.bf16.mxu1 %v3412_v28  ;;  %v3484_v28 = vld [vmem:[%s4231_s25 + $0x3ec] ss:$20 sps:$4 sm:$0xff]  }
  0xda   : > { %1098 = vmatpush1.bf16.msra.mxu0 %v3413_v30  ;;  %v3482_v30 = vld [vmem:[%s4231_s25 + $0x3e8] ss:$20 sps:$4 sm:$0xff]  }
  0xdb   : > { %1459 = vmatpush1.bf16.msra.mxu1 %v3410_v29  ;;  %1099 = vmatprep.subr.bf16.mxu0 %v3670_v37  ;;  %v3487_v29 = vld [vmem:[%s4231_s25 + $0x3f4] ss:$20 sps:$4 sm:$0xff]  }
  0xdc   : > { %1460 = vmatprep.subr.bf16.mxu1 %v3416_v31  ;;  %v3485_v31 = vld [vmem:[%s4231_s25 + $0x3f0] ss:$20 sps:$4 sm:$0xff]  }
  0xde   : > { %1100 = vmatpush1.bf16.msra.mxu0 %v3417_v33  ;;  %v3493_v33 = vld [vmem:[%s4231_s25 + $0x3cc] ss:$20 sps:$4 sm:$0xff]  }
  0xdf   : > { %1461 = vmatpush1.bf16.msra.mxu1 %v3414_v32  ;;  %1101 = vmatprep.subr.bf16.mxu0 %v3670_v37  ;;  %v3490_v32 = vld [vmem:[%s4231_s25 + $0x3c4] ss:$20 sps:$4 sm:$0xff]  }
  0xe0   : > { %1462 = vmatprep.subr.bf16.mxu1 %v3420_v34  ;;  %v3488_v34 = vld [vmem:[%s4231_s25 + $0x3c0] ss:$20 sps:$4 sm:$0xff]  }
  0xe2   : > { %1102 = vmatpush1.bf16.msra.mxu0 %v3421_v38  ;;  %v3496_v38 = vld [vmem:[%s4231_s25 + $0x39c] ss:$20 sps:$4 sm:$0xff]  }
  0xe3   : > { %1463 = vmatpush1.bf16.msra.mxu1 %v3418_v35  ;;  %1103 = vmatprep.subr.bf16.mxu0 %v3670_v37  ;;  %v3491_v35 = vld [vmem:[%s4231_s25 + $0x3c8] ss:$20 sps:$4 sm:$0xff]  }
  0xe4   : > { %1464 = vmatprep.subr.bf16.mxu1 %v3424_v39  ;;  %v3499_v39 = vld [vmem:[%s4231_s25 + $0x3a4] ss:$20 sps:$4 sm:$0xff]  }
  0xe6   : > { %1104 = vmatpush1.bf16.msra.mxu0 %v3425_v41  ;;  %v3497_v41 = vld [vmem:[%s4231_s25 + $0x3a0] ss:$20 sps:$4 sm:$0xff]  }
  0xe7   : > { %1465 = vmatpush1.bf16.msra.mxu1 %v3422_v40  ;;  %1105 = vmatprep.subr.bf16.mxu0 %v3670_v37  ;;  %v3494_v40 = vld [vmem:[%s4231_s25 + $0x398] ss:$20 sps:$4 sm:$0xff]  }
  0xe8   : > { %1466 = vmatprep.subr.bf16.mxu1 %v3428_v42  ;;  %v3505_v42 = vld [vmem:[%s4231_s25 + $0x37c] ss:$20 sps:$4 sm:$0xff]  }
  0xea   : > { %1106 = vmatpush1.bf16.msra.mxu0 %v3429_v45  ;;  %v3508_v45 = vld [vmem:[%s4231_s25 + $0x34c] ss:$20 sps:$4 sm:$0xff]  }
  0xeb   : > { %1467 = vmatpush1.bf16.msra.mxu1 %v3426_v44  ;;  %1119 = vmatprep.subr.bf16.mxu0 %v3670_v37  ;;  %v3503_v44 = vld [vmem:[%s4231_s25 + $0x378] ss:$20 sps:$4 sm:$0xff]  }
  0xec   : > { %3026 = vmatprep.subr.msk.bf16.mxu1 %vm989_vm1, %v3022_v46  ;;  %v3511_v46 = vld [vmem:[%s4231_s25 + $0x354] ss:$20 sps:$4 sm:$0xff]  }
  0xee   : > { %1120 = vmatpush2.bf16.msra.mxu0 %v1003_v49  ;;  %v3509_v49 = vld [vmem:[%s4231_s25 + $0x350] ss:$20 sps:$4 sm:$0xff]  }
  0xef   : > { %1481 = vmatpush2.bf16.msra.mxu1 %v1438_v50  ;;  %1121 = vmatprep.subr.bf16.mxu0 %v3670_v37  ;;  %v3514_v50 = vld [vmem:[%s4231_s25 + $0x324] ss:$20 sps:$4 sm:$0xff]  }
  0xf0   : > { %1482 = vmatprep.subr.bf16.mxu1 %v3435_v51  ;;  %v3517_v51 = vld [vmem:[%s4231_s25 + $0x32c] ss:$20 sps:$4 sm:$0xff]  }
  0xf2   : > { %1122 = vmatpush2.bf16.msra.mxu0 %v3436_v53  ;;  %v3515_v53 = vld [vmem:[%s4231_s25 + $0x328] ss:$20 sps:$4 sm:$0xff]  }
  0xf3   : > { %1483 = vmatpush2.bf16.msra.mxu1 %v3433_v52  ;;  %1495 = vmatprep.subr.bf16.mxu0 %v3439_v54  ;;  %v3512_v52 = vld [vmem:[%s4231_s25 + $0x320] ss:$20 sps:$4 sm:$0xff]   ;;  %v3520_v54 = vld [vmem:[%s4231_s25 + $0x2fc] ss:$20 sps:$4 sm:$0xff]  }
  0xf4   : > { %1538 = vmatprep.subr.bf16.mxu1 %v3670_v37 }
  0xf5   : > { %1124 = vmatmul.mubr.bf16.vlgmr.msra.gmra.mxu0 %v4279_v19 }
  0xf6   : > { %1485 = vmatmul.mubr.bf16.vlgmr.msra.gmra.mxu1 %v4279_v19  ;;  %1496 = vmatpush1.bf16.msra.mxu0 %v3437_v55  ;;  %v3523_v55 = vld [vmem:[%s4231_s25 + $0x304] ss:$20 sps:$4 sm:$0xff]  }
  0xf7   : > { %1539 = vmatpush1.bf16.msra.mxu1 %v3440_v56  ;;  %1497 = vmatprep.subr.bf16.mxu0 %v3443_v57  ;;  %v3085_v56 = vld [vmem:[%s4231_s25 + $0x460] sm:$0x77]  ;;  %v3086_v57 = vld [vmem:[%s4231_s25 + $0x468] sm:$0x77] }
  0xf8   : > { %1540 = vmatprep.subr.bf16.mxu1 %v3670_v37  ;;  %3029 = vmatprep.mubr.msk.bf16.mxu0 %vm985_vm0, %v4222_v36 }
  0xf9   : > { %3030 = vmatprep.mubr.msk.bf16.mxu1 %vm985_vm0, %v4222_v36 }
  0xfa   : > { %1498 = vmatpush1.bf16.msra.mxu0 %v3441_v58  ;;  %v3518_v58 = vld [vmem:[%s4231_s25 + $0x2f8] ss:$20 sps:$4 sm:$0xff]  }
  0xfb   : > { %1541 = vmatpush1.bf16.msra.mxu1 %v3444_v59  ;;  %1499 = vmatprep.subr.bf16.mxu0 %v3447_v60  ;;  %v3521_v59 = vld [vmem:[%s4231_s25 + $0x300] ss:$20 sps:$4 sm:$0xff]   ;;  %v3134_v60 = vcombine.high %v3085_v56, %v3085_v56 }
  0xfc   : > { %1542 = vmatprep.subr.bf16.mxu1 %v3670_v37 }
  0xfe   : > { %1500 = vmatpush1.bf16.msra.mxu0 %v3445_v61  ;;  %v3136_v61 = vcombine.high %v3086_v57, %v3086_v57 }
  0xff   : > { %1543 = vmatpush1.bf16.msra.mxu1 %v3448_v62  ;;  %1501 = vmatprep.subr.bf16.mxu0 %v3451_v63  ;;  %v3133_v62 = vcombine.low %v3085_v56, %v3085_v56  ;;  %v3135_v63 = vcombine.low %v3086_v57, %v3086_v57  ;;  %v3592_v56 = vld [vmem:[%s4231_s25 + $0x4fc] ss:$20 sps:$4 sm:$0xff]  }
 0x100   : > { %1544 = vmatprep.subr.bf16.mxu1 %v3670_v37  ;;  %v3595_v57 = vld [vmem:[%s4231_s25 + $0x4d0] ss:$20 sps:$4 sm:$0xff]  }
 0x102   : > { %1502 = vmatpush1.bf16.msra.mxu0 %v3449_v0  ;;  %v2504_v0 = vld [vmem:[%s4604_s2 + $0x8] sm:$0xff] }
 0x103   : > { %1545 = vmatpush1.bf16.msra.mxu1 %v3452_v1  ;;  %1503 = vmatprep.subr.bf16.mxu0 %v3455_v2  ;;  %v1895_v1 = vsel %vm989_vm1, %v3133_v62, 0  ;;  %v1901_v2 = vsel %vm989_vm1, %v3135_v63, 0  ;;  %v3600_v62 = vld [vmem:[%s4231_s25 + $0x4ac] ss:$20 sps:$4 sm:$0xff]  }
 0x104   : > { %1546 = vmatprep.subr.bf16.mxu1 %v3670_v37  ;;  %2512 = vperm.xlu0 %3336, %v2504_v0   ;;  %v3603_v63 = vld [vmem:[%s4231_s25 + $0x480] ss:$20 sps:$4 sm:$0xff]   ;;  %v3198_v0 = vld [vmem:[%s4231_s25 + $0x5e4] sm:$0x77] }
 0x106   : > { %1504 = vmatpush1.bf16.msra.mxu0 %v3453_v3  ;;  %v3530_v3 = vld [vmem:[%s4231_s25 + $0x43c] ss:$20 sps:$4 sm:$0xff]  }
 0x107   : > { %1547 = vmatpush1.bf16.msra.mxu1 %v3456_v4  ;;  %1505 = vmatprep.subr.bf16.mxu0 %v3459_v5  ;;  %v3533_v4 = vld [vmem:[%s4231_s25 + $0x444] ss:$20 sps:$4 sm:$0xff]  }
 0x108   : > { %1548 = vmatprep.subr.bf16.mxu1 %v3670_v37  ;;  %v3528_v5 = vld [vmem:[%s4231_s25 + $0x438] ss:$20 sps:$4 sm:$0xff]  }
 0x10a   : > { %1506 = vmatpush1.bf16.msra.mxu0 %v3457_v6  ;;  %v3531_v6 = vld [vmem:[%s4231_s25 + $0x440] ss:$20 sps:$4 sm:$0xff]  }
 0x10b   : > { %1549 = vmatpush1.bf16.msra.mxu1 %v3460_v7  ;;  %1507 = vmatprep.subr.bf16.mxu0 %v3463_v8  ;;  %v3536_v7 = vld [vmem:[%s4231_s25 + $0x590] ss:$20 sps:$4 sm:$0xff]   ;;  %v3534_v8 = vld [vmem:[%s4231_s25 + $0x58c] ss:$20 sps:$4 sm:$0xff]  }
 0x10c   : > { %1550 = vmatprep.subr.bf16.mxu1 %v3670_v37 }
 0x10e   : > { %1508 = vmatpush1.bf16.msra.mxu0 %v3461_v9  ;;  %v3537_v9 = vld [vmem:[%s4231_s25 + $0x420] ss:$20 sps:$4 sm:$0xff]  }
 0x10f   : > { %1551 = vmatpush1.bf16.msra.mxu1 %v3464_v10  ;;  %1509 = vmatprep.subr.bf16.mxu0 %v3467_v11  ;;  %v3540_v10 = vld [vmem:[%s4231_s25 + $0x568] ss:$20 sps:$4 sm:$0xff]   ;;  %v3538_v11 = vld [vmem:[%s4231_s25 + $0x564] ss:$20 sps:$4 sm:$0xff]  }
 0x110   : > { %1552 = vmatprep.subr.bf16.mxu1 %v3670_v37 }
 0x112   : > { %1510 = vmatpush1.bf16.msra.mxu0 %v3465_v12  ;;  %v3541_v12 = vld [vmem:[%s4231_s25 + $0x3f8] ss:$20 sps:$4 sm:$0xff]  }
 0x113   : > { %1553 = vmatpush1.bf16.msra.mxu1 %v3468_v14  ;;  %3028 = vmatprep.subr.msk.bf16.mxu0 %vm989_vm1, %v3024_v16  ;;  %v4444_v14 = vld [vmem:[%s4603_s1 + $0x4] ss:$8 sps:$4 sm:$0xff]  }
 0x114   : > { %1566 = vmatprep.subr.bf16.mxu1 %v3670_v37  ;;  %v3545_v16 = vld [vmem:[%s4231_s25 + $0x3d0] ss:$20 sps:$4 sm:$0xff]  }
 0x116   : > { %1524 = vmatpush2.bf16.msra.mxu0 %v1444_v20  ;;  %v3549_v20 = vld [vmem:[%s4231_s25 + $0x3a8] ss:$20 sps:$4 sm:$0xff]  }
 0x117   : > { %1567 = vmatpush2.bf16.msra.mxu1 %v1450_v21  ;;  %1525 = vmatprep.subr.bf16.mxu0 %v3474_v18  ;;  %v3546_v18 = vld [vmem:[%s4231_s25 + $0x514] ss:$20 sps:$4 sm:$0xff]   ;;  %v3552_v21 = vld [vmem:[%s4231_s25 + $0x4f0] ss:$20 sps:$4 sm:$0xff]  }
 0x118   : > { %1568 = vmatprep.subr.bf16.mxu1 %v3670_v37 }
 0x11a   : > { %1526 = vmatpush2.bf16.msra.mxu0 %v3472_v22  ;;  %v3550_v22 = vld [vmem:[%s4231_s25 + $0x4ec] ss:$20 sps:$4 sm:$0xff]  }
 0x11b   : > { %1569 = vmatpush2.bf16.msra.mxu1 %v3475_v23  ;;  %1909 = vmatprep.subr.bf16.mxu0 %v3478_v24  ;;  %v3553_v23 = vld [vmem:[%s4231_s25 + $0x380] ss:$20 sps:$4 sm:$0xff]   ;;  %v3556_v24 = vld [vmem:[%s4231_s25 + $0x4c8] ss:$20 sps:$4 sm:$0xff]  }
 0x11c   : > { %1952 = vmatprep.subr.bf16.mxu1 %v3481_v25  ;;  %v3554_v25 = vld [vmem:[%s4231_s25 + $0x4c4] ss:$20 sps:$4 sm:$0xff]  }
 0x11d   : > { %1528 = vmatmul.mubr.bf16.vlgmr.msra.gmra.mxu0 %v4279_v19 }
 0x11e   : > { %1571 = vmatmul.mubr.bf16.vlgmr.msra.gmra.mxu1 %v4279_v19  ;;  %1910 = vmatpush1.bf16.msra.mxu0 %v3476_v26  ;;  %v3557_v26 = vld [vmem:[%s4231_s25 + $0x358] ss:$20 sps:$4 sm:$0xff]  }
 0x11f   : > { %1953 = vmatpush1.bf16.msra.mxu1 %v3479_v27  ;;  %1911 = vmatprep.subr.bf16.mxu0 %v3484_v28  ;;  %v3560_v27 = vld [vmem:[%s4231_s25 + $0x4a0] ss:$20 sps:$4 sm:$0xff]   ;;  %v3558_v28 = vld [vmem:[%s4231_s25 + $0x49c] ss:$20 sps:$4 sm:$0xff]  }
 0x120   : > { %1954 = vmatprep.subr.bf16.mxu1 %v3487_v29  ;;  %3139 = vmatprep.mubr.msk.bf16.mxu0 %vm985_vm0, %v4222_v36  ;;  %v3561_v29 = vld [vmem:[%s4231_s25 + $0x330] ss:$20 sps:$4 sm:$0xff]  }
 0x121   : > { %3141 = vmatprep.mubr.msk.bf16.mxu1 %vm985_vm0, %v4222_v36  ;;  %v3502_v36 = vld [vmem:[%s4231_s25 + $0x374] ss:$20 sps:$4 sm:$0xff]  }
 0x122   : > { %1912 = vmatpush1.bf16.msra.mxu0 %v3482_v30  ;;  %v3564_v30 = vld [vmem:[%s4231_s25 + $0x478] ss:$20 sps:$4 sm:$0xff]  }
 0x123   : > { %1955 = vmatpush1.bf16.msra.mxu1 %v3485_v31  ;;  %1913 = vmatprep.subr.bf16.mxu0 %v3490_v32  ;;  %v3197_v31 = vld [vmem:[%s4231_s25 + $0x5dc] sm:$0x77]  ;;  %v3562_v32 = vld [vmem:[%s4231_s25 + $0x474] ss:$20 sps:$4 sm:$0xff]  }
 0x124   : > { %1956 = vmatprep.subr.bf16.mxu1 %v3493_v33  ;;  %v3565_v33 = vld [vmem:[%s4231_s25 + $0x308] ss:$20 sps:$4 sm:$0xff]  }
 0x126   : > { %1914 = vmatpush1.bf16.msra.mxu0 %v3488_v34  ;;  %v3246_v34 = vcombine.high %v3197_v31, %v3197_v31 }
 0x127   : > { %1957 = vmatpush1.bf16.msra.mxu1 %v3491_v35  ;;  %1915 = vmatprep.subr.bf16.mxu0 %v3496_v38  ;;  %v3567_v35 = vld [vmem:[%s4231_s25 + $0x470] ss:$0 sps:$4 sm:$0x77]   ;;  %v3245_v38 = vcombine.low %v3197_v31, %v3197_v31 }
 0x128   : > { %1958 = vmatprep.subr.bf16.mxu1 %v3499_v39  ;;  %v1907_v39 = vsel %vm989_vm1, %v3567_v35, 0 }
 0x12a   : > { %1916 = vmatpush1.bf16.msra.mxu0 %v3494_v40  ;;  %v2352_v40 = vsel %vm989_vm1, %v3245_v38, 0 }
 0x12b   : > { %1959 = vmatpush1.bf16.msra.mxu1 %v3497_v41  ;;  %1917 = vmatprep.subr.bf16.mxu0 %v3502_v36  ;;  %v3571_v41 = vld [vmem:[%s4231_s25 + $0x5b8] ss:$20 sps:$4 sm:$0xff]   ;;  %v3569_v36 = vld [vmem:[%s4231_s25 + $0x5b4] ss:$20 sps:$4 sm:$0xff]  }
 0x12c   : > { %1960 = vmatprep.subr.bf16.mxu1 %v3505_v42  ;;  %v3572_v42 = vld [vmem:[%s4231_s25 + $0x448] ss:$20 sps:$4 sm:$0xff]  }
 0x12e   : > { %1918 = vmatpush1.bf16.msra.mxu0 %v3500_v43  ;;  %v3575_v43 = vld [vmem:[%s4231_s25 + $0x598] ss:$20 sps:$4 sm:$0xff]  }
 0x12f   : > { %1961 = vmatpush1.bf16.msra.mxu1 %v3503_v44  ;;  %1919 = vmatprep.subr.bf16.mxu0 %v3508_v45  ;;  %v3573_v44 = vld [vmem:[%s4231_s25 + $0x594] ss:$20 sps:$4 sm:$0xff]   ;;  %v3576_v45 = vld [vmem:[%s4231_s25 + $0x59c] ss:$20 sps:$4 sm:$0xff]  }
 0x130   : > { %1962 = vmatprep.subr.bf16.mxu1 %v3511_v46  ;;  %v3579_v46 = vld [vmem:[%s4231_s25 + $0x570] ss:$20 sps:$4 sm:$0xff]  }
 0x132   : > { %1920 = vmatpush1.bf16.msra.mxu0 %v3506_v48  ;;  %v3580_v48 = vld [vmem:[%s4231_s25 + $0x574] ss:$20 sps:$4 sm:$0xff]  }
 0x133   : > { %1963 = vmatpush1.bf16.msra.mxu1 %v3509_v49  ;;  %1921 = vmatprep.subr.bf16.mxu0 %v3514_v50  ;;  %v3583_v49 = vld [vmem:[%s4231_s25 + $0x548] ss:$20 sps:$4 sm:$0xff]   ;;  %v3584_v50 = vld [vmem:[%s4231_s25 + $0x54c] ss:$20 sps:$4 sm:$0xff]  }
 0x134   : > { %1964 = vmatprep.subr.bf16.mxu1 %v3517_v51  ;;  %v3587_v51 = vld [vmem:[%s4231_s25 + $0x520] ss:$20 sps:$4 sm:$0xff]  }
 0x136   : > { %1922 = vmatpush1.bf16.msra.mxu0 %v3512_v52  ;;  %v3585_v52 = vld [vmem:[%s4231_s25 + $0x51c] ss:$20 sps:$4 sm:$0xff]  }
 0x137   : > { %1965 = vmatpush1.bf16.msra.mxu1 %v3515_v53  ;;  %1923 = vmatprep.subr.bf16.mxu0 %v3520_v54  ;;  %v3588_v53 = vld [vmem:[%s4231_s25 + $0x524] ss:$20 sps:$4 sm:$0xff]  }
 0x138   : > { %1966 = vmatprep.subr.bf16.mxu1 %v3523_v55  ;;  %v3591_v54 = vld [vmem:[%s4231_s25 + $0x4f8] ss:$20 sps:$4 sm:$0xff]   ;;  %v3589_v55 = vld [vmem:[%s4231_s25 + $0x4f4] ss:$20 sps:$4 sm:$0xff]  }
 0x13a   : > { %1924 = vmatpush1.bf16.msra.mxu0 %v3518_v58  ;;  %v3593_v58 = vld [vmem:[%s4231_s25 + $0x4cc] ss:$20 sps:$4 sm:$0xff]  }
 0x13b   : > { %1967 = vmatpush1.bf16.msra.mxu1 %v3521_v59  ;;  %3138 = vmatprep.subr.msk.bf16.mxu0 %vm989_vm1, %v3134_v60  ;;  %v3596_v59 = vld [vmem:[%s4231_s25 + $0x4d4] ss:$20 sps:$4 sm:$0xff]  }
 0x13c   : > { %3140 = vmatprep.subr.msk.bf16.mxu1 %vm989_vm1, %v3136_v61  ;;  %v3599_v60 = vld [vmem:[%s4231_s25 + $0x4a8] ss:$20 sps:$4 sm:$0xff]   ;;  %v3597_v61 = vld [vmem:[%s4231_s25 + $0x4a4] ss:$20 sps:$4 sm:$0xff]  }
 0x13e   : > { %1938 = vmatpush2.bf16.msra.mxu0 %v1895_v1  ;;  %v3601_v1 = vld [vmem:[%s4231_s25 + $0x47c] ss:$20 sps:$4 sm:$0xff]  }
 0x13f   : > { %1981 = vmatpush2.bf16.msra.mxu1 %v1901_v2  ;;  %1939 = vmatprep.subr.bf16.mxu0 %v3530_v3  ;;  %v3604_v2 = vld [vmem:[%s4231_s25 + $0x484] ss:$20 sps:$4 sm:$0xff]   ;;  %v3248_v3 = vcombine.high %v3198_v0, %v3198_v0 }
 0x140   : > { %1982 = vmatprep.subr.bf16.mxu1 %v3533_v4  ;;  %v3247_v4 = vcombine.low %v3198_v0, %v3198_v0 }
 0x142   : > { %1940 = vmatpush2.bf16.msra.mxu0 %v3528_v5  ;;  %v3607_v5 = vld [vmem:[%s4231_s25 + $0x5ec] ss:$0 sps:$4 sm:$0x77]  }
 0x143   : > { %1983 = vmatpush2.bf16.msra.mxu1 %v3531_v6  ;;  %1995 = vmatprep.subr.bf16.mxu0 %v3670_v37  ;;  %v2358_v6 = vsel %vm989_vm1, %v3247_v4, 0 }
 0x144   : > { %2366 = vmatprep.subr.bf16.mxu1 %v3536_v7  ;;  %v2364_v7 = vsel %vm989_vm1, %v3607_v5, 0 }
 0x145   : > { %1942 = vmatmul.mubr.bf16.vlgmr.msra.gmra.mxu0 %v4279_v19 }
 0x146   : > { %1985 = vmatmul.mubr.bf16.vlgmr.msra.gmra.mxu1 %v4279_v19  ;;  %1996 = vmatpush1.bf16.msra.mxu0 %v3537_v9  ;;  %v3608_v9 = vld [vmem:[%s4231_s25 + $0x5bc] ss:$20 sps:$4 sm:$0xff]  }
 0x147   : > { %2367 = vmatpush1.bf16.msra.mxu1 %v3534_v8  ;;  %1997 = vmatprep.subr.bf16.mxu0 %v3670_v37  ;;  %v3610_v8 = vld [vmem:[%s4231_s25 + $0x5c0] ss:$20 sps:$4 sm:$0xff]  }
 0x148   : > { %2368 = vmatprep.subr.bf16.mxu1 %v3540_v10  ;;  %3142 = vmatprep.mubr.msk.bf16.mxu0 %vm985_vm0, %v4444_v14  ;;  %v3611_v10 = vld [vmem:[%s4231_s25 + $0x5c4] ss:$20 sps:$4 sm:$0xff]  }
 0x149   : > { %3251 = vmatprep.mubr.msk.bf16.mxu1 %vm985_vm0, %v4444_v14 }
 0x14a   : > { %1998 = vmatpush1.bf16.msra.mxu0 %v3541_v12 }
 0x14b   : > { %2369 = vmatpush1.bf16.msra.mxu1 %v3538_v11  ;;  %1999 = vmatprep.subr.bf16.mxu0 %v3670_v37  ;;  %v3613_v11 = vld [vmem:[%s4603_s1] ss:$8 sps:$4 sm:$0xff]  }
 0x14c   : > { %2370 = vmatprep.subr.bf16.mxu1 %v3544_v13 }
 0x14e   : > { %2000 = vmatpush1.bf16.msra.mxu0 %v3545_v16 }
 0x14f   : > { %2371 = vmatpush1.bf16.msra.mxu1 %v3542_v15  ;;  %2001 = vmatprep.subr.bf16.mxu0 %v3670_v37 }
 0x150   : > { %2372 = vmatprep.subr.bf16.mxu1 %v3548_v17 }
 0x152   : > { %2002 = vmatpush1.bf16.msra.mxu0 %v3549_v20 }
 0x153   : > { %2373 = vmatpush1.bf16.msra.mxu1 %v3546_v18  ;;  %2003 = vmatprep.subr.bf16.mxu0 %v3670_v37 }
 0x154   : > { %2374 = vmatprep.subr.bf16.mxu1 %v3552_v21 }
 0x156   : > { %2004 = vmatpush1.bf16.msra.mxu0 %v3553_v23 }
 0x157   : > { %2375 = vmatpush1.bf16.msra.mxu1 %v3550_v22  ;;  %2005 = vmatprep.subr.bf16.mxu0 %v3670_v37 }
 0x158   : > { %2376 = vmatprep.subr.bf16.mxu1 %v3556_v24 }
 0x15a   : > { %2006 = vmatpush1.bf16.msra.mxu0 %v3557_v26 }
 0x15b   : > { %2377 = vmatpush1.bf16.msra.mxu1 %v3554_v25  ;;  %2007 = vmatprep.subr.bf16.mxu0 %v3670_v37 }
 0x15c   : > { %2378 = vmatprep.subr.bf16.mxu1 %v3560_v27 }
 0x15e   : > { %2008 = vmatpush1.bf16.msra.mxu0 %v3561_v29 }
 0x15f   : > { %2379 = vmatpush1.bf16.msra.mxu1 %v3558_v28  ;;  %2009 = vmatprep.subr.bf16.mxu0 %v3670_v37 }
 0x160   : > { %2380 = vmatprep.subr.bf16.mxu1 %v3564_v30 }
 0x162   : > { %2010 = vmatpush1.bf16.msra.mxu0 %v3565_v33 }
 0x163   : > { %2381 = vmatpush1.bf16.msra.mxu1 %v3562_v32  ;;  %2023 = vmatprep.subr.bf16.mxu0 %v3670_v37 }
 0x164   : > { %3250 = vmatprep.subr.msk.bf16.mxu1 %vm989_vm1, %v3246_v34 }
 0x166   : > { %2024 = vmatpush2.bf16.msra.mxu0 %v1907_v39 }
 0x167   : > { %2395 = vmatpush2.bf16.msra.mxu1 %v2352_v40  ;;  %2025 = vmatprep.subr.bf16.mxu0 %v3670_v37 }
 0x168   : > { %2396 = vmatprep.subr.bf16.mxu1 %v3571_v41 }
 0x16a   : > { %2026 = vmatpush2.bf16.msra.mxu0 %v3572_v42 }
 0x16b   : > { %2397 = vmatpush2.bf16.msra.mxu1 %v3569_v36  ;;  %2409 = vmatprep.subr.bf16.mxu0 %v3575_v43 }
 0x16c   : > { %2452 = vmatprep.subr.bf16.mxu1 %v3670_v37 }
 0x16d   : > { %2028 = vmatmul.mubr.bf16.vlgmr.msra.gmra.mxu0 %v4279_v19 }
 0x16e   : > { %2399 = vmatmul.mubr.bf16.vlgmr.msra.gmra.mxu1 %v4279_v19  ;;  %2410 = vmatpush1.bf16.msra.mxu0 %v3573_v44  ;;  %v3581_v19 = vld [vmem:[%s4231_s25 + $0x544] ss:$20 sps:$4 sm:$0xff]  }
 0x16f   : > { %2453 = vmatpush1.bf16.msra.mxu1 %v3576_v45  ;;  %2411 = vmatprep.subr.bf16.mxu0 %v3579_v46 }
 0x170   : > { %2454 = vmatprep.subr.bf16.mxu1 %v3670_v37  ;;  %3253 = vmatprep.mubr.msk.bf16.mxu0 %vm985_vm0, %v4444_v14 }
 0x171   : > { %3254 = vmatprep.mubr.msk.bf16.mxu1 %vm985_vm0, %v4444_v14 }
 0x172   : > { %2412 = vmatpush1.bf16.msra.mxu0 %v3577_v47 }
 0x173   : > { %2455 = vmatpush1.bf16.msra.mxu1 %v3580_v48  ;;  %2413 = vmatprep.subr.bf16.mxu0 %v3583_v49  ;;  %v2508_v49 = vpop.permute.xlu0 %2507 }
 0x174   : > { %2456 = vmatprep.subr.bf16.mxu1 %v3670_v37 }
 0x176   : > { %2414 = vmatpush1.bf16.msra.mxu0 %v3581_v19 }
 0x177   : > { %2457 = vmatpush1.bf16.msra.mxu1 %v3584_v50  ;;  %2415 = vmatprep.subr.bf16.mxu0 %v3587_v51 }
 0x178   : > { %2458 = vmatprep.subr.bf16.mxu1 %v3670_v37 }
 0x17a   : > { %2416 = vmatpush1.bf16.msra.mxu0 %v3585_v52 }
 0x17b   : > { %2459 = vmatpush1.bf16.msra.mxu1 %v3588_v53  ;;  %2417 = vmatprep.subr.bf16.mxu0 %v3591_v54 }
 0x17c   : > { %2460 = vmatprep.subr.bf16.mxu1 %v3670_v37 }
 0x17e   : > { %2418 = vmatpush1.bf16.msra.mxu0 %v3589_v55 }
 0x17f   : > { %2461 = vmatpush1.bf16.msra.mxu1 %v3592_v56  ;;  %2419 = vmatprep.subr.bf16.mxu0 %v3595_v57 }
 0x180   : > { %2462 = vmatprep.subr.bf16.mxu1 %v3670_v37 }
 0x182   : > { %2420 = vmatpush1.bf16.msra.mxu0 %v3593_v58 }
 0x183   : > { %2463 = vmatpush1.bf16.msra.mxu1 %v3596_v59  ;;  %2421 = vmatprep.subr.bf16.mxu0 %v3599_v60 }
 0x184   : > { %2464 = vmatprep.subr.bf16.mxu1 %v3670_v37 }
 0x186   : > { %2422 = vmatpush1.bf16.msra.mxu0 %v3597_v61  ;;  %v2513_v61 = vpop.permute.xlu0 %2512 }
 0x187   : > { %2465 = vmatpush1.bf16.msra.mxu1 %v3600_v62  ;;  %2423 = vmatprep.subr.bf16.mxu0 %v3603_v63 }
 0x188   : > { %2466 = vmatprep.subr.bf16.mxu1 %v3670_v37 }
 0x18a   : > { %2424 = vmatpush1.bf16.msra.mxu0 %v3601_v1 }
 0x18b   : > { %2467 = vmatpush1.bf16.msra.mxu1 %v3604_v2  ;;  %3252 = vmatprep.subr.msk.bf16.mxu0 %vm989_vm1, %v3248_v3 }
 0x18c   : > { %2480 = vmatprep.subr.bf16.mxu1 %v3670_v37 }
 0x18d   : > { %v1039_v12 = vpop.f32.mrf.mxu0 }
 0x18e   : > { %2438 = vmatpush2.bf16.msra.mxu0 %v2358_v6  ;;  %v4534_v13 = vpop.f32.mrf.mxu1 }
 0x18f   : > { %2481 = vmatpush2.bf16.msra.mxu1 %v2364_v7  ;;  %2439 = vmatprep.subr.bf16.mxu0 %v3610_v8  ;;  %v1041_v14 = vpop.f32.mrf.mxu0 }
 0x190   : > { %2482 = vmatprep.subr.bf16.mxu1 %v3670_v37  ;;  %v4536_v15 = vpop.f32.mrf.mxu1 }
 0x191   : > { %v1043_v16 = vpop.f32.mrf.mxu0 }
 0x192   : > { %2440 = vmatpush2.bf16.msra.mxu0 %v3608_v9  ;;  %v4538_v17 = vpop.f32.mrf.mxu1 }
 0x193   : > { %2483 = vmatpush2.bf16.msra.mxu1 %v3611_v10  ;;  %v1045_v18 = vpop.f32.mrf.mxu0 }
 0x194   : > { %v4540_v20 = vpop.f32.mrf.mxu1 }
 0x195   : > { %2442 = vmatmul.mubr.bf16.vlgmr.msra.gmra.mxu0 %v3613_v11 }
 0x196   : > { %2485 = vmatmul.mubr.bf16.vlgmr.msra.gmra.mxu1 %v3613_v11 }
 0x1b5   : > { %v4542_v37 = vpop.f32.mrf.mxu0 }
 0x1b6   : > { %v1486_v21 = vpop.f32.mrf.mxu1 }
 0x1b7   : > { %v1579_v22 = vmax.f32 %v1039_v12, %v1486_v21  ;;  %v1127_v23 = vpop.f32.mrf.mxu0 }
 0x1b8   : > { %v1488_v24 = vpop.f32.mrf.mxu1 }
 0x1b9   : > { %v1580_v25 = vmax.f32 %v1041_v14, %v1488_v24  ;;  %v4544_v26 = vpop.f32.mrf.mxu0 }
 0x1ba   : > { %v1490_v27 = vpop.f32.mrf.mxu1 }
 0x1bb   : > { %v1584_v28 = vmax.f32 %v1043_v16, %v1490_v27  ;;  %v1130_v29 = vpop.f32.mrf.mxu0 }
 0x1bc   : > { %v1492_v30 = vpop.f32.mrf.mxu1 }
 0x1bd   : > { %v1585_v31 = vmax.f32 %v1045_v18, %v1492_v30 }
 0x1dd   : > { %v1529_v40 = vpop.f32.mrf.mxu0 }
 0x1de   : > { %v1572_v32 = vpop.f32.mrf.mxu1  ;;  %v1581_v16 = vmax.f32 %v4534_v13, %v1529_v40 }
 0x1df   : > { %v1583_v33 = vmax.f32 %v4542_v37, %v1572_v32  ;;  %v1531_v41 = vpop.f32.mrf.mxu0 }
 0x1e0   : > { %v1574_v34 = vpop.f32.mrf.mxu1  ;;  %v1582_v18 = vmax.f32 %v4536_v15, %v1531_v41 }
 0x1e1   : > { %v1533_v36 = vpop.f32.mrf.mxu0 }
 0x1e2   : > { %v4547_v35 = vpop.f32.mrf.mxu1  ;;  %v1586_v24 = vmax.f32 %v4538_v17, %v1533_v36 }
 0x1e3   : > { %v1588_v38 = vmax.f32 %v4544_v26, %v4547_v35  ;;  %v1535_v42 = vpop.f32.mrf.mxu0 }
 0x1e4   : > { %v1577_v39 = vpop.f32.mrf.mxu1  ;;  %v1587_v29 = vmax.f32 %v4540_v20, %v1535_v42 }
 0x205   : > { %v1943_v43 = vpop.f32.mrf.mxu0 }
 0x206   : > { %v1986_v44 = vpop.f32.mrf.mxu1  ;;  %v2036_v51 = vmax.f32 %v1579_v22, %v1943_v43 }
 0x207   : > { %v1945_v45 = vpop.f32.mrf.mxu0  ;;  %v2038_v37 = vmax.f32 %v1581_v16, %v1986_v44 }
 0x208   : > { %v1988_v46 = vpop.f32.mrf.mxu1  ;;  %v2037_v54 = vmax.f32 %v1580_v25, %v1945_v45 }
 0x209   : > { %v1947_v47 = vpop.f32.mrf.mxu0  ;;  %v2039_v25 = vmax.f32 %v1582_v18, %v1988_v46 }
 0x20a   : > { %v1990_v48 = vpop.f32.mrf.mxu1  ;;  %v2041_v58 = vmax.f32 %v1584_v28, %v1947_v47 }
 0x20b   : > { %v1949_v19 = vpop.f32.mrf.mxu0  ;;  %v2043_v32 = vmax.f32 %v1586_v24, %v1990_v48 }
 0x20c   : > { %v1992_v50 = vpop.f32.mrf.mxu1  ;;  %v2042_v0 = vmax.f32 %v1585_v31, %v1949_v19 }
 0x20d   : > { %v2044_v40 = vmax.f32 %v1587_v29, %v1992_v50 }
 0x22d   : > { %v2029_v52 = vpop.f32.mrf.mxu0 }
 0x22e   : > { %v2400_v53 = vpop.f32.mrf.mxu1  ;;  %v2040_v21 = vmax.f32 %v1583_v33, %v2029_v52 }
 0x22f   : > { %v2493_v55 = vmax.f32 %v2036_v51, %v2400_v53  ;;  %v2031_v56 = vpop.f32.mrf.mxu0 }
 0x230   : > { %v2402_v57 = vpop.f32.mrf.mxu1 }
 0x231   : > { %v2494_v59 = vmax.f32 %v2037_v54, %v2402_v57  ;;  %v2515_v60 = vadd.f32 %v2508_v49, %v2493_v55  ;;  %v2032_v62 = vpop.f32.mrf.mxu0 }
 0x232   : > { %v2404_v63 = vpop.f32.mrf.mxu1  ;;  %v2045_v13 = vmax.f32 %v1588_v38, %v2032_v62 }
 0x233   : > { %v2516_v1 = vadd.f32 %v2508_v49, %v2494_v59  ;;  %v2498_v2 = vmax.f32 %v2041_v58, %v2404_v63  ;;  %v2034_v3 = vpop.f32.mrf.mxu0  ;;  %v2525_v5 = vmax.f32 %v2515_v60, 0.0 }
 0x234   : > { %v2406_v4 = vpop.f32.mrf.mxu1 }
 0x235   : > { %v2526_v6 = vmax.f32 %v2516_v1, 0.0  ;;  %v2520_v7 = vadd.f32 %v2513_v61, %v2498_v2  ;;  %v2499_v8 = vmax.f32 %v2042_v0, %v2406_v4 }
 0x237   : > { %v3268_v9 = vpack.c.bf16 %v2526_v6, %v2525_v5  ;;  %v2521_v10 = vadd.f32 %v2513_v61, %v2499_v8  ;;  %v2530_v11 = vmax.f32 %v2520_v7, 0.0 }
 0x239   : > { %2567 = vst [vmem:[%s4553_s21] sm:$0xff] %v3268_v9  ;;  %v2531_v12 = vmax.f32 %v2521_v10, 0.0 }
 0x23b   : > { %v3271_v14 = vpack.c.bf16 %v2531_v12, %v2530_v11 }
 0x23d   : > { %2570 = vst [vmem:[%s4553_s21 + $0x14] sm:$0xff] %v3271_v14 }
 0x240   : > { %v2599_v54 = vld [vmem:[%s4553_s21] sm:$0xff] (%p3739_p6) }
 0x241   : > { %2600 = vst [vmem:[%s2584_s26] sm:$0xff] (%p3739_p6), %v2599_v54 }
 0x244   : > { %v2603_v56 = vld [vmem:[%s4553_s21 + $0x14] sm:$0xff] (%p3739_p6) }
 0x245   : > { %2604 = vst [vmem:[%s2584_s26 + $0x28] sm:$0xff] (%p3739_p6), %v2603_v56 }
 0x255   : > { %v2443_v22 = vpop.f32.mrf.mxu0 }
 0x256   : > { %v2486_v23 = vpop.f32.mrf.mxu1  ;;  %v2495_v27 = vmax.f32 %v2038_v37, %v2443_v22 }
 0x257   : > { %v2497_v28 = vmax.f32 %v2040_v21, %v2486_v23  ;;  %v2445_v30 = vpop.f32.mrf.mxu0 }
 0x258   : > { %v2488_v31 = vpop.f32.mrf.mxu1  ;;  %v2517_v34 = vadd.f32 %v2508_v49, %v2495_v27  ;;  %v2496_v43 = vmax.f32 %v2039_v25, %v2445_v30 }
 0x259   : > { %v2519_v39 = vadd.f32 %v2508_v49, %v2497_v28  ;;  %v2447_v15 = vpop.f32.mrf.mxu0 }
 0x25a   : > { %v2489_v33 = vpop.f32.mrf.mxu1  ;;  %v2518_v41 = vadd.f32 %v2508_v49, %v2496_v43  ;;  %v2500_v36 = vmax.f32 %v2043_v32, %v2447_v15  ;;  %v2527_v44 = vmax.f32 %v2517_v34, 0.0 }
 0x25b   : > { %v2529_v17 = vmax.f32 %v2519_v39, 0.0  ;;  %v2502_v20 = vmax.f32 %v2045_v13, %v2489_v33  ;;  %v2449_v42 = vpop.f32.mrf.mxu0 }
 0x25c   : > { %v2491_v45 = vpop.f32.mrf.mxu1  ;;  %v2528_v47 = vmax.f32 %v2518_v41, 0.0  ;;  %v2522_v48 = vadd.f32 %v2513_v61, %v2500_v36  ;;  %v2501_v19 = vmax.f32 %v2044_v40, %v2449_v42 }
 0x25d   : > { %v3270_v46 = vpack.c.bf16 %v2529_v17, %v2529_v17  ;;  %v2524_v26 = vadd.f32 %v2513_v61, %v2502_v20 }
 0x25e   : > { %v3269_v35 = vpack.c.bf16 %v2528_v47, %v2527_v44  ;;  %v2523_v38 = vadd.f32 %v2513_v61, %v2501_v19  ;;  %v2532_v50 = vmax.f32 %v2522_v48, 0.0 }
 0x25f   : > { %2569 = vst [vmem:[%s4553_s21 + $0x10] sm:$0xf] %v3270_v46  ;;  %v2534_v51 = vmax.f32 %v2524_v26, 0.0 }
 0x260   : > { %2568 = vst [vmem:[%s4553_s21 + $0x8] sm:$0xff] %v3269_v35  ;;  %v2533_v52 = vmax.f32 %v2523_v38, 0.0  ;;  %2579 = sbr.rel (!%p3739_p6) target bundleno = 621 (0x26d), region = 62 }
 0x261   : > { %v3273_v49 = vpack.c.bf16 %v2534_v51, %v2534_v51 }
 0x262   : > { %v3272_v53 = vpack.c.bf16 %v2533_v52, %v2532_v50 }
 0x263   : > { %2572 = vst [vmem:[%s4553_s21 + $0x24] sm:$0xf] %v3273_v49 }
 0x264   : > { %2571 = vst [vmem:[%s4553_s21 + $0x1c] sm:$0xff] %v3272_v53 }
 0x266   : > { %v3262_v58 = vld [vmem:[%s4553_s21 + $0x10] sm:$0xf] }
 0x267   : > { %v2601_v55 = vld [vmem:[%s4553_s21 + $0x8] sm:$0xff]  ;;  %3263 = vst [vmem:[%s2584_s26 + $0x10] sm:$0xf] %v3262_v58 }
 0x268   : > { %2602 = vst [vmem:[%s2584_s26 + $0x8] sm:$0xff] %v2601_v55 }
 0x26a   : > { %v3264_v59 = vld [vmem:[%s4553_s21 + $0x24] sm:$0xf] }
 0x26b   : > { %v2605_v57 = vld [vmem:[%s4553_s21 + $0x1c] sm:$0xff]  ;;  %3265 = vst [vmem:[%s2584_s26 + $0x38] sm:$0xf] %v3264_v59 }
 0x26c   : > { %2606 = vst [vmem:[%s2584_s26 + $0x30] sm:$0xff] %v2605_v57 }
 0x26d PF: > { %s13_s18 = sadd.s32 1, %s3668_s18   ;;  %s4607_s12 = smov %s3648_s13 }
 0x26e   : > { %p10_p12 = scmp.ge.s32.totalorder %s13_s18, 6   ;;  %s4608_s13 = smov %s3747_s27 }
 0x26f   : > { %s4609_s14 = smov %s3660_s16  ;;  %s4610_s15 = smov %s3664_s17 }
 0x270   : > { %s4611_s16 = smov %s4614_s19  ;;  %s4612_s17 = smov %s4618_s20 }
 0x271   :  { %12 = sbr.rel (!%p10_p12) target bundleno = 4 (0x4), region = 134 }

// kernel: net_forward.5
= control target key start
LH: loop header
LB: loop body
LE: loop exit
PB: predicated region body
PF: predicated region fallthrough
CT: control target
= control target key end

     0   :  { %12 = vsyncpa [#allocation4], 0  ;;  %s10250_s24 = smov 0   ;;  %s11226_s0 = inlined_call_operand.vmem [shape: bf16[2,20480], index: 0, kind: input, shape index: {}]   ;;  %s11227_s1 = inlined_call_operand.vmem [shape: bf16[20480,128], index: 1, kind: input, shape index: {}]   ;;  %s11228_s2 = inlined_call_operand.vmem [shape: f32[1,128], index: 2, kind: input, shape index: {}]   ;;  %s11229_s3 = inlined_call_operand.vmem [shape: f32[128,128], index: 3, kind: input, shape index: {}]   ;;  %s11230_s4 = inlined_call_operand.vmem [shape: f32[1,128], index: 4, kind: input, shape index: {}]   ;;  %s11231_s5 = inlined_call_operand.vmem [shape: f32[128,128], index: 5, kind: input, shape index: {}]   ;;  %s11232_s6 = inlined_call_operand.vmem [shape: f32[1,128], index: 6, kind: input, shape index: {}]   ;;  %s11233_s7 = inlined_call_operand.hbm [shape: f32[2,128], index: 7, kind: output, shape index: {}]  }
   0x1 LB: > { %s10256_s25 = sadd.s32 4294967295, %s10203_s24   ;;  %p7865_p0 = scmp.ge.s32.totalorder %s10203_s24, 1  ;;  %s10203_s24 = sphi %s10250_s24, %s18_s24  }
   0x2   : > { %p244_p1 = scmp.lt.s32.totalorder %s10203_s24, 3 }
   0x4   : > { %p245_p2 = pnand %p7865_p0, %p244_p1 }
   0x5   : > { %s275_s26 = smul.u32 (!%p245_p2), 80, %s10256_s25  ;;  %p7867_p5 = scmp.ne.s32.totalorder (!%p245_p2), %s10256_s25, 0 }
   0x6   : > { %248 = sbr.rel (%p245_p2) target bundleno = 1307 (0x51b), region = 48 }
   0x7   : > { %s280_s27 = smul.u32 (!%p245_p2), 1280, %s10256_s25  ;;  %p276_p3 = scmp.lt.s32.totalorder (!%p245_p2), %s275_s26, 159 }
   0x9   : > { %p281_p4 = scmp.lt.s32.totalorder (!%p245_p2), %s280_s27, 2559 }
   0xb   : > { %s11235_s26 = smov (!%p276_p3, %s275_s26), 159  ;;  %s11237_s27 = smov (!%p281_p4, %s280_s27), 2559 }
   0xc   : > { %s10265_s30 = scalar_lea.vmem %s11226_s0, %s11235_s26  ;;  %s7866_s8 = sshll.u32 %s11237_s27, 2 }
   0xd   : > { %s10270_s11 = scalar_lea.vmem %s11227_s1, %s7866_s8  ;;  %290 = sbr.rel (%p7867_p5) target bundleno = 20 (0x14), region = 52 }
  0x12   : > { %v10205_v0 = vmov 0.0  }
  0x13   : > { %291 = vst [vmem:[#allocation2] sm:$0x3] %v10205_v0 }
  0x14 PF: > { %v9519_v1 = vld [vmem:[%s10270_s11 + $0x78] sm:$0xff]   ;;  %v9523_v5 = vld [vmem:[%s10270_s11 + $0x70] sm:$0xff]   ;;  %v9527_v9 = vld [vmem:[%s10270_s11 + $0x68] sm:$0xff]   ;;  %v1597_v29 = vlaneseq  ;;  %v10206_v37 = vmov 1966171168   ;;  %p8508_p6 = scmp.ne.s32.totalorder %s10256_s25, 1 }
  0x15   : > { %v9520_v2 = vld [vmem:[%s10270_s11 + $0xf8] sm:$0xff]   ;;  %8516 = vmatprep.subr.bf16.mxu0 %v9519_v1  ;;  %v9524_v6 = vld [vmem:[%s10270_s11 + $0xf0] sm:$0xff]   ;;  %v9528_v10 = vld [vmem:[%s10270_s11 + $0xe8] sm:$0xff]   ;;  %v1595_v38 = vunpack.c.l.s4 %v10206_v37 }
  0x16   : > { %v9521_v3 = vld [vmem:[%s10270_s11 + $0x38] sm:$0xff]   ;;  %8538 = vmatprep.subr.bf16.mxu1 %v9520_v2  ;;  %v9525_v7 = vld [vmem:[%s10270_s11 + $0x30] sm:$0xff]   ;;  %v9529_v11 = vld [vmem:[%s10270_s11 + $0x28] sm:$0xff]   ;;  %v1598_v34 = vshrl.u32 %v1597_v29, 7 }
  0x17   : > { %v9522_v4 = vld [vmem:[%s10270_s11 + $0xb8] sm:$0xff]   ;;  %8517 = vmatpush3.bf16.msra.mxu0 %v9521_v3  ;;  %v9526_v8 = vld [vmem:[%s10270_s11 + $0xb0] sm:$0xff]   ;;  %v9530_v12 = vld [vmem:[%s10270_s11 + $0xa8] sm:$0xff]   ;;  %v1596_v41 = vunpack.c.0.s8 %v1595_v38 }
  0x18   : > { %8539 = vmatpush3.bf16.msra.mxu1 %v9522_v4  ;;  %8518 = vmatprep.subr.bf16.mxu0 %v9523_v5  ;;  %v9531_v13 = vld [vmem:[%s10270_s11 + $0x60] sm:$0xff]   ;;  %v9535_v17 = vld [vmem:[%s10270_s11 + $0x58] sm:$0xff]   ;;  %v9539_v21 = vld [vmem:[%s10270_s11 + $0x50] sm:$0xff]  }
  0x19   : > { %8540 = vmatprep.subr.bf16.mxu1 %v9524_v6  ;;  %v9532_v14 = vld [vmem:[%s10270_s11 + $0xe0] sm:$0xff]   ;;  %v9536_v18 = vld [vmem:[%s10270_s11 + $0xd8] sm:$0xff]   ;;  %v9540_v22 = vld [vmem:[%s10270_s11 + $0xd0] sm:$0xff]   ;;  %v10308_v42 = vsub.s32 %v1596_v41, %v1598_v34 }
  0x1a   : > { %v9533_v15 = vld [vmem:[%s10270_s11 + $0x20] sm:$0xff]   ;;  %v9537_v19 = vld [vmem:[%s10270_s11 + $0x18] sm:$0xff]   ;;  %v9541_v23 = vld [vmem:[%s10270_s11 + $0x10] sm:$0xff]  }
  0x1b   : > { %8519 = vmatpush3.bf16.msra.mxu0 %v9525_v7  ;;  %v9534_v16 = vld [vmem:[%s10270_s11 + $0xa0] sm:$0xff]   ;;  %v9538_v20 = vld [vmem:[%s10270_s11 + $0x98] sm:$0xff]   ;;  %v9542_v24 = vld [vmem:[%s10270_s11 + $0x90] sm:$0xff]  }
  0x1c   : > { %8541 = vmatpush3.bf16.msra.mxu1 %v9526_v8  ;;  %8520 = vmatprep.subr.bf16.mxu0 %v9527_v9  ;;  %v9543_v25 = vld [vmem:[%s10270_s11 + $0x48] sm:$0xff]   ;;  %v9547_v30 = vld [vmem:[%s10270_s11 + $0x40] sm:$0xff]   ;;  %v9552_v36 = vld [vmem:[%s10270_s11 + $0x178] sm:$0xff]  }
  0x1d   : > { %8542 = vmatprep.subr.bf16.mxu1 %v9528_v10  ;;  %v9544_v26 = vld [vmem:[%s10270_s11 + $0xc8] sm:$0xff]   ;;  %v9548_v31 = vld [vmem:[%s10270_s11 + $0xc0] sm:$0xff]   ;;  %v9553_v39 = vld [vmem:[%s10270_s11 + $0x1f8] sm:$0xff]  }
  0x1e   : > { %v9545_v27 = vld [vmem:[%s10270_s11 + $0x8] sm:$0xff]   ;;  %v9549_v32 = vld [vmem:[%s10270_s11] sm:$0xff]   ;;  %v9554_v48 = vld [vmem:[%s10270_s11 + $0x138] sm:$0xff]  }
  0x1f   : > { %8521 = vmatpush3.bf16.msra.mxu0 %v9529_v11  ;;  %v9546_v28 = vld [vmem:[%s10270_s11 + $0x88] sm:$0xff]   ;;  %v9550_v33 = vld [vmem:[%s10270_s11 + $0x80] sm:$0xff]   ;;  %v9555_v50 = vld [vmem:[%s10270_s11 + $0x1b8] sm:$0xff]  }
  0x20   : > { %8543 = vmatpush3.bf16.msra.mxu1 %v9530_v12  ;;  %8522 = vmatprep.subr.bf16.mxu0 %v9531_v13  ;;  %v293_v35 = vld [vmem:[%s10265_s30] sm:$0xff]  ;;  %v9556_v53 = vld [vmem:[%s10270_s11 + $0x170] sm:$0xff]   ;;  %v9560_v59 = vld [vmem:[%s10270_s11 + $0x168] sm:$0xff]  }
  0x21   : > { %8544 = vmatprep.subr.bf16.mxu1 %v9532_v14  ;;  %v1593_v40 = vcombine.high %v293_v35, %v293_v35  ;;  %v1600_v43 = vrot.slane %v293_v35, %v10308_v42  ;;  %v9557_v55 = vld [vmem:[%s10270_s11 + $0x1f0] sm:$0xff]   ;;  %v9561_v60 = vld [vmem:[%s10270_s11 + $0x1e8] sm:$0xff]   ;;  %v9564_v63 = vld [vmem:[%s10270_s11 + $0x160] sm:$0xff]  }
  0x22   : > { %v9558_v56 = vld [vmem:[%s10270_s11 + $0x130] sm:$0xff]   ;;  %v9562_v61 = vld [vmem:[%s10270_s11 + $0x128] sm:$0xff]   ;;  %v9565_v0 = vld [vmem:[%s10270_s11 + $0x1e0] sm:$0xff]  }
  0x23   : > { %8523 = vmatpush3.bf16.msra.mxu0 %v9533_v15  ;;  %v10312_v44 = vrot.slane %v1593_v40, %v10308_v42  ;;  %v1608_v45 = vcombine.high %v1600_v43, %v1600_v43  ;;  %v1616_v46 = vrot.slane %v1600_v43, %v10308_v42  ;;  %v9559_v58 = vld [vmem:[%s10270_s11 + $0x1b0] sm:$0xff]   ;;  %v9563_v62 = vld [vmem:[%s10270_s11 + $0x1a8] sm:$0xff]   ;;  %v9566_v1 = vld [vmem:[%s10270_s11 + $0x120] sm:$0xff]  }
  0x24   : > { %8545 = vmatpush3.bf16.msra.mxu1 %v9534_v16  ;;  %8524 = vmatprep.subr.bf16.mxu0 %v9535_v17  ;;  %v9567_v2 = vld [vmem:[%s10270_s11 + $0x1a0] sm:$0xff]   ;;  %v9568_v3 = vld [vmem:[%s10270_s11 + $0x158] sm:$0xff]   ;;  %v9572_v7 = vld [vmem:[%s10270_s11 + $0x150] sm:$0xff]  }
  0x25   : > { %8546 = vmatprep.subr.bf16.mxu1 %v9536_v18  ;;  %v1609_v47 = vcombine.high %v10312_v44, %v10312_v44  ;;  %v1630_v49 = vrot.slane %v1608_v45, %v10308_v42  ;;  %v1638_v52 = vcombine.high %v1616_v46, %v1616_v46  ;;  %v9569_v4 = vld [vmem:[%s10270_s11 + $0x1d8] sm:$0xff]   ;;  %v9573_v8 = vld [vmem:[%s10270_s11 + $0x1d0] sm:$0xff]   ;;  %v9576_v11 = vld [vmem:[%s10270_s11 + $0x148] sm:$0xff]  }
  0x26   : > { %v9570_v5 = vld [vmem:[%s10270_s11 + $0x118] sm:$0xff]   ;;  %v9574_v9 = vld [vmem:[%s10270_s11 + $0x110] sm:$0xff]   ;;  %v9577_v12 = vld [vmem:[%s10270_s11 + $0x1c8] sm:$0xff]  }
  0x27   : > { %8525 = vmatpush3.bf16.msra.mxu0 %v9537_v19  ;;  %v1637_v51 = vrot.slane %v1609_v47, %v10308_v42  ;;  %6035 = vmatprep.mubr.bf16.mxu0 %v1630_v49  ;;  %v1640_v54 = vcombine.high %v1630_v49, %v1630_v49  ;;  %v9571_v6 = vld [vmem:[%s10270_s11 + $0x198] sm:$0xff]   ;;  %v9575_v10 = vld [vmem:[%s10270_s11 + $0x190] sm:$0xff]   ;;  %v9578_v13 = vld [vmem:[%s10270_s11 + $0x108] sm:$0xff]   ;;  %v1623_v19 = vrot.slane %v10312_v44, %v10308_v42 }
  0x28   : > { %8547 = vmatpush3.bf16.msra.mxu1 %v9538_v20  ;;  %8526 = vmatprep.subr.bf16.mxu0 %v9539_v21  ;;  %v9579_v14 = vld [vmem:[%s10270_s11 + $0x188] sm:$0xff]   ;;  %v9580_v15 = vld [vmem:[%s10270_s11 + $0x140] sm:$0xff]   ;;  %v9584_v20 = vld [vmem:[%s10270_s11 + $0x278] sm:$0xff]  }
  0x29   : > { %8548 = vmatprep.subr.bf16.mxu1 %v9540_v22  ;;  %v1641_v57 = vcombine.high %v1637_v51, %v1637_v51  ;;  %6075 = vmatprep.mubr.bf16.mxu1 %v1640_v54  ;;  %v9581_v16 = vld [vmem:[%s10270_s11 + $0x1c0] sm:$0xff]   ;;  %v9585_v21 = vld [vmem:[%s10270_s11 + $0x2f8] sm:$0xff]   ;;  %v9592_v29 = vld [vmem:[%s10270_s11 + $0x268] sm:$0xff]  }
  0x2a   : > { %v9582_v17 = vld [vmem:[%s10270_s11 + $0x100] sm:$0xff]   ;;  %v9586_v22 = vld [vmem:[%s10270_s11 + $0x238] sm:$0xff]   ;;  %v9604_v41 = vld [vmem:[%s10270_s11 + $0x250] sm:$0xff]  }
  0x2b   : > { %8527 = vmatpush3.bf16.msra.mxu0 %v9541_v23  ;;  %v9583_v18 = vld [vmem:[%s10270_s11 + $0x180] sm:$0xff]   ;;  %v9587_v23 = vld [vmem:[%s10270_s11 + $0x2b8] sm:$0xff]   ;;  %v9605_v43 = vld [vmem:[%s10270_s11 + $0x2d0] sm:$0xff]  }
  0x2c   : > { %8549 = vmatpush3.bf16.msra.mxu1 %v9542_v24  ;;  %8528 = vmatprep.subr.bf16.mxu0 %v9543_v25  ;;  %v1639_v24 = vcombine.high %v1623_v19, %v1623_v19  ;;  %v9588_v25 = vld [vmem:[%s10270_s11 + $0x270] sm:$0xff]   ;;  %v9597_v34 = vld [vmem:[%s10270_s11 + $0x2e0] sm:$0xff]   ;;  %v9600_v37 = vld [vmem:[%s10270_s11 + $0x258] sm:$0xff]  }
  0x2d   : > { %8550 = vmatprep.subr.bf16.mxu1 %v9544_v26  ;;  %v9589_v26 = vld [vmem:[%s10270_s11 + $0x2f0] sm:$0xff]   ;;  %v9598_v35 = vld [vmem:[%s10270_s11 + $0x220] sm:$0xff]   ;;  %v9601_v38 = vld [vmem:[%s10270_s11 + $0x2d8] sm:$0xff]  }
  0x2e   : > { %v9603_v40 = vld [vmem:[%s10270_s11 + $0x298] sm:$0xff]   ;;  %v9606_v44 = vld [vmem:[%s10270_s11 + $0x210] sm:$0xff]   ;;  %v294_v47 = vld [vmem:[%s10265_s30 + $0x8] sm:$0xff] }
  0x2f   : > { %8529 = vmatpush3.bf16.msra.mxu0 %v9545_v27  ;;  %v9590_v27 = vld [vmem:[%s10270_s11 + $0x230] sm:$0xff]   ;;  %v1649_v49 = vrot.slane %v294_v47, %v10308_v42 }
  0x30   : > { %8551 = vmatpush3.bf16.msra.mxu1 %v9546_v28  ;;  %8530 = vmatprep.subr.bf16.mxu0 %v9547_v30  ;;  %v9591_v28 = vld [vmem:[%s10270_s11 + $0x2b0] sm:$0xff]   ;;  %v9593_v30 = vld [vmem:[%s10270_s11 + $0x2e8] sm:$0xff]  }
  0x31   : > { %8552 = vmatprep.subr.bf16.mxu1 %v9548_v31  ;;  %v9594_v31 = vld [vmem:[%s10270_s11 + $0x228] sm:$0xff]   ;;  %v9607_v45 = vld [vmem:[%s10270_s11 + $0x290] sm:$0xff]  }
  0x33   : > { %8531 = vmatpush3.bf16.msra.mxu0 %v9549_v32  ;;  %v9595_v32 = vld [vmem:[%s10270_s11 + $0x2a8] sm:$0xff]  }
  0x34   : > { %8553 = vmatpush3.bf16.msra.mxu1 %v9550_v33  ;;  %8560 = vmatprep.subr.bf16.mxu0 %v9552_v36  ;;  %v9596_v33 = vld [vmem:[%s10270_s11 + $0x260] sm:$0xff]  }
  0x35   : > { %8582 = vmatprep.subr.bf16.mxu1 %v9553_v39  ;;  %v9599_v36 = vld [vmem:[%s10270_s11 + $0x2a0] sm:$0xff]   ;;  %v9602_v39 = vld [vmem:[%s10270_s11 + $0x218] sm:$0xff]  }
  0x36   : > { %6036 = vmatmul.mubr.bf16.vlgmr.msra.gmra.mxu0 %v1616_v46  ;;  %v9608_v46 = vld [vmem:[%s10270_s11 + $0x248] sm:$0xff]  }
  0x37   : > { %8561 = vmatpush3.bf16.msra.mxu0 %v9554_v48  ;;  %6076 = vmatmul.mubr.bf16.vlgmr.msra.gmra.mxu1 %v1638_v52  ;;  %v9609_v48 = vld [vmem:[%s10270_s11 + $0x2c8] sm:$0xff]  }
  0x38   : > { %8562 = vmatprep.subr.bf16.mxu0 %v9556_v53  ;;  %8583 = vmatpush3.bf16.msra.mxu1 %v9555_v50  ;;  %v1642_v50 = vcombine.high %v294_v47, %v294_v47  ;;  %v9611_v52 = vld [vmem:[%s10270_s11 + $0x288] sm:$0xff]   ;;  %v1657_v53 = vcombine.high %v1649_v49, %v1649_v49 }
  0x39   : > { %6115 = vmatprep.mubr.bf16.mxu0 %v1637_v51  ;;  %8584 = vmatprep.subr.bf16.mxu1 %v9557_v55  ;;  %v9610_v51 = vld [vmem:[%s10270_s11 + $0x208] sm:$0xff]   ;;  %v9612_v55 = vld [vmem:[%s10270_s11 + $0x240] sm:$0xff]  }
  0x3a   : > { %6155 = vmatprep.mubr.bf16.mxu1 %v1641_v57  ;;  %v10382_v54 = vrot.slane %v1642_v50, %v10308_v42  ;;  %v1679_v57 = vrot.slane %v1657_v53, %v10308_v42  ;;  %v9659_v47 = vld [vmem:[%s10270_s11 + $0x428] sm:$0xff]   ;;  %v9662_v50 = vld [vmem:[%s10270_s11 + $0x4e0] sm:$0xff]   ;;  %v9665_v53 = vld [vmem:[%s10270_s11 + $0x458] sm:$0xff]  }
  0x3b   : > { %8563 = vmatpush3.bf16.msra.mxu0 %v9558_v56  ;;  %v9613_v56 = vld [vmem:[%s10270_s11 + $0x2c0] sm:$0xff]  }
  0x3c   : > { %8564 = vmatprep.subr.bf16.mxu0 %v9560_v59  ;;  %8585 = vmatpush3.bf16.msra.mxu1 %v9559_v58  ;;  %v1658_v58 = vcombine.high %v10382_v54, %v10382_v54  ;;  %v9614_v59 = vld [vmem:[%s10270_s11 + $0x200] sm:$0xff]  }
  0x3d   : > { %8586 = vmatprep.subr.bf16.mxu1 %v9561_v60  ;;  %v9615_v60 = vld [vmem:[%s10270_s11 + $0x280] sm:$0xff]  }
  0x3f   : > { %8565 = vmatpush3.bf16.msra.mxu0 %v9562_v61  ;;  %v1689_v61 = vcombine.high %v1679_v57, %v1679_v57 }
  0x40   : > { %8566 = vmatprep.subr.bf16.mxu0 %v9564_v63  ;;  %8587 = vmatpush3.bf16.msra.mxu1 %v9563_v62  ;;  %v1665_v62 = vrot.slane %v1649_v49, %v10308_v42  ;;  %v9616_v63 = vld [vmem:[%s10270_s11 + $0x378] sm:$0xff]   ;;  %v9661_v49 = vld [vmem:[%s10270_s11 + $0x460] sm:$0xff]  }
  0x41   : > { %8588 = vmatprep.subr.bf16.mxu1 %v9565_v0  ;;  %v9617_v0 = vld [vmem:[%s10270_s11 + $0x3f8] sm:$0xff]  }
  0x43   : > { %8567 = vmatpush3.bf16.msra.mxu0 %v9566_v1  ;;  %v1686_v1 = vrot.slane %v1658_v58, %v10308_v42  ;;  %v9670_v58 = vld [vmem:[%s10270_s11 + $0x4d0] sm:$0xff]  }
  0x44   : > { %8568 = vmatprep.subr.bf16.mxu0 %v9568_v3  ;;  %8589 = vmatpush3.bf16.msra.mxu1 %v9567_v2  ;;  %v9618_v2 = vld [vmem:[%s10270_s11 + $0x338] sm:$0xff]  }
  0x45   : > { %8590 = vmatprep.subr.bf16.mxu1 %v9569_v4  ;;  %v9619_v3 = vld [vmem:[%s10270_s11 + $0x3b8] sm:$0xff]   ;;  %v1687_v4 = vcombine.high %v1665_v62, %v1665_v62 }
  0x47   : > { %8569 = vmatpush3.bf16.msra.mxu0 %v9570_v5  ;;  %v9620_v5 = vld [vmem:[%s10270_s11 + $0x370] sm:$0xff]  }
  0x48   : > { %8570 = vmatprep.subr.bf16.mxu0 %v9572_v7  ;;  %8591 = vmatpush3.bf16.msra.mxu1 %v9571_v6  ;;  %v9621_v6 = vld [vmem:[%s10270_s11 + $0x3f0] sm:$0xff]   ;;  %v1690_v7 = vcombine.high %v1686_v1, %v1686_v1 }
  0x49   : > { %8592 = vmatprep.subr.bf16.mxu1 %v9573_v8  ;;  %v9622_v8 = vld [vmem:[%s10270_s11 + $0x330] sm:$0xff]  }
  0x4b   : > { %8571 = vmatpush3.bf16.msra.mxu0 %v9574_v9  ;;  %v9623_v9 = vld [vmem:[%s10270_s11 + $0x3b0] sm:$0xff]  }
  0x4c   : > { %8572 = vmatprep.subr.bf16.mxu0 %v9576_v11  ;;  %8593 = vmatpush3.bf16.msra.mxu1 %v9575_v10  ;;  %v9624_v10 = vld [vmem:[%s10270_s11 + $0x368] sm:$0xff]  }
  0x4d   : > { %8594 = vmatprep.subr.bf16.mxu1 %v9577_v12  ;;  %v9625_v11 = vld [vmem:[%s10270_s11 + $0x3e8] sm:$0xff]  }
  0x4e   : > { %v9626_v12 = vld [vmem:[%s10270_s11 + $0x328] sm:$0xff]  }
  0x4f   : > { %8573 = vmatpush3.bf16.msra.mxu0 %v9578_v13  ;;  %v9627_v13 = vld [vmem:[%s10270_s11 + $0x3a8] sm:$0xff]  }
  0x50   : > { %8574 = vmatprep.subr.bf16.mxu0 %v9580_v15  ;;  %8595 = vmatpush3.bf16.msra.mxu1 %v9579_v14  ;;  %v9628_v14 = vld [vmem:[%s10270_s11 + $0x360] sm:$0xff]  }
  0x51   : > { %8596 = vmatprep.subr.bf16.mxu1 %v9581_v16  ;;  %v9629_v15 = vld [vmem:[%s10270_s11 + $0x3e0] sm:$0xff]  }
  0x52   : > { %v9630_v16 = vld [vmem:[%s10270_s11 + $0x320] sm:$0xff]  }
  0x53   : > { %8575 = vmatpush3.bf16.msra.mxu0 %v9582_v17  ;;  %v9631_v17 = vld [vmem:[%s10270_s11 + $0x3a0] sm:$0xff]  }
  0x54   : > { %8604 = vmatprep.subr.bf16.mxu0 %v9584_v20  ;;  %8597 = vmatpush3.bf16.msra.mxu1 %v9583_v18  ;;  %v9632_v18 = vld [vmem:[%s10270_s11 + $0x358] sm:$0xff]  }
  0x55   : > { %8626 = vmatprep.subr.bf16.mxu1 %v9585_v21  ;;  %v9634_v20 = vld [vmem:[%s10270_s11 + $0x318] sm:$0xff]  }
  0x56   : > { %6116 = vmatmul.mubr.bf16.vlgmr.msra.gmra.mxu0 %v1623_v19  ;;  %v9633_v19 = vld [vmem:[%s10270_s11 + $0x3d8] sm:$0xff]  }
  0x57   : > { %8605 = vmatpush3.bf16.msra.mxu0 %v9586_v22  ;;  %6156 = vmatmul.mubr.bf16.vlgmr.msra.gmra.mxu1 %v1639_v24  ;;  %v9635_v21 = vld [vmem:[%s10270_s11 + $0x398] sm:$0xff]   ;;  %v9636_v22 = vld [vmem:[%s10270_s11 + $0x350] sm:$0xff]  }
  0x58   : > { %8606 = vmatprep.subr.bf16.mxu0 %v9588_v25  ;;  %8627 = vmatpush3.bf16.msra.mxu1 %v9587_v23  ;;  %v9637_v23 = vld [vmem:[%s10270_s11 + $0x3d0] sm:$0xff]  }
  0x59   : > { %8628 = vmatprep.subr.bf16.mxu1 %v9589_v26  ;;  %6195 = vmatprep.mubr.bf16.mxu0 %v1679_v57  ;;  %v9638_v24 = vld [vmem:[%s10270_s11 + $0x310] sm:$0xff]   ;;  %v9640_v26 = vld [vmem:[%s10270_s11 + $0x348] sm:$0xff]  }
  0x5a   : > { %6235 = vmatprep.mubr.bf16.mxu1 %v1689_v61  ;;  %v9639_v25 = vld [vmem:[%s10270_s11 + $0x390] sm:$0xff]   ;;  %v9673_v61 = vld [vmem:[%s10270_s11 + $0x448] sm:$0xff]  }
  0x5b   : > { %8607 = vmatpush3.bf16.msra.mxu0 %v9590_v27  ;;  %v9641_v27 = vld [vmem:[%s10270_s11 + $0x3c8] sm:$0xff]   ;;  %v9669_v57 = vld [vmem:[%s10270_s11 + $0x450] sm:$0xff]  }
  0x5c   : > { %8608 = vmatprep.subr.bf16.mxu0 %v9592_v29  ;;  %8629 = vmatpush3.bf16.msra.mxu1 %v9591_v28  ;;  %v9642_v28 = vld [vmem:[%s10270_s11 + $0x308] sm:$0xff]  }
  0x5d   : > { %8630 = vmatprep.subr.bf16.mxu1 %v9593_v30  ;;  %v9643_v29 = vld [vmem:[%s10270_s11 + $0x388] sm:$0xff]   ;;  %v9644_v30 = vld [vmem:[%s10270_s11 + $0x340] sm:$0xff]  }
  0x5f   : > { %8609 = vmatpush3.bf16.msra.mxu0 %v9594_v31  ;;  %v9645_v31 = vld [vmem:[%s10270_s11 + $0x3c0] sm:$0xff]  }
  0x60   : > { %8610 = vmatprep.subr.bf16.mxu0 %v9596_v33  ;;  %8631 = vmatpush3.bf16.msra.mxu1 %v9595_v32  ;;  %v9646_v32 = vld [vmem:[%s10270_s11 + $0x300] sm:$0xff]  }
  0x61   : > { %8632 = vmatprep.subr.bf16.mxu1 %v9597_v34  ;;  %v9647_v33 = vld [vmem:[%s10270_s11 + $0x380] sm:$0xff]   ;;  %v1672_v34 = vrot.slane %v10382_v54, %v10308_v42  ;;  %v9666_v54 = vld [vmem:[%s10270_s11 + $0x4d8] sm:$0xff]  }
  0x63   : > { %8611 = vmatpush3.bf16.msra.mxu0 %v9598_v35  ;;  %v9649_v35 = vld [vmem:[%s10270_s11 + $0x478] sm:$0xff]  }
  0x64   : > { %8612 = vmatprep.subr.bf16.mxu0 %v9600_v37  ;;  %8633 = vmatpush3.bf16.msra.mxu1 %v9599_v36  ;;  %v9650_v36 = vld [vmem:[%s10270_s11 + $0x4f8] sm:$0xff]  }
  0x65   : > { %8634 = vmatprep.subr.bf16.mxu1 %v9601_v38  ;;  %v9651_v37 = vld [vmem:[%s10270_s11 + $0x438] sm:$0xff]  }
  0x66   : > { %v9652_v38 = vld [vmem:[%s10270_s11 + $0x4b8] sm:$0xff]  }
  0x67   : > { %8613 = vmatpush3.bf16.msra.mxu0 %v9602_v39  ;;  %v1688_v39 = vcombine.high %v1672_v34, %v1672_v34 }
  0x68   : > { %8614 = vmatprep.subr.bf16.mxu0 %v9604_v41  ;;  %8635 = vmatpush3.bf16.msra.mxu1 %v9603_v40  ;;  %v9653_v40 = vld [vmem:[%s10270_s11 + $0x470] sm:$0xff]  }
  0x69   : > { %8636 = vmatprep.subr.bf16.mxu1 %v9605_v43  ;;  %v9654_v41 = vld [vmem:[%s10270_s11 + $0x4f0] sm:$0xff]  }
  0x6a   : > { %v9655_v43 = vld [vmem:[%s10270_s11 + $0x430] sm:$0xff]  }
  0x6b   : > { %8615 = vmatpush3.bf16.msra.mxu0 %v9606_v44  ;;  %v9656_v44 = vld [vmem:[%s10270_s11 + $0x4b0] sm:$0xff]  }
  0x6c   : > { %8616 = vmatprep.subr.bf16.mxu0 %v9608_v46  ;;  %8637 = vmatpush3.bf16.msra.mxu1 %v9607_v45  ;;  %v9657_v45 = vld [vmem:[%s10270_s11 + $0x468] sm:$0xff]  }
  0x6d   : > { %8638 = vmatprep.subr.bf16.mxu1 %v9609_v48  ;;  %v9658_v46 = vld [vmem:[%s10270_s11 + $0x4e8] sm:$0xff]  }
  0x6e   : > { %v9660_v48 = vld [vmem:[%s10270_s11 + $0x4a8] sm:$0xff]  }
  0x6f   : > { %8617 = vmatpush3.bf16.msra.mxu0 %v9610_v51  ;;  %v9663_v51 = vld [vmem:[%s10270_s11 + $0x420] sm:$0xff]  }
  0x70   : > { %8618 = vmatprep.subr.bf16.mxu0 %v9612_v55  ;;  %8639 = vmatpush3.bf16.msra.mxu1 %v9611_v52  ;;  %v9664_v52 = vld [vmem:[%s10270_s11 + $0x4a0] sm:$0xff]   ;;  %v9667_v55 = vld [vmem:[%s10270_s11 + $0x418] sm:$0xff]  }
  0x71   : > { %8640 = vmatprep.subr.bf16.mxu1 %v9613_v56  ;;  %v9668_v56 = vld [vmem:[%s10270_s11 + $0x498] sm:$0xff]  }
  0x73   : > { %8619 = vmatpush3.bf16.msra.mxu0 %v9614_v59  ;;  %v9671_v59 = vld [vmem:[%s10270_s11 + $0x410] sm:$0xff]  }
  0x74   : > { %8648 = vmatprep.subr.bf16.mxu0 %v9616_v63  ;;  %8641 = vmatpush3.bf16.msra.mxu1 %v9615_v60  ;;  %v9672_v60 = vld [vmem:[%s10270_s11 + $0x490] sm:$0xff]   ;;  %v9674_v63 = vld [vmem:[%s10270_s11 + $0x4c8] sm:$0xff]  }
  0x75   : > { %8670 = vmatprep.subr.bf16.mxu1 %v9617_v0 }
  0x76   : > { %6196 = vmatmul.mubr.bf16.vlgmr.msra.gmra.mxu0 %v1665_v62  ;;  %v295_v62 = vld [vmem:[%s10265_s30 + $0x10] sm:$0xff] }
  0x77   : > { %8649 = vmatpush3.bf16.msra.mxu0 %v9618_v2  ;;  %6275 = vmatprep.mubr.bf16.mxu0 %v1686_v1  ;;  %v1698_v0 = vrot.slane %v295_v62, %v10308_v42  ;;  %v1691_v1 = vcombine.high %v295_v62, %v295_v62  ;;  %v9675_v2 = vld [vmem:[%s10270_s11 + $0x408] sm:$0xff]  }
  0x78   : > { %6236 = vmatmul.mubr.bf16.vlgmr.msra.gmra.mxu1 %v1687_v4  ;;  %8650 = vmatprep.subr.bf16.mxu0 %v9620_v5  ;;  %v9724_v62 = vld [vmem:[%s10270_s11 + $0x628] sm:$0xff]  }
  0x79   : > { %8671 = vmatpush3.bf16.msra.mxu1 %v9619_v3  ;;  %6315 = vmatprep.mubr.bf16.mxu1 %v1690_v7  ;;  %v9676_v3 = vld [vmem:[%s10270_s11 + $0x488] sm:$0xff]   ;;  %v1706_v4 = vcombine.high %v1698_v0, %v1698_v0  ;;  %v10458_v5 = vrot.slane %v1691_v1, %v10308_v42  ;;  %v9678_v7 = vld [vmem:[%s10270_s11 + $0x4c0] sm:$0xff]  }
  0x7a   : > { %8672 = vmatprep.subr.bf16.mxu1 %v9621_v6  ;;  %v9677_v6 = vld [vmem:[%s10270_s11 + $0x440] sm:$0xff]  }
  0x7b   : > { %8651 = vmatpush3.bf16.msra.mxu0 %v9622_v8  ;;  %v1728_v8 = vrot.slane %v1706_v4, %v10308_v42  ;;  %v9727_v1 = vld [vmem:[%s10270_s11 + $0x6e0] sm:$0xff]   ;;  %v9730_v4 = vld [vmem:[%s10270_s11 + $0x658] sm:$0xff]  }
  0x7c   : > { %8652 = vmatprep.subr.bf16.mxu0 %v9624_v10  ;;  %v9679_v10 = vld [vmem:[%s10270_s11 + $0x400] sm:$0xff]  }
  0x7d   : > { %8673 = vmatpush3.bf16.msra.mxu1 %v9623_v9  ;;  %v1707_v9 = vcombine.high %v10458_v5, %v10458_v5 }
  0x7e   : > { %8674 = vmatprep.subr.bf16.mxu1 %v9625_v11  ;;  %v9680_v11 = vld [vmem:[%s10270_s11 + $0x480] sm:$0xff]  }
  0x7f   : > { %8653 = vmatpush3.bf16.msra.mxu0 %v9626_v12  ;;  %v1738_v12 = vcombine.high %v1728_v8, %v1728_v8 }
  0x80   : > { %8654 = vmatprep.subr.bf16.mxu0 %v9628_v14  ;;  %v9681_v14 = vld [vmem:[%s10270_s11 + $0x578] sm:$0xff]  }
  0x81   : > { %8675 = vmatpush3.bf16.msra.mxu1 %v9627_v13  ;;  %v1714_v13 = vrot.slane %v1698_v0, %v10308_v42  ;;  %v9726_v0 = vld [vmem:[%s10270_s11 + $0x660] sm:$0xff]  }
  0x82   : > { %8676 = vmatprep.subr.bf16.mxu1 %v9629_v15  ;;  %v9682_v15 = vld [vmem:[%s10270_s11 + $0x5f8] sm:$0xff]  }
  0x83   : > { %8655 = vmatpush3.bf16.msra.mxu0 %v9630_v16  ;;  %v1735_v16 = vrot.slane %v1707_v9, %v10308_v42  ;;  %v9735_v9 = vld [vmem:[%s10270_s11 + $0x6d0] sm:$0xff]  }
  0x84   : > { %8656 = vmatprep.subr.bf16.mxu0 %v9632_v18  ;;  %v9684_v18 = vld [vmem:[%s10270_s11 + $0x5b8] sm:$0xff]  }
  0x85   : > { %8677 = vmatpush3.bf16.msra.mxu1 %v9631_v17  ;;  %v9683_v17 = vld [vmem:[%s10270_s11 + $0x538] sm:$0xff]  }
  0x86   : > { %8678 = vmatprep.subr.bf16.mxu1 %v9633_v19  ;;  %v1736_v19 = vcombine.high %v1714_v13, %v1714_v13 }
  0x87   : > { %8657 = vmatpush3.bf16.msra.mxu0 %v9634_v20  ;;  %v9685_v20 = vld [vmem:[%s10270_s11 + $0x570] sm:$0xff]  }
  0x88   : > { %8658 = vmatprep.subr.bf16.mxu0 %v9636_v22  ;;  %v1739_v22 = vcombine.high %v1735_v16, %v1735_v16 }
  0x89   : > { %8679 = vmatpush3.bf16.msra.mxu1 %v9635_v21  ;;  %v9686_v21 = vld [vmem:[%s10270_s11 + $0x5f0] sm:$0xff]  }
  0x8a   : > { %8680 = vmatprep.subr.bf16.mxu1 %v9637_v23  ;;  %v9687_v23 = vld [vmem:[%s10270_s11 + $0x530] sm:$0xff]  }
  0x8b   : > { %8659 = vmatpush3.bf16.msra.mxu0 %v9638_v24  ;;  %v9688_v24 = vld [vmem:[%s10270_s11 + $0x5b0] sm:$0xff]  }
  0x8c   : > { %8660 = vmatprep.subr.bf16.mxu0 %v9640_v26  ;;  %v9690_v26 = vld [vmem:[%s10270_s11 + $0x5e8] sm:$0xff]  }
  0x8d   : > { %8681 = vmatpush3.bf16.msra.mxu1 %v9639_v25  ;;  %v9689_v25 = vld [vmem:[%s10270_s11 + $0x568] sm:$0xff]  }
  0x8e   : > { %8682 = vmatprep.subr.bf16.mxu1 %v9641_v27  ;;  %v9691_v27 = vld [vmem:[%s10270_s11 + $0x528] sm:$0xff]  }
  0x8f   : > { %8661 = vmatpush3.bf16.msra.mxu0 %v9642_v28  ;;  %v9692_v28 = vld [vmem:[%s10270_s11 + $0x5a8] sm:$0xff]  }
  0x90   : > { %8662 = vmatprep.subr.bf16.mxu0 %v9644_v30  ;;  %v9694_v30 = vld [vmem:[%s10270_s11 + $0x5e0] sm:$0xff]  }
  0x91   : > { %8683 = vmatpush3.bf16.msra.mxu1 %v9643_v29  ;;  %v9693_v29 = vld [vmem:[%s10270_s11 + $0x560] sm:$0xff]  }
  0x92   : > { %8684 = vmatprep.subr.bf16.mxu1 %v9645_v31  ;;  %v9695_v31 = vld [vmem:[%s10270_s11 + $0x520] sm:$0xff]  }
  0x93   : > { %8663 = vmatpush3.bf16.msra.mxu0 %v9646_v32  ;;  %v9696_v32 = vld [vmem:[%s10270_s11 + $0x5a0] sm:$0xff]  }
  0x94   : > { %8692 = vmatprep.subr.bf16.mxu0 %v9649_v35  ;;  %v9699_v35 = vld [vmem:[%s10270_s11 + $0x518] sm:$0xff]  }
  0x95   : > { %8685 = vmatpush3.bf16.msra.mxu1 %v9647_v33  ;;  %v9697_v33 = vld [vmem:[%s10270_s11 + $0x558] sm:$0xff]  }
  0x96   : > { %6276 = vmatmul.mubr.bf16.vlgmr.msra.gmra.mxu0 %v1672_v34  ;;  %8714 = vmatprep.subr.bf16.mxu1 %v9650_v36  ;;  %v9698_v34 = vld [vmem:[%s10270_s11 + $0x5d8] sm:$0xff]  }
  0x97   : > { %8693 = vmatpush3.bf16.msra.mxu0 %v9651_v37  ;;  %6355 = vmatprep.mubr.bf16.mxu0 %v1728_v8  ;;  %v9700_v36 = vld [vmem:[%s10270_s11 + $0x598] sm:$0xff]   ;;  %v9701_v37 = vld [vmem:[%s10270_s11 + $0x550] sm:$0xff]  }
  0x98   : > { %6316 = vmatmul.mubr.bf16.vlgmr.msra.gmra.mxu1 %v1688_v39  ;;  %8694 = vmatprep.subr.bf16.mxu0 %v9653_v40  ;;  %v9703_v39 = vld [vmem:[%s10270_s11 + $0x510] sm:$0xff]  }
  0x99   : > { %8715 = vmatpush3.bf16.msra.mxu1 %v9652_v38  ;;  %6395 = vmatprep.mubr.bf16.mxu1 %v1738_v12  ;;  %v9702_v38 = vld [vmem:[%s10270_s11 + $0x5d0] sm:$0xff]   ;;  %v9738_v12 = vld [vmem:[%s10270_s11 + $0x648] sm:$0xff]  }
  0x9a   : > { %8716 = vmatprep.subr.bf16.mxu1 %v9654_v41  ;;  %v9704_v40 = vld [vmem:[%s10270_s11 + $0x590] sm:$0xff]   ;;  %v9705_v41 = vld [vmem:[%s10270_s11 + $0x548] sm:$0xff]  }
  0x9b   : > { %8695 = vmatpush3.bf16.msra.mxu0 %v9655_v43  ;;  %v9706_v43 = vld [vmem:[%s10270_s11 + $0x5c8] sm:$0xff]   ;;  %v9734_v8 = vld [vmem:[%s10270_s11 + $0x650] sm:$0xff]  }
  0x9c   : > { %8696 = vmatprep.subr.bf16.mxu0 %v9657_v45  ;;  %v9708_v45 = vld [vmem:[%s10270_s11 + $0x588] sm:$0xff]  }
  0x9d   : > { %8717 = vmatpush3.bf16.msra.mxu1 %v9656_v44  ;;  %v9707_v44 = vld [vmem:[%s10270_s11 + $0x508] sm:$0xff]  }
  0x9e   : > { %8718 = vmatprep.subr.bf16.mxu1 %v9658_v46  ;;  %v9709_v46 = vld [vmem:[%s10270_s11 + $0x540] sm:$0xff]  }
  0x9f   : > { %8697 = vmatpush3.bf16.msra.mxu0 %v9659_v47  ;;  %v9710_v47 = vld [vmem:[%s10270_s11 + $0x5c0] sm:$0xff]  }
  0xa0   : > { %8698 = vmatprep.subr.bf16.mxu0 %v9661_v49  ;;  %v9712_v49 = vld [vmem:[%s10270_s11 + $0x580] sm:$0xff]  }
  0xa1   : > { %8719 = vmatpush3.bf16.msra.mxu1 %v9660_v48  ;;  %v9711_v48 = vld [vmem:[%s10270_s11 + $0x500] sm:$0xff]  }
  0xa2   : > { %8720 = vmatprep.subr.bf16.mxu1 %v9662_v50  ;;  %v1721_v50 = vrot.slane %v10458_v5, %v10308_v42  ;;  %v9731_v5 = vld [vmem:[%s10270_s11 + $0x6d8] sm:$0xff]  }
  0xa3   : > { %8699 = vmatpush3.bf16.msra.mxu0 %v9663_v51  ;;  %v9714_v51 = vld [vmem:[%s10270_s11 + $0x678] sm:$0xff]  }
  0xa4   : > { %8700 = vmatprep.subr.bf16.mxu0 %v9665_v53  ;;  %v9716_v53 = vld [vmem:[%s10270_s11 + $0x638] sm:$0xff]  }
  0xa5   : > { %8721 = vmatpush3.bf16.msra.mxu1 %v9664_v52  ;;  %v9715_v52 = vld [vmem:[%s10270_s11 + $0x6f8] sm:$0xff]  }
  0xa6   : > { %8722 = vmatprep.subr.bf16.mxu1 %v9666_v54  ;;  %v9717_v54 = vld [vmem:[%s10270_s11 + $0x6b8] sm:$0xff]  }
  0xa7   : > { %8701 = vmatpush3.bf16.msra.mxu0 %v9667_v55  ;;  %v1737_v55 = vcombine.high %v1721_v50, %v1721_v50 }
  0xa8   : > { %8702 = vmatprep.subr.bf16.mxu0 %v9669_v57  ;;  %v9719_v57 = vld [vmem:[%s10270_s11 + $0x6f0] sm:$0xff]  }
  0xa9   : > { %8723 = vmatpush3.bf16.msra.mxu1 %v9668_v56  ;;  %v9718_v56 = vld [vmem:[%s10270_s11 + $0x670] sm:$0xff]  }
  0xaa   : > { %8724 = vmatprep.subr.bf16.mxu1 %v9670_v58  ;;  %v9720_v58 = vld [vmem:[%s10270_s11 + $0x630] sm:$0xff]  }
  0xab   : > { %8703 = vmatpush3.bf16.msra.mxu0 %v9671_v59  ;;  %v9721_v59 = vld [vmem:[%s10270_s11 + $0x6b0] sm:$0xff]  }
  0xac   : > { %8704 = vmatprep.subr.bf16.mxu0 %v9673_v61  ;;  %v9723_v61 = vld [vmem:[%s10270_s11 + $0x6e8] sm:$0xff]  }
  0xad   : > { %8725 = vmatpush3.bf16.msra.mxu1 %v9672_v60  ;;  %v9722_v60 = vld [vmem:[%s10270_s11 + $0x668] sm:$0xff]  }
  0xae   : > { %8726 = vmatprep.subr.bf16.mxu1 %v9674_v63  ;;  %v9725_v63 = vld [vmem:[%s10270_s11 + $0x6a8] sm:$0xff]  }
  0xaf   : > { %8705 = vmatpush3.bf16.msra.mxu0 %v9675_v2  ;;  %v9728_v2 = vld [vmem:[%s10270_s11 + $0x620] sm:$0xff]  }
  0xb0   : > { %8706 = vmatprep.subr.bf16.mxu0 %v9677_v6  ;;  %v9732_v6 = vld [vmem:[%s10270_s11 + $0x618] sm:$0xff]  }
  0xb1   : > { %8727 = vmatpush3.bf16.msra.mxu1 %v9676_v3  ;;  %v9729_v3 = vld [vmem:[%s10270_s11 + $0x6a0] sm:$0xff]  }
  0xb2   : > { %8728 = vmatprep.subr.bf16.mxu1 %v9678_v7  ;;  %v9733_v7 = vld [vmem:[%s10270_s11 + $0x698] sm:$0xff]  }
  0xb3   : > { %8707 = vmatpush3.bf16.msra.mxu0 %v9679_v10  ;;  %v9736_v10 = vld [vmem:[%s10270_s11 + $0x610] sm:$0xff]  }
  0xb4   : > { %8736 = vmatprep.subr.bf16.mxu0 %v9681_v14  ;;  %v296_v14 = vld [vmem:[%s10265_s30 + $0x18] sm:$0xff] }
  0xb5   : > { %8729 = vmatpush3.bf16.msra.mxu1 %v9680_v11  ;;  %v9737_v11 = vld [vmem:[%s10270_s11 + $0x690] sm:$0xff]  }
  0xb6   : > { %6356 = vmatmul.mubr.bf16.vlgmr.msra.gmra.mxu0 %v1714_v13  ;;  %8758 = vmatprep.subr.bf16.mxu1 %v9682_v15  ;;  %v9739_v13 = vld [vmem:[%s10270_s11 + $0x6c8] sm:$0xff]  }
  0xb7   : > { %8737 = vmatpush3.bf16.msra.mxu0 %v9683_v17  ;;  %6435 = vmatprep.mubr.bf16.mxu0 %v1735_v16  ;;  %v9740_v15 = vld [vmem:[%s10270_s11 + $0x608] sm:$0xff]   ;;  %v1747_v16 = vrot.slane %v296_v14, %v10308_v42  ;;  %v1740_v17 = vcombine.high %v296_v14, %v296_v14  ;;  %v9780_v14 = vld [vmem:[%s10270_s11 + $0x8f8] sm:$0xff]  }
  0xb8   : > { %6396 = vmatmul.mubr.bf16.vlgmr.msra.gmra.mxu1 %v1736_v19  ;;  %8738 = vmatprep.subr.bf16.mxu0 %v9685_v20  ;;  %v9742_v19 = vld [vmem:[%s10270_s11 + $0x640] sm:$0xff]  }
  0xb9   : > { %8759 = vmatpush3.bf16.msra.mxu1 %v9684_v18  ;;  %6475 = vmatprep.mubr.bf16.mxu1 %v1739_v22  ;;  %v9741_v18 = vld [vmem:[%s10270_s11 + $0x688] sm:$0xff]   ;;  %v1755_v20 = vcombine.high %v1747_v16, %v1747_v16  ;;  %v9743_v22 = vld [vmem:[%s10270_s11 + $0x6c0] sm:$0xff]  }
  0xba   : > { %8760 = vmatprep.subr.bf16.mxu1 %v9686_v21  ;;  %v10535_v21 = vrot.slane %v1740_v17, %v10308_v42 }
  0xbb   : > { %8739 = vmatpush3.bf16.msra.mxu0 %v9687_v23  ;;  %v9744_v23 = vld [vmem:[%s10270_s11 + $0x600] sm:$0xff]  }
  0xbc   : > { %8740 = vmatprep.subr.bf16.mxu0 %v9689_v25  ;;  %v1756_v25 = vcombine.high %v10535_v21, %v10535_v21 }
  0xbd   : > { %8761 = vmatpush3.bf16.msra.mxu1 %v9688_v24  ;;  %v1777_v24 = vrot.slane %v1755_v20, %v10308_v42 }
  0xbe   : > { %8762 = vmatprep.subr.bf16.mxu1 %v9690_v26  ;;  %v9745_v26 = vld [vmem:[%s10270_s11 + $0x680] sm:$0xff]  }
  0xbf   : > { %8741 = vmatpush3.bf16.msra.mxu0 %v9691_v27  ;;  %v1787_v27 = vcombine.high %v1777_v24, %v1777_v24 }
  0xc0   : > { %8742 = vmatprep.subr.bf16.mxu0 %v9693_v29  ;;  %v9746_v29 = vld [vmem:[%s10270_s11 + $0x778] sm:$0xff]  }
  0xc1   : > { %8763 = vmatpush3.bf16.msra.mxu1 %v9692_v28  ;;  %v1763_v28 = vrot.slane %v1747_v16, %v10308_v42  ;;  %v9782_v16 = vld [vmem:[%s10270_s11 + $0x8b8] sm:$0xff]  }
  0xc2   : > { %8764 = vmatprep.subr.bf16.mxu1 %v9694_v30  ;;  %v9747_v30 = vld [vmem:[%s10270_s11 + $0x7f8] sm:$0xff]  }
  0xc3   : > { %8743 = vmatpush3.bf16.msra.mxu0 %v9695_v31  ;;  %v1784_v31 = vrot.slane %v1756_v25, %v10308_v42  ;;  %v9787_v25 = vld [vmem:[%s10270_s11 + $0x868] sm:$0xff]  }
  0xc4   : > { %8744 = vmatprep.subr.bf16.mxu0 %v9697_v33  ;;  %v9749_v33 = vld [vmem:[%s10270_s11 + $0x7b8] sm:$0xff]  }
  0xc5   : > { %8765 = vmatpush3.bf16.msra.mxu1 %v9696_v32  ;;  %v9748_v32 = vld [vmem:[%s10270_s11 + $0x738] sm:$0xff]  }
  0xc6   : > { %8766 = vmatprep.subr.bf16.mxu1 %v9698_v34  ;;  %v1785_v34 = vcombine.high %v1763_v28, %v1763_v28 }
  0xc7   : > { %8745 = vmatpush3.bf16.msra.mxu0 %v9699_v35  ;;  %v9750_v35 = vld [vmem:[%s10270_s11 + $0x770] sm:$0xff]  }
  0xc8   : > { %8746 = vmatprep.subr.bf16.mxu0 %v9701_v37  ;;  %v1788_v37 = vcombine.high %v1784_v31, %v1784_v31 }
  0xc9   : > { %8767 = vmatpush3.bf16.msra.mxu1 %v9700_v36  ;;  %v9751_v36 = vld [vmem:[%s10270_s11 + $0x7f0] sm:$0xff]  }
  0xca   : > { %8768 = vmatprep.subr.bf16.mxu1 %v9702_v38 }
  0xcb   : > { %8747 = vmatpush3.bf16.msra.mxu0 %v9703_v39  ;;  %v9752_v39 = vld [vmem:[%s10270_s11 + $0x730] sm:$0xff]  }
  0xcc   : > { %8748 = vmatprep.subr.bf16.mxu0 %v9705_v41 }
  0xcd   : > { %8769 = vmatpush3.bf16.msra.mxu1 %v9704_v40  ;;  %v9753_v40 = vld [vmem:[%s10270_s11 + $0x7b0] sm:$0xff]  }
  0xce   : > { %8770 = vmatprep.subr.bf16.mxu1 %v9706_v43 }
  0xcf   : > { %8749 = vmatpush3.bf16.msra.mxu0 %v9707_v44  ;;  %v9754_v44 = vld [vmem:[%s10270_s11 + $0x768] sm:$0xff]  }
  0xd0   : > { %8750 = vmatprep.subr.bf16.mxu0 %v9709_v46  ;;  %v9755_v46 = vld [vmem:[%s10270_s11 + $0x7e8] sm:$0xff]  }
  0xd1   : > { %8771 = vmatpush3.bf16.msra.mxu1 %v9708_v45 }
  0xd2   : > { %8772 = vmatprep.subr.bf16.mxu1 %v9710_v47 }
  0xd3   : > { %8751 = vmatpush3.bf16.msra.mxu0 %v9711_v48 }
  0xd4   : > { %8780 = vmatprep.subr.bf16.mxu0 %v9714_v51  ;;  %v9757_v51 = vld [vmem:[%s10270_s11 + $0x7a8] sm:$0xff]  }
  0xd5   : > { %8773 = vmatpush3.bf16.msra.mxu1 %v9712_v49  ;;  %v9756_v49 = vld [vmem:[%s10270_s11 + $0x728] sm:$0xff]  }
  0xd6   : > { %6436 = vmatmul.mubr.bf16.vlgmr.msra.gmra.mxu0 %v1721_v50  ;;  %8802 = vmatprep.subr.bf16.mxu1 %v9715_v52 }
  0xd7   : > { %8781 = vmatpush3.bf16.msra.mxu0 %v9716_v53  ;;  %6515 = vmatprep.mubr.bf16.mxu0 %v1777_v24 }
  0xd8   : > { %6476 = vmatmul.mubr.bf16.vlgmr.msra.gmra.mxu1 %v1737_v55  ;;  %8782 = vmatprep.subr.bf16.mxu0 %v9718_v56  ;;  %v9759_v56 = vld [vmem:[%s10270_s11 + $0x7e0] sm:$0xff]  }
  0xd9   : > { %8803 = vmatpush3.bf16.msra.mxu1 %v9717_v54  ;;  %6555 = vmatprep.mubr.bf16.mxu1 %v1787_v27  ;;  %v9758_v54 = vld [vmem:[%s10270_s11 + $0x760] sm:$0xff]   ;;  %v9788_v27 = vld [vmem:[%s10270_s11 + $0x8e8] sm:$0xff]  }
  0xda   : > { %8804 = vmatprep.subr.bf16.mxu1 %v9719_v57 }
  0xdb   : > { %8783 = vmatpush3.bf16.msra.mxu0 %v9720_v58  ;;  %v9760_v58 = vld [vmem:[%s10270_s11 + $0x720] sm:$0xff]  }
  0xdc   : > { %8784 = vmatprep.subr.bf16.mxu0 %v9722_v60  ;;  %v9762_v60 = vld [vmem:[%s10270_s11 + $0x758] sm:$0xff]  }
  0xdd   : > { %8805 = vmatpush3.bf16.msra.mxu1 %v9721_v59  ;;  %v9761_v59 = vld [vmem:[%s10270_s11 + $0x7a0] sm:$0xff]  }
  0xde   : > { %8806 = vmatprep.subr.bf16.mxu1 %v9723_v61  ;;  %v9763_v61 = vld [vmem:[%s10270_s11 + $0x7d8] sm:$0xff]  }
  0xdf   : > { %8785 = vmatpush3.bf16.msra.mxu0 %v9724_v62  ;;  %v9764_v62 = vld [vmem:[%s10270_s11 + $0x718] sm:$0xff]  }
  0xe0   : > { %8786 = vmatprep.subr.bf16.mxu0 %v9726_v0  ;;  %v9766_v0 = vld [vmem:[%s10270_s11 + $0x750] sm:$0xff]  }
  0xe1   : > { %8807 = vmatpush3.bf16.msra.mxu1 %v9725_v63  ;;  %v9765_v63 = vld [vmem:[%s10270_s11 + $0x798] sm:$0xff]  }
  0xe2   : > { %8808 = vmatprep.subr.bf16.mxu1 %v9727_v1  ;;  %v9767_v1 = vld [vmem:[%s10270_s11 + $0x7d0] sm:$0xff]  }
  0xe3   : > { %8787 = vmatpush3.bf16.msra.mxu0 %v9728_v2  ;;  %v9768_v2 = vld [vmem:[%s10270_s11 + $0x710] sm:$0xff]  }
  0xe4   : > { %8788 = vmatprep.subr.bf16.mxu0 %v9730_v4  ;;  %v9770_v4 = vld [vmem:[%s10270_s11 + $0x748] sm:$0xff]  }
  0xe5   : > { %8809 = vmatpush3.bf16.msra.mxu1 %v9729_v3  ;;  %v9769_v3 = vld [vmem:[%s10270_s11 + $0x790] sm:$0xff]  }
  0xe6   : > { %8810 = vmatprep.subr.bf16.mxu1 %v9731_v5  ;;  %v9771_v5 = vld [vmem:[%s10270_s11 + $0x7c8] sm:$0xff]  }
  0xe7   : > { %8789 = vmatpush3.bf16.msra.mxu0 %v9732_v6  ;;  %v9772_v6 = vld [vmem:[%s10270_s11 + $0x708] sm:$0xff]  }
  0xe8   : > { %8790 = vmatprep.subr.bf16.mxu0 %v9734_v8  ;;  %v9774_v8 = vld [vmem:[%s10270_s11 + $0x740] sm:$0xff]  }
  0xe9   : > { %8811 = vmatpush3.bf16.msra.mxu1 %v9733_v7  ;;  %v9773_v7 = vld [vmem:[%s10270_s11 + $0x788] sm:$0xff]  }
  0xea   : > { %8812 = vmatprep.subr.bf16.mxu1 %v9735_v9  ;;  %v9775_v9 = vld [vmem:[%s10270_s11 + $0x7c0] sm:$0xff]  }
  0xeb   : > { %8791 = vmatpush3.bf16.msra.mxu0 %v9736_v10  ;;  %v9776_v10 = vld [vmem:[%s10270_s11 + $0x700] sm:$0xff]  }
  0xec   : > { %8792 = vmatprep.subr.bf16.mxu0 %v9738_v12  ;;  %v1770_v12 = vrot.slane %v10535_v21, %v10308_v42  ;;  %v9785_v21 = vld [vmem:[%s10270_s11 + $0x830] sm:$0xff]  }
  0xed   : > { %8813 = vmatpush3.bf16.msra.mxu1 %v9737_v11  ;;  %v9777_v11 = vld [vmem:[%s10270_s11 + $0x780] sm:$0xff]  }
  0xee   : > { %8814 = vmatprep.subr.bf16.mxu1 %v9739_v13  ;;  %v9779_v13 = vld [vmem:[%s10270_s11 + $0x878] sm:$0xff]   ;;  %v1786_v17 = vcombine.high %v1770_v12, %v1770_v12 }
  0xef   : > { %8793 = vmatpush3.bf16.msra.mxu0 %v9740_v15  ;;  %v9781_v15 = vld [vmem:[%s10270_s11 + $0x838] sm:$0xff]  }
  0xf0   : > { %8794 = vmatprep.subr.bf16.mxu0 %v9742_v19  ;;  %v9784_v19 = vld [vmem:[%s10270_s11 + $0x8f0] sm:$0xff]  }
  0xf1   : > { %8815 = vmatpush3.bf16.msra.mxu1 %v9741_v18  ;;  %v9783_v18 = vld [vmem:[%s10270_s11 + $0x870] sm:$0xff]  }
  0xf2   : > { %8816 = vmatprep.subr.bf16.mxu1 %v9743_v22  ;;  %v9786_v22 = vld [vmem:[%s10270_s11 + $0x8b0] sm:$0xff]  }
  0xf3   : > { %8795 = vmatpush3.bf16.msra.mxu0 %v9744_v23 }
  0xf4   : > { %8824 = vmatprep.subr.bf16.mxu0 %v9746_v29 }
  0xf5   : > { %8817 = vmatpush3.bf16.msra.mxu1 %v9745_v26 }
  0xf6   : > { %v8532_v38 = vpop.f32.mrf.mxu0  ;;  %6516 = vmatmul.mubr.bf16.vlgmr.msra.gmra.mxu0 %v1763_v28  ;;  %8846 = vmatprep.subr.bf16.mxu1 %v9747_v30  ;;  %v9789_v30 = vld [vmem:[%s10270_s11 + $0x828] sm:$0xff]  }
  0xf7   : > { %8825 = vmatpush3.bf16.msra.mxu0 %v9748_v32  ;;  %6595 = vmatprep.mubr.bf16.mxu0 %v1784_v31  ;;  %v8554_v41 = vpop.f32.mrf.mxu1 }
  0xf8   : > { %6556 = vmatmul.mubr.bf16.vlgmr.msra.gmra.mxu1 %v1785_v34  ;;  %v8533_v43 = vpop.f32.mrf.mxu0  ;;  %8826 = vmatprep.subr.bf16.mxu0 %v9750_v35 }
  0xf9   : > { %8847 = vmatpush3.bf16.msra.mxu1 %v9749_v33  ;;  %v8534_v45 = vadd.f32 %v8533_v43, %v8532_v38  ;;  %6635 = vmatprep.mubr.bf16.mxu1 %v1788_v37  ;;  %v8555_v47 = vpop.f32.mrf.mxu1  ;;  %v9790_v33 = vld [vmem:[%s10270_s11 + $0x8a8] sm:$0xff]   ;;  %v9792_v38 = vld [vmem:[%s10270_s11 + $0x8e0] sm:$0xff]   ;;  %v9795_v43 = vld [vmem:[%s10270_s11 + $0x858] sm:$0xff]  }
  0xfa   : > { %v8535_v48 = vpop.f32.mrf.mxu0  ;;  %8848 = vmatprep.subr.bf16.mxu1 %v9751_v36  ;;  %v8556_v50 = vadd.f32 %v8555_v47, %v8554_v41  ;;  %v9791_v36 = vld [vmem:[%s10270_s11 + $0x860] sm:$0xff]   ;;  %v9799_v47 = vld [vmem:[%s10270_s11 + $0x850] sm:$0xff]  }
  0xfb   : > { %8827 = vmatpush3.bf16.msra.mxu0 %v9752_v39  ;;  %v8557_v52 = vpop.f32.mrf.mxu1  ;;  %v9794_v41 = vld [vmem:[%s10270_s11 + $0x8a0] sm:$0xff]   ;;  %v9800_v48 = vld [vmem:[%s10270_s11 + $0x8d0] sm:$0xff]  }
  0xfc   : > { %v8536_v53 = vpop.f32.mrf.mxu0  ;;  %8828 = vmatprep.subr.bf16.mxu0 %v9754_v44  ;;  %v10558_v55 = vadd.f32 %v8556_v50, %v8534_v45  ;;  %v9796_v44 = vld [vmem:[%s10270_s11 + $0x8d8] sm:$0xff]   ;;  %v9802_v50 = vld [vmem:[%s10270_s11 + $0x890] sm:$0xff]   ;;  %v9804_v52 = vld [vmem:[%s10270_s11 + $0x8c8] sm:$0xff]  }
  0xfd   : > { %8849 = vmatpush3.bf16.msra.mxu1 %v9753_v40  ;;  %v8558_v57 = vpop.f32.mrf.mxu1  ;;  %v9793_v40 = vld [vmem:[%s10270_s11 + $0x820] sm:$0xff]   ;;  %v9797_v45 = vld [vmem:[%s10270_s11 + $0x818] sm:$0xff]  }
  0xfe   : > { %8850 = vmatprep.subr.bf16.mxu1 %v9755_v46  ;;  %v9798_v46 = vld [vmem:[%s10270_s11 + $0x898] sm:$0xff]   ;;  %v297_v53 = vld [vmem:[%s10265_s30 + $0x20] sm:$0xff]  ;;  %v9806_v57 = vld [vmem:[%s10270_s11 + $0x888] sm:$0xff]  }
  0xff   : > { %8829 = vmatpush3.bf16.msra.mxu0 %v9756_v49  ;;  %v9801_v49 = vld [vmem:[%s10270_s11 + $0x810] sm:$0xff]  }
 0x100   : > { %8830 = vmatprep.subr.bf16.mxu0 %v9758_v54  ;;  %v9805_v54 = vld [vmem:[%s10270_s11 + $0x808] sm:$0xff]  }
 0x101   : > { %8851 = vmatpush3.bf16.msra.mxu1 %v9757_v51  ;;  %v9803_v51 = vld [vmem:[%s10270_s11 + $0x848] sm:$0xff]  }
 0x102   : > { %8852 = vmatprep.subr.bf16.mxu1 %v9759_v56  ;;  %v1789_v56 = vcombine.high %v297_v53, %v297_v53 }
 0x103   : > { %8831 = vmatpush3.bf16.msra.mxu0 %v9760_v58  ;;  %v9807_v58 = vld [vmem:[%s10270_s11 + $0x840] sm:$0xff]  }
 0x104   : > { %8832 = vmatprep.subr.bf16.mxu0 %v9762_v60  ;;  %v10616_v60 = vrot.slane %v1789_v56, %v10308_v42  ;;  %v9847_v56 = vld [vmem:[%s10270_s11 + $0xab8] sm:$0xff]  }
 0x105   : > { %8853 = vmatpush3.bf16.msra.mxu1 %v9761_v59 }
 0x106   : > { %8854 = vmatprep.subr.bf16.mxu1 %v9763_v61  ;;  %v9808_v61 = vld [vmem:[%s10270_s11 + $0x8c0] sm:$0xff]  }
 0x107   : > { %8833 = vmatpush3.bf16.msra.mxu0 %v9764_v62  ;;  %v9809_v62 = vld [vmem:[%s10270_s11 + $0x800] sm:$0xff]  }
 0x108   : > { %8834 = vmatprep.subr.bf16.mxu0 %v9766_v0  ;;  %v1805_v0 = vcombine.high %v10616_v60, %v10616_v60 }
 0x109   : > { %8855 = vmatpush3.bf16.msra.mxu1 %v9765_v63 }
 0x10a   : > { %8856 = vmatprep.subr.bf16.mxu1 %v9767_v1  ;;  %v9810_v1 = vld [vmem:[%s10270_s11 + $0x880] sm:$0xff]  }
 0x10b   : > { %8835 = vmatpush3.bf16.msra.mxu0 %v9768_v2 }
 0x10c   : > { %8836 = vmatprep.subr.bf16.mxu0 %v9770_v4  ;;  %v9811_v4 = vld [vmem:[%s10270_s11 + $0x978] sm:$0xff]  }
 0x10d   : > { %8857 = vmatpush3.bf16.msra.mxu1 %v9769_v3 }
 0x10e   : > { %8858 = vmatprep.subr.bf16.mxu1 %v9771_v5  ;;  %v9812_v5 = vld [vmem:[%s10270_s11 + $0x9f8] sm:$0xff]  }
 0x10f   : > { %8837 = vmatpush3.bf16.msra.mxu0 %v9772_v6  ;;  %v1833_v6 = vrot.slane %v1805_v0, %v10308_v42 }
 0x110   : > { %8838 = vmatprep.subr.bf16.mxu0 %v9774_v8  ;;  %v9814_v8 = vld [vmem:[%s10270_s11 + $0x9b8] sm:$0xff]  }
 0x111   : > { %8859 = vmatpush3.bf16.msra.mxu1 %v9773_v7  ;;  %v9813_v7 = vld [vmem:[%s10270_s11 + $0x938] sm:$0xff]  }
 0x112   : > { %8860 = vmatprep.subr.bf16.mxu1 %v9775_v9 }
 0x113   : > { %8839 = vmatpush3.bf16.msra.mxu0 %v9776_v10  ;;  %v9815_v10 = vld [vmem:[%s10270_s11 + $0x970] sm:$0xff]  }
 0x114   : > { %8868 = vmatprep.subr.bf16.mxu0 %v9779_v13 }
 0x115   : > { %8861 = vmatpush3.bf16.msra.mxu1 %v9777_v11  ;;  %v9816_v11 = vld [vmem:[%s10270_s11 + $0x9f0] sm:$0xff]  }
 0x116   : > { %v8576_v20 = vpop.f32.mrf.mxu0  ;;  %6596 = vmatmul.mubr.bf16.vlgmr.msra.gmra.mxu0 %v1770_v12  ;;  %8890 = vmatprep.subr.bf16.mxu1 %v9780_v14  ;;  %v1837_v12 = vcombine.high %v1833_v6, %v1833_v6  ;;  %v9817_v14 = vld [vmem:[%s10270_s11 + $0x930] sm:$0xff]  }
 0x117   : > { %8869 = vmatpush3.bf16.msra.mxu0 %v9781_v15  ;;  %v8598_v23 = vpop.f32.mrf.mxu1  ;;  %v9818_v15 = vld [vmem:[%s10270_s11 + $0x9b0] sm:$0xff]  }
 0x118   : > { %6636 = vmatmul.mubr.bf16.vlgmr.msra.gmra.mxu1 %v1786_v17  ;;  %v8577_v24 = vpop.f32.mrf.mxu0  ;;  %8870 = vmatprep.subr.bf16.mxu0 %v9783_v18  ;;  %v9819_v18 = vld [vmem:[%s10270_s11 + $0x968] sm:$0xff]  }
 0x119   : > { %8891 = vmatpush3.bf16.msra.mxu1 %v9782_v16  ;;  %v8578_v26 = vadd.f32 %v8577_v24, %v8576_v20  ;;  %v8599_v28 = vpop.f32.mrf.mxu1  ;;  %v9820_v20 = vld [vmem:[%s10270_s11 + $0x9e8] sm:$0xff]  }
 0x11a   : > { %v8579_v29 = vpop.f32.mrf.mxu0  ;;  %8892 = vmatprep.subr.bf16.mxu1 %v9784_v19  ;;  %v8600_v32 = vadd.f32 %v8599_v28, %v8598_v23  ;;  %v9821_v23 = vld [vmem:[%s10270_s11 + $0x928] sm:$0xff]  }
 0x11b   : > { %v6118_v31 = vadd.f32 %v8578_v26, %v10558_v55  ;;  %8871 = vmatpush3.bf16.msra.mxu0 %v9785_v21  ;;  %v8601_v34 = vpop.f32.mrf.mxu1  ;;  %v1796_v55 = vrot.slane %v297_v53, %v10308_v42  ;;  %v9822_v26 = vld [vmem:[%s10270_s11 + $0x9a8] sm:$0xff]   ;;  %v9823_v29 = vld [vmem:[%s10270_s11 + $0x960] sm:$0xff]   ;;  %v9844_v53 = vld [vmem:[%s10270_s11 + $0xa78] sm:$0xff]  }
 0x11c   : > { %v8580_v35 = vpop.f32.mrf.mxu0  ;;  %8872 = vmatprep.subr.bf16.mxu0 %v9787_v25  ;;  %v9826_v34 = vld [vmem:[%s10270_s11 + $0x9a0] sm:$0xff]  }
 0x11d   : > { %v10595_v37 = vadd.f32 %v8600_v32, %v6118_v31  ;;  %8893 = vmatpush3.bf16.msra.mxu1 %v9786_v22  ;;  %v8602_v39 = vpop.f32.mrf.mxu1  ;;  %v1804_v59 = vcombine.high %v1796_v55, %v1796_v55  ;;  %v1812_v3 = vrot.slane %v1796_v55, %v10308_v42  ;;  %v9824_v31 = vld [vmem:[%s10270_s11 + $0x9e0] sm:$0xff]   ;;  %v9827_v35 = vld [vmem:[%s10270_s11 + $0x958] sm:$0xff]  }
 0x11e   : > { %8894 = vmatprep.subr.bf16.mxu1 %v9788_v27  ;;  %v9831_v39 = vld [vmem:[%s10270_s11 + $0x950] sm:$0xff]   ;;  %v9846_v55 = vld [vmem:[%s10270_s11 + $0xa38] sm:$0xff]  }
 0x11f   : > { %8873 = vmatpush3.bf16.msra.mxu0 %v9789_v30  ;;  %v1826_v63 = vrot.slane %v1804_v59, %v10308_v42  ;;  %v1834_v9 = vcombine.high %v1812_v3, %v1812_v3  ;;  %v9849_v59 = vld [vmem:[%s10270_s11 + $0xaf0] sm:$0xff]  }
 0x120   : > { %8874 = vmatprep.subr.bf16.mxu0 %v9791_v36  ;;  %v9828_v36 = vld [vmem:[%s10270_s11 + $0x9d8] sm:$0xff]  }
 0x121   : > { %8895 = vmatpush3.bf16.msra.mxu1 %v9790_v33  ;;  %6675 = vmatprep.mubr.bf16.mxu0 %v1826_v63  ;;  %v1836_v2 = vcombine.high %v1826_v63, %v1826_v63  ;;  %v9825_v33 = vld [vmem:[%s10270_s11 + $0x920] sm:$0xff]  }
 0x122   : > { %8896 = vmatprep.subr.bf16.mxu1 %v9792_v38  ;;  %v9830_v38 = vld [vmem:[%s10270_s11 + $0x998] sm:$0xff]  }
 0x123   : > { %8875 = vmatpush3.bf16.msra.mxu0 %v9793_v40  ;;  %6715 = vmatprep.mubr.bf16.mxu1 %v1836_v2  ;;  %v9832_v40 = vld [vmem:[%s10270_s11 + $0x9d0] sm:$0xff]  }
 0x124   : > { %8876 = vmatprep.subr.bf16.mxu0 %v9795_v43  ;;  %v9834_v43 = vld [vmem:[%s10270_s11 + $0x990] sm:$0xff]  }
 0x125   : > { %8897 = vmatpush3.bf16.msra.mxu1 %v9794_v41  ;;  %v9833_v41 = vld [vmem:[%s10270_s11 + $0x910] sm:$0xff]  }
 0x126   : > { %8898 = vmatprep.subr.bf16.mxu1 %v9796_v44  ;;  %v9835_v44 = vld [vmem:[%s10270_s11 + $0x948] sm:$0xff]  }
 0x127   : > { %8877 = vmatpush3.bf16.msra.mxu0 %v9797_v45  ;;  %v9836_v45 = vld [vmem:[%s10270_s11 + $0x9c8] sm:$0xff]  }
 0x128   : > { %8878 = vmatprep.subr.bf16.mxu0 %v9799_v47  ;;  %v9838_v47 = vld [vmem:[%s10270_s11 + $0x988] sm:$0xff]  }
 0x129   : > { %8899 = vmatpush3.bf16.msra.mxu1 %v9798_v46  ;;  %v9837_v46 = vld [vmem:[%s10270_s11 + $0x908] sm:$0xff]  }
 0x12a   : > { %8900 = vmatprep.subr.bf16.mxu1 %v9800_v48  ;;  %v9839_v48 = vld [vmem:[%s10270_s11 + $0x940] sm:$0xff]  }
 0x12b   : > { %8879 = vmatpush3.bf16.msra.mxu0 %v9801_v49  ;;  %v9840_v49 = vld [vmem:[%s10270_s11 + $0x9c0] sm:$0xff]  }
 0x12c   : > { %8880 = vmatprep.subr.bf16.mxu0 %v9803_v51  ;;  %v9842_v51 = vld [vmem:[%s10270_s11 + $0x980] sm:$0xff]  }
 0x12d   : > { %8901 = vmatpush3.bf16.msra.mxu1 %v9802_v50  ;;  %v9841_v50 = vld [vmem:[%s10270_s11 + $0x900] sm:$0xff]  }
 0x12e   : > { %8902 = vmatprep.subr.bf16.mxu1 %v9804_v52  ;;  %v1819_v52 = vrot.slane %v10616_v60, %v10308_v42  ;;  %v9850_v60 = vld [vmem:[%s10270_s11 + $0xa30] sm:$0xff]  }
 0x12f   : > { %8881 = vmatpush3.bf16.msra.mxu0 %v9805_v54  ;;  %v9845_v54 = vld [vmem:[%s10270_s11 + $0xaf8] sm:$0xff]  }
 0x130   : > { %8882 = vmatprep.subr.bf16.mxu0 %v9807_v58  ;;  %v9848_v58 = vld [vmem:[%s10270_s11 + $0xa70] sm:$0xff]  }
 0x131   : > { %8903 = vmatpush3.bf16.msra.mxu1 %v9806_v57  ;;  %v1835_v57 = vcombine.high %v1819_v52, %v1819_v52 }
 0x132   : > { %8904 = vmatprep.subr.bf16.mxu1 %v9808_v61 }
 0x133   : > { %8883 = vmatpush3.bf16.msra.mxu0 %v9809_v62  ;;  %v9851_v62 = vld [vmem:[%s10270_s11 + $0xab0] sm:$0xff]  }
 0x134   : > { %8912 = vmatprep.subr.bf16.mxu0 %v9811_v4 }
 0x135   : > { %8905 = vmatpush3.bf16.msra.mxu1 %v9810_v1  ;;  %v9852_v1 = vld [vmem:[%s10270_s11 + $0xa68] sm:$0xff]  }
 0x136   : > { %v8620_v13 = vpop.f32.mrf.mxu0  ;;  %6676 = vmatmul.mubr.bf16.vlgmr.msra.gmra.mxu0 %v1812_v3  ;;  %8934 = vmatprep.subr.bf16.mxu1 %v9812_v5  ;;  %v9853_v3 = vld [vmem:[%s10270_s11 + $0xae8] sm:$0xff]  }
 0x137   : > { %8913 = vmatpush3.bf16.msra.mxu0 %v9813_v7  ;;  %6755 = vmatprep.mubr.bf16.mxu0 %v1833_v6  ;;  %v9854_v6 = vld [vmem:[%s10270_s11 + $0xa28] sm:$0xff]  }
 0x138   : > { %v8642_v16 = vpop.f32.mrf.mxu1  ;;  %6716 = vmatmul.mubr.bf16.vlgmr.msra.gmra.mxu1 %v1834_v9  ;;  %v8621_v17 = vpop.f32.mrf.mxu0  ;;  %8914 = vmatprep.subr.bf16.mxu0 %v9815_v10  ;;  %v9855_v9 = vld [vmem:[%s10270_s11 + $0xaa8] sm:$0xff]  }
 0x139   : > { %8935 = vmatpush3.bf16.msra.mxu1 %v9814_v8  ;;  %v8622_v19 = vadd.f32 %v8621_v17, %v8620_v13  ;;  %6795 = vmatprep.mubr.bf16.mxu1 %v1837_v12  ;;  %v9856_v12 = vld [vmem:[%s10270_s11 + $0xa60] sm:$0xff]  }
 0x13a   : > { %v8643_v21 = vpop.f32.mrf.mxu1  ;;  %v8623_v22 = vpop.f32.mrf.mxu0  ;;  %8936 = vmatprep.subr.bf16.mxu1 %v9816_v11  ;;  %v9859_v17 = vld [vmem:[%s10270_s11 + $0xaa0] sm:$0xff]  }
 0x13b   : > { %v6198_v24 = vadd.f32 %v8622_v19, %v10595_v37  ;;  %v8644_v25 = vadd.f32 %v8643_v21, %v8642_v16  ;;  %8915 = vmatpush3.bf16.msra.mxu0 %v9817_v14  ;;  %v9829_v37 = vld [vmem:[%s10270_s11 + $0x918] sm:$0xff]   ;;  %v9857_v14 = vld [vmem:[%s10270_s11 + $0xae0] sm:$0xff]   ;;  %v9864_v22 = vld [vmem:[%s10270_s11 + $0xa50] sm:$0xff]  }
 0x13c   : > { %v8645_v27 = vpop.f32.mrf.mxu1  ;;  %v8624_v28 = vpop.f32.mrf.mxu0  ;;  %8916 = vmatprep.subr.bf16.mxu0 %v9819_v18  ;;  %v9858_v16 = vld [vmem:[%s10270_s11 + $0xa20] sm:$0xff]   ;;  %v9860_v18 = vld [vmem:[%s10270_s11 + $0xa58] sm:$0xff]  }
 0x13d   : > { %v10640_v30 = vadd.f32 %v8644_v25, %v6198_v24  ;;  %8937 = vmatpush3.bf16.msra.mxu1 %v9818_v15  ;;  %v9861_v19 = vld [vmem:[%s10270_s11 + $0xad8] sm:$0xff]   ;;  %v9866_v24 = vld [vmem:[%s10270_s11 + $0xa10] sm:$0xff]   ;;  %v9869_v27 = vld [vmem:[%s10270_s11 + $0xac8] sm:$0xff]  }
 0x13e   : > { %v8646_v32 = vpop.f32.mrf.mxu1  ;;  %8938 = vmatprep.subr.bf16.mxu1 %v9820_v20  ;;  %v9862_v20 = vld [vmem:[%s10270_s11 + $0xa18] sm:$0xff]   ;;  %v9867_v25 = vld [vmem:[%s10270_s11 + $0xa90] sm:$0xff]   ;;  %v298_v28 = vld [vmem:[%s10265_s30 + $0x28] sm:$0xff] }
 0x13f   : > { %8917 = vmatpush3.bf16.msra.mxu0 %v9821_v23  ;;  %v9863_v21 = vld [vmem:[%s10270_s11 + $0xa98] sm:$0xff]   ;;  %v9865_v23 = vld [vmem:[%s10270_s11 + $0xad0] sm:$0xff]   ;;  %v9871_v32 = vld [vmem:[%s10270_s11 + $0xa88] sm:$0xff]  }
 0x140   : > { %8918 = vmatprep.subr.bf16.mxu0 %v9823_v29  ;;  %v9870_v29 = vld [vmem:[%s10270_s11 + $0xa08] sm:$0xff]  }
 0x141   : > { %8939 = vmatpush3.bf16.msra.mxu1 %v9822_v26  ;;  %v9868_v26 = vld [vmem:[%s10270_s11 + $0xa48] sm:$0xff]  }
 0x142   : > { %8940 = vmatprep.subr.bf16.mxu1 %v9824_v31  ;;  %v1838_v31 = vcombine.high %v298_v28, %v298_v28 }
 0x143   : > { %8919 = vmatpush3.bf16.msra.mxu0 %v9825_v33  ;;  %v9872_v33 = vld [vmem:[%s10270_s11 + $0xa40] sm:$0xff]  }
 0x144   : > { %8920 = vmatprep.subr.bf16.mxu0 %v9827_v35  ;;  %v10698_v35 = vrot.slane %v1838_v31, %v10308_v42  ;;  %v9912_v31 = vld [vmem:[%s10270_s11 + $0xcb8] sm:$0xff]  }
 0x145   : > { %8941 = vmatpush3.bf16.msra.mxu1 %v9826_v34 }
 0x146   : > { %8942 = vmatprep.subr.bf16.mxu1 %v9828_v36  ;;  %v9873_v36 = vld [vmem:[%s10270_s11 + $0xac0] sm:$0xff]  }
 0x147   : > { %8921 = vmatpush3.bf16.msra.mxu0 %v9829_v37  ;;  %v9874_v37 = vld [vmem:[%s10270_s11 + $0xa00] sm:$0xff]  }
 0x148   : > { %8922 = vmatprep.subr.bf16.mxu0 %v9831_v39  ;;  %v1854_v39 = vcombine.high %v10698_v35, %v10698_v35 }
 0x149   : > { %8943 = vmatpush3.bf16.msra.mxu1 %v9830_v38 }
 0x14a   : > { %8944 = vmatprep.subr.bf16.mxu1 %v9832_v40  ;;  %v9875_v40 = vld [vmem:[%s10270_s11 + $0xa80] sm:$0xff]  }
 0x14b   : > { %8923 = vmatpush3.bf16.msra.mxu0 %v9833_v41 }
 0x14c   : > { %8924 = vmatprep.subr.bf16.mxu0 %v9835_v44  ;;  %v9876_v44 = vld [vmem:[%s10270_s11 + $0xb78] sm:$0xff]  }
 0x14d   : > { %8945 = vmatpush3.bf16.msra.mxu1 %v9834_v43 }
 0x14e   : > { %8946 = vmatprep.subr.bf16.mxu1 %v9836_v45  ;;  %v9877_v45 = vld [vmem:[%s10270_s11 + $0xbf8] sm:$0xff]  }
 0x14f   : > { %8925 = vmatpush3.bf16.msra.mxu0 %v9837_v46  ;;  %v1882_v46 = vrot.slane %v1854_v39, %v10308_v42 }
 0x150   : > { %8926 = vmatprep.subr.bf16.mxu0 %v9839_v48  ;;  %v9879_v48 = vld [vmem:[%s10270_s11 + $0xbb8] sm:$0xff]  }
 0x151   : > { %8947 = vmatpush3.bf16.msra.mxu1 %v9838_v47  ;;  %v9878_v47 = vld [vmem:[%s10270_s11 + $0xb38] sm:$0xff]  }
 0x152   : > { %8948 = vmatprep.subr.bf16.mxu1 %v9840_v49 }
 0x153   : > { %8927 = vmatpush3.bf16.msra.mxu0 %v9841_v50  ;;  %v9880_v50 = vld [vmem:[%s10270_s11 + $0xb70] sm:$0xff]  }
 0x154   : > { %8956 = vmatprep.subr.bf16.mxu0 %v9844_v53 }
 0x155   : > { %8949 = vmatpush3.bf16.msra.mxu1 %v9842_v51  ;;  %v9881_v51 = vld [vmem:[%s10270_s11 + $0xbf0] sm:$0xff]  }
 0x156   : > { %v8664_v61 = vpop.f32.mrf.mxu0  ;;  %6756 = vmatmul.mubr.bf16.vlgmr.msra.gmra.mxu0 %v1819_v52  ;;  %8978 = vmatprep.subr.bf16.mxu1 %v9845_v54  ;;  %v1886_v52 = vcombine.high %v1882_v46, %v1882_v46  ;;  %v9882_v54 = vld [vmem:[%s10270_s11 + $0xb30] sm:$0xff]  }
 0x157   : > { %8957 = vmatpush3.bf16.msra.mxu0 %v9846_v55  ;;  %v9883_v55 = vld [vmem:[%s10270_s11 + $0xbb0] sm:$0xff]  }
 0x158   : > { %v8686_v63 = vpop.f32.mrf.mxu1  ;;  %6796 = vmatmul.mubr.bf16.vlgmr.msra.gmra.mxu1 %v1835_v57  ;;  %v8665_v0 = vpop.f32.mrf.mxu0  ;;  %8958 = vmatprep.subr.bf16.mxu0 %v9848_v58  ;;  %v9884_v58 = vld [vmem:[%s10270_s11 + $0xb68] sm:$0xff]  }
 0x159   : > { %8979 = vmatpush3.bf16.msra.mxu1 %v9847_v56  ;;  %v8666_v2 = vadd.f32 %v8665_v0, %v8664_v61  ;;  %v9885_v61 = vld [vmem:[%s10270_s11 + $0xbe8] sm:$0xff]  }
 0x15a   : > { %v8687_v4 = vpop.f32.mrf.mxu1  ;;  %v8667_v5 = vpop.f32.mrf.mxu0  ;;  %8980 = vmatprep.subr.bf16.mxu1 %v9849_v59 }
 0x15b   : > { %v6278_v7 = vadd.f32 %v8666_v2, %v10640_v30  ;;  %v8688_v8 = vadd.f32 %v8687_v4, %v8686_v63  ;;  %8959 = vmatpush3.bf16.msra.mxu0 %v9850_v60  ;;  %v1845_v30 = vrot.slane %v298_v28, %v10308_v42  ;;  %v9886_v63 = vld [vmem:[%s10270_s11 + $0xb28] sm:$0xff]   ;;  %v9888_v5 = vld [vmem:[%s10270_s11 + $0xb60] sm:$0xff]   ;;  %v9909_v28 = vld [vmem:[%s10270_s11 + $0xc78] sm:$0xff]  }
 0x15c   : > { %v8689_v10 = vpop.f32.mrf.mxu1  ;;  %v8668_v11 = vpop.f32.mrf.mxu0  ;;  %8960 = vmatprep.subr.bf16.mxu0 %v9852_v1  ;;  %v9887_v2 = vld [vmem:[%s10270_s11 + $0xba8] sm:$0xff]  }
 0x15d   : > { %v10677_v13 = vadd.f32 %v8688_v8, %v6278_v7  ;;  %8981 = vmatpush3.bf16.msra.mxu1 %v9851_v62  ;;  %v1853_v34 = vcombine.high %v1845_v30, %v1845_v30  ;;  %v1861_v43 = vrot.slane %v1845_v30, %v10308_v42  ;;  %v9889_v7 = vld [vmem:[%s10270_s11 + $0xbe0] sm:$0xff]   ;;  %v9892_v11 = vld [vmem:[%s10270_s11 + $0xb58] sm:$0xff]  }
 0x15e   : > { %v8690_v15 = vpop.f32.mrf.mxu1  ;;  %8982 = vmatprep.subr.bf16.mxu1 %v9853_v3  ;;  %v9891_v10 = vld [vmem:[%s10270_s11 + $0xba0] sm:$0xff]   ;;  %v9911_v30 = vld [vmem:[%s10270_s11 + $0xc38] sm:$0xff]  }
 0x15f   : > { %8961 = vmatpush3.bf16.msra.mxu0 %v9854_v6  ;;  %v1875_v38 = vrot.slane %v1853_v34, %v10308_v42  ;;  %v1883_v49 = vcombine.high %v1861_v43, %v1861_v43  ;;  %v9896_v15 = vld [vmem:[%s10270_s11 + $0xb50] sm:$0xff]  }
 0x160   : > { %8962 = vmatprep.subr.bf16.mxu0 %v9856_v12  ;;  %v9893_v12 = vld [vmem:[%s10270_s11 + $0xbd8] sm:$0xff]   ;;  %v9914_v34 = vld [vmem:[%s10270_s11 + $0xcf0] sm:$0xff]  }
 0x161   : > { %8983 = vmatpush3.bf16.msra.mxu1 %v9855_v9  ;;  %6835 = vmatprep.mubr.bf16.mxu0 %v1875_v38  ;;  %v1885_v41 = vcombine.high %v1875_v38, %v1875_v38  ;;  %v9890_v9 = vld [vmem:[%s10270_s11 + $0xb20] sm:$0xff]  }
 0x162   : > { %8984 = vmatprep.subr.bf16.mxu1 %v9857_v14  ;;  %v9895_v14 = vld [vmem:[%s10270_s11 + $0xb98] sm:$0xff]  }
 0x163   : > { %8963 = vmatpush3.bf16.msra.mxu0 %v9858_v16  ;;  %6875 = vmatprep.mubr.bf16.mxu1 %v1885_v41  ;;  %v9897_v16 = vld [vmem:[%s10270_s11 + $0xbd0] sm:$0xff]  }
 0x164   : > { %8964 = vmatprep.subr.bf16.mxu0 %v9860_v18  ;;  %v9899_v18 = vld [vmem:[%s10270_s11 + $0xb90] sm:$0xff]  }
 0x165   : > { %8985 = vmatpush3.bf16.msra.mxu1 %v9859_v17  ;;  %v9898_v17 = vld [vmem:[%s10270_s11 + $0xb10] sm:$0xff]  }
 0x166   : > { %8986 = vmatprep.subr.bf16.mxu1 %v9861_v19  ;;  %v9900_v19 = vld [vmem:[%s10270_s11 + $0xb48] sm:$0xff]  }
 0x167   : > { %8965 = vmatpush3.bf16.msra.mxu0 %v9862_v20  ;;  %v9901_v20 = vld [vmem:[%s10270_s11 + $0xbc8] sm:$0xff]  }
 0x168   : > { %8966 = vmatprep.subr.bf16.mxu0 %v9864_v22  ;;  %v9903_v22 = vld [vmem:[%s10270_s11 + $0xb88] sm:$0xff]  }
 0x169   : > { %8987 = vmatpush3.bf16.msra.mxu1 %v9863_v21  ;;  %v9902_v21 = vld [vmem:[%s10270_s11 + $0xb08] sm:$0xff]  }
 0x16a   : > { %8988 = vmatprep.subr.bf16.mxu1 %v9865_v23  ;;  %v9904_v23 = vld [vmem:[%s10270_s11 + $0xb40] sm:$0xff]  }
 0x16b   : > { %8967 = vmatpush3.bf16.msra.mxu0 %v9866_v24  ;;  %v9905_v24 = vld [vmem:[%s10270_s11 + $0xbc0] sm:$0xff]  }
 0x16c   : > { %8968 = vmatprep.subr.bf16.mxu0 %v9868_v26  ;;  %v9907_v26 = vld [vmem:[%s10270_s11 + $0xb80] sm:$0xff]  }
 0x16d   : > { %8989 = vmatpush3.bf16.msra.mxu1 %v9867_v25  ;;  %v9906_v25 = vld [vmem:[%s10270_s11 + $0xb00] sm:$0xff]  }
 0x16e   : > { %8990 = vmatprep.subr.bf16.mxu1 %v9869_v27  ;;  %v1868_v27 = vrot.slane %v10698_v35, %v10308_v42  ;;  %v9915_v35 = vld [vmem:[%s10270_s11 + $0xc30] sm:$0xff]  }
 0x16f   : > { %8969 = vmatpush3.bf16.msra.mxu0 %v9870_v29  ;;  %v9910_v29 = vld [vmem:[%s10270_s11 + $0xcf8] sm:$0xff]  }
 0x170   : > { %8970 = vmatprep.subr.bf16.mxu0 %v9872_v33  ;;  %v9913_v33 = vld [vmem:[%s10270_s11 + $0xc70] sm:$0xff]  }
 0x171   : > { %8991 = vmatpush3.bf16.msra.mxu1 %v9871_v32  ;;  %v1884_v32 = vcombine.high %v1868_v27, %v1868_v27 }
 0x172   : > { %8992 = vmatprep.subr.bf16.mxu1 %v9873_v36 }
 0x173   : > { %8971 = vmatpush3.bf16.msra.mxu0 %v9874_v37  ;;  %v9916_v37 = vld [vmem:[%s10270_s11 + $0xcb0] sm:$0xff]  }
 0x174   : > { %9000 = vmatprep.subr.bf16.mxu0 %v9876_v44 }
 0x175   : > { %8993 = vmatpush3.bf16.msra.mxu1 %v9875_v40  ;;  %v9917_v40 = vld [vmem:[%s10270_s11 + $0xc68] sm:$0xff]  }
 0x176   : > { %v8708_v53 = vpop.f32.mrf.mxu0  ;;  %6836 = vmatmul.mubr.bf16.vlgmr.msra.gmra.mxu0 %v1861_v43  ;;  %9022 = vmatprep.subr.bf16.mxu1 %v9877_v45  ;;  %v9918_v43 = vld [vmem:[%s10270_s11 + $0xce8] sm:$0xff]  }
 0x177   : > { %9001 = vmatpush3.bf16.msra.mxu0 %v9878_v47  ;;  %6915 = vmatprep.mubr.bf16.mxu0 %v1882_v46  ;;  %v9919_v46 = vld [vmem:[%s10270_s11 + $0xc28] sm:$0xff]  }
 0x178   : > { %v8730_v56 = vpop.f32.mrf.mxu1  ;;  %6876 = vmatmul.mubr.bf16.vlgmr.msra.gmra.mxu1 %v1883_v49  ;;  %v8709_v57 = vpop.f32.mrf.mxu0  ;;  %9002 = vmatprep.subr.bf16.mxu0 %v9880_v50  ;;  %v9920_v49 = vld [vmem:[%s10270_s11 + $0xca8] sm:$0xff]  }
 0x179   : > { %9023 = vmatpush3.bf16.msra.mxu1 %v9879_v48  ;;  %v8710_v59 = vadd.f32 %v8709_v57, %v8708_v53  ;;  %6955 = vmatprep.mubr.bf16.mxu1 %v1886_v52  ;;  %v9921_v52 = vld [vmem:[%s10270_s11 + $0xc60] sm:$0xff]  }
 0x17a   : > { %v8731_v60 = vpop.f32.mrf.mxu1  ;;  %v8711_v62 = vpop.f32.mrf.mxu0  ;;  %9024 = vmatprep.subr.bf16.mxu1 %v9881_v51  ;;  %v9924_v57 = vld [vmem:[%s10270_s11 + $0xca0] sm:$0xff]  }
 0x17b   : > { %v6358_v0 = vadd.f32 %v8710_v59, %v10677_v13  ;;  %v8732_v1 = vadd.f32 %v8731_v60, %v8730_v56  ;;  %9003 = vmatpush3.bf16.msra.mxu0 %v9882_v54  ;;  %v9894_v13 = vld [vmem:[%s10270_s11 + $0xb18] sm:$0xff]   ;;  %v9922_v54 = vld [vmem:[%s10270_s11 + $0xce0] sm:$0xff]   ;;  %v9929_v62 = vld [vmem:[%s10270_s11 + $0xc50] sm:$0xff]  }
 0x17c   : > { %v8733_v3 = vpop.f32.mrf.mxu1  ;;  %v8712_v4 = vpop.f32.mrf.mxu0  ;;  %9004 = vmatprep.subr.bf16.mxu0 %v9884_v58  ;;  %v9923_v56 = vld [vmem:[%s10270_s11 + $0xc20] sm:$0xff]   ;;  %v9925_v58 = vld [vmem:[%s10270_s11 + $0xc58] sm:$0xff]  }
 0x17d   : > { %v10722_v6 = vadd.f32 %v8732_v1, %v6358_v0  ;;  %9025 = vmatpush3.bf16.msra.mxu1 %v9883_v55  ;;  %v9926_v59 = vld [vmem:[%s10270_s11 + $0xcd8] sm:$0xff]   ;;  %v9931_v0 = vld [vmem:[%s10270_s11 + $0xc10] sm:$0xff]   ;;  %v9934_v3 = vld [vmem:[%s10270_s11 + $0xcc8] sm:$0xff]  }
 0x17e   : > { %v8734_v8 = vpop.f32.mrf.mxu1  ;;  %9026 = vmatprep.subr.bf16.mxu1 %v9885_v61  ;;  %v9927_v61 = vld [vmem:[%s10270_s11 + $0xc18] sm:$0xff]   ;;  %v9932_v1 = vld [vmem:[%s10270_s11 + $0xc90] sm:$0xff]   ;;  %v9935_v4 = vld [vmem:[%s10270_s11 + $0xc08] sm:$0xff]  }
 0x17f   : > { %9005 = vmatpush3.bf16.msra.mxu0 %v9886_v63  ;;  %v9928_v60 = vld [vmem:[%s10270_s11 + $0xc98] sm:$0xff]   ;;  %v9930_v63 = vld [vmem:[%s10270_s11 + $0xcd0] sm:$0xff]  }
 0x180   : > { %9006 = vmatprep.subr.bf16.mxu0 %v9888_v5  ;;  %v299_v5 = vld [vmem:[%s10265_s30 + $0x30] sm:$0xff] }
 0x181   : > { %9027 = vmatpush3.bf16.msra.mxu1 %v9887_v2  ;;  %v9933_v2 = vld [vmem:[%s10270_s11 + $0xc48] sm:$0xff]   ;;  %v1887_v8 = vcombine.high %v299_v5, %v299_v5 }
 0x182   : > { %9028 = vmatprep.subr.bf16.mxu1 %v9889_v7  ;;  %v1894_v7 = vrot.slane %v299_v5, %v10308_v42  ;;  %v9975_v5 = vld [vmem:[%s10270_s11 + $0xef8] sm:$0xff]  }
 0x183   : > { %9007 = vmatpush3.bf16.msra.mxu0 %v9890_v9  ;;  %v9937_v9 = vld [vmem:[%s10270_s11 + $0xc40] sm:$0xff]  }
 0x184   : > { %9008 = vmatprep.subr.bf16.mxu0 %v9892_v11  ;;  %v1902_v11 = vcombine.high %v1894_v7, %v1894_v7 }
 0x185   : > { %9029 = vmatpush3.bf16.msra.mxu1 %v9891_v10  ;;  %v9938_v10 = vld [vmem:[%s10270_s11 + $0xcc0] sm:$0xff]  }
 0x186   : > { %9030 = vmatprep.subr.bf16.mxu1 %v9893_v12  ;;  %v10781_v12 = vrot.slane %v1887_v8, %v10308_v42 }
 0x187   : > { %9009 = vmatpush3.bf16.msra.mxu0 %v9894_v13  ;;  %v9939_v13 = vld [vmem:[%s10270_s11 + $0xc00] sm:$0xff]  }
 0x188   : > { %9010 = vmatprep.subr.bf16.mxu0 %v9896_v15  ;;  %v1924_v15 = vrot.slane %v1902_v11, %v10308_v42 }
 0x189   : > { %9031 = vmatpush3.bf16.msra.mxu1 %v9895_v14  ;;  %v9940_v14 = vld [vmem:[%s10270_s11 + $0xc80] sm:$0xff]  }
 0x18a   : > { %9032 = vmatprep.subr.bf16.mxu1 %v9897_v16  ;;  %v1903_v16 = vcombine.high %v10781_v12, %v10781_v12 }
 0x18b   : > { %9011 = vmatpush3.bf16.msra.mxu0 %v9898_v17  ;;  %v1910_v17 = vrot.slane %v1894_v7, %v10308_v42  ;;  %v9977_v7 = vld [vmem:[%s10270_s11 + $0xeb8] sm:$0xff]  }
 0x18c   : > { %9012 = vmatprep.subr.bf16.mxu0 %v9900_v19  ;;  %v1934_v19 = vcombine.high %v1924_v15, %v1924_v15 }
 0x18d   : > { %9033 = vmatpush3.bf16.msra.mxu1 %v9899_v18  ;;  %v9941_v18 = vld [vmem:[%s10270_s11 + $0xd78] sm:$0xff]  }
 0x18e   : > { %9034 = vmatprep.subr.bf16.mxu1 %v9901_v20  ;;  %v9942_v20 = vld [vmem:[%s10270_s11 + $0xdf8] sm:$0xff]  }
 0x18f   : > { %9013 = vmatpush3.bf16.msra.mxu0 %v9902_v21  ;;  %v1931_v21 = vrot.slane %v1903_v16, %v10308_v42  ;;  %v9982_v16 = vld [vmem:[%s10270_s11 + $0xe68] sm:$0xff]  }
 0x190   : > { %9014 = vmatprep.subr.bf16.mxu0 %v9904_v23  ;;  %v9944_v23 = vld [vmem:[%s10270_s11 + $0xdb8] sm:$0xff]  }
 0x191   : > { %9035 = vmatpush3.bf16.msra.mxu1 %v9903_v22  ;;  %v9943_v22 = vld [vmem:[%s10270_s11 + $0xd38] sm:$0xff]  }
 0x192   : > { %9036 = vmatprep.subr.bf16.mxu1 %v9905_v24  ;;  %v1932_v24 = vcombine.high %v1910_v17, %v1910_v17 }
 0x193   : > { %9015 = vmatpush3.bf16.msra.mxu0 %v9906_v25  ;;  %v9945_v25 = vld [vmem:[%s10270_s11 + $0xd70] sm:$0xff]  }
 0x194   : > { %9044 = vmatprep.subr.bf16.mxu0 %v9909_v28 }
 0x195   : > { %9037 = vmatpush3.bf16.msra.mxu1 %v9907_v26  ;;  %v9946_v26 = vld [vmem:[%s10270_s11 + $0xdf0] sm:$0xff]  }
 0x196   : > { %v8752_v36 = vpop.f32.mrf.mxu0  ;;  %6916 = vmatmul.mubr.bf16.vlgmr.msra.gmra.mxu0 %v1868_v27  ;;  %9066 = vmatprep.subr.bf16.mxu1 %v9910_v29  ;;  %v1935_v27 = vcombine.high %v1931_v21, %v1931_v21  ;;  %v9947_v29 = vld [vmem:[%s10270_s11 + $0xd30] sm:$0xff]  }
 0x197   : > { %9045 = vmatpush3.bf16.msra.mxu0 %v9911_v30  ;;  %6995 = vmatprep.mubr.bf16.mxu0 %v1924_v15  ;;  %v9948_v30 = vld [vmem:[%s10270_s11 + $0xdb0] sm:$0xff]  }
 0x198   : > { %v8774_v38 = vpop.f32.mrf.mxu1  ;;  %6956 = vmatmul.mubr.bf16.vlgmr.msra.gmra.mxu1 %v1884_v32  ;;  %v8753_v39 = vpop.f32.mrf.mxu0  ;;  %9046 = vmatprep.subr.bf16.mxu0 %v9913_v33  ;;  %v9949_v33 = vld [vmem:[%s10270_s11 + $0xd68] sm:$0xff]  }
 0x199   : > { %9067 = vmatpush3.bf16.msra.mxu1 %v9912_v31  ;;  %v8754_v41 = vadd.f32 %v8753_v39, %v8752_v36  ;;  %7035 = vmatprep.mubr.bf16.mxu1 %v1934_v19  ;;  %v9950_v36 = vld [vmem:[%s10270_s11 + $0xde8] sm:$0xff]  }
 0x19a   : > { %v8775_v44 = vpop.f32.mrf.mxu1  ;;  %v8755_v45 = vpop.f32.mrf.mxu0  ;;  %9068 = vmatprep.subr.bf16.mxu1 %v9914_v34 }
 0x19b   : > { %v6438_v47 = vadd.f32 %v8754_v41, %v10722_v6  ;;  %v8776_v48 = vadd.f32 %v8775_v44, %v8774_v38  ;;  %9047 = vmatpush3.bf16.msra.mxu0 %v9915_v35  ;;  %v9936_v6 = vld [vmem:[%s10270_s11 + $0xc88] sm:$0xff]   ;;  %v9953_v45 = vld [vmem:[%s10270_s11 + $0xd60] sm:$0xff]  }
 0x19c   : > { %v8777_v50 = vpop.f32.mrf.mxu1  ;;  %v8756_v51 = vpop.f32.mrf.mxu0  ;;  %9048 = vmatprep.subr.bf16.mxu0 %v9917_v40  ;;  %v9951_v38 = vld [vmem:[%s10270_s11 + $0xd28] sm:$0xff]  }
 0x19d   : > { %v10759_v53 = vadd.f32 %v8776_v48, %v6438_v47  ;;  %9069 = vmatpush3.bf16.msra.mxu1 %v9916_v37  ;;  %v9952_v41 = vld [vmem:[%s10270_s11 + $0xda8] sm:$0xff]   ;;  %v9954_v47 = vld [vmem:[%s10270_s11 + $0xde0] sm:$0xff]   ;;  %v9957_v51 = vld [vmem:[%s10270_s11 + $0xd58] sm:$0xff]  }
 0x19e   : > { %v8778_v55 = vpop.f32.mrf.mxu1  ;;  %9070 = vmatprep.subr.bf16.mxu1 %v9918_v43  ;;  %v9956_v50 = vld [vmem:[%s10270_s11 + $0xda0] sm:$0xff]  }
 0x19f   : > { %9049 = vmatpush3.bf16.msra.mxu0 %v9919_v46  ;;  %v9961_v55 = vld [vmem:[%s10270_s11 + $0xd50] sm:$0xff]  }
 0x1a0   : > { %9050 = vmatprep.subr.bf16.mxu0 %v9921_v52  ;;  %v9958_v52 = vld [vmem:[%s10270_s11 + $0xdd8] sm:$0xff]  }
 0x1a1   : > { %9071 = vmatpush3.bf16.msra.mxu1 %v9920_v49  ;;  %v9955_v49 = vld [vmem:[%s10270_s11 + $0xd20] sm:$0xff]  }
 0x1a2   : > { %9072 = vmatprep.subr.bf16.mxu1 %v9922_v54  ;;  %v9960_v54 = vld [vmem:[%s10270_s11 + $0xd98] sm:$0xff]  }
 0x1a3   : > { %9051 = vmatpush3.bf16.msra.mxu0 %v9923_v56  ;;  %v9962_v56 = vld [vmem:[%s10270_s11 + $0xdd0] sm:$0xff]  }
 0x1a4   : > { %9052 = vmatprep.subr.bf16.mxu0 %v9925_v58  ;;  %v9964_v58 = vld [vmem:[%s10270_s11 + $0xd90] sm:$0xff]  }
 0x1a5   : > { %9073 = vmatpush3.bf16.msra.mxu1 %v9924_v57  ;;  %v9963_v57 = vld [vmem:[%s10270_s11 + $0xd10] sm:$0xff]  }
 0x1a6   : > { %9074 = vmatprep.subr.bf16.mxu1 %v9926_v59  ;;  %v9965_v59 = vld [vmem:[%s10270_s11 + $0xd48] sm:$0xff]  }
 0x1a7   : > { %9053 = vmatpush3.bf16.msra.mxu0 %v9927_v61  ;;  %v9966_v61 = vld [vmem:[%s10270_s11 + $0xdc8] sm:$0xff]  }
 0x1a8   : > { %9054 = vmatprep.subr.bf16.mxu0 %v9929_v62  ;;  %v9968_v62 = vld [vmem:[%s10270_s11 + $0xd88] sm:$0xff]  }
 0x1a9   : > { %9075 = vmatpush3.bf16.msra.mxu1 %v9928_v60  ;;  %v9967_v60 = vld [vmem:[%s10270_s11 + $0xd08] sm:$0xff]  }
 0x1aa   : > { %9076 = vmatprep.subr.bf16.mxu1 %v9930_v63  ;;  %v9969_v63 = vld [vmem:[%s10270_s11 + $0xd40] sm:$0xff]  }
 0x1ab   : > { %9055 = vmatpush3.bf16.msra.mxu0 %v9931_v0  ;;  %v9970_v0 = vld [vmem:[%s10270_s11 + $0xdc0] sm:$0xff]  }
 0x1ac   : > { %9056 = vmatprep.subr.bf16.mxu0 %v9933_v2  ;;  %v9972_v2 = vld [vmem:[%s10270_s11 + $0xd80] sm:$0xff]  }
 0x1ad   : > { %9077 = vmatpush3.bf16.msra.mxu1 %v9932_v1  ;;  %v9971_v1 = vld [vmem:[%s10270_s11 + $0xd00] sm:$0xff]  }
 0x1ae   : > { %9078 = vmatprep.subr.bf16.mxu1 %v9934_v3  ;;  %v1917_v3 = vrot.slane %v10781_v12, %v10308_v42  ;;  %v9980_v12 = vld [vmem:[%s10270_s11 + $0xe30] sm:$0xff]  }
 0x1af   : > { %9057 = vmatpush3.bf16.msra.mxu0 %v9935_v4  ;;  %v9974_v4 = vld [vmem:[%s10270_s11 + $0xe78] sm:$0xff]  }
 0x1b0   : > { %9058 = vmatprep.subr.bf16.mxu0 %v9937_v9  ;;  %v1933_v8 = vcombine.high %v1917_v3, %v1917_v3  ;;  %v9978_v9 = vld [vmem:[%s10270_s11 + $0xe70] sm:$0xff]  }
 0x1b1   : > { %9079 = vmatpush3.bf16.msra.mxu1 %v9936_v6  ;;  %v9976_v6 = vld [vmem:[%s10270_s11 + $0xe38] sm:$0xff]  }
 0x1b2   : > { %9080 = vmatprep.subr.bf16.mxu1 %v9938_v10  ;;  %v9979_v10 = vld [vmem:[%s10270_s11 + $0xef0] sm:$0xff]  }
 0x1b3   : > { %9059 = vmatpush3.bf16.msra.mxu0 %v9939_v13  ;;  %v9981_v13 = vld [vmem:[%s10270_s11 + $0xeb0] sm:$0xff]  }
 0x1b4   : > { %9088 = vmatprep.subr.bf16.mxu0 %v9941_v18  ;;  %v9983_v18 = vld [vmem:[%s10270_s11 + $0xee8] sm:$0xff]  }
 0x1b5   : > { %9081 = vmatpush3.bf16.msra.mxu1 %v9940_v14 }
 0x1b6   : > { %v8796_v28 = vpop.f32.mrf.mxu0  ;;  %6996 = vmatmul.mubr.bf16.vlgmr.msra.gmra.mxu0 %v1910_v17  ;;  %9110 = vmatprep.subr.bf16.mxu1 %v9942_v20 }
 0x1b7   : > { %9089 = vmatpush3.bf16.msra.mxu0 %v9943_v22  ;;  %7075 = vmatprep.mubr.bf16.mxu0 %v1931_v21  ;;  %v9984_v21 = vld [vmem:[%s10270_s11 + $0xe28] sm:$0xff]  }
 0x1b8   : > { %v8818_v31 = vpop.f32.mrf.mxu1  ;;  %7036 = vmatmul.mubr.bf16.vlgmr.msra.gmra.mxu1 %v1932_v24  ;;  %v8797_v32 = vpop.f32.mrf.mxu0  ;;  %9090 = vmatprep.subr.bf16.mxu0 %v9945_v25  ;;  %v9985_v24 = vld [vmem:[%s10270_s11 + $0xea8] sm:$0xff]  }
 0x1b9   : > { %9111 = vmatpush3.bf16.msra.mxu1 %v9944_v23  ;;  %v8798_v34 = vadd.f32 %v8797_v32, %v8796_v28  ;;  %7115 = vmatprep.mubr.bf16.mxu1 %v1935_v27  ;;  %v9986_v27 = vld [vmem:[%s10270_s11 + $0xe60] sm:$0xff]  }
 0x1ba   : > { %v8819_v35 = vpop.f32.mrf.mxu1  ;;  %v8799_v37 = vpop.f32.mrf.mxu0  ;;  %9112 = vmatprep.subr.bf16.mxu1 %v9946_v26  ;;  %v9989_v32 = vld [vmem:[%s10270_s11 + $0xea0] sm:$0xff]  }
 0x1bb   : > { %v6518_v39 = vadd.f32 %v8798_v34, %v10759_v53  ;;  %v8820_v40 = vadd.f32 %v8819_v35, %v8818_v31  ;;  %9091 = vmatpush3.bf16.msra.mxu0 %v9947_v29  ;;  %v9959_v53 = vld [vmem:[%s10270_s11 + $0xd18] sm:$0xff]   ;;  %v9987_v29 = vld [vmem:[%s10270_s11 + $0xee0] sm:$0xff]   ;;  %v9994_v37 = vld [vmem:[%s10270_s11 + $0xe50] sm:$0xff]  }
 0x1bc   : > { %v8821_v43 = vpop.f32.mrf.mxu1  ;;  %v8800_v44 = vpop.f32.mrf.mxu0  ;;  %9092 = vmatprep.subr.bf16.mxu0 %v9949_v33  ;;  %v9988_v31 = vld [vmem:[%s10270_s11 + $0xe20] sm:$0xff]   ;;  %v9990_v33 = vld [vmem:[%s10270_s11 + $0xe58] sm:$0xff]  }
 0x1bd   : > { %v10804_v46 = vadd.f32 %v8820_v40, %v6518_v39  ;;  %9113 = vmatpush3.bf16.msra.mxu1 %v9948_v30  ;;  %v9991_v34 = vld [vmem:[%s10270_s11 + $0xed8] sm:$0xff]   ;;  %v9996_v39 = vld [vmem:[%s10270_s11 + $0xe10] sm:$0xff]   ;;  %v9999_v43 = vld [vmem:[%s10270_s11 + $0xec8] sm:$0xff]  }
 0x1be   : > { %v8822_v48 = vpop.f32.mrf.mxu1  ;;  %9114 = vmatprep.subr.bf16.mxu1 %v9950_v36  ;;  %v9992_v36 = vld [vmem:[%s10270_s11 + $0xe18] sm:$0xff]   ;;  %v9997_v40 = vld [vmem:[%s10270_s11 + $0xe90] sm:$0xff]   ;;  %v10000_v44 = vld [vmem:[%s10270_s11 + $0xe08] sm:$0xff]  }
 0x1bf   : > { %9093 = vmatpush3.bf16.msra.mxu0 %v9951_v38  ;;  %v9993_v35 = vld [vmem:[%s10270_s11 + $0xe98] sm:$0xff]   ;;  %v9995_v38 = vld [vmem:[%s10270_s11 + $0xed0] sm:$0xff]  }
 0x1c0   : > { %9094 = vmatprep.subr.bf16.mxu0 %v9953_v45  ;;  %v300_v45 = vld [vmem:[%s10265_s30 + $0x38] sm:$0xff] }
 0x1c1   : > { %9115 = vmatpush3.bf16.msra.mxu1 %v9952_v41  ;;  %v9998_v41 = vld [vmem:[%s10270_s11 + $0xe48] sm:$0xff]   ;;  %v1936_v48 = vcombine.high %v300_v45, %v300_v45 }
 0x1c2   : > { %9116 = vmatprep.subr.bf16.mxu1 %v9954_v47  ;;  %v1943_v47 = vrot.slane %v300_v45, %v10308_v42  ;;  %v10040_v45 = vld [vmem:[%s10270_s11 + $0x10f8] sm:$0xff]  }
 0x1c3   : > { %9095 = vmatpush3.bf16.msra.mxu0 %v9955_v49  ;;  %v10002_v49 = vld [vmem:[%s10270_s11 + $0xe40] sm:$0xff]  }
 0x1c4   : > { %9096 = vmatprep.subr.bf16.mxu0 %v9957_v51  ;;  %v1951_v51 = vcombine.high %v1943_v47, %v1943_v47 }
 0x1c5   : > { %9117 = vmatpush3.bf16.msra.mxu1 %v9956_v50  ;;  %v10003_v50 = vld [vmem:[%s10270_s11 + $0xec0] sm:$0xff]  }
 0x1c6   : > { %9118 = vmatprep.subr.bf16.mxu1 %v9958_v52  ;;  %v10863_v52 = vrot.slane %v1936_v48, %v10308_v42 }
 0x1c7   : > { %9097 = vmatpush3.bf16.msra.mxu0 %v9959_v53  ;;  %v10004_v53 = vld [vmem:[%s10270_s11 + $0xe00] sm:$0xff]  }
 0x1c8   : > { %9098 = vmatprep.subr.bf16.mxu0 %v9961_v55  ;;  %v1973_v55 = vrot.slane %v1951_v51, %v10308_v42 }
 0x1c9   : > { %9119 = vmatpush3.bf16.msra.mxu1 %v9960_v54  ;;  %v10005_v54 = vld [vmem:[%s10270_s11 + $0xe80] sm:$0xff]  }
 0x1ca   : > { %9120 = vmatprep.subr.bf16.mxu1 %v9962_v56  ;;  %v1952_v56 = vcombine.high %v10863_v52, %v10863_v52 }
 0x1cb   : > { %9099 = vmatpush3.bf16.msra.mxu0 %v9963_v57  ;;  %v1959_v57 = vrot.slane %v1943_v47, %v10308_v42  ;;  %v10042_v47 = vld [vmem:[%s10270_s11 + $0x10b8] sm:$0xff]  }
 0x1cc   : > { %9100 = vmatprep.subr.bf16.mxu0 %v9965_v59  ;;  %v1983_v59 = vcombine.high %v1973_v55, %v1973_v55 }
 0x1cd   : > { %9121 = vmatpush3.bf16.msra.mxu1 %v9964_v58  ;;  %v10006_v58 = vld [vmem:[%s10270_s11 + $0xf78] sm:$0xff]  }
 0x1ce   : > { %9122 = vmatprep.subr.bf16.mxu1 %v9966_v61  ;;  %v10007_v61 = vld [vmem:[%s10270_s11 + $0xff8] sm:$0xff]  }
 0x1cf   : > { %9101 = vmatpush3.bf16.msra.mxu0 %v9967_v60  ;;  %v1980_v60 = vrot.slane %v1952_v56, %v10308_v42  ;;  %v10047_v56 = vld [vmem:[%s10270_s11 + $0x1068] sm:$0xff]  }
 0x1d0   : > { %9102 = vmatprep.subr.bf16.mxu0 %v9969_v63  ;;  %v10009_v63 = vld [vmem:[%s10270_s11 + $0xfb8] sm:$0xff]  }
 0x1d1   : > { %9123 = vmatpush3.bf16.msra.mxu1 %v9968_v62  ;;  %v10008_v62 = vld [vmem:[%s10270_s11 + $0xf38] sm:$0xff]  }
 0x1d2   : > { %9124 = vmatprep.subr.bf16.mxu1 %v9970_v0  ;;  %v1981_v0 = vcombine.high %v1959_v57, %v1959_v57 }
 0x1d3   : > { %9103 = vmatpush3.bf16.msra.mxu0 %v9971_v1  ;;  %v10010_v1 = vld [vmem:[%s10270_s11 + $0xf70] sm:$0xff]  }
 0x1d4   : > { %9132 = vmatprep.subr.bf16.mxu0 %v9974_v4 }
 0x1d5   : > { %9125 = vmatpush3.bf16.msra.mxu1 %v9972_v2  ;;  %v10011_v2 = vld [vmem:[%s10270_s11 + $0xff0] sm:$0xff]  }
 0x1d6   : > { %v8840_v11 = vpop.f32.mrf.mxu0  ;;  %7076 = vmatmul.mubr.bf16.vlgmr.msra.gmra.mxu0 %v1917_v3  ;;  %9154 = vmatprep.subr.bf16.mxu1 %v9975_v5  ;;  %v1984_v3 = vcombine.high %v1980_v60, %v1980_v60  ;;  %v10012_v5 = vld [vmem:[%s10270_s11 + $0xf30] sm:$0xff]  }
 0x1d7   : > { %9133 = vmatpush3.bf16.msra.mxu0 %v9976_v6  ;;  %7155 = vmatprep.mubr.bf16.mxu0 %v1973_v55  ;;  %v10013_v6 = vld [vmem:[%s10270_s11 + $0xfb0] sm:$0xff]  }
 0x1d8   : > { %v8862_v14 = vpop.f32.mrf.mxu1  ;;  %7116 = vmatmul.mubr.bf16.vlgmr.msra.gmra.mxu1 %v1933_v8  ;;  %v8841_v15 = vpop.f32.mrf.mxu0  ;;  %9134 = vmatprep.subr.bf16.mxu0 %v9978_v9  ;;  %v10014_v9 = vld [vmem:[%s10270_s11 + $0xf68] sm:$0xff]  }
 0x1d9   : > { %9155 = vmatpush3.bf16.msra.mxu1 %v9977_v7  ;;  %v8842_v17 = vadd.f32 %v8841_v15, %v8840_v11  ;;  %7195 = vmatprep.mubr.bf16.mxu1 %v1983_v59  ;;  %v10015_v11 = vld [vmem:[%s10270_s11 + $0xfe8] sm:$0xff]  }
 0x1da   : > { %v8863_v19 = vpop.f32.mrf.mxu1  ;;  %v8843_v20 = vpop.f32.mrf.mxu0  ;;  %9156 = vmatprep.subr.bf16.mxu1 %v9979_v10 }
 0x1db   : > { %v6598_v22 = vadd.f32 %v8842_v17, %v10804_v46  ;;  %v8864_v23 = vadd.f32 %v8863_v19, %v8862_v14  ;;  %9135 = vmatpush3.bf16.msra.mxu0 %v9980_v12  ;;  %v10001_v46 = vld [vmem:[%s10270_s11 + $0xe88] sm:$0xff]   ;;  %v10018_v20 = vld [vmem:[%s10270_s11 + $0xf60] sm:$0xff]  }
 0x1dc   : > { %v8865_v25 = vpop.f32.mrf.mxu1  ;;  %v8844_v26 = vpop.f32.mrf.mxu0  ;;  %9136 = vmatprep.subr.bf16.mxu0 %v9982_v16  ;;  %v10016_v14 = vld [vmem:[%s10270_s11 + $0xf28] sm:$0xff]  }
 0x1dd   : > { %v10841_v28 = vadd.f32 %v8864_v23, %v6598_v22  ;;  %9157 = vmatpush3.bf16.msra.mxu1 %v9981_v13  ;;  %v10017_v17 = vld [vmem:[%s10270_s11 + $0xfa8] sm:$0xff]   ;;  %v10019_v22 = vld [vmem:[%s10270_s11 + $0xfe0] sm:$0xff]   ;;  %v10022_v26 = vld [vmem:[%s10270_s11 + $0xf58] sm:$0xff]  }
 0x1de   : > { %v8866_v30 = vpop.f32.mrf.mxu1  ;;  %9158 = vmatprep.subr.bf16.mxu1 %v9983_v18  ;;  %v10021_v25 = vld [vmem:[%s10270_s11 + $0xfa0] sm:$0xff]  }
 0x1df   : > { %9137 = vmatpush3.bf16.msra.mxu0 %v9984_v21  ;;  %v10026_v30 = vld [vmem:[%s10270_s11 + $0xf50] sm:$0xff]  }
 0x1e0   : > { %9138 = vmatprep.subr.bf16.mxu0 %v9986_v27  ;;  %v10023_v27 = vld [vmem:[%s10270_s11 + $0xfd8] sm:$0xff]  }
 0x1e1   : > { %9159 = vmatpush3.bf16.msra.mxu1 %v9985_v24  ;;  %v10020_v24 = vld [vmem:[%s10270_s11 + $0xf20] sm:$0xff]  }
 0x1e2   : > { %9160 = vmatprep.subr.bf16.mxu1 %v9987_v29  ;;  %v10025_v29 = vld [vmem:[%s10270_s11 + $0xf98] sm:$0xff]  }
 0x1e3   : > { %9139 = vmatpush3.bf16.msra.mxu0 %v9988_v31  ;;  %v10027_v31 = vld [vmem:[%s10270_s11 + $0xfd0] sm:$0xff]  }
 0x1e4   : > { %9140 = vmatprep.subr.bf16.mxu0 %v9990_v33  ;;  %v10029_v33 = vld [vmem:[%s10270_s11 + $0xf90] sm:$0xff]  }
 0x1e5   : > { %9161 = vmatpush3.bf16.msra.mxu1 %v9989_v32  ;;  %v10028_v32 = vld [vmem:[%s10270_s11 + $0xf10] sm:$0xff]  }
 0x1e6   : > { %9162 = vmatprep.subr.bf16.mxu1 %v9991_v34  ;;  %v10030_v34 = vld [vmem:[%s10270_s11 + $0xf48] sm:$0xff]  }
 0x1e7   : > { %9141 = vmatpush3.bf16.msra.mxu0 %v9992_v36  ;;  %v10031_v36 = vld [vmem:[%s10270_s11 + $0xfc8] sm:$0xff]  }
 0x1e8   : > { %9142 = vmatprep.subr.bf16.mxu0 %v9994_v37  ;;  %v10033_v37 = vld [vmem:[%s10270_s11 + $0xf88] sm:$0xff]  }
 0x1e9   : > { %9163 = vmatpush3.bf16.msra.mxu1 %v9993_v35  ;;  %v10032_v35 = vld [vmem:[%s10270_s11 + $0xf08] sm:$0xff]  }
 0x1ea   : > { %9164 = vmatprep.subr.bf16.mxu1 %v9995_v38  ;;  %v10034_v38 = vld [vmem:[%s10270_s11 + $0xf40] sm:$0xff]  }
 0x1eb   : > { %9143 = vmatpush3.bf16.msra.mxu0 %v9996_v39  ;;  %v10035_v39 = vld [vmem:[%s10270_s11 + $0xfc0] sm:$0xff]  }
 0x1ec   : > { %9144 = vmatprep.subr.bf16.mxu0 %v9998_v41  ;;  %v10037_v41 = vld [vmem:[%s10270_s11 + $0xf80] sm:$0xff]  }
 0x1ed   : > { %9165 = vmatpush3.bf16.msra.mxu1 %v9997_v40  ;;  %v10036_v40 = vld [vmem:[%s10270_s11 + $0xf00] sm:$0xff]  }
 0x1ee   : > { %9166 = vmatprep.subr.bf16.mxu1 %v9999_v43  ;;  %v1966_v43 = vrot.slane %v10863_v52, %v10308_v42  ;;  %v10045_v52 = vld [vmem:[%s10270_s11 + $0x1030] sm:$0xff]  }
 0x1ef   : > { %9145 = vmatpush3.bf16.msra.mxu0 %v10000_v44  ;;  %v10039_v44 = vld [vmem:[%s10270_s11 + $0x1078] sm:$0xff]  }
 0x1f0   : > { %9146 = vmatprep.subr.bf16.mxu0 %v10002_v49  ;;  %v1982_v48 = vcombine.high %v1966_v43, %v1966_v43  ;;  %v10043_v49 = vld [vmem:[%s10270_s11 + $0x1070] sm:$0xff]  }
 0x1f1   : > { %9167 = vmatpush3.bf16.msra.mxu1 %v10001_v46  ;;  %v10041_v46 = vld [vmem:[%s10270_s11 + $0x1038] sm:$0xff]  }
 0x1f2   : > { %9168 = vmatprep.subr.bf16.mxu1 %v10003_v50  ;;  %v10044_v50 = vld [vmem:[%s10270_s11 + $0x10f0] sm:$0xff]  }
 0x1f3   : > { %9147 = vmatpush3.bf16.msra.mxu0 %v10004_v53  ;;  %v10046_v53 = vld [vmem:[%s10270_s11 + $0x10b0] sm:$0xff]  }
 0x1f4   : > { %9176 = vmatprep.subr.bf16.mxu0 %v10006_v58  ;;  %v10048_v58 = vld [vmem:[%s10270_s11 + $0x10e8] sm:$0xff]  }
 0x1f5   : > { %9169 = vmatpush3.bf16.msra.mxu1 %v10005_v54 }
 0x1f6   : > { %v8884_v4 = vpop.f32.mrf.mxu0  ;;  %7156 = vmatmul.mubr.bf16.vlgmr.msra.gmra.mxu0 %v1959_v57  ;;  %9198 = vmatprep.subr.bf16.mxu1 %v10007_v61 }
 0x1f7   : > { %9177 = vmatpush3.bf16.msra.mxu0 %v10008_v62  ;;  %7235 = vmatprep.mubr.bf16.mxu0 %v1980_v60  ;;  %v10049_v60 = vld [vmem:[%s10270_s11 + $0x1028] sm:$0xff]  }
 0x1f8   : > { %v8906_v7 = vpop.f32.mrf.mxu1  ;;  %7196 = vmatmul.mubr.bf16.vlgmr.msra.gmra.mxu1 %v1981_v0  ;;  %v8885_v8 = vpop.f32.mrf.mxu0  ;;  %9178 = vmatprep.subr.bf16.mxu0 %v10010_v1  ;;  %v10050_v0 = vld [vmem:[%s10270_s11 + $0x10a8] sm:$0xff]  }
 0x1f9   : > { %9199 = vmatpush3.bf16.msra.mxu1 %v10009_v63  ;;  %v8886_v10 = vadd.f32 %v8885_v8, %v8884_v4  ;;  %7275 = vmatprep.mubr.bf16.mxu1 %v1984_v3  ;;  %v10051_v3 = vld [vmem:[%s10270_s11 + $0x1060] sm:$0xff]  }
 0x1fa   : > { %v8907_v12 = vpop.f32.mrf.mxu1  ;;  %v8887_v13 = vpop.f32.mrf.mxu0  ;;  %9200 = vmatprep.subr.bf16.mxu1 %v10011_v2  ;;  %v10054_v8 = vld [vmem:[%s10270_s11 + $0x10a0] sm:$0xff]  }
 0x1fb   : > { %v6678_v15 = vadd.f32 %v8886_v10, %v10841_v28  ;;  %v8908_v16 = vadd.f32 %v8907_v12, %v8906_v7  ;;  %9179 = vmatpush3.bf16.msra.mxu0 %v10012_v5  ;;  %v10024_v28 = vld [vmem:[%s10270_s11 + $0xf18] sm:$0xff]   ;;  %v10052_v5 = vld [vmem:[%s10270_s11 + $0x10e0] sm:$0xff]   ;;  %v10059_v13 = vld [vmem:[%s10270_s11 + $0x1050] sm:$0xff]  }
 0x1fc   : > { %v8909_v18 = vpop.f32.mrf.mxu1  ;;  %v8888_v19 = vpop.f32.mrf.mxu0  ;;  %9180 = vmatprep.subr.bf16.mxu0 %v10014_v9  ;;  %v10053_v7 = vld [vmem:[%s10270_s11 + $0x1020] sm:$0xff]   ;;  %v10055_v9 = vld [vmem:[%s10270_s11 + $0x1058] sm:$0xff]  }
 0x1fd   : > { %v10886_v21 = vadd.f32 %v8908_v16, %v6678_v15  ;;  %9201 = vmatpush3.bf16.msra.mxu1 %v10013_v6  ;;  %v10056_v10 = vld [vmem:[%s10270_s11 + $0x10d8] sm:$0xff]   ;;  %v10061_v15 = vld [vmem:[%s10270_s11 + $0x1010] sm:$0xff]   ;;  %v10064_v18 = vld [vmem:[%s10270_s11 + $0x10c8] sm:$0xff]  }
 0x1fe   : > { %v8910_v23 = vpop.f32.mrf.mxu1  ;;  %9202 = vmatprep.subr.bf16.mxu1 %v10015_v11  ;;  %v10057_v11 = vld [vmem:[%s10270_s11 + $0x1018] sm:$0xff]   ;;  %v10062_v16 = vld [vmem:[%s10270_s11 + $0x1090] sm:$0xff]   ;;  %v10065_v19 = vld [vmem:[%s10270_s11 + $0x1008] sm:$0xff]  }
 0x1ff   : > { %9181 = vmatpush3.bf16.msra.mxu0 %v10016_v14  ;;  %v10058_v12 = vld [vmem:[%s10270_s11 + $0x1098] sm:$0xff]   ;;  %v10060_v14 = vld [vmem:[%s10270_s11 + $0x10d0] sm:$0xff]  }
 0x200   : > { %9182 = vmatprep.subr.bf16.mxu0 %v10018_v20  ;;  %v301_v20 = vld [vmem:[%s10265_s30 + $0x40] sm:$0xff] }
 0x201   : > { %9203 = vmatpush3.bf16.msra.mxu1 %v10017_v17  ;;  %v10063_v17 = vld [vmem:[%s10270_s11 + $0x1048] sm:$0xff]   ;;  %v1985_v23 = vcombine.high %v301_v20, %v301_v20 }
 0x202   : > { %9204 = vmatprep.subr.bf16.mxu1 %v10019_v22  ;;  %v1992_v22 = vrot.slane %v301_v20, %v10308_v42  ;;  %v10105_v20 = vld [vmem:[%s10270_s11 + $0x12f8] sm:$0xff]  }
 0x203   : > { %9183 = vmatpush3.bf16.msra.mxu0 %v10020_v24  ;;  %v10067_v24 = vld [vmem:[%s10270_s11 + $0x1040] sm:$0xff]  }
 0x204   : > { %9184 = vmatprep.subr.bf16.mxu0 %v10022_v26  ;;  %v2000_v26 = vcombine.high %v1992_v22, %v1992_v22 }
 0x205   : > { %9205 = vmatpush3.bf16.msra.mxu1 %v10021_v25  ;;  %v10068_v25 = vld [vmem:[%s10270_s11 + $0x10c0] sm:$0xff]  }
 0x206   : > { %9206 = vmatprep.subr.bf16.mxu1 %v10023_v27  ;;  %v10945_v27 = vrot.slane %v1985_v23, %v10308_v42 }
 0x207   : > { %9185 = vmatpush3.bf16.msra.mxu0 %v10024_v28  ;;  %v10069_v28 = vld [vmem:[%s10270_s11 + $0x1000] sm:$0xff]  }
 0x208   : > { %9186 = vmatprep.subr.bf16.mxu0 %v10026_v30  ;;  %v2022_v30 = vrot.slane %v2000_v26, %v10308_v42 }
 0x209   : > { %9207 = vmatpush3.bf16.msra.mxu1 %v10025_v29  ;;  %v10070_v29 = vld [vmem:[%s10270_s11 + $0x1080] sm:$0xff]  }
 0x20a   : > { %9208 = vmatprep.subr.bf16.mxu1 %v10027_v31  ;;  %v2001_v31 = vcombine.high %v10945_v27, %v10945_v27 }
 0x20b   : > { %9187 = vmatpush3.bf16.msra.mxu0 %v10028_v32  ;;  %v2008_v32 = vrot.slane %v1992_v22, %v10308_v42  ;;  %v10107_v22 = vld [vmem:[%s10270_s11 + $0x12b8] sm:$0xff]  }
 0x20c   : > { %9188 = vmatprep.subr.bf16.mxu0 %v10030_v34  ;;  %v2032_v34 = vcombine.high %v2022_v30, %v2022_v30 }
 0x20d   : > { %9209 = vmatpush3.bf16.msra.mxu1 %v10029_v33  ;;  %v10071_v33 = vld [vmem:[%s10270_s11 + $0x1178] sm:$0xff]  }
 0x20e   : > { %9210 = vmatprep.subr.bf16.mxu1 %v10031_v36  ;;  %v10072_v36 = vld [vmem:[%s10270_s11 + $0x11f8] sm:$0xff]  }
 0x20f   : > { %9189 = vmatpush3.bf16.msra.mxu0 %v10032_v35  ;;  %v2029_v35 = vrot.slane %v2001_v31, %v10308_v42  ;;  %v10112_v31 = vld [vmem:[%s10270_s11 + $0x1268] sm:$0xff]  }
 0x210   : > { %9190 = vmatprep.subr.bf16.mxu0 %v10034_v38  ;;  %v10074_v38 = vld [vmem:[%s10270_s11 + $0x11b8] sm:$0xff]  }
 0x211   : > { %9211 = vmatpush3.bf16.msra.mxu1 %v10033_v37  ;;  %v10073_v37 = vld [vmem:[%s10270_s11 + $0x1138] sm:$0xff]  }
 0x212   : > { %9212 = vmatprep.subr.bf16.mxu1 %v10035_v39  ;;  %v2030_v39 = vcombine.high %v2008_v32, %v2008_v32 }
 0x213   : > { %9191 = vmatpush3.bf16.msra.mxu0 %v10036_v40  ;;  %v10075_v40 = vld [vmem:[%s10270_s11 + $0x1170] sm:$0xff]  }
 0x214   : > { %9220 = vmatprep.subr.bf16.mxu0 %v10039_v44 }
 0x215   : > { %9213 = vmatpush3.bf16.msra.mxu1 %v10037_v41  ;;  %v10076_v41 = vld [vmem:[%s10270_s11 + $0x11f0] sm:$0xff]  }
 0x216   : > { %v8928_v51 = vpop.f32.mrf.mxu0  ;;  %7236 = vmatmul.mubr.bf16.vlgmr.msra.gmra.mxu0 %v1966_v43  ;;  %9242 = vmatprep.subr.bf16.mxu1 %v10040_v45  ;;  %v2033_v43 = vcombine.high %v2029_v35, %v2029_v35  ;;  %v10077_v45 = vld [vmem:[%s10270_s11 + $0x1130] sm:$0xff]  }
 0x217   : > { %9221 = vmatpush3.bf16.msra.mxu0 %v10041_v46  ;;  %7315 = vmatprep.mubr.bf16.mxu0 %v2022_v30  ;;  %v10078_v46 = vld [vmem:[%s10270_s11 + $0x11b0] sm:$0xff]  }
 0x218   : > { %v8950_v54 = vpop.f32.mrf.mxu1  ;;  %7276 = vmatmul.mubr.bf16.vlgmr.msra.gmra.mxu1 %v1982_v48  ;;  %v8929_v55 = vpop.f32.mrf.mxu0  ;;  %9222 = vmatprep.subr.bf16.mxu0 %v10043_v49  ;;  %v10079_v49 = vld [vmem:[%s10270_s11 + $0x1168] sm:$0xff]  }
 0x219   : > { %9243 = vmatpush3.bf16.msra.mxu1 %v10042_v47  ;;  %v8930_v57 = vadd.f32 %v8929_v55, %v8928_v51  ;;  %7355 = vmatprep.mubr.bf16.mxu1 %v2032_v34  ;;  %v10080_v51 = vld [vmem:[%s10270_s11 + $0x11e8] sm:$0xff]  }
 0x21a   : > { %v8951_v59 = vpop.f32.mrf.mxu1  ;;  %v8931_v61 = vpop.f32.mrf.mxu0  ;;  %9244 = vmatprep.subr.bf16.mxu1 %v10044_v50 }
 0x21b   : > { %v6758_v62 = vadd.f32 %v8930_v57, %v10886_v21  ;;  %v8952_v63 = vadd.f32 %v8951_v59, %v8950_v54  ;;  %9223 = vmatpush3.bf16.msra.mxu0 %v10045_v52  ;;  %v10066_v21 = vld [vmem:[%s10270_s11 + $0x1088] sm:$0xff]   ;;  %v10083_v61 = vld [vmem:[%s10270_s11 + $0x1160] sm:$0xff]  }
 0x21c   : > { %v8953_v1 = vpop.f32.mrf.mxu1  ;;  %v8932_v2 = vpop.f32.mrf.mxu0  ;;  %9224 = vmatprep.subr.bf16.mxu0 %v10047_v56  ;;  %v10081_v54 = vld [vmem:[%s10270_s11 + $0x1128] sm:$0xff]  }
 0x21d   : > { %v10923_v4 = vadd.f32 %v8952_v63, %v6758_v62  ;;  %9245 = vmatpush3.bf16.msra.mxu1 %v10046_v53  ;;  %v10082_v57 = vld [vmem:[%s10270_s11 + $0x11a8] sm:$0xff]   ;;  %v10084_v62 = vld [vmem:[%s10270_s11 + $0x11e0] sm:$0xff]   ;;  %v10087_v2 = vld [vmem:[%s10270_s11 + $0x1158] sm:$0xff]  }
 0x21e   : > { %v8954_v6 = vpop.f32.mrf.mxu1  ;;  %9246 = vmatprep.subr.bf16.mxu1 %v10048_v58  ;;  %v10086_v1 = vld [vmem:[%s10270_s11 + $0x11a0] sm:$0xff]  }
 0x21f   : > { %9225 = vmatpush3.bf16.msra.mxu0 %v10049_v60  ;;  %v10091_v6 = vld [vmem:[%s10270_s11 + $0x1150] sm:$0xff]  }
 0x220   : > { %9226 = vmatprep.subr.bf16.mxu0 %v10051_v3  ;;  %v10088_v3 = vld [vmem:[%s10270_s11 + $0x11d8] sm:$0xff]  }
 0x221   : > { %9247 = vmatpush3.bf16.msra.mxu1 %v10050_v0  ;;  %v10085_v0 = vld [vmem:[%s10270_s11 + $0x1120] sm:$0xff]  }
 0x222   : > { %9248 = vmatprep.subr.bf16.mxu1 %v10052_v5  ;;  %v10090_v5 = vld [vmem:[%s10270_s11 + $0x1198] sm:$0xff]  }
 0x223   : > { %9227 = vmatpush3.bf16.msra.mxu0 %v10053_v7  ;;  %v10092_v7 = vld [vmem:[%s10270_s11 + $0x11d0] sm:$0xff]  }
 0x224   : > { %9228 = vmatprep.subr.bf16.mxu0 %v10055_v9  ;;  %v10094_v9 = vld [vmem:[%s10270_s11 + $0x1190] sm:$0xff]  }
 0x225   : > { %9249 = vmatpush3.bf16.msra.mxu1 %v10054_v8  ;;  %v10093_v8 = vld [vmem:[%s10270_s11 + $0x1110] sm:$0xff]  }
 0x226   : > { %9250 = vmatprep.subr.bf16.mxu1 %v10056_v10  ;;  %v10095_v10 = vld [vmem:[%s10270_s11 + $0x1148] sm:$0xff]  }
 0x227   : > { %9229 = vmatpush3.bf16.msra.mxu0 %v10057_v11  ;;  %v10096_v11 = vld [vmem:[%s10270_s11 + $0x11c8] sm:$0xff]  }
 0x228   : > { %9230 = vmatprep.subr.bf16.mxu0 %v10059_v13  ;;  %v10098_v13 = vld [vmem:[%s10270_s11 + $0x1188] sm:$0xff]  }
 0x229   : > { %9251 = vmatpush3.bf16.msra.mxu1 %v10058_v12  ;;  %v10097_v12 = vld [vmem:[%s10270_s11 + $0x1108] sm:$0xff]  }
 0x22a   : > { %9252 = vmatprep.subr.bf16.mxu1 %v10060_v14  ;;  %v10099_v14 = vld [vmem:[%s10270_s11 + $0x1140] sm:$0xff]  }
 0x22b   : > { %9231 = vmatpush3.bf16.msra.mxu0 %v10061_v15  ;;  %v10100_v15 = vld [vmem:[%s10270_s11 + $0x11c0] sm:$0xff]  }
 0x22c   : > { %9232 = vmatprep.subr.bf16.mxu0 %v10063_v17  ;;  %v10102_v17 = vld [vmem:[%s10270_s11 + $0x1180] sm:$0xff]  }
 0x22d   : > { %9253 = vmatpush3.bf16.msra.mxu1 %v10062_v16  ;;  %v10101_v16 = vld [vmem:[%s10270_s11 + $0x1100] sm:$0xff]  }
 0x22e   : > { %9254 = vmatprep.subr.bf16.mxu1 %v10064_v18  ;;  %v2015_v18 = vrot.slane %v10945_v27, %v10308_v42  ;;  %v10110_v27 = vld [vmem:[%s10270_s11 + $0x1230] sm:$0xff]  }
 0x22f   : > { %9233 = vmatpush3.bf16.msra.mxu0 %v10065_v19  ;;  %v10104_v19 = vld [vmem:[%s10270_s11 + $0x1278] sm:$0xff]  }
 0x230   : > { %9234 = vmatprep.subr.bf16.mxu0 %v10067_v24  ;;  %v2031_v23 = vcombine.high %v2015_v18, %v2015_v18  ;;  %v10108_v24 = vld [vmem:[%s10270_s11 + $0x1270] sm:$0xff]  }
 0x231   : > { %9255 = vmatpush3.bf16.msra.mxu1 %v10066_v21  ;;  %v10106_v21 = vld [vmem:[%s10270_s11 + $0x1238] sm:$0xff]  }
 0x232   : > { %9256 = vmatprep.subr.bf16.mxu1 %v10068_v25  ;;  %v10109_v25 = vld [vmem:[%s10270_s11 + $0x12f0] sm:$0xff]  }
 0x233   : > { %9235 = vmatpush3.bf16.msra.mxu0 %v10069_v28  ;;  %v10111_v28 = vld [vmem:[%s10270_s11 + $0x12b0] sm:$0xff]  }
 0x234   : > { %9264 = vmatprep.subr.bf16.mxu0 %v10071_v33  ;;  %v10113_v33 = vld [vmem:[%s10270_s11 + $0x12e8] sm:$0xff]  }
 0x235   : > { %9257 = vmatpush3.bf16.msra.mxu1 %v10070_v29 }
 0x236   : > { %v8972_v44 = vpop.f32.mrf.mxu0  ;;  %7316 = vmatmul.mubr.bf16.vlgmr.msra.gmra.mxu0 %v2008_v32  ;;  %9286 = vmatprep.subr.bf16.mxu1 %v10072_v36 }
 0x237   : > { %9265 = vmatpush3.bf16.msra.mxu0 %v10073_v37  ;;  %7395 = vmatprep.mubr.bf16.mxu0 %v2029_v35  ;;  %v10114_v35 = vld [vmem:[%s10270_s11 + $0x1228] sm:$0xff]  }
 0x238   : > { %v8994_v47 = vpop.f32.mrf.mxu1  ;;  %7356 = vmatmul.mubr.bf16.vlgmr.msra.gmra.mxu1 %v2030_v39  ;;  %v8973_v48 = vpop.f32.mrf.mxu0  ;;  %9266 = vmatprep.subr.bf16.mxu0 %v10075_v40  ;;  %v10115_v39 = vld [vmem:[%s10270_s11 + $0x12a8] sm:$0xff]  }
 0x239   : > { %9287 = vmatpush3.bf16.msra.mxu1 %v10074_v38  ;;  %v8974_v50 = vadd.f32 %v8973_v48, %v8972_v44  ;;  %7435 = vmatprep.mubr.bf16.mxu1 %v2033_v43  ;;  %v10116_v43 = vld [vmem:[%s10270_s11 + $0x1260] sm:$0xff]  }
 0x23a   : > { %v8995_v52 = vpop.f32.mrf.mxu1  ;;  %v8975_v53 = vpop.f32.mrf.mxu0  ;;  %9288 = vmatprep.subr.bf16.mxu1 %v10076_v41  ;;  %v10119_v48 = vld [vmem:[%s10270_s11 + $0x12a0] sm:$0xff]  }
 0x23b   : > { %v6838_v55 = vadd.f32 %v8974_v50, %v10923_v4  ;;  %v8996_v56 = vadd.f32 %v8995_v52, %v8994_v47  ;;  %9267 = vmatpush3.bf16.msra.mxu0 %v10077_v45  ;;  %v10089_v4 = vld [vmem:[%s10270_s11 + $0x1118] sm:$0xff]   ;;  %v10117_v45 = vld [vmem:[%s10270_s11 + $0x12e0] sm:$0xff]   ;;  %v10124_v53 = vld [vmem:[%s10270_s11 + $0x1250] sm:$0xff]  }
 0x23c   : > { %v8997_v58 = vpop.f32.mrf.mxu1  ;;  %v8976_v59 = vpop.f32.mrf.mxu0  ;;  %9268 = vmatprep.subr.bf16.mxu0 %v10079_v49  ;;  %v10118_v47 = vld [vmem:[%s10270_s11 + $0x1220] sm:$0xff]   ;;  %v10120_v49 = vld [vmem:[%s10270_s11 + $0x1258] sm:$0xff]  }
 0x23d   : > { %v10968_v60 = vadd.f32 %v8996_v56, %v6838_v55  ;;  %9289 = vmatpush3.bf16.msra.mxu1 %v10078_v46  ;;  %v10121_v50 = vld [vmem:[%s10270_s11 + $0x12d8] sm:$0xff]   ;;  %v10126_v55 = vld [vmem:[%s10270_s11 + $0x1210] sm:$0xff]   ;;  %v10129_v58 = vld [vmem:[%s10270_s11 + $0x12c8] sm:$0xff]  }
 0x23e   : > { %v8998_v63 = vpop.f32.mrf.mxu1  ;;  %9290 = vmatprep.subr.bf16.mxu1 %v10080_v51  ;;  %v10122_v51 = vld [vmem:[%s10270_s11 + $0x1218] sm:$0xff]   ;;  %v10127_v56 = vld [vmem:[%s10270_s11 + $0x1290] sm:$0xff]   ;;  %v10130_v59 = vld [vmem:[%s10270_s11 + $0x1208] sm:$0xff]  }
 0x23f   : > { %9269 = vmatpush3.bf16.msra.mxu0 %v10081_v54  ;;  %v10123_v52 = vld [vmem:[%s10270_s11 + $0x1298] sm:$0xff]   ;;  %v10125_v54 = vld [vmem:[%s10270_s11 + $0x12d0] sm:$0xff]  }
 0x240   : > { %9270 = vmatprep.subr.bf16.mxu0 %v10083_v61  ;;  %v302_v61 = vld [vmem:[%s10265_s30 + $0x48] sm:$0xff] }
 0x241   : > { %9291 = vmatpush3.bf16.msra.mxu1 %v10082_v57  ;;  %v10128_v57 = vld [vmem:[%s10270_s11 + $0x1248] sm:$0xff]   ;;  %v2034_v63 = vcombine.high %v302_v61, %v302_v61 }
 0x242   : > { %9292 = vmatprep.subr.bf16.mxu1 %v10084_v62  ;;  %v2041_v62 = vrot.slane %v302_v61, %v10308_v42 }
 0x243   : > { %9271 = vmatpush3.bf16.msra.mxu0 %v10085_v0  ;;  %v10131_v0 = vld [vmem:[%s10270_s11 + $0x1288] sm:$0xff]  }
 0x244   : > { %9272 = vmatprep.subr.bf16.mxu0 %v10087_v2  ;;  %v2049_v2 = vcombine.high %v2041_v62, %v2041_v62 }
 0x245   : > { %9293 = vmatpush3.bf16.msra.mxu1 %v10086_v1  ;;  %v10133_v1 = vld [vmem:[%s10270_s11 + $0x12c0] sm:$0xff]  }
 0x246   : > { %9294 = vmatprep.subr.bf16.mxu1 %v10088_v3  ;;  %v11027_v3 = vrot.slane %v2034_v63, %v10308_v42 }
 0x247   : > { %9273 = vmatpush3.bf16.msra.mxu0 %v10089_v4  ;;  %v10134_v4 = vld [vmem:[%s10270_s11 + $0x1200] sm:$0xff]  }
 0x248   : > { %9274 = vmatprep.subr.bf16.mxu0 %v10091_v6  ;;  %v2057_v6 = vrot.slane %v2041_v62, %v10308_v42 }
 0x249   : > { %9295 = vmatpush3.bf16.msra.mxu1 %v10090_v5  ;;  %v2071_v5 = vrot.slane %v2049_v2, %v10308_v42 }
 0x24a   : > { %9296 = vmatprep.subr.bf16.mxu1 %v10092_v7  ;;  %v10136_v7 = vld [vmem:[%s10270_s11 + $0x1378] sm:$0xff]  }
 0x24b   : > { %9275 = vmatpush3.bf16.msra.mxu0 %v10093_v8  ;;  %v2050_v8 = vcombine.high %v11027_v3, %v11027_v3 }
 0x24c   : > { %9276 = vmatprep.subr.bf16.mxu0 %v10095_v10  ;;  %v2081_v10 = vcombine.high %v2071_v5, %v2071_v5 }
 0x24d   : > { %9297 = vmatpush3.bf16.msra.mxu1 %v10094_v9  ;;  %v10135_v9 = vld [vmem:[%s10270_s11 + $0x1280] sm:$0xff]  }
 0x24e   : > { %9298 = vmatprep.subr.bf16.mxu1 %v10096_v11  ;;  %v10137_v11 = vld [vmem:[%s10270_s11 + $0x13f8] sm:$0xff]  }
 0x24f   : > { %9277 = vmatpush3.bf16.msra.mxu0 %v10097_v12  ;;  %v2078_v12 = vrot.slane %v2050_v8, %v10308_v42 }
 0x250   : > { %9278 = vmatprep.subr.bf16.mxu0 %v10099_v14  ;;  %v2079_v14 = vcombine.high %v2057_v6, %v2057_v6 }
 0x251   : > { %9299 = vmatpush3.bf16.msra.mxu1 %v10098_v13  ;;  %v10138_v13 = vld [vmem:[%s10270_s11 + $0x1338] sm:$0xff]  }
 0x252   : > { %9300 = vmatprep.subr.bf16.mxu1 %v10100_v15  ;;  %v10140_v15 = vld [vmem:[%s10270_s11 + $0x1370] sm:$0xff]  }
 0x253   : > { %9279 = vmatpush3.bf16.msra.mxu0 %v10101_v16  ;;  %v10139_v16 = vld [vmem:[%s10270_s11 + $0x13b8] sm:$0xff]  }
 0x254   : > { %9308 = vmatprep.subr.bf16.mxu0 %v10104_v19  ;;  %v10141_v19 = vld [vmem:[%s10270_s11 + $0x13f0] sm:$0xff]  }
 0x255   : > { %9301 = vmatpush3.bf16.msra.mxu1 %v10102_v17  ;;  %v2082_v17 = vcombine.high %v2078_v12, %v2078_v12 }
 0x256   : > { %v9016_v26 = vpop.f32.mrf.mxu0  ;;  %7396 = vmatmul.mubr.bf16.vlgmr.msra.gmra.mxu0 %v2015_v18  ;;  %9330 = vmatprep.subr.bf16.mxu1 %v10105_v20  ;;  %v10142_v20 = vld [vmem:[%s10270_s11 + $0x1330] sm:$0xff]  }
 0x257   : > { %9309 = vmatpush3.bf16.msra.mxu0 %v10106_v21  ;;  %7475 = vmatprep.mubr.bf16.mxu0 %v2071_v5 }
 0x258   : > { %v9038_v29 = vpop.f32.mrf.mxu1  ;;  %7436 = vmatmul.mubr.bf16.vlgmr.msra.gmra.mxu1 %v2031_v23  ;;  %v9017_v30 = vpop.f32.mrf.mxu0  ;;  %9310 = vmatprep.subr.bf16.mxu0 %v10108_v24  ;;  %v10144_v23 = vld [vmem:[%s10270_s11 + $0x1368] sm:$0xff]  }
 0x259   : > { %9331 = vmatpush3.bf16.msra.mxu1 %v10107_v22  ;;  %v9018_v32 = vadd.f32 %v9017_v30, %v9016_v26  ;;  %7515 = vmatprep.mubr.bf16.mxu1 %v2081_v10 }
 0x25a   : > { %v9039_v34 = vpop.f32.mrf.mxu1  ;;  %v9019_v36 = vpop.f32.mrf.mxu0  ;;  %9332 = vmatprep.subr.bf16.mxu1 %v10109_v25  ;;  %v10143_v25 = vld [vmem:[%s10270_s11 + $0x13b0] sm:$0xff]  }
 0x25b   : > { %v6918_v37 = vadd.f32 %v9018_v32, %v10968_v60  ;;  %v9040_v38 = vadd.f32 %v9039_v34, %v9038_v29  ;;  %9311 = vmatpush3.bf16.msra.mxu0 %v10110_v27  ;;  %v10132_v60 = vld [vmem:[%s10270_s11 + $0x1240] sm:$0xff]  }
 0x25c   : > { %v9041_v40 = vpop.f32.mrf.mxu1  ;;  %v9020_v41 = vpop.f32.mrf.mxu0  ;;  %9312 = vmatprep.subr.bf16.mxu0 %v10112_v31  ;;  %v10146_v31 = vld [vmem:[%s10270_s11 + $0x1328] sm:$0xff]   ;;  %v10148_v34 = vld [vmem:[%s10270_s11 + $0x1360] sm:$0xff]  }
 0x25d   : > { %v11005_v44 = vadd.f32 %v9040_v38, %v6918_v37  ;;  %9333 = vmatpush3.bf16.msra.mxu1 %v10111_v28  ;;  %v10145_v28 = vld [vmem:[%s10270_s11 + $0x13e8] sm:$0xff]   ;;  %v10149_v38 = vld [vmem:[%s10270_s11 + $0x13e0] sm:$0xff]   ;;  %v10152_v40 = vld [vmem:[%s10270_s11 + $0x1358] sm:$0xff]  }
 0x25e   : > { %v9042_v46 = vpop.f32.mrf.mxu1  ;;  %9334 = vmatprep.subr.bf16.mxu1 %v10113_v33  ;;  %v10151_v41 = vld [vmem:[%s10270_s11 + $0x13a0] sm:$0xff]  }
 0x25f   : > { %9313 = vmatpush3.bf16.msra.mxu0 %v10114_v35  ;;  %v10147_v35 = vld [vmem:[%s10270_s11 + $0x13a8] sm:$0xff]   ;;  %v10155_v46 = vld [vmem:[%s10270_s11 + $0x1398] sm:$0xff]  }
 0x260   : > { %9314 = vmatprep.subr.bf16.mxu0 %v10116_v43  ;;  %v10153_v43 = vld [vmem:[%s10270_s11 + $0x13d8] sm:$0xff]  }
 0x261   : > { %9335 = vmatpush3.bf16.msra.mxu1 %v10115_v39  ;;  %v10150_v39 = vld [vmem:[%s10270_s11 + $0x1320] sm:$0xff]  }
 0x262   : > { %9336 = vmatprep.subr.bf16.mxu1 %v10117_v45  ;;  %v10156_v45 = vld [vmem:[%s10270_s11 + $0x1350] sm:$0xff]  }
 0x263   : > { %9315 = vmatpush3.bf16.msra.mxu0 %v10118_v47  ;;  %v10157_v47 = vld [vmem:[%s10270_s11 + $0x13d0] sm:$0xff]  }
 0x264   : > { %9316 = vmatprep.subr.bf16.mxu0 %v10120_v49  ;;  %v10160_v49 = vld [vmem:[%s10270_s11 + $0x1348] sm:$0xff]  }
 0x265   : > { %9337 = vmatpush3.bf16.msra.mxu1 %v10119_v48  ;;  %v10158_v48 = vld [vmem:[%s10270_s11 + $0x1310] sm:$0xff]  }
 0x266   : > { %9338 = vmatprep.subr.bf16.mxu1 %v10121_v50  ;;  %v10159_v50 = vld [vmem:[%s10270_s11 + $0x1390] sm:$0xff]  }
 0x267   : > { %9317 = vmatpush3.bf16.msra.mxu0 %v10122_v51  ;;  %v10161_v51 = vld [vmem:[%s10270_s11 + $0x13c8] sm:$0xff]  }
 0x268   : > { %9318 = vmatprep.subr.bf16.mxu0 %v10124_v53  ;;  %v10164_v53 = vld [vmem:[%s10270_s11 + $0x1340] sm:$0xff]  }
 0x269   : > { %9339 = vmatpush3.bf16.msra.mxu1 %v10123_v52  ;;  %v10162_v52 = vld [vmem:[%s10270_s11 + $0x1308] sm:$0xff]  }
 0x26a   : > { %9340 = vmatprep.subr.bf16.mxu1 %v10125_v54  ;;  %v10163_v54 = vld [vmem:[%s10270_s11 + $0x1388] sm:$0xff]  }
 0x26b   : > { %9319 = vmatpush3.bf16.msra.mxu0 %v10126_v55  ;;  %v10165_v55 = vld [vmem:[%s10270_s11 + $0x13c0] sm:$0xff]  }
 0x26c   : > { %9320 = vmatprep.subr.bf16.mxu0 %v10128_v57  ;;  %v2064_v57 = vrot.slane %v11027_v3, %v10308_v42 }
 0x26d   : > { %9341 = vmatpush3.bf16.msra.mxu1 %v10127_v56  ;;  %v10166_v56 = vld [vmem:[%s10270_s11 + $0x1300] sm:$0xff]  }
 0x26e   : > { %9342 = vmatprep.subr.bf16.mxu1 %v10129_v58  ;;  %v10167_v58 = vld [vmem:[%s10270_s11 + $0x1380] sm:$0xff]  }
 0x26f   : > { %9321 = vmatpush3.bf16.msra.mxu0 %v10130_v59  ;;  %v2080_v59 = vcombine.high %v2064_v57, %v2064_v57 }
 0x270   : > { %9322 = vmatprep.subr.bf16.mxu0 %v10132_v60 }
 0x271   : > { %9343 = vmatpush3.bf16.msra.mxu1 %v10131_v0 }
 0x272   : > { %9344 = vmatprep.subr.bf16.mxu1 %v10133_v1 }
 0x273   : > { %9323 = vmatpush3.bf16.msra.mxu0 %v10134_v4 }
 0x274   : > { %9352 = vmatprep.subr.bf16.mxu0 %v10136_v7 }
 0x275   : > { %9345 = vmatpush3.bf16.msra.mxu1 %v10135_v9 }
 0x276   : > { %v9060_v18 = vpop.f32.mrf.mxu0  ;;  %7476 = vmatmul.mubr.bf16.vlgmr.msra.gmra.mxu0 %v2057_v6  ;;  %9374 = vmatprep.subr.bf16.mxu1 %v10137_v11 }
 0x277   : > { %9353 = vmatpush3.bf16.msra.mxu0 %v10138_v13  ;;  %7555 = vmatprep.mubr.bf16.mxu0 %v2078_v12 }
 0x278   : > { %v9082_v21 = vpop.f32.mrf.mxu1  ;;  %7516 = vmatmul.mubr.bf16.vlgmr.msra.gmra.mxu1 %v2079_v14  ;;  %v9061_v22 = vpop.f32.mrf.mxu0  ;;  %9354 = vmatprep.subr.bf16.mxu0 %v10140_v15 }
 0x279   : > { %9375 = vmatpush3.bf16.msra.mxu1 %v10139_v16  ;;  %v9062_v24 = vadd.f32 %v9061_v22, %v9060_v18  ;;  %7595 = vmatprep.mubr.bf16.mxu1 %v2082_v17 }
 0x27a   : > { %v9083_v26 = vpop.f32.mrf.mxu1  ;;  %v9063_v27 = vpop.f32.mrf.mxu0  ;;  %9376 = vmatprep.subr.bf16.mxu1 %v10141_v19 }
 0x27b   : > { %v6998_v29 = vadd.f32 %v9062_v24, %v11005_v44  ;;  %v9084_v30 = vadd.f32 %v9083_v26, %v9082_v21  ;;  %9355 = vmatpush3.bf16.msra.mxu0 %v10142_v20  ;;  %v10154_v44 = vld [vmem:[%s10270_s11 + $0x1318] sm:$0xff]  }
 0x27c   : > { %v9085_v32 = vpop.f32.mrf.mxu1  ;;  %v9064_v33 = vpop.f32.mrf.mxu0  ;;  %9356 = vmatprep.subr.bf16.mxu0 %v10144_v23 }
 0x27d   : > { %v7038_v36 = vadd.f32 %v9084_v30, %v6998_v29  ;;  %9377 = vmatpush3.bf16.msra.mxu1 %v10143_v25 }
 0x27e   : > { %v9086_v37 = vpop.f32.mrf.mxu1  ;;  %9378 = vmatprep.subr.bf16.mxu1 %v10145_v28 }
 0x27f   : > { %9357 = vmatpush3.bf16.msra.mxu0 %v10146_v31 }
 0x280   : > { %9358 = vmatprep.subr.bf16.mxu0 %v10148_v34 }
 0x281   : > { %9379 = vmatpush3.bf16.msra.mxu1 %v10147_v35 }
 0x282   : > { %9380 = vmatprep.subr.bf16.mxu1 %v10149_v38 }
 0x283   : > { %9359 = vmatpush3.bf16.msra.mxu0 %v10150_v39 }
 0x284   : > { %9360 = vmatprep.subr.bf16.mxu0 %v10152_v40 }
 0x285   : > { %9381 = vmatpush3.bf16.msra.mxu1 %v10151_v41 }
 0x286   : > { %9382 = vmatprep.subr.bf16.mxu1 %v10153_v43 }
 0x287   : > { %9361 = vmatpush3.bf16.msra.mxu0 %v10154_v44 }
 0x288   : > { %9362 = vmatprep.subr.bf16.mxu0 %v10156_v45 }
 0x289   : > { %9383 = vmatpush3.bf16.msra.mxu1 %v10155_v46 }
 0x28a   : > { %9384 = vmatprep.subr.bf16.mxu1 %v10157_v47 }
 0x28b   : > { %9363 = vmatpush3.bf16.msra.mxu0 %v10158_v48 }
 0x28c   : > { %9364 = vmatprep.subr.bf16.mxu0 %v10160_v49 }
 0x28d   : > { %9385 = vmatpush3.bf16.msra.mxu1 %v10159_v50 }
 0x28e   : > { %9386 = vmatprep.subr.bf16.mxu1 %v10161_v51 }
 0x28f   : > { %9365 = vmatpush3.bf16.msra.mxu0 %v10162_v52 }
 0x290   : > { %9366 = vmatprep.subr.bf16.mxu0 %v10164_v53 }
 0x291   : > { %9387 = vmatpush3.bf16.msra.mxu1 %v10163_v54 }
 0x292   : > { %9388 = vmatprep.subr.bf16.mxu1 %v10165_v55 }
 0x293   : > { %9367 = vmatpush3.bf16.msra.mxu0 %v10166_v56 }
 0x295   : > { %9389 = vmatpush3.bf16.msra.mxu1 %v10167_v58 }
 0x296   : > { %v9104_v61 = vpop.f32.mrf.mxu0  ;;  %7556 = vmatmul.mubr.bf16.vlgmr.msra.gmra.mxu0 %v2064_v57 }
 0x298   : > { %v9126_v60 = vpop.f32.mrf.mxu1  ;;  %7596 = vmatmul.mubr.bf16.vlgmr.msra.gmra.mxu1 %v2080_v59  ;;  %v9105_v62 = vpop.f32.mrf.mxu0 }
 0x299   : > { %v9106_v63 = vadd.f32 %v9105_v62, %v9104_v61 }
 0x29a   : > { %v9127_v0 = vpop.f32.mrf.mxu1  ;;  %v9107_v1 = vpop.f32.mrf.mxu0 }
 0x29b   : > { %v7078_v2 = vadd.f32 %v9106_v63, %v7038_v36  ;;  %v9128_v4 = vadd.f32 %v9127_v0, %v9126_v60 }
 0x29c   : > { %v9129_v5 = vpop.f32.mrf.mxu1  ;;  %v9108_v6 = vpop.f32.mrf.mxu0 }
 0x29d   : > { %v7118_v7 = vadd.f32 %v9128_v4, %v7078_v2 }
 0x29e   : > { %v9130_v42 = vpop.f32.mrf.mxu1 }
 0x2b6   : > { %v9148_v3 = vpop.f32.mrf.mxu0 }
 0x2b8   : > { %v9170_v8 = vpop.f32.mrf.mxu1  ;;  %v9149_v9 = vpop.f32.mrf.mxu0 }
 0x2b9   : > { %v9150_v10 = vadd.f32 %v9149_v9, %v9148_v3 }
 0x2ba   : > { %v9171_v11 = vpop.f32.mrf.mxu1  ;;  %v9151_v12 = vpop.f32.mrf.mxu0 }
 0x2bb   : > { %v7158_v13 = vadd.f32 %v9150_v10, %v7118_v7  ;;  %v9172_v14 = vadd.f32 %v9171_v11, %v9170_v8  ;;  %v292_v11 = vld [vmem:[#allocation2] sm:$0x3] }
 0x2bc   : > { %v9173_v15 = vpop.f32.mrf.mxu1  ;;  %v9152_v16 = vpop.f32.mrf.mxu0 }
 0x2bd   : > { %v7198_v17 = vadd.f32 %v9172_v14, %v7158_v13 }
 0x2be   : > { %v9174_v18 = vpop.f32.mrf.mxu1 }
 0x2d6   : > { %v9192_v19 = vpop.f32.mrf.mxu0 }
 0x2d8   : > { %v9214_v20 = vpop.f32.mrf.mxu1  ;;  %v9193_v21 = vpop.f32.mrf.mxu0 }
 0x2d9   : > { %v9194_v22 = vadd.f32 %v9193_v21, %v9192_v19 }
 0x2da   : > { %v9215_v23 = vpop.f32.mrf.mxu1  ;;  %v9195_v24 = vpop.f32.mrf.mxu0 }
 0x2db   : > { %v7238_v25 = vadd.f32 %v9194_v22, %v7198_v17  ;;  %v9216_v26 = vadd.f32 %v9215_v23, %v9214_v20 }
 0x2dc   : > { %v9217_v27 = vpop.f32.mrf.mxu1  ;;  %v9196_v28 = vpop.f32.mrf.mxu0 }
 0x2dd   : > { %v7278_v29 = vadd.f32 %v9216_v26, %v7238_v25 }
 0x2de   : > { %v9218_v30 = vpop.f32.mrf.mxu1 }
 0x2f6   : > { %v9236_v31 = vpop.f32.mrf.mxu0 }
 0x2f8   : > { %v9258_v32 = vpop.f32.mrf.mxu1  ;;  %v9237_v33 = vpop.f32.mrf.mxu0 }
 0x2f9   : > { %v9238_v34 = vadd.f32 %v9237_v33, %v9236_v31 }
 0x2fa   : > { %v9259_v36 = vpop.f32.mrf.mxu1  ;;  %v9239_v35 = vpop.f32.mrf.mxu0 }
 0x2fb   : > { %v7318_v37 = vadd.f32 %v9238_v34, %v7278_v29  ;;  %v9260_v38 = vadd.f32 %v9259_v36, %v9258_v32 }
 0x2fc   : > { %v9261_v39 = vpop.f32.mrf.mxu1  ;;  %v9240_v40 = vpop.f32.mrf.mxu0 }
 0x2fd   : > { %v7358_v41 = vadd.f32 %v9260_v38, %v7318_v37 }
 0x2fe   : > { %v9262_v43 = vpop.f32.mrf.mxu1 }
 0x316   : > { %v9280_v44 = vpop.f32.mrf.mxu0 }
 0x318   : > { %v9302_v45 = vpop.f32.mrf.mxu1  ;;  %v9281_v46 = vpop.f32.mrf.mxu0 }
 0x319   : > { %v9282_v61 = vadd.f32 %v9281_v46, %v9280_v44 }
 0x31a   : > { %v9303_v47 = vpop.f32.mrf.mxu1  ;;  %v9283_v48 = vpop.f32.mrf.mxu0 }
 0x31b   : > { %v7398_v60 = vadd.f32 %v9282_v61, %v7358_v41  ;;  %v9304_v62 = vadd.f32 %v9303_v47, %v9302_v45 }
 0x31c   : > { %v9305_v49 = vpop.f32.mrf.mxu1  ;;  %v9284_v50 = vpop.f32.mrf.mxu0 }
 0x31d   : > { %v7438_v0 = vadd.f32 %v9304_v62, %v7398_v60 }
 0x31e   : > { %v9306_v51 = vpop.f32.mrf.mxu1 }
 0x336   : > { %v9324_v52 = vpop.f32.mrf.mxu0 }
 0x338   : > { %v9346_v53 = vpop.f32.mrf.mxu1  ;;  %v9325_v54 = vpop.f32.mrf.mxu0 }
 0x339   : > { %v9326_v63 = vadd.f32 %v9325_v54, %v9324_v52 }
 0x33a   : > { %v9347_v55 = vpop.f32.mrf.mxu1  ;;  %v9327_v56 = vpop.f32.mrf.mxu0 }
 0x33b   : > { %v7478_v1 = vadd.f32 %v9326_v63, %v7438_v0  ;;  %v9348_v2 = vadd.f32 %v9347_v55, %v9346_v53 }
 0x33c   : > { %v9349_v57 = vpop.f32.mrf.mxu1  ;;  %v9328_v58 = vpop.f32.mrf.mxu0 }
 0x33d   : > { %v7518_v7 = vadd.f32 %v9348_v2, %v7478_v1 }
 0x33e   : > { %v9350_v59 = vpop.f32.mrf.mxu1 }
 0x356   : > { %v9368_v4 = vpop.f32.mrf.mxu0 }
 0x358   : > { %v9390_v5 = vpop.f32.mrf.mxu1  ;;  %v9369_v6 = vpop.f32.mrf.mxu0 }
 0x359   : > { %v9370_v42 = vadd.f32 %v9369_v6, %v9368_v4 }
 0x35a   : > { %v9391_v3 = vpop.f32.mrf.mxu1  ;;  %v9371_v8 = vpop.f32.mrf.mxu0 }
 0x35b   : > { %v7558_v9 = vadd.f32 %v9370_v42, %v7518_v7  ;;  %v9392_v10 = vadd.f32 %v9391_v3, %v9390_v5 }
 0x35c   : > { %v9393_v12 = vpop.f32.mrf.mxu1  ;;  %v9372_v13 = vpop.f32.mrf.mxu0 }
 0x35d   : > { %v7598_v14 = vadd.f32 %v9392_v10, %v7558_v9  ;;  %7608 = sbr.rel (%p8508_p6) target bundleno = 1292 (0x50c), region = 56 }
 0x35e   : > { %v9394_v15 = vpop.f32.mrf.mxu1 }
 0x35f   : > { %v7603_v16 = vadd.f32 %v7598_v14, %v292_v11 }
 0x361   : > { %7604 = vst [vmem:[#allocation2] sm:$0x3] %v7603_v16 }
 0x362   : > { %v7634_v17 = vld [vmem:[%s11229_s3 + $0x78] sm:$0xff]  ;;  %v10207_v18 = vmov 0.0   ;;  %v7633_v19 = vld [vmem:[%s11229_s3 + $0x70] sm:$0xff]  ;;  %vm10208_vm0 = vmmov 0   ;;  %v7632_v20 = vld [vmem:[%s11229_s3 + $0x68] sm:$0xff] }
 0x363   : > { %9430 = vmatprep.subr.mxu0 %v10207_v18  ;;  %9462 = vmatprep.mubr.msk.f32.mxu0 %vm10208_vm0, %v10207_v18  ;;  %v7631_v21 = vld [vmem:[%s11229_s3 + $0x60] sm:$0xff]  ;;  %v7728_v22 = vld [vmem:[%s11231_s5 + $0x78] sm:$0xff]  ;;  %v7727_v23 = vld [vmem:[%s11231_s5 + $0x70] sm:$0xff] }
 0x364   : > { %9431 = vmatpush3.msra.mxu0 %v7634_v17  ;;  %9465 = vmatprep.subr.mxu1 %v10207_v18  ;;  %v7630_v24 = vld [vmem:[%s11229_s3 + $0x58] sm:$0xff]  ;;  %v7726_v25 = vld [vmem:[%s11231_s5 + $0x68] sm:$0xff]  ;;  %v7629_v26 = vld [vmem:[%s11229_s3 + $0x50] sm:$0xff] }
 0x365   : > { %9432 = vmatprep.subr.mxu0 %v10207_v18  ;;  %9497 = vmatprep.mubr.msk.f32.mxu1 %vm10208_vm0, %v10207_v18  ;;  %v7725_v27 = vld [vmem:[%s11231_s5 + $0x60] sm:$0xff]  ;;  %v7628_v28 = vld [vmem:[%s11229_s3 + $0x48] sm:$0xff]  ;;  %v7724_v29 = vld [vmem:[%s11231_s5 + $0x58] sm:$0xff] }
 0x366   : > { %9433 = vmatpush3.msra.mxu0 %v7633_v19  ;;  %9466 = vmatpush3.msra.mxu1 %v7728_v22  ;;  %v7627_v30 = vld [vmem:[%s11229_s3 + $0x40] sm:$0xff]  ;;  %v7723_v31 = vld [vmem:[%s11231_s5 + $0x50] sm:$0xff]  ;;  %v7626_v32 = vld [vmem:[%s11229_s3 + $0x38] sm:$0xff] }
 0x367   : > { %9434 = vmatprep.subr.mxu0 %v10207_v18  ;;  %9467 = vmatprep.subr.mxu1 %v10207_v18  ;;  %v7722_v33 = vld [vmem:[%s11231_s5 + $0x48] sm:$0xff]  ;;  %v7625_v34 = vld [vmem:[%s11229_s3 + $0x30] sm:$0xff]  ;;  %v7721_v36 = vld [vmem:[%s11231_s5 + $0x40] sm:$0xff] }
 0x368   : > { %9435 = vmatpush3.msra.mxu0 %v7632_v20  ;;  %9468 = vmatpush3.msra.mxu1 %v7727_v23  ;;  %v7624_v35 = vld [vmem:[%s11229_s3 + $0x28] sm:$0xff]  ;;  %v7720_v37 = vld [vmem:[%s11231_s5 + $0x38] sm:$0xff]  ;;  %v7623_v38 = vld [vmem:[%s11229_s3 + $0x20] sm:$0xff] }
 0x369   : > { %9436 = vmatprep.subr.mxu0 %v10207_v18  ;;  %9469 = vmatprep.subr.mxu1 %v10207_v18  ;;  %v7609_v39 = vld [vmem:[#allocation2] sm:$0x3]  ;;  %v7719_v41 = vld [vmem:[%s11231_s5 + $0x30] sm:$0xff]  ;;  %v7622_v43 = vld [vmem:[%s11229_s3 + $0x18] sm:$0xff] }
 0x36a   : > { %9437 = vmatpush3.msra.mxu0 %v7631_v21  ;;  %9470 = vmatpush3.msra.mxu1 %v7726_v25  ;;  %v8509_v40 = vld [vmem:[%s11228_s2] ss:$0 sm:$0xff]  ;;  %v7718_v44 = vld [vmem:[%s11231_s5 + $0x28] sm:$0xff]  ;;  %v7621_v45 = vld [vmem:[%s11229_s3 + $0x10] sm:$0xff] }
 0x36b   : > { %9438 = vmatprep.subr.mxu0 %v10207_v18  ;;  %9471 = vmatprep.subr.mxu1 %v10207_v18  ;;  %v7617_v46 = vadd.f32 %v8509_v40, %v7609_v39  ;;  %v7717_v47 = vld [vmem:[%s11231_s5 + $0x20] sm:$0xff]  ;;  %v7620_v48 = vld [vmem:[%s11229_s3 + $0x8] sm:$0xff]  ;;  %v7716_v49 = vld [vmem:[%s11231_s5 + $0x18] sm:$0xff] }
 0x36c   : > { %9439 = vmatpush3.msra.mxu0 %v7630_v24  ;;  %9472 = vmatpush3.msra.mxu1 %v7725_v27  ;;  %v7619_v50 = vld [vmem:[%s11229_s3] sm:$0xff]  ;;  %v7715_v52 = vld [vmem:[%s11231_s5 + $0x10] sm:$0xff]  ;;  %v7714_v53 = vld [vmem:[%s11231_s5 + $0x8] sm:$0xff] }
 0x36d   : > { %9440 = vmatprep.subr.mxu0 %v10207_v18  ;;  %9473 = vmatprep.subr.mxu1 %v10207_v18  ;;  %v7618_v51 = vmax.f32 %v7617_v46, 0.0  ;;  %v7713_v54 = vld [vmem:[%s11231_s5] sm:$0xff] }
 0x36e   : > { %9441 = vmatpush3.msra.mxu0 %v7629_v26  ;;  %9474 = vmatpush3.msra.mxu1 %v7724_v29  ;;  %v8510_v55 = vld [vmem:[%s11230_s4] ss:$0 sm:$0xff] }
 0x36f   : > { %9442 = vmatprep.subr.mxu0 %v10207_v18  ;;  %9475 = vmatprep.subr.mxu1 %v10207_v18  ;;  %v8511_v61 = vld [vmem:[%s11232_s6] ss:$0 sm:$0xff] }
 0x370   : > { %9443 = vmatpush3.msra.mxu0 %v7628_v28  ;;  %9476 = vmatpush3.msra.mxu1 %v7723_v31 }
 0x371   : > { %9444 = vmatprep.subr.mxu0 %v10207_v18  ;;  %9477 = vmatprep.subr.mxu1 %v10207_v18 }
 0x372   : > { %9445 = vmatpush3.msra.mxu0 %v7627_v30  ;;  %9478 = vmatpush3.msra.mxu1 %v7722_v33 }
 0x373   : > { %9446 = vmatprep.subr.mxu0 %v10207_v18  ;;  %9479 = vmatprep.subr.mxu1 %v10207_v18 }
 0x374   : > { %9447 = vmatpush3.msra.mxu0 %v7626_v32  ;;  %9480 = vmatpush3.msra.mxu1 %v7721_v36 }
 0x375   : > { %9448 = vmatprep.subr.mxu0 %v10207_v18  ;;  %9481 = vmatprep.subr.mxu1 %v10207_v18 }
 0x376   : > { %9449 = vmatpush3.msra.mxu0 %v7625_v34  ;;  %9482 = vmatpush3.msra.mxu1 %v7720_v37 }
 0x377   : > { %9450 = vmatprep.subr.mxu0 %v10207_v18  ;;  %9483 = vmatprep.subr.mxu1 %v10207_v18 }
 0x378   : > { %9451 = vmatpush3.msra.mxu0 %v7624_v35  ;;  %9484 = vmatpush3.msra.mxu1 %v7719_v41 }
 0x379   : > { %9452 = vmatprep.subr.mxu0 %v10207_v18  ;;  %9485 = vmatprep.subr.mxu1 %v10207_v18 }
 0x37a   : > { %9453 = vmatpush3.msra.mxu0 %v7623_v38  ;;  %9486 = vmatpush3.msra.mxu1 %v7718_v44 }
 0x37b   : > { %9454 = vmatprep.subr.mxu0 %v10207_v18  ;;  %9487 = vmatprep.subr.mxu1 %v10207_v18 }
 0x37c   : > { %9455 = vmatpush3.msra.mxu0 %v7622_v43  ;;  %9488 = vmatpush3.msra.mxu1 %v7717_v47 }
 0x37d   : > { %9456 = vmatprep.subr.mxu0 %v10207_v18  ;;  %9489 = vmatprep.subr.mxu1 %v10207_v18 }
 0x37e   : > { %9457 = vmatpush3.msra.mxu0 %v7621_v45  ;;  %9490 = vmatpush3.msra.mxu1 %v7716_v49 }
 0x37f   : > { %9458 = vmatprep.subr.mxu0 %v10207_v18  ;;  %9491 = vmatprep.subr.mxu1 %v10207_v18 }
 0x380   : > { %9459 = vmatpush3.msra.mxu0 %v7620_v48  ;;  %9492 = vmatpush3.msra.mxu1 %v7715_v52 }
 0x381   : > { %9460 = vmatprep.subr.mxu0 %v10207_v18  ;;  %9493 = vmatprep.subr.mxu1 %v10207_v18 }
 0x382   : > { %9461 = vmatpush3.msra.mxu0 %v7619_v50  ;;  %9494 = vmatpush3.msra.mxu1 %v7714_v53 }
 0x383   : > { %9463 = vmatmul.mubr.f32.vlgmr.msra.gmra.mxu0 %v7618_v51  ;;  %9495 = vmatprep.subr.mxu1 %v10207_v18 }
 0x384   : > { %9496 = vmatpush3.msra.mxu1 %v7713_v54 }
 0x443   : > { %v7708_v56 = vpop.f32.mrf.mxu0 }
 0x444   : > { %v7709_v57 = vadd.f32 %v8510_v55, %v7708_v56 }
 0x445   : > { %v9464_v58 = vpop.f32.mrf.mxu0 }
 0x446   : > { %v7712_v59 = vmax.f32 %v7709_v57, 0.0 }
 0x448   : > { %9498 = vmatmul.mubr.f32.vlgmr.msra.gmra.mxu1 %v7712_v59 }
 0x508   : > { %v7802_v60 = vpop.f32.mrf.mxu1 }
 0x509   : > { %v7803_v62 = vadd.f32 %v8511_v61, %v7802_v60 }
 0x50a   : > { %v9499_v63 = vpop.f32.mrf.mxu1 }
 0x50b   : > { %7806 = vst [vmem:[#allocation3] sm:$0x3] %v7803_v62 }
 0x50c PF: > { %p9504_p7 = scmp.eq.s32.totalorder %s10256_s25, 1  ;;  %s10209_s19 = smov [#allocation3]  }
 0x50d   : > { %s7814_s20 = sshll.u32 %s10209_s19, 4  ;;  %s7815_s20 = int_to_ptr.vmem [resolvable:$true] %s7814_s20 }
 0x50e   : > { %s10169_s21 = scalar_lea.vmem %s7815_s20, 32  ;;  %p10176_p11 = scmp.lt.s32.totalorder %s7815_s20, %s7815_s20 }
 0x50f   : > { %p10170_p8 = scmp.ne.s32.totalorder %s7815_s20, %s10169_s21  ;;  %p10177_p12 = scmp.lt.s32.totalorder %s10169_s21, %s10169_s21 }
 0x511   : > { %p10171_p9 = pnand %p10170_p8, %p9504_p7  ;;  %p10178_p13 = por %p10177_p12, %p10176_p11 }
 0x513   : > { %p10172_p10 = pneg %p10171_p9 }
 0x515   : > { %p10179_p0 = pnand %p10178_p13, %p10172_p10 }
 0x517   : > { %10182 = shalt.err (!%p10179_p0)
}
 0x518   : > { %9501 = dma.vmem_to_hbm [thread:$0]  (%p9504_p7), %s7815_s20, 32, %s11233_s7, [#allocation4]  }
 0x519   : > { %10198 = dma.done.wait (%p9504_p7), [#allocation4], 32  }
 0x51a   : > { %10200 = vsyncadd (%p9504_p7), [#allocation4], 4294967264 }
 0x51b PF: > { %s18_s24 = sadd.s32 1, %s10203_s24  }
 0x51c   : > { %p15_p1 = scmp.ge.s32.totalorder %s18_s24, 4  }
 0x51e   :  { %17 = sbr.rel (!%p15_p1) target bundleno = 1 (0x1), region = 86 }
 0x523   :  { %7827 = vsyncpa [#allocation4], 1 }
 0x524   :  { %7829 = vsyncpa [#allocation4 + $0x1], 1 }

</bundles_post_ra>
